<compile_context>
chip_gen: v7x
topology: tpu7x:2x2x1
jax: 0.10.0
libtpu: 0.0.40
codegen_flags: <defaults>
</compile_context>

<pallas_src>
import functools

import jax
import jax.numpy as jnp
from jax.experimental import pallas as pl
from jax.experimental.pallas import tpu as pltpu


# Model geometry (hard-coded by the nn.Module: feature_size = 128 * (252 // 8)).
L1, L2, L3 = 252, 126, 63          # sequence length entering conv block 1/2/3
C0, C1, C2, C3 = 5, 32, 64, 128    # channel widths
K1, K2, K3 = 7, 5, 3               # kernel sizes ('same' padding = (K-1)//2)
NPOOL = 31                         # floor(63 / 2): MaxPool drops the last step
FEAT = C3 * NPOOL                  # 3968


def _fused_forward_kernel(
    x_ref,                                         # (1, 252, 5)  f32, channels-last
    w1_ref, s1_ref, b1_ref,                        # (35, 32) bf16, (1,32) f32, (1,32) f32
    w2_ref, s2_ref, b2_ref,                        # (160, 64) bf16, (1,64) f32 x2
    w3_ref, s3_ref, b3_ref,                        # (192, 128) bf16, (1,128) f32 x2
    wf1_ref, bf1_ref, wf2_ref, bf2_ref, wf3_ref, bf3_ref,
    o_ref,                                         # (1, 1, 2) f32
    pad1,                                          # (258, 5)   f32  padded input
    cols1,                                         # (252, 35)  bf16 im2col block 1
    ypad1,                                         # (260, 32)  f32  pre-pool act 1, zero-padded
    cols2,                                         # (126, 160) bf16 im2col block 2
    ypad2,                                         # (130, 64)  f32  pre-pool act 2, zero-padded
    cols3,                                         # (63, 192)  bf16 im2col block 3
    ypad3,                                         # (63, 128)  f32  pre-pool act 3
    flat,                                          # (1, 3968)  bf16 flattened features
):
    f32 = jnp.float32
    bf16 = jnp.bfloat16

    # ---- Block 1: Conv1d(5->32, k=7, pad=3) + BN + ReLU  (pool fused into block 2)
    pad1[0:3, :] = jnp.zeros((3, C0), f32)
    pad1[L1 + 3:L1 + 6, :] = jnp.zeros((3, C0), f32)
    pad1[3:L1 + 3, :] = x_ref[0]                                   # (252, 5)

    for k in range(K1):                                            # im2col -> (252, 35)
        cols1[:, C0 * k:C0 * (k + 1)] = pad1[pl.ds(k, L1), :].astype(bf16)

    y1 = jnp.dot(cols1[...], w1_ref[...], preferred_element_type=f32)   # (252, 32)
    y1 = jnp.maximum(y1 * s1_ref[...] + b1_ref[...], 0.0)

    # Store pre-pool activation with 2*pad2 leading zeros so that MaxPool(2) +
    # 'same' padding of block 2 become stride-2 reads: h1_pad[i] = max(ypad1[2i], ypad1[2i+1]).
    ypad1[0:4, :] = jnp.zeros((4, C1), f32)
    ypad1[L1 + 4:L1 + 8, :] = jnp.zeros((4, C1), f32)
    ypad1[4:L1 + 4, :] = y1

    # ---- Block 2: Conv1d(32->64, k=5, pad=2) + BN + ReLU  (pool of block 1 fused here)
    for k in range(K2):                                            # im2col -> (126, 160)
        cols2[:, C1 * k:C1 * (k + 1)] = jnp.maximum(
            ypad1[pl.ds(2 * k, L2, 2), :],
            ypad1[pl.ds(2 * k + 1, L2, 2), :]).astype(bf16)

    y2 = jnp.dot(cols2[...], w2_ref[...], preferred_element_type=f32)   # (126, 64)
    y2 = jnp.maximum(y2 * s2_ref[...] + b2_ref[...], 0.0)

    ypad2[0:2, :] = jnp.zeros((2, C2), f32)
    ypad2[L2 + 2:L2 + 4, :] = jnp.zeros((2, C2), f32)
    ypad2[2:L2 + 2, :] = y2

    # ---- Block 3: Conv1d(64->128, k=3, pad=1) + BN + ReLU  (pool of block 2 fused here)
    for k in range(K3):                                            # im2col -> (63, 192)
        cols3[:, C2 * k:C2 * (k + 1)] = jnp.maximum(
            ypad2[pl.ds(2 * k, L3, 2), :],
            ypad2[pl.ds(2 * k + 1, L3, 2), :]).astype(bf16)

    y3 = jnp.dot(cols3[...], w3_ref[...], preferred_element_type=f32)   # (63, 128)
    y3 = jnp.maximum(y3 * s3_ref[...] + b3_ref[...], 0.0)
    ypad3[...] = y3

    # ---- MaxPool(2) of block 3 + flatten into a lane-aligned (1, 3968) buffer.
    # PyTorch's channel-major view(-1, 128*31) is reproduced by the offline row
    # permutation of fc1's weight, so a row-major (31, 128) flatten is correct.
    for l in range(NPOOL):
        row = jnp.maximum(ypad3[2 * l:2 * l + 1, :], ypad3[2 * l + 1:2 * l + 2, :])
        flat[0:1, C3 * l:C3 * (l + 1)] = row.astype(bf16)

    # ---- FC head: 3968 -> 128 -> 64 -> 2 (Dropout = identity in eval mode).
    a = jnp.dot(flat[...], wf1_ref[...], preferred_element_type=f32) + bf1_ref[...]
    a = jnp.maximum(a, 0.0).astype(bf16)
    a = jnp.dot(a, wf2_ref[...], preferred_element_type=f32) + bf2_ref[...]
    a = jnp.maximum(a, 0.0).astype(bf16)
    out = jnp.dot(a, wf3_ref[...], preferred_element_type=f32) + bf3_ref[...]   # (1, 2)
    o_ref[0] = out


def stock_price_cnn_forward(x_ncl, params):
    """x_ncl: (N, 5, 252) f32  ->  (N, 2) f32 logits."""
    n = x_ncl.shape[0]
    x_nlc = jnp.transpose(x_ncl, (0, 2, 1))       # NCL -> NLC (single tiny wrapper op)

    (w1c, s1, b1), (w2c, s2, b2), (w3c, s3, b3) = params["conv"]
    wf1, bf1, wf2, bf2, wf3, bf3 = params["fc"]

    const2d = lambda i: (0, 0)
    out = pl.pallas_call(
        _fused_forward_kernel,
        out_shape=jax.ShapeDtypeStruct((n, 1, 2), jnp.float32),
        grid=(n,),
        in_specs=[
            pl.BlockSpec((1, L1, C0), lambda i: (i, 0, 0)),
            pl.BlockSpec((K1 * C0, C1), const2d),
            pl.BlockSpec((1, C1), const2d),
            pl.BlockSpec((1, C1), const2d),
            pl.BlockSpec((K2 * C1, C2), const2d),
            pl.BlockSpec((1, C2), const2d),
            pl.BlockSpec((1, C2), const2d),
            pl.BlockSpec((K3 * C2, C3), const2d),
            pl.BlockSpec((1, C3), const2d),
            pl.BlockSpec((1, C3), const2d),
            pl.BlockSpec((FEAT, 128), const2d),
            pl.BlockSpec((1, 128), const2d),
            pl.BlockSpec((128, 64), const2d),
            pl.BlockSpec((1, 64), const2d),
            pl.BlockSpec((64, 2), const2d),
            pl.BlockSpec((1, 2), const2d),
        ],
        out_specs=pl.BlockSpec((1, 1, 2), lambda i: (i, 0, 0)),
        scratch_shapes=[
            pltpu.VMEM((L1 + 6, C0), jnp.float32),     # pad1
            pltpu.VMEM((L1, K1 * C0), jnp.bfloat16),   # cols1
            pltpu.VMEM((L1 + 8, C1), jnp.float32),     # ypad1
            pltpu.VMEM((L2, K2 * C1), jnp.bfloat16),   # cols2
            pltpu.VMEM((L2 + 4, C2), jnp.float32),     # ypad2
            pltpu.VMEM((L3, K3 * C2), jnp.bfloat16),   # cols3
            pltpu.VMEM((L3, C3), jnp.float32),         # ypad3
            pltpu.VMEM((1, FEAT), jnp.bfloat16),       # flat
        ],
        compiler_params=pltpu.CompilerParams(
            dimension_semantics=("parallel",)),        # v7x: split batch across 2 TCs
    )(x_nlc, w1c, s1, b1, w2c, s2, b2, w3c, s3, b3, wf1, bf1, wf2, bf2, wf3, bf3)
    return out.reshape(n, 2)


def init_params(key):
    """Deterministic synthetic parameters matching the nn.Module shapes,
    pre-folded / pre-laid-out for the fused kernel."""

    def conv_layer(k, c_in, c_out, ksz):
        k1, k2, k3, k4, k5, k6 = jax.random.split(k, 6)
        w_pt = jax.random.normal(k1, (c_out, c_in, ksz), jnp.float32) * 0.05   # Conv1d.weight
        b_pt = jax.random.normal(k2, (c_out,), jnp.float32) * 0.05             # Conv1d.bias
        gamma = 1.0 + 0.1 * jax.random.normal(k3, (c_out,), jnp.float32)       # BN.weight
        beta = 0.1 * jax.random.normal(k4, (c_out,), jnp.float32)              # BN.bias
        mean = 0.1 * jax.random.normal(k5, (c_out,), jnp.float32)              # BN.running_mean
        var = jax.random.uniform(k6, (c_out,), jnp.float32, minval=0.5, maxval=1.5)
        inv_std = 1.0 / jnp.sqrt(var + 1e-5)
        scale = gamma * inv_std                         # folded eval-mode BN
        bias_eff = beta + (b_pt - mean) * scale
        # (Cout, Cin, K) -> im2col layout (K*Cin, Cout), row index = k*Cin + ci.
        w_col = jnp.transpose(w_pt, (2, 1, 0)).reshape(ksz * c_in, c_out)
        return (w_col.astype(jnp.bfloat16),
                scale.reshape(1, c_out), bias_eff.reshape(1, c_out))

    def linear(k, d_in, d_out, gain):
        k1, k2 = jax.random.split(k)
        w_pt = jax.random.normal(k1, (d_out, d_in), jnp.float32) * gain        # Linear.weight
        b_pt = jax.random.normal(k2, (d_out,), jnp.float32) * gain             # Linear.bias
        return w_pt, b_pt

    kc1, kc2, kc3, kf1, kf2, kf3 = jax.random.split(key, 6)
    conv = [conv_layer(kc1, C0, C1, K1),
            conv_layer(kc2, C1, C2, K2),
            conv_layer(kc3, C2, C3, K3)]

    w1_pt, b1_pt = linear(kf1, FEAT, 128, 0.02)
    w2_pt, b2_pt = linear(kf2, 128, 64, 0.05)
    w3_pt, b3_pt = linear(kf3, 64, 2, 0.1)

    # fc1: PyTorch flatten index is c*31 + l (channel-major view of (128, 31));
    # the kernel's channels-last flatten index is l*128 + c.  Permute the rows
    # of the (in, out) weight so both produce identical logits -- this removes
    # the (N,31,128)->(N,128,31) transpose from the forward pass.
    w1_io = w1_pt.T.reshape(C3, NPOOL, 128)                       # [c, l, h]
    w1_perm = jnp.transpose(w1_io, (1, 0, 2)).reshape(FEAT, 128)  # [l*128 + c, h]

    fc = (w1_perm.astype(jnp.bfloat16), b1_pt.reshape(1, -1),
          w2_pt.T.astype(jnp.bfloat16), b2_pt.reshape(1, -1),
          w3_pt.T.astype(jnp.bfloat16), b3_pt.reshape(1, -1))
    return {"conv": conv, "fc": fc}


if __name__ == "__main__":
    key = jax.random.PRNGKey(0)
    pkey, xkey = jax.random.split(key)
    params = init_params(pkey)

    # batch=2, 5 input channels, sequence length 252 (the module hard-codes
    # feature_size = 128 * (252 // 8), so L must be 252 for the flatten to work).
    x = jax.random.normal(xkey, (2, 5, 252), jnp.float32)

    fwd = jax.jit(functools.partial(stock_price_cnn_forward, params=params))
    out = jax.block_until_ready(fwd(x))
    assert out.shape == (2, 2) and out.dtype == jnp.float32
    print("KERNEL_OK")
</pallas_src>

<mosaic_0001>
module attributes {stable_mosaic.version = 11 : i64} {
  func.func @_fused_forward_kernel(%arg0: i32, %arg1: memref<1x252x5xf32, #tpu.memory_space<vmem>>, %arg2: memref<35x32xbf16, #tpu.memory_space<vmem>>, %arg3: memref<1x32xf32, #tpu.memory_space<vmem>>, %arg4: memref<1x32xf32, #tpu.memory_space<vmem>>, %arg5: memref<160x64xbf16, #tpu.memory_space<vmem>>, %arg6: memref<1x64xf32, #tpu.memory_space<vmem>>, %arg7: memref<1x64xf32, #tpu.memory_space<vmem>>, %arg8: memref<192x128xbf16, #tpu.memory_space<vmem>>, %arg9: memref<1x128xf32, #tpu.memory_space<vmem>>, %arg10: memref<1x128xf32, #tpu.memory_space<vmem>>, %arg11: memref<3968x128xbf16, #tpu.memory_space<vmem>>, %arg12: memref<1x128xf32, #tpu.memory_space<vmem>>, %arg13: memref<128x64xbf16, #tpu.memory_space<vmem>>, %arg14: memref<1x64xf32, #tpu.memory_space<vmem>>, %arg15: memref<64x2xbf16, #tpu.memory_space<vmem>>, %arg16: memref<1x2xf32, #tpu.memory_space<vmem>>, %arg17: memref<1x1x2xf32, #tpu.memory_space<vmem>>, %arg18: memref<258x5xf32, #tpu.memory_space<vmem>>, %arg19: memref<252x35xbf16, #tpu.memory_space<vmem>>, %arg20: memref<260x32xf32, #tpu.memory_space<vmem>>, %arg21: memref<126x160xbf16, #tpu.memory_space<vmem>>, %arg22: memref<130x64xf32, #tpu.memory_space<vmem>>, %arg23: memref<63x192xbf16, #tpu.memory_space<vmem>>, %arg24: memref<63x128xf32, #tpu.memory_space<vmem>>, %arg25: memref<1x3968xbf16, #tpu.memory_space<vmem>>) attributes {dimension_semantics = [#tpu.dimension_semantics<parallel>], iteration_bounds = array<i64: 2>, scalar_prefetch = 0 : i64, scratch_operands = 8 : i64, tpu.core_type = #tpu.core_type<tc>, window_params = [{transform_indices = @transform_0, window_bounds = array<i64: 1, 252, 5>}, {pipeline_mode = #tpu.pipeline_mode<synchronous>, transform_indices = @transform_1, window_bounds = array<i64: 35, 32>}, {pipeline_mode = #tpu.pipeline_mode<synchronous>, transform_indices = @transform_2, window_bounds = array<i64: 1, 32>}, {pipeline_mode = #tpu.pipeline_mode<synchronous>, transform_indices = @transform_3, window_bounds = array<i64: 1, 32>}, {pipeline_mode = #tpu.pipeline_mode<synchronous>, transform_indices = @transform_4, window_bounds = array<i64: 160, 64>}, {pipeline_mode = #tpu.pipeline_mode<synchronous>, transform_indices = @transform_5, window_bounds = array<i64: 1, 64>}, {pipeline_mode = #tpu.pipeline_mode<synchronous>, transform_indices = @transform_6, window_bounds = array<i64: 1, 64>}, {pipeline_mode = #tpu.pipeline_mode<synchronous>, transform_indices = @transform_7, window_bounds = array<i64: 192, 128>}, {pipeline_mode = #tpu.pipeline_mode<synchronous>, transform_indices = @transform_8, window_bounds = array<i64: 1, 128>}, {pipeline_mode = #tpu.pipeline_mode<synchronous>, transform_indices = @transform_9, window_bounds = array<i64: 1, 128>}, {pipeline_mode = #tpu.pipeline_mode<synchronous>, transform_indices = @transform_10, window_bounds = array<i64: 3968, 128>}, {pipeline_mode = #tpu.pipeline_mode<synchronous>, transform_indices = @transform_11, window_bounds = array<i64: 1, 128>}, {pipeline_mode = #tpu.pipeline_mode<synchronous>, transform_indices = @transform_12, window_bounds = array<i64: 128, 64>}, {pipeline_mode = #tpu.pipeline_mode<synchronous>, transform_indices = @transform_13, window_bounds = array<i64: 1, 64>}, {pipeline_mode = #tpu.pipeline_mode<synchronous>, transform_indices = @transform_14, window_bounds = array<i64: 64, 2>}, {pipeline_mode = #tpu.pipeline_mode<synchronous>, transform_indices = @transform_15, window_bounds = array<i64: 1, 2>}, {transform_indices = @transform_16, window_bounds = array<i64: 1, 1, 2>}]} {
    %cst = arith.constant 0.000000e+00 : f32
    %0 = vector.broadcast %cst : f32 to vector<3x5xf32>
    %c0 = arith.constant 0 : index
    %c0_0 = arith.constant 0 : index
    %1 = vector.load %arg18[%c0, %c0_0] : memref<258x5xf32, #tpu.memory_space<vmem>>, vector<3x5xf32>
    tpu.vector_store %arg18[%c0, %c0_0], %0 {strides = array<i32>} : memref<258x5xf32, #tpu.memory_space<vmem>>, vector<3x5xf32>,
    %cst_1 = arith.constant 0.000000e+00 : f32
    %2 = vector.broadcast %cst_1 : f32 to vector<3x5xf32>
    %c255 = arith.constant 255 : index
    %c0_2 = arith.constant 0 : index
    %3 = vector.load %arg18[%c255, %c0_2] : memref<258x5xf32, #tpu.memory_space<vmem>>, vector<3x5xf32>
    tpu.vector_store %arg18[%c255, %c0_2], %2 {strides = array<i32>} : memref<258x5xf32, #tpu.memory_space<vmem>>, vector<3x5xf32>,
    %c0_3 = arith.constant 0 : index
    %c0_4 = arith.constant 0 : index
    %c0_5 = arith.constant 0 : index
    %4 = vector.load %arg1[%c0_3, %c0_4, %c0_5] : memref<1x252x5xf32, #tpu.memory_space<vmem>>, vector<1x252x5xf32>
    %5 = vector.shape_cast %4 : vector<1x252x5xf32> to vector<252x5xf32>
    %c3 = arith.constant 3 : index
    %c0_6 = arith.constant 0 : index
    %6 = vector.load %arg18[%c3, %c0_6] : memref<258x5xf32, #tpu.memory_space<vmem>>, vector<252x5xf32>
    tpu.vector_store %arg18[%c3, %c0_6], %5 {strides = array<i32>} : memref<258x5xf32, #tpu.memory_space<vmem>>, vector<252x5xf32>,
    %c0_7 = arith.constant 0 : index
    %c0_8 = arith.constant 0 : index
    %7 = vector.load %arg18[%c0_7, %c0_8] : memref<258x5xf32, #tpu.memory_space<vmem>>, vector<252x5xf32>
    %8 = arith.truncf %7 : vector<252x5xf32> to vector<252x5xbf16>
    %c0_9 = arith.constant 0 : index
    %c0_10 = arith.constant 0 : index
    %9 = vector.load %arg19[%c0_9, %c0_10] : memref<252x35xbf16, #tpu.memory_space<vmem>>, vector<252x5xbf16>
    tpu.vector_store %arg19[%c0_9, %c0_10], %8 {strides = array<i32>} : memref<252x35xbf16, #tpu.memory_space<vmem>>, vector<252x5xbf16>,
    %c1 = arith.constant 1 : index
    %c0_11 = arith.constant 0 : index
    %10 = vector.load %arg18[%c1, %c0_11] : memref<258x5xf32, #tpu.memory_space<vmem>>, vector<252x5xf32>
    %11 = arith.truncf %10 : vector<252x5xf32> to vector<252x5xbf16>
    %c0_12 = arith.constant 0 : index
    %c5 = arith.constant 5 : index
    %12 = vector.load %arg19[%c0_12, %c5] : memref<252x35xbf16, #tpu.memory_space<vmem>>, vector<252x5xbf16>
    tpu.vector_store %arg19[%c0_12, %c5], %11 {strides = array<i32>} : memref<252x35xbf16, #tpu.memory_space<vmem>>, vector<252x5xbf16>,
    %c2 = arith.constant 2 : index
    %c0_13 = arith.constant 0 : index
    %13 = vector.load %arg18[%c2, %c0_13] : memref<258x5xf32, #tpu.memory_space<vmem>>, vector<252x5xf32>
    %14 = arith.truncf %13 : vector<252x5xf32> to vector<252x5xbf16>
    %c0_14 = arith.constant 0 : index
    %c10 = arith.constant 10 : index
    %15 = vector.load %arg19[%c0_14, %c10] : memref<252x35xbf16, #tpu.memory_space<vmem>>, vector<252x5xbf16>
    tpu.vector_store %arg19[%c0_14, %c10], %14 {strides = array<i32>} : memref<252x35xbf16, #tpu.memory_space<vmem>>, vector<252x5xbf16>,
    %c3_15 = arith.constant 3 : index
    %c0_16 = arith.constant 0 : index
    %16 = vector.load %arg18[%c3_15, %c0_16] : memref<258x5xf32, #tpu.memory_space<vmem>>, vector<252x5xf32>
    %17 = arith.truncf %16 : vector<252x5xf32> to vector<252x5xbf16>
    %c0_17 = arith.constant 0 : index
    %c15 = arith.constant 15 : index
    %18 = vector.load %arg19[%c0_17, %c15] : memref<252x35xbf16, #tpu.memory_space<vmem>>, vector<252x5xbf16>
    tpu.vector_store %arg19[%c0_17, %c15], %17 {strides = array<i32>} : memref<252x35xbf16, #tpu.memory_space<vmem>>, vector<252x5xbf16>,
    %c4 = arith.constant 4 : index
    %c0_18 = arith.constant 0 : index
    %19 = vector.load %arg18[%c4, %c0_18] : memref<258x5xf32, #tpu.memory_space<vmem>>, vector<252x5xf32>
    %20 = arith.truncf %19 : vector<252x5xf32> to vector<252x5xbf16>
    %c0_19 = arith.constant 0 : index
    %c20 = arith.constant 20 : index
    %21 = vector.load %arg19[%c0_19, %c20] : memref<252x35xbf16, #tpu.memory_space<vmem>>, vector<252x5xbf16>
    tpu.vector_store %arg19[%c0_19, %c20], %20 {strides = array<i32>} : memref<252x35xbf16, #tpu.memory_space<vmem>>, vector<252x5xbf16>,
    %c5_20 = arith.constant 5 : index
    %c0_21 = arith.constant 0 : index
    %22 = vector.load %arg18[%c5_20, %c0_21] : memref<258x5xf32, #tpu.memory_space<vmem>>, vector<252x5xf32>
    %23 = arith.truncf %22 : vector<252x5xf32> to vector<252x5xbf16>
    %c0_22 = arith.constant 0 : index
    %c25 = arith.constant 25 : index
    %24 = vector.load %arg19[%c0_22, %c25] : memref<252x35xbf16, #tpu.memory_space<vmem>>, vector<252x5xbf16>
    tpu.vector_store %arg19[%c0_22, %c25], %23 {strides = array<i32>} : memref<252x35xbf16, #tpu.memory_space<vmem>>, vector<252x5xbf16>,
    %c6 = arith.constant 6 : index
    %c0_23 = arith.constant 0 : index
    %25 = vector.load %arg18[%c6, %c0_23] : memref<258x5xf32, #tpu.memory_space<vmem>>, vector<252x5xf32>
    %26 = arith.truncf %25 : vector<252x5xf32> to vector<252x5xbf16>
    %c0_24 = arith.constant 0 : index
    %c30 = arith.constant 30 : index
    %27 = vector.load %arg19[%c0_24, %c30] : memref<252x35xbf16, #tpu.memory_space<vmem>>, vector<252x5xbf16>
    tpu.vector_store %arg19[%c0_24, %c30], %26 {strides = array<i32>} : memref<252x35xbf16, #tpu.memory_space<vmem>>, vector<252x5xbf16>,
    %c0_25 = arith.constant 0 : index
    %c0_26 = arith.constant 0 : index
    %28 = vector.load %arg19[%c0_25, %c0_26] : memref<252x35xbf16, #tpu.memory_space<vmem>>, vector<252x35xbf16>
    %c0_27 = arith.constant 0 : index
    %c0_28 = arith.constant 0 : index
    %29 = vector.load %arg2[%c0_27, %c0_28] : memref<35x32xbf16, #tpu.memory_space<vmem>>, vector<35x32xbf16>
    %cst_29 = arith.constant dense<0.000000e+00> : vector<252x32xf32>
    %30 = tpu.matmul %28, %29, %cst_29 {dimension_numbers = #tpu.dot_dimension_numbers<[1], [0], [0], [1], [0, 0, 1, 1], [], []>} : vector<252x35xbf16>, vector<35x32xbf16>, vector<252x32xf32> -> vector<252x32xf32>
    %c0_30 = arith.constant 0 : index
    %c0_31 = arith.constant 0 : index
    %31 = vector.load %arg3[%c0_30, %c0_31] : memref<1x32xf32, #tpu.memory_space<vmem>>, vector<1x32xf32>
    %32 = vector.broadcast %31 : vector<1x32xf32> to vector<252x32xf32>
    %33 = arith.mulf %30, %32 : vector<252x32xf32>
    %c0_32 = arith.constant 0 : index
    %c0_33 = arith.constant 0 : index
    %34 = vector.load %arg4[%c0_32, %c0_33] : memref<1x32xf32, #tpu.memory_space<vmem>>, vector<1x32xf32>
    %35 = vector.broadcast %34 : vector<1x32xf32> to vector<252x32xf32>
    %36 = arith.addf %33, %35 : vector<252x32xf32>
    %cst_34 = arith.constant 0.000000e+00 : f32
    %37 = vector.broadcast %cst_34 : f32 to vector<252x32xf32>
    %38 = arith.maximumf %36, %37 : vector<252x32xf32>
    %cst_35 = arith.constant 0.000000e+00 : f32
    %39 = vector.broadcast %cst_35 : f32 to vector<4x32xf32>
    %c0_36 = arith.constant 0 : index
    %c0_37 = arith.constant 0 : index
    %40 = vector.load %arg20[%c0_36, %c0_37] : memref<260x32xf32, #tpu.memory_space<vmem>>, vector<4x32xf32>
    tpu.vector_store %arg20[%c0_36, %c0_37], %39 {strides = array<i32>} : memref<260x32xf32, #tpu.memory_space<vmem>>, vector<4x32xf32>,
    %cst_38 = arith.constant 0.000000e+00 : f32
    %41 = vector.broadcast %cst_38 : f32 to vector<4x32xf32>
    %c256 = arith.constant 256 : index
    %c0_39 = arith.constant 0 : index
    %42 = vector.load %arg20[%c256, %c0_39] : memref<260x32xf32, #tpu.memory_space<vmem>>, vector<4x32xf32>
    tpu.vector_store %arg20[%c256, %c0_39], %41 {strides = array<i32>} : memref<260x32xf32, #tpu.memory_space<vmem>>, vector<4x32xf32>,
    %c4_40 = arith.constant 4 : index
    %c0_41 = arith.constant 0 : index
    %43 = vector.load %arg20[%c4_40, %c0_41] : memref<260x32xf32, #tpu.memory_space<vmem>>, vector<252x32xf32>
    tpu.vector_store %arg20[%c4_40, %c0_41], %38 {strides = array<i32>} : memref<260x32xf32, #tpu.memory_space<vmem>>, vector<252x32xf32>,
    %c0_42 = arith.constant 0 : index
    %c0_43 = arith.constant 0 : index
    %44 = tpu.strided_load %arg20[%c0_42, %c0_43] {strides = array<i32: 2, 1>} : memref<260x32xf32, #tpu.memory_space<vmem>>, vector<126x32xf32>
    %c1_44 = arith.constant 1 : index
    %c0_45 = arith.constant 0 : index
    %45 = tpu.strided_load %arg20[%c1_44, %c0_45] {strides = array<i32: 2, 1>} : memref<260x32xf32, #tpu.memory_space<vmem>>, vector<126x32xf32>
    %46 = arith.maximumf %44, %45 : vector<126x32xf32>
    %47 = arith.truncf %46 : vector<126x32xf32> to vector<126x32xbf16>
    %c0_46 = arith.constant 0 : index
    %c0_47 = arith.constant 0 : index
    %48 = vector.load %arg21[%c0_46, %c0_47] : memref<126x160xbf16, #tpu.memory_space<vmem>>, vector<126x32xbf16>
    tpu.vector_store %arg21[%c0_46, %c0_47], %47 {strides = array<i32>} : memref<126x160xbf16, #tpu.memory_space<vmem>>, vector<126x32xbf16>,
    %c2_48 = arith.constant 2 : index
    %c0_49 = arith.constant 0 : index
    %49 = tpu.strided_load %arg20[%c2_48, %c0_49] {strides = array<i32: 2, 1>} : memref<260x32xf32, #tpu.memory_space<vmem>>, vector<126x32xf32>
    %c3_50 = arith.constant 3 : index
    %c0_51 = arith.constant 0 : index
    %50 = tpu.strided_load %arg20[%c3_50, %c0_51] {strides = array<i32: 2, 1>} : memref<260x32xf32, #tpu.memory_space<vmem>>, vector<126x32xf32>
    %51 = arith.maximumf %49, %50 : vector<126x32xf32>
    %52 = arith.truncf %51 : vector<126x32xf32> to vector<126x32xbf16>
    %c0_52 = arith.constant 0 : index
    %c32 = arith.constant 32 : index
    %53 = vector.load %arg21[%c0_52, %c32] : memref<126x160xbf16, #tpu.memory_space<vmem>>, vector<126x32xbf16>
    tpu.vector_store %arg21[%c0_52, %c32], %52 {strides = array<i32>} : memref<126x160xbf16, #tpu.memory_space<vmem>>, vector<126x32xbf16>,
    %c4_53 = arith.constant 4 : index
    %c0_54 = arith.constant 0 : index
    %54 = tpu.strided_load %arg20[%c4_53, %c0_54] {strides = array<i32: 2, 1>} : memref<260x32xf32, #tpu.memory_space<vmem>>, vector<126x32xf32>
    %c5_55 = arith.constant 5 : index
    %c0_56 = arith.constant 0 : index
    %55 = tpu.strided_load %arg20[%c5_55, %c0_56] {strides = array<i32: 2, 1>} : memref<260x32xf32, #tpu.memory_space<vmem>>, vector<126x32xf32>
    %56 = arith.maximumf %54, %55 : vector<126x32xf32>
    %57 = arith.truncf %56 : vector<126x32xf32> to vector<126x32xbf16>
    %c0_57 = arith.constant 0 : index
    %c64 = arith.constant 64 : index
    %58 = vector.load %arg21[%c0_57, %c64] : memref<126x160xbf16, #tpu.memory_space<vmem>>, vector<126x32xbf16>
    tpu.vector_store %arg21[%c0_57, %c64], %57 {strides = array<i32>} : memref<126x160xbf16, #tpu.memory_space<vmem>>, vector<126x32xbf16>,
    %c6_58 = arith.constant 6 : index
    %c0_59 = arith.constant 0 : index
    %59 = tpu.strided_load %arg20[%c6_58, %c0_59] {strides = array<i32: 2, 1>} : memref<260x32xf32, #tpu.memory_space<vmem>>, vector<126x32xf32>
    %c7 = arith.constant 7 : index
    %c0_60 = arith.constant 0 : index
    %60 = tpu.strided_load %arg20[%c7, %c0_60] {strides = array<i32: 2, 1>} : memref<260x32xf32, #tpu.memory_space<vmem>>, vector<126x32xf32>
    %61 = arith.maximumf %59, %60 : vector<126x32xf32>
    %62 = arith.truncf %61 : vector<126x32xf32> to vector<126x32xbf16>
    %c0_61 = arith.constant 0 : index
    %c96 = arith.constant 96 : index
    %63 = vector.load %arg21[%c0_61, %c96] : memref<126x160xbf16, #tpu.memory_space<vmem>>, vector<126x32xbf16>
    tpu.vector_store %arg21[%c0_61, %c96], %62 {strides = array<i32>} : memref<126x160xbf16, #tpu.memory_space<vmem>>, vector<126x32xbf16>,
    %c8 = arith.constant 8 : index
    %c0_62 = arith.constant 0 : index
    %64 = tpu.strided_load %arg20[%c8, %c0_62] {strides = array<i32: 2, 1>} : memref<260x32xf32, #tpu.memory_space<vmem>>, vector<126x32xf32>
    %c9 = arith.constant 9 : index
    %c0_63 = arith.constant 0 : index
    %65 = tpu.strided_load %arg20[%c9, %c0_63] {strides = array<i32: 2, 1>} : memref<260x32xf32, #tpu.memory_space<vmem>>, vector<126x32xf32>
    %66 = arith.maximumf %64, %65 : vector<126x32xf32>
    %67 = arith.truncf %66 : vector<126x32xf32> to vector<126x32xbf16>
    %c0_64 = arith.constant 0 : index
    %c128 = arith.constant 128 : index
    %68 = vector.load %arg21[%c0_64, %c128] : memref<126x160xbf16, #tpu.memory_space<vmem>>, vector<126x32xbf16>
    tpu.vector_store %arg21[%c0_64, %c128], %67 {strides = array<i32>} : memref<126x160xbf16, #tpu.memory_space<vmem>>, vector<126x32xbf16>,
    %c0_65 = arith.constant 0 : index
    %c0_66 = arith.constant 0 : index
    %69 = vector.load %arg21[%c0_65, %c0_66] : memref<126x160xbf16, #tpu.memory_space<vmem>>, vector<126x160xbf16>
    %c0_67 = arith.constant 0 : index
    %c0_68 = arith.constant 0 : index
    %70 = vector.load %arg5[%c0_67, %c0_68] : memref<160x64xbf16, #tpu.memory_space<vmem>>, vector<160x64xbf16>
    %cst_69 = arith.constant dense<0.000000e+00> : vector<126x64xf32>
    %71 = tpu.matmul %69, %70, %cst_69 {dimension_numbers = #tpu.dot_dimension_numbers<[1], [0], [0], [1], [0, 0, 1, 1], [], []>} : vector<126x160xbf16>, vector<160x64xbf16>, vector<126x64xf32> -> vector<126x64xf32>
    %c0_70 = arith.constant 0 : index
    %c0_71 = arith.constant 0 : index
    %72 = vector.load %arg6[%c0_70, %c0_71] : memref<1x64xf32, #tpu.memory_space<vmem>>, vector<1x64xf32>
    %73 = vector.broadcast %72 : vector<1x64xf32> to vector<126x64xf32>
    %74 = arith.mulf %71, %73 : vector<126x64xf32>
    %c0_72 = arith.constant 0 : index
    %c0_73 = arith.constant 0 : index
    %75 = vector.load %arg7[%c0_72, %c0_73] : memref<1x64xf32, #tpu.memory_space<vmem>>, vector<1x64xf32>
    %76 = vector.broadcast %75 : vector<1x64xf32> to vector<126x64xf32>
    %77 = arith.addf %74, %76 : vector<126x64xf32>
    %cst_74 = arith.constant 0.000000e+00 : f32
    %78 = vector.broadcast %cst_74 : f32 to vector<126x64xf32>
    %79 = arith.maximumf %77, %78 : vector<126x64xf32>
    %cst_75 = arith.constant 0.000000e+00 : f32
    %80 = vector.broadcast %cst_75 : f32 to vector<2x64xf32>
    %c0_76 = arith.constant 0 : index
    %c0_77 = arith.constant 0 : index
    %81 = vector.load %arg22[%c0_76, %c0_77] : memref<130x64xf32, #tpu.memory_space<vmem>>, vector<2x64xf32>
    tpu.vector_store %arg22[%c0_76, %c0_77], %80 {strides = array<i32>} : memref<130x64xf32, #tpu.memory_space<vmem>>, vector<2x64xf32>,
    %cst_78 = arith.constant 0.000000e+00 : f32
    %82 = vector.broadcast %cst_78 : f32 to vector<2x64xf32>
    %c128_79 = arith.constant 128 : index
    %c0_80 = arith.constant 0 : index
    %83 = vector.load %arg22[%c128_79, %c0_80] : memref<130x64xf32, #tpu.memory_space<vmem>>, vector<2x64xf32>
    tpu.vector_store %arg22[%c128_79, %c0_80], %82 {strides = array<i32>} : memref<130x64xf32, #tpu.memory_space<vmem>>, vector<2x64xf32>,
    %c2_81 = arith.constant 2 : index
    %c0_82 = arith.constant 0 : index
    %84 = vector.load %arg22[%c2_81, %c0_82] : memref<130x64xf32, #tpu.memory_space<vmem>>, vector<126x64xf32>
    tpu.vector_store %arg22[%c2_81, %c0_82], %79 {strides = array<i32>} : memref<130x64xf32, #tpu.memory_space<vmem>>, vector<126x64xf32>,
    %c0_83 = arith.constant 0 : index
    %c0_84 = arith.constant 0 : index
    %85 = tpu.strided_load %arg22[%c0_83, %c0_84] {strides = array<i32: 2, 1>} : memref<130x64xf32, #tpu.memory_space<vmem>>, vector<63x64xf32>
    %c1_85 = arith.constant 1 : index
    %c0_86 = arith.constant 0 : index
    %86 = tpu.strided_load %arg22[%c1_85, %c0_86] {strides = array<i32: 2, 1>} : memref<130x64xf32, #tpu.memory_space<vmem>>, vector<63x64xf32>
    %87 = arith.maximumf %85, %86 : vector<63x64xf32>
    %88 = arith.truncf %87 : vector<63x64xf32> to vector<63x64xbf16>
    %c0_87 = arith.constant 0 : index
    %c0_88 = arith.constant 0 : index
    %89 = vector.load %arg23[%c0_87, %c0_88] : memref<63x192xbf16, #tpu.memory_space<vmem>>, vector<63x64xbf16>
    tpu.vector_store %arg23[%c0_87, %c0_88], %88 {strides = array<i32>} : memref<63x192xbf16, #tpu.memory_space<vmem>>, vector<63x64xbf16>,
    %c2_89 = arith.constant 2 : index
    %c0_90 = arith.constant 0 : index
    %90 = tpu.strided_load %arg22[%c2_89, %c0_90] {strides = array<i32: 2, 1>} : memref<130x64xf32, #tpu.memory_space<vmem>>, vector<63x64xf32>
    %c3_91 = arith.constant 3 : index
    %c0_92 = arith.constant 0 : index
    %91 = tpu.strided_load %arg22[%c3_91, %c0_92] {strides = array<i32: 2, 1>} : memref<130x64xf32, #tpu.memory_space<vmem>>, vector<63x64xf32>
    %92 = arith.maximumf %90, %91 : vector<63x64xf32>
    %93 = arith.truncf %92 : vector<63x64xf32> to vector<63x64xbf16>
    %c0_93 = arith.constant 0 : index
    %c64_94 = arith.constant 64 : index
    %94 = vector.load %arg23[%c0_93, %c64_94] : memref<63x192xbf16, #tpu.memory_space<vmem>>, vector<63x64xbf16>
    tpu.vector_store %arg23[%c0_93, %c64_94], %93 {strides = array<i32>} : memref<63x192xbf16, #tpu.memory_space<vmem>>, vector<63x64xbf16>,
    %c4_95 = arith.constant 4 : index
    %c0_96 = arith.constant 0 : index
    %95 = tpu.strided_load %arg22[%c4_95, %c0_96] {strides = array<i32: 2, 1>} : memref<130x64xf32, #tpu.memory_space<vmem>>, vector<63x64xf32>
    %c5_97 = arith.constant 5 : index
    %c0_98 = arith.constant 0 : index
    %96 = tpu.strided_load %arg22[%c5_97, %c0_98] {strides = array<i32: 2, 1>} : memref<130x64xf32, #tpu.memory_space<vmem>>, vector<63x64xf32>
    %97 = arith.maximumf %95, %96 : vector<63x64xf32>
    %98 = arith.truncf %97 : vector<63x64xf32> to vector<63x64xbf16>
    %c0_99 = arith.constant 0 : index
    %c128_100 = arith.constant 128 : index
    %99 = vector.load %arg23[%c0_99, %c128_100] : memref<63x192xbf16, #tpu.memory_space<vmem>>, vector<63x64xbf16>
    tpu.vector_store %arg23[%c0_99, %c128_100], %98 {strides = array<i32>} : memref<63x192xbf16, #tpu.memory_space<vmem>>, vector<63x64xbf16>,
    %c0_101 = arith.constant 0 : index
    %c0_102 = arith.constant 0 : index
    %100 = vector.load %arg23[%c0_101, %c0_102] : memref<63x192xbf16, #tpu.memory_space<vmem>>, vector<63x192xbf16>
    %c0_103 = arith.constant 0 : index
    %c0_104 = arith.constant 0 : index
    %101 = vector.load %arg8[%c0_103, %c0_104] : memref<192x128xbf16, #tpu.memory_space<vmem>>, vector<192x128xbf16>
    %cst_105 = arith.constant dense<0.000000e+00> : vector<63x128xf32>
    %102 = tpu.matmul %100, %101, %cst_105 {dimension_numbers = #tpu.dot_dimension_numbers<[1], [0], [0], [1], [0, 0, 1, 1], [], []>} : vector<63x192xbf16>, vector<192x128xbf16>, vector<63x128xf32> -> vector<63x128xf32>
    %c0_106 = arith.constant 0 : index
    %c0_107 = arith.constant 0 : index
    %103 = vector.load %arg9[%c0_106, %c0_107] : memref<1x128xf32, #tpu.memory_space<vmem>>, vector<1x128xf32>
    %104 = vector.broadcast %103 : vector<1x128xf32> to vector<63x128xf32>
    %105 = arith.mulf %102, %104 : vector<63x128xf32>
    %c0_108 = arith.constant 0 : index
    %c0_109 = arith.constant 0 : index
    %106 = vector.load %arg10[%c0_108, %c0_109] : memref<1x128xf32, #tpu.memory_space<vmem>>, vector<1x128xf32>
    %107 = vector.broadcast %106 : vector<1x128xf32> to vector<63x128xf32>
    %108 = arith.addf %105, %107 : vector<63x128xf32>
    %cst_110 = arith.constant 0.000000e+00 : f32
    %109 = vector.broadcast %cst_110 : f32 to vector<63x128xf32>
    %110 = arith.maximumf %108, %109 : vector<63x128xf32>
    %c0_111 = arith.constant 0 : index
    %c0_112 = arith.constant 0 : index
    %111 = vector.load %arg24[%c0_111, %c0_112] : memref<63x128xf32, #tpu.memory_space<vmem>>, vector<63x128xf32>
    tpu.vector_store %arg24[%c0_111, %c0_112], %110 {strides = array<i32>} : memref<63x128xf32, #tpu.memory_space<vmem>>, vector<63x128xf32>,
    %c0_113 = arith.constant 0 : index
    %c0_114 = arith.constant 0 : index
    %112 = vector.load %arg24[%c0_113, %c0_114] : memref<63x128xf32, #tpu.memory_space<vmem>>, vector<1x128xf32>
    %c1_115 = arith.constant 1 : index
    %c0_116 = arith.constant 0 : index
    %113 = vector.load %arg24[%c1_115, %c0_116] : memref<63x128xf32, #tpu.memory_space<vmem>>, vector<1x128xf32>
    %114 = arith.maximumf %112, %113 : vector<1x128xf32>
    %115 = arith.truncf %114 : vector<1x128xf32> to vector<1x128xbf16>
    %c0_117 = arith.constant 0 : index
    %c0_118 = arith.constant 0 : index
    %116 = vector.load %arg25[%c0_117, %c0_118] : memref<1x3968xbf16, #tpu.memory_space<vmem>>, vector<1x128xbf16>
    tpu.vector_store %arg25[%c0_117, %c0_118], %115 {strides = array<i32>} : memref<1x3968xbf16, #tpu.memory_space<vmem>>, vector<1x128xbf16>,
    %c2_119 = arith.constant 2 : index
    %c0_120 = arith.constant 0 : index
    %117 = vector.load %arg24[%c2_119, %c0_120] : memref<63x128xf32, #tpu.memory_space<vmem>>, vector<1x128xf32>
    %c3_121 = arith.constant 3 : index
    %c0_122 = arith.constant 0 : index
    %118 = vector.load %arg24[%c3_121, %c0_122] : memref<63x128xf32, #tpu.memory_space<vmem>>, vector<1x128xf32>
    %119 = arith.maximumf %117, %118 : vector<1x128xf32>
    %120 = arith.truncf %119 : vector<1x128xf32> to vector<1x128xbf16>
    %c0_123 = arith.constant 0 : index
    %c128_124 = arith.constant 128 : index
    %121 = vector.load %arg25[%c0_123, %c128_124] : memref<1x3968xbf16, #tpu.memory_space<vmem>>, vector<1x128xbf16>
    tpu.vector_store %arg25[%c0_123, %c128_124], %120 {strides = array<i32>} : memref<1x3968xbf16, #tpu.memory_space<vmem>>, vector<1x128xbf16>,
    %c4_125 = arith.constant 4 : index
    %c0_126 = arith.constant 0 : index
    %122 = vector.load %arg24[%c4_125, %c0_126] : memref<63x128xf32, #tpu.memory_space<vmem>>, vector<1x128xf32>
    %c5_127 = arith.constant 5 : index
    %c0_128 = arith.constant 0 : index
    %123 = vector.load %arg24[%c5_127, %c0_128] : memref<63x128xf32, #tpu.memory_space<vmem>>, vector<1x128xf32>
    %124 = arith.maximumf %122, %123 : vector<1x128xf32>
    %125 = arith.truncf %124 : vector<1x128xf32> to vector<1x128xbf16>
    %c0_129 = arith.constant 0 : index
    %c256_130 = arith.constant 256 : index
    %126 = vector.load %arg25[%c0_129, %c256_130] : memref<1x3968xbf16, #tpu.memory_space<vmem>>, vector<1x128xbf16>
    tpu.vector_store %arg25[%c0_129, %c256_130], %125 {strides = array<i32>} : memref<1x3968xbf16, #tpu.memory_space<vmem>>, vector<1x128xbf16>,
    %c6_131 = arith.constant 6 : index
    %c0_132 = arith.constant 0 : index
    %127 = vector.load %arg24[%c6_131, %c0_132] : memref<63x128xf32, #tpu.memory_space<vmem>>, vector<1x128xf32>
    %c7_133 = arith.constant 7 : index
    %c0_134 = arith.constant 0 : index
    %128 = vector.load %arg24[%c7_133, %c0_134] : memref<63x128xf32, #tpu.memory_space<vmem>>, vector<1x128xf32>
    %129 = arith.maximumf %127, %128 : vector<1x128xf32>
    %130 = arith.truncf %129 : vector<1x128xf32> to vector<1x128xbf16>
    %c0_135 = arith.constant 0 : index
    %c384 = arith.constant 384 : index
    %131 = vector.load %arg25[%c0_135, %c384] : memref<1x3968xbf16, #tpu.memory_space<vmem>>, vector<1x128xbf16>
    tpu.vector_store %arg25[%c0_135, %c384], %130 {strides = array<i32>} : memref<1x3968xbf16, #tpu.memory_space<vmem>>, vector<1x128xbf16>,
    %c8_136 = arith.constant 8 : index
    %c0_137 = arith.constant 0 : index
    %132 = vector.load %arg24[%c8_136, %c0_137] : memref<63x128xf32, #tpu.memory_space<vmem>>, vector<1x128xf32>
    %c9_138 = arith.constant 9 : index
    %c0_139 = arith.constant 0 : index
    %133 = vector.load %arg24[%c9_138, %c0_139] : memref<63x128xf32, #tpu.memory_space<vmem>>, vector<1x128xf32>
    %134 = arith.maximumf %132, %133 : vector<1x128xf32>
    %135 = arith.truncf %134 : vector<1x128xf32> to vector<1x128xbf16>
    %c0_140 = arith.constant 0 : index
    %c512 = arith.constant 512 : index
    %136 = vector.load %arg25[%c0_140, %c512] : memref<1x3968xbf16, #tpu.memory_space<vmem>>, vector<1x128xbf16>
    tpu.vector_store %arg25[%c0_140, %c512], %135 {strides = array<i32>} : memref<1x3968xbf16, #tpu.memory_space<vmem>>, vector<1x128xbf16>,
    %c10_141 = arith.constant 10 : index
    %c0_142 = arith.constant 0 : index
    %137 = vector.load %arg24[%c10_141, %c0_142] : memref<63x128xf32, #tpu.memory_space<vmem>>, vector<1x128xf32>
    %c11 = arith.constant 11 : index
    %c0_143 = arith.constant 0 : index
    %138 = vector.load %arg24[%c11, %c0_143] : memref<63x128xf32, #tpu.memory_space<vmem>>, vector<1x128xf32>
    %139 = arith.maximumf %137, %138 : vector<1x128xf32>
    %140 = arith.truncf %139 : vector<1x128xf32> to vector<1x128xbf16>
    %c0_144 = arith.constant 0 : index
    %c640 = arith.constant 640 : index
    %141 = vector.load %arg25[%c0_144, %c640] : memref<1x3968xbf16, #tpu.memory_space<vmem>>, vector<1x128xbf16>
    tpu.vector_store %arg25[%c0_144, %c640], %140 {strides = array<i32>} : memref<1x3968xbf16, #tpu.memory_space<vmem>>, vector<1x128xbf16>,
    %c12 = arith.constant 12 : index
    %c0_145 = arith.constant 0 : index
    %142 = vector.load %arg24[%c12, %c0_145] : memref<63x128xf32, #tpu.memory_space<vmem>>, vector<1x128xf32>
    %c13 = arith.constant 13 : index
    %c0_146 = arith.constant 0 : index
    %143 = vector.load %arg24[%c13, %c0_146] : memref<63x128xf32, #tpu.memory_space<vmem>>, vector<1x128xf32>
    %144 = arith.maximumf %142, %143 : vector<1x128xf32>
    %145 = arith.truncf %144 : vector<1x128xf32> to vector<1x128xbf16>
    %c0_147 = arith.constant 0 : index
    %c768 = arith.constant 768 : index
    %146 = vector.load %arg25[%c0_147, %c768] : memref<1x3968xbf16, #tpu.memory_space<vmem>>, vector<1x128xbf16>
    tpu.vector_store %arg25[%c0_147, %c768], %145 {strides = array<i32>} : memref<1x3968xbf16, #tpu.memory_space<vmem>>, vector<1x128xbf16>,
    %c14 = arith.constant 14 : index
    %c0_148 = arith.constant 0 : index
    %147 = vector.load %arg24[%c14, %c0_148] : memref<63x128xf32, #tpu.memory_space<vmem>>, vector<1x128xf32>
    %c15_149 = arith.constant 15 : index
    %c0_150 = arith.constant 0 : index
    %148 = vector.load %arg24[%c15_149, %c0_150] : memref<63x128xf32, #tpu.memory_space<vmem>>, vector<1x128xf32>
    %149 = arith.maximumf %147, %148 : vector<1x128xf32>
    %150 = arith.truncf %149 : vector<1x128xf32> to vector<1x128xbf16>
    %c0_151 = arith.constant 0 : index
    %c896 = arith.constant 896 : index
    %151 = vector.load %arg25[%c0_151, %c896] : memref<1x3968xbf16, #tpu.memory_space<vmem>>, vector<1x128xbf16>
    tpu.vector_store %arg25[%c0_151, %c896], %150 {strides = array<i32>} : memref<1x3968xbf16, #tpu.memory_space<vmem>>, vector<1x128xbf16>,
    %c16 = arith.constant 16 : index
    %c0_152 = arith.constant 0 : index
    %152 = vector.load %arg24[%c16, %c0_152] : memref<63x128xf32, #tpu.memory_space<vmem>>, vector<1x128xf32>
    %c17 = arith.constant 17 : index
    %c0_153 = arith.constant 0 : index
    %153 = vector.load %arg24[%c17, %c0_153] : memref<63x128xf32, #tpu.memory_space<vmem>>, vector<1x128xf32>
    %154 = arith.maximumf %152, %153 : vector<1x128xf32>
    %155 = arith.truncf %154 : vector<1x128xf32> to vector<1x128xbf16>
    %c0_154 = arith.constant 0 : index
    %c1024 = arith.constant 1024 : index
    %156 = vector.load %arg25[%c0_154, %c1024] : memref<1x3968xbf16, #tpu.memory_space<vmem>>, vector<1x128xbf16>
    tpu.vector_store %arg25[%c0_154, %c1024], %155 {strides = array<i32>} : memref<1x3968xbf16, #tpu.memory_space<vmem>>, vector<1x128xbf16>,
    %c18 = arith.constant 18 : index
    %c0_155 = arith.constant 0 : index
    %157 = vector.load %arg24[%c18, %c0_155] : memref<63x128xf32, #tpu.memory_space<vmem>>, vector<1x128xf32>
    %c19 = arith.constant 19 : index
    %c0_156 = arith.constant 0 : index
    %158 = vector.load %arg24[%c19, %c0_156] : memref<63x128xf32, #tpu.memory_space<vmem>>, vector<1x128xf32>
    %159 = arith.maximumf %157, %158 : vector<1x128xf32>
    %160 = arith.truncf %159 : vector<1x128xf32> to vector<1x128xbf16>
    %c0_157 = arith.constant 0 : index
    %c1152 = arith.constant 1152 : index
    %161 = vector.load %arg25[%c0_157, %c1152] : memref<1x3968xbf16, #tpu.memory_space<vmem>>, vector<1x128xbf16>
    tpu.vector_store %arg25[%c0_157, %c1152], %160 {strides = array<i32>} : memref<1x3968xbf16, #tpu.memory_space<vmem>>, vector<1x128xbf16>,
    %c20_158 = arith.constant 20 : index
    %c0_159 = arith.constant 0 : index
    %162 = vector.load %arg24[%c20_158, %c0_159] : memref<63x128xf32, #tpu.memory_space<vmem>>, vector<1x128xf32>
    %c21 = arith.constant 21 : index
    %c0_160 = arith.constant 0 : index
    %163 = vector.load %arg24[%c21, %c0_160] : memref<63x128xf32, #tpu.memory_space<vmem>>, vector<1x128xf32>
    %164 = arith.maximumf %162, %163 : vector<1x128xf32>
    %165 = arith.truncf %164 : vector<1x128xf32> to vector<1x128xbf16>
    %c0_161 = arith.constant 0 : index
    %c1280 = arith.constant 1280 : index
    %166 = vector.load %arg25[%c0_161, %c1280] : memref<1x3968xbf16, #tpu.memory_space<vmem>>, vector<1x128xbf16>
    tpu.vector_store %arg25[%c0_161, %c1280], %165 {strides = array<i32>} : memref<1x3968xbf16, #tpu.memory_space<vmem>>, vector<1x128xbf16>,
    %c22 = arith.constant 22 : index
    %c0_162 = arith.constant 0 : index
    %167 = vector.load %arg24[%c22, %c0_162] : memref<63x128xf32, #tpu.memory_space<vmem>>, vector<1x128xf32>
    %c23 = arith.constant 23 : index
    %c0_163 = arith.constant 0 : index
    %168 = vector.load %arg24[%c23, %c0_163] : memref<63x128xf32, #tpu.memory_space<vmem>>, vector<1x128xf32>
    %169 = arith.maximumf %167, %168 : vector<1x128xf32>
    %170 = arith.truncf %169 : vector<1x128xf32> to vector<1x128xbf16>
    %c0_164 = arith.constant 0 : index
    %c1408 = arith.constant 1408 : index
    %171 = vector.load %arg25[%c0_164, %c1408] : memref<1x3968xbf16, #tpu.memory_space<vmem>>, vector<1x128xbf16>
    tpu.vector_store %arg25[%c0_164, %c1408], %170 {strides = array<i32>} : memref<1x3968xbf16, #tpu.memory_space<vmem>>, vector<1x128xbf16>,
    %c24 = arith.constant 24 : index
    %c0_165 = arith.constant 0 : index
    %172 = vector.load %arg24[%c24, %c0_165] : memref<63x128xf32, #tpu.memory_space<vmem>>, vector<1x128xf32>
    %c25_166 = arith.constant 25 : index
    %c0_167 = arith.constant 0 : index
    %173 = vector.load %arg24[%c25_166, %c0_167] : memref<63x128xf32, #tpu.memory_space<vmem>>, vector<1x128xf32>
    %174 = arith.maximumf %172, %173 : vector<1x128xf32>
    %175 = arith.truncf %174 : vector<1x128xf32> to vector<1x128xbf16>
    %c0_168 = arith.constant 0 : index
    %c1536 = arith.constant 1536 : index
    %176 = vector.load %arg25[%c0_168, %c1536] : memref<1x3968xbf16, #tpu.memory_space<vmem>>, vector<1x128xbf16>
    tpu.vector_store %arg25[%c0_168, %c1536], %175 {strides = array<i32>} : memref<1x3968xbf16, #tpu.memory_space<vmem>>, vector<1x128xbf16>,
    %c26 = arith.constant 26 : index
    %c0_169 = arith.constant 0 : index
    %177 = vector.load %arg24[%c26, %c0_169] : memref<63x128xf32, #tpu.memory_space<vmem>>, vector<1x128xf32>
    %c27 = arith.constant 27 : index
    %c0_170 = arith.constant 0 : index
    %178 = vector.load %arg24[%c27, %c0_170] : memref<63x128xf32, #tpu.memory_space<vmem>>, vector<1x128xf32>
    %179 = arith.maximumf %177, %178 : vector<1x128xf32>
    %180 = arith.truncf %179 : vector<1x128xf32> to vector<1x128xbf16>
    %c0_171 = arith.constant 0 : index
    %c1664 = arith.constant 1664 : index
    %181 = vector.load %arg25[%c0_171, %c1664] : memref<1x3968xbf16, #tpu.memory_space<vmem>>, vector<1x128xbf16>
    tpu.vector_store %arg25[%c0_171, %c1664], %180 {strides = array<i32>} : memref<1x3968xbf16, #tpu.memory_space<vmem>>, vector<1x128xbf16>,
    %c28 = arith.constant 28 : index
    %c0_172 = arith.constant 0 : index
    %182 = vector.load %arg24[%c28, %c0_172] : memref<63x128xf32, #tpu.memory_space<vmem>>, vector<1x128xf32>
    %c29 = arith.constant 29 : index
    %c0_173 = arith.constant 0 : index
    %183 = vector.load %arg24[%c29, %c0_173] : memref<63x128xf32, #tpu.memory_space<vmem>>, vector<1x128xf32>
    %184 = arith.maximumf %182, %183 : vector<1x128xf32>
    %185 = arith.truncf %184 : vector<1x128xf32> to vector<1x128xbf16>
    %c0_174 = arith.constant 0 : index
    %c1792 = arith.constant 1792 : index
    %186 = vector.load %arg25[%c0_174, %c1792] : memref<1x3968xbf16, #tpu.memory_space<vmem>>, vector<1x128xbf16>
    tpu.vector_store %arg25[%c0_174, %c1792], %185 {strides = array<i32>} : memref<1x3968xbf16, #tpu.memory_space<vmem>>, vector<1x128xbf16>,
    %c30_175 = arith.constant 30 : index
    %c0_176 = arith.constant 0 : index
    %187 = vector.load %arg24[%c30_175, %c0_176] : memref<63x128xf32, #tpu.memory_space<vmem>>, vector<1x128xf32>
    %c31 = arith.constant 31 : index
    %c0_177 = arith.constant 0 : index
    %188 = vector.load %arg24[%c31, %c0_177] : memref<63x128xf32, #tpu.memory_space<vmem>>, vector<1x128xf32>
    %189 = arith.maximumf %187, %188 : vector<1x128xf32>
    %190 = arith.truncf %189 : vector<1x128xf32> to vector<1x128xbf16>
    %c0_178 = arith.constant 0 : index
    %c1920 = arith.constant 1920 : index
    %191 = vector.load %arg25[%c0_178, %c1920] : memref<1x3968xbf16, #tpu.memory_space<vmem>>, vector<1x128xbf16>
    tpu.vector_store %arg25[%c0_178, %c1920], %190 {strides = array<i32>} : memref<1x3968xbf16, #tpu.memory_space<vmem>>, vector<1x128xbf16>,
    %c32_179 = arith.constant 32 : index
    %c0_180 = arith.constant 0 : index
    %192 = vector.load %arg24[%c32_179, %c0_180] : memref<63x128xf32, #tpu.memory_space<vmem>>, vector<1x128xf32>
    %c33 = arith.constant 33 : index
    %c0_181 = arith.constant 0 : index
    %193 = vector.load %arg24[%c33, %c0_181] : memref<63x128xf32, #tpu.memory_space<vmem>>, vector<1x128xf32>
    %194 = arith.maximumf %192, %193 : vector<1x128xf32>
    %195 = arith.truncf %194 : vector<1x128xf32> to vector<1x128xbf16>
    %c0_182 = arith.constant 0 : index
    %c2048 = arith.constant 2048 : index
    %196 = vector.load %arg25[%c0_182, %c2048] : memref<1x3968xbf16, #tpu.memory_space<vmem>>, vector<1x128xbf16>
    tpu.vector_store %arg25[%c0_182, %c2048], %195 {strides = array<i32>} : memref<1x3968xbf16, #tpu.memory_space<vmem>>, vector<1x128xbf16>,
    %c34 = arith.constant 34 : index
    %c0_183 = arith.constant 0 : index
    %197 = vector.load %arg24[%c34, %c0_183] : memref<63x128xf32, #tpu.memory_space<vmem>>, vector<1x128xf32>
    %c35 = arith.constant 35 : index
    %c0_184 = arith.constant 0 : index
    %198 = vector.load %arg24[%c35, %c0_184] : memref<63x128xf32, #tpu.memory_space<vmem>>, vector<1x128xf32>
    %199 = arith.maximumf %197, %198 : vector<1x128xf32>
    %200 = arith.truncf %199 : vector<1x128xf32> to vector<1x128xbf16>
    %c0_185 = arith.constant 0 : index
    %c2176 = arith.constant 2176 : index
    %201 = vector.load %arg25[%c0_185, %c2176] : memref<1x3968xbf16, #tpu.memory_space<vmem>>, vector<1x128xbf16>
    tpu.vector_store %arg25[%c0_185, %c2176], %200 {strides = array<i32>} : memref<1x3968xbf16, #tpu.memory_space<vmem>>, vector<1x128xbf16>,
    %c36 = arith.constant 36 : index
    %c0_186 = arith.constant 0 : index
    %202 = vector.load %arg24[%c36, %c0_186] : memref<63x128xf32, #tpu.memory_space<vmem>>, vector<1x128xf32>
    %c37 = arith.constant 37 : index
    %c0_187 = arith.constant 0 : index
    %203 = vector.load %arg24[%c37, %c0_187] : memref<63x128xf32, #tpu.memory_space<vmem>>, vector<1x128xf32>
    %204 = arith.maximumf %202, %203 : vector<1x128xf32>
    %205 = arith.truncf %204 : vector<1x128xf32> to vector<1x128xbf16>
    %c0_188 = arith.constant 0 : index
    %c2304 = arith.constant 2304 : index
    %206 = vector.load %arg25[%c0_188, %c2304] : memref<1x3968xbf16, #tpu.memory_space<vmem>>, vector<1x128xbf16>
    tpu.vector_store %arg25[%c0_188, %c2304], %205 {strides = array<i32>} : memref<1x3968xbf16, #tpu.memory_space<vmem>>, vector<1x128xbf16>,
    %c38 = arith.constant 38 : index
    %c0_189 = arith.constant 0 : index
    %207 = vector.load %arg24[%c38, %c0_189] : memref<63x128xf32, #tpu.memory_space<vmem>>, vector<1x128xf32>
    %c39 = arith.constant 39 : index
    %c0_190 = arith.constant 0 : index
    %208 = vector.load %arg24[%c39, %c0_190] : memref<63x128xf32, #tpu.memory_space<vmem>>, vector<1x128xf32>
    %209 = arith.maximumf %207, %208 : vector<1x128xf32>
    %210 = arith.truncf %209 : vector<1x128xf32> to vector<1x128xbf16>
    %c0_191 = arith.constant 0 : index
    %c2432 = arith.constant 2432 : index
    %211 = vector.load %arg25[%c0_191, %c2432] : memref<1x3968xbf16, #tpu.memory_space<vmem>>, vector<1x128xbf16>
    tpu.vector_store %arg25[%c0_191, %c2432], %210 {strides = array<i32>} : memref<1x3968xbf16, #tpu.memory_space<vmem>>, vector<1x128xbf16>,
    %c40 = arith.constant 40 : index
    %c0_192 = arith.constant 0 : index
    %212 = vector.load %arg24[%c40, %c0_192] : memref<63x128xf32, #tpu.memory_space<vmem>>, vector<1x128xf32>
    %c41 = arith.constant 41 : index
    %c0_193 = arith.constant 0 : index
    %213 = vector.load %arg24[%c41, %c0_193] : memref<63x128xf32, #tpu.memory_space<vmem>>, vector<1x128xf32>
    %214 = arith.maximumf %212, %213 : vector<1x128xf32>
    %215 = arith.truncf %214 : vector<1x128xf32> to vector<1x128xbf16>
    %c0_194 = arith.constant 0 : index
    %c2560 = arith.constant 2560 : index
    %216 = vector.load %arg25[%c0_194, %c2560] : memref<1x3968xbf16, #tpu.memory_space<vmem>>, vector<1x128xbf16>
    tpu.vector_store %arg25[%c0_194, %c2560], %215 {strides = array<i32>} : memref<1x3968xbf16, #tpu.memory_space<vmem>>, vector<1x128xbf16>,
    %c42 = arith.constant 42 : index
    %c0_195 = arith.constant 0 : index
    %217 = vector.load %arg24[%c42, %c0_195] : memref<63x128xf32, #tpu.memory_space<vmem>>, vector<1x128xf32>
    %c43 = arith.constant 43 : index
    %c0_196 = arith.constant 0 : index
    %218 = vector.load %arg24[%c43, %c0_196] : memref<63x128xf32, #tpu.memory_space<vmem>>, vector<1x128xf32>
    %219 = arith.maximumf %217, %218 : vector<1x128xf32>
    %220 = arith.truncf %219 : vector<1x128xf32> to vector<1x128xbf16>
    %c0_197 = arith.constant 0 : index
    %c2688 = arith.constant 2688 : index
    %221 = vector.load %arg25[%c0_197, %c2688] : memref<1x3968xbf16, #tpu.memory_space<vmem>>, vector<1x128xbf16>
    tpu.vector_store %arg25[%c0_197, %c2688], %220 {strides = array<i32>} : memref<1x3968xbf16, #tpu.memory_space<vmem>>, vector<1x128xbf16>,
    %c44 = arith.constant 44 : index
    %c0_198 = arith.constant 0 : index
    %222 = vector.load %arg24[%c44, %c0_198] : memref<63x128xf32, #tpu.memory_space<vmem>>, vector<1x128xf32>
    %c45 = arith.constant 45 : index
    %c0_199 = arith.constant 0 : index
    %223 = vector.load %arg24[%c45, %c0_199] : memref<63x128xf32, #tpu.memory_space<vmem>>, vector<1x128xf32>
    %224 = arith.maximumf %222, %223 : vector<1x128xf32>
    %225 = arith.truncf %224 : vector<1x128xf32> to vector<1x128xbf16>
    %c0_200 = arith.constant 0 : index
    %c2816 = arith.constant 2816 : index
    %226 = vector.load %arg25[%c0_200, %c2816] : memref<1x3968xbf16, #tpu.memory_space<vmem>>, vector<1x128xbf16>
    tpu.vector_store %arg25[%c0_200, %c2816], %225 {strides = array<i32>} : memref<1x3968xbf16, #tpu.memory_space<vmem>>, vector<1x128xbf16>,
    %c46 = arith.constant 46 : index
    %c0_201 = arith.constant 0 : index
    %227 = vector.load %arg24[%c46, %c0_201] : memref<63x128xf32, #tpu.memory_space<vmem>>, vector<1x128xf32>
    %c47 = arith.constant 47 : index
    %c0_202 = arith.constant 0 : index
    %228 = vector.load %arg24[%c47, %c0_202] : memref<63x128xf32, #tpu.memory_space<vmem>>, vector<1x128xf32>
    %229 = arith.maximumf %227, %228 : vector<1x128xf32>
    %230 = arith.truncf %229 : vector<1x128xf32> to vector<1x128xbf16>
    %c0_203 = arith.constant 0 : index
    %c2944 = arith.constant 2944 : index
    %231 = vector.load %arg25[%c0_203, %c2944] : memref<1x3968xbf16, #tpu.memory_space<vmem>>, vector<1x128xbf16>
    tpu.vector_store %arg25[%c0_203, %c2944], %230 {strides = array<i32>} : memref<1x3968xbf16, #tpu.memory_space<vmem>>, vector<1x128xbf16>,
    %c48 = arith.constant 48 : index
    %c0_204 = arith.constant 0 : index
    %232 = vector.load %arg24[%c48, %c0_204] : memref<63x128xf32, #tpu.memory_space<vmem>>, vector<1x128xf32>
    %c49 = arith.constant 49 : index
    %c0_205 = arith.constant 0 : index
    %233 = vector.load %arg24[%c49, %c0_205] : memref<63x128xf32, #tpu.memory_space<vmem>>, vector<1x128xf32>
    %234 = arith.maximumf %232, %233 : vector<1x128xf32>
    %235 = arith.truncf %234 : vector<1x128xf32> to vector<1x128xbf16>
    %c0_206 = arith.constant 0 : index
    %c3072 = arith.constant 3072 : index
    %236 = vector.load %arg25[%c0_206, %c3072] : memref<1x3968xbf16, #tpu.memory_space<vmem>>, vector<1x128xbf16>
    tpu.vector_store %arg25[%c0_206, %c3072], %235 {strides = array<i32>} : memref<1x3968xbf16, #tpu.memory_space<vmem>>, vector<1x128xbf16>,
    %c50 = arith.constant 50 : index
    %c0_207 = arith.constant 0 : index
    %237 = vector.load %arg24[%c50, %c0_207] : memref<63x128xf32, #tpu.memory_space<vmem>>, vector<1x128xf32>
    %c51 = arith.constant 51 : index
    %c0_208 = arith.constant 0 : index
    %238 = vector.load %arg24[%c51, %c0_208] : memref<63x128xf32, #tpu.memory_space<vmem>>, vector<1x128xf32>
    %239 = arith.maximumf %237, %238 : vector<1x128xf32>
    %240 = arith.truncf %239 : vector<1x128xf32> to vector<1x128xbf16>
    %c0_209 = arith.constant 0 : index
    %c3200 = arith.constant 3200 : index
    %241 = vector.load %arg25[%c0_209, %c3200] : memref<1x3968xbf16, #tpu.memory_space<vmem>>, vector<1x128xbf16>
    tpu.vector_store %arg25[%c0_209, %c3200], %240 {strides = array<i32>} : memref<1x3968xbf16, #tpu.memory_space<vmem>>, vector<1x128xbf16>,
    %c52 = arith.constant 52 : index
    %c0_210 = arith.constant 0 : index
    %242 = vector.load %arg24[%c52, %c0_210] : memref<63x128xf32, #tpu.memory_space<vmem>>, vector<1x128xf32>
    %c53 = arith.constant 53 : index
    %c0_211 = arith.constant 0 : index
    %243 = vector.load %arg24[%c53, %c0_211] : memref<63x128xf32, #tpu.memory_space<vmem>>, vector<1x128xf32>
    %244 = arith.maximumf %242, %243 : vector<1x128xf32>
    %245 = arith.truncf %244 : vector<1x128xf32> to vector<1x128xbf16>
    %c0_212 = arith.constant 0 : index
    %c3328 = arith.constant 3328 : index
    %246 = vector.load %arg25[%c0_212, %c3328] : memref<1x3968xbf16, #tpu.memory_space<vmem>>, vector<1x128xbf16>
    tpu.vector_store %arg25[%c0_212, %c3328], %245 {strides = array<i32>} : memref<1x3968xbf16, #tpu.memory_space<vmem>>, vector<1x128xbf16>,
    %c54 = arith.constant 54 : index
    %c0_213 = arith.constant 0 : index
    %247 = vector.load %arg24[%c54, %c0_213] : memref<63x128xf32, #tpu.memory_space<vmem>>, vector<1x128xf32>
    %c55 = arith.constant 55 : index
    %c0_214 = arith.constant 0 : index
    %248 = vector.load %arg24[%c55, %c0_214] : memref<63x128xf32, #tpu.memory_space<vmem>>, vector<1x128xf32>
    %249 = arith.maximumf %247, %248 : vector<1x128xf32>
    %250 = arith.truncf %249 : vector<1x128xf32> to vector<1x128xbf16>
    %c0_215 = arith.constant 0 : index
    %c3456 = arith.constant 3456 : index
    %251 = vector.load %arg25[%c0_215, %c3456] : memref<1x3968xbf16, #tpu.memory_space<vmem>>, vector<1x128xbf16>
    tpu.vector_store %arg25[%c0_215, %c3456], %250 {strides = array<i32>} : memref<1x3968xbf16, #tpu.memory_space<vmem>>, vector<1x128xbf16>,
    %c56 = arith.constant 56 : index
    %c0_216 = arith.constant 0 : index
    %252 = vector.load %arg24[%c56, %c0_216] : memref<63x128xf32, #tpu.memory_space<vmem>>, vector<1x128xf32>
    %c57 = arith.constant 57 : index
    %c0_217 = arith.constant 0 : index
    %253 = vector.load %arg24[%c57, %c0_217] : memref<63x128xf32, #tpu.memory_space<vmem>>, vector<1x128xf32>
    %254 = arith.maximumf %252, %253 : vector<1x128xf32>
    %255 = arith.truncf %254 : vector<1x128xf32> to vector<1x128xbf16>
    %c0_218 = arith.constant 0 : index
    %c3584 = arith.constant 3584 : index
    %256 = vector.load %arg25[%c0_218, %c3584] : memref<1x3968xbf16, #tpu.memory_space<vmem>>, vector<1x128xbf16>
    tpu.vector_store %arg25[%c0_218, %c3584], %255 {strides = array<i32>} : memref<1x3968xbf16, #tpu.memory_space<vmem>>, vector<1x128xbf16>,
    %c58 = arith.constant 58 : index
    %c0_219 = arith.constant 0 : index
    %257 = vector.load %arg24[%c58, %c0_219] : memref<63x128xf32, #tpu.memory_space<vmem>>, vector<1x128xf32>
    %c59 = arith.constant 59 : index
    %c0_220 = arith.constant 0 : index
    %258 = vector.load %arg24[%c59, %c0_220] : memref<63x128xf32, #tpu.memory_space<vmem>>, vector<1x128xf32>
    %259 = arith.maximumf %257, %258 : vector<1x128xf32>
    %260 = arith.truncf %259 : vector<1x128xf32> to vector<1x128xbf16>
    %c0_221 = arith.constant 0 : index
    %c3712 = arith.constant 3712 : index
    %261 = vector.load %arg25[%c0_221, %c3712] : memref<1x3968xbf16, #tpu.memory_space<vmem>>, vector<1x128xbf16>
    tpu.vector_store %arg25[%c0_221, %c3712], %260 {strides = array<i32>} : memref<1x3968xbf16, #tpu.memory_space<vmem>>, vector<1x128xbf16>,
    %c60 = arith.constant 60 : index
    %c0_222 = arith.constant 0 : index
    %262 = vector.load %arg24[%c60, %c0_222] : memref<63x128xf32, #tpu.memory_space<vmem>>, vector<1x128xf32>
    %c61 = arith.constant 61 : index
    %c0_223 = arith.constant 0 : index
    %263 = vector.load %arg24[%c61, %c0_223] : memref<63x128xf32, #tpu.memory_space<vmem>>, vector<1x128xf32>
    %264 = arith.maximumf %262, %263 : vector<1x128xf32>
    %265 = arith.truncf %264 : vector<1x128xf32> to vector<1x128xbf16>
    %c0_224 = arith.constant 0 : index
    %c3840 = arith.constant 3840 : index
    %266 = vector.load %arg25[%c0_224, %c3840] : memref<1x3968xbf16, #tpu.memory_space<vmem>>, vector<1x128xbf16>
    tpu.vector_store %arg25[%c0_224, %c3840], %265 {strides = array<i32>} : memref<1x3968xbf16, #tpu.memory_space<vmem>>, vector<1x128xbf16>,
    %c0_225 = arith.constant 0 : index
    %c0_226 = arith.constant 0 : index
    %267 = vector.load %arg25[%c0_225, %c0_226] : memref<1x3968xbf16, #tpu.memory_space<vmem>>, vector<1x3968xbf16>
    %c0_227 = arith.constant 0 : index
    %c0_228 = arith.constant 0 : index
    %268 = vector.load %arg11[%c0_227, %c0_228] : memref<3968x128xbf16, #tpu.memory_space<vmem>>, vector<3968x128xbf16>
    %cst_229 = arith.constant dense<0.000000e+00> : vector<1x128xf32>
    %269 = tpu.matmul %267, %268, %cst_229 {dimension_numbers = #tpu.dot_dimension_numbers<[1], [0], [0], [1], [0, 0, 1, 1], [], []>} : vector<1x3968xbf16>, vector<3968x128xbf16>, vector<1x128xf32> -> vector<1x128xf32>
    %c0_230 = arith.constant 0 : index
    %c0_231 = arith.constant 0 : index
    %270 = vector.load %arg12[%c0_230, %c0_231] : memref<1x128xf32, #tpu.memory_space<vmem>>, vector<1x128xf32>
    %271 = arith.addf %269, %270 : vector<1x128xf32>
    %cst_232 = arith.constant 0.000000e+00 : f32
    %272 = vector.broadcast %cst_232 : f32 to vector<1x128xf32>
    %273 = arith.maximumf %271, %272 : vector<1x128xf32>
    %274 = arith.truncf %273 : vector<1x128xf32> to vector<1x128xbf16>
    %c0_233 = arith.constant 0 : index
    %c0_234 = arith.constant 0 : index
    %275 = vector.load %arg13[%c0_233, %c0_234] : memref<128x64xbf16, #tpu.memory_space<vmem>>, vector<128x64xbf16>
    %cst_235 = arith.constant dense<0.000000e+00> : vector<1x64xf32>
    %276 = tpu.matmul %274, %275, %cst_235 {dimension_numbers = #tpu.dot_dimension_numbers<[1], [0], [0], [1], [0, 0, 1, 1], [], []>} : vector<1x128xbf16>, vector<128x64xbf16>, vector<1x64xf32> -> vector<1x64xf32>
    %c0_236 = arith.constant 0 : index
    %c0_237 = arith.constant 0 : index
    %277 = vector.load %arg14[%c0_236, %c0_237] : memref<1x64xf32, #tpu.memory_space<vmem>>, vector<1x64xf32>
    %278 = arith.addf %276, %277 : vector<1x64xf32>
    %cst_238 = arith.constant 0.000000e+00 : f32
    %279 = vector.broadcast %cst_238 : f32 to vector<1x64xf32>
    %280 = arith.maximumf %278, %279 : vector<1x64xf32>
    %281 = arith.truncf %280 : vector<1x64xf32> to vector<1x64xbf16>
    %c0_239 = arith.constant 0 : index
    %c0_240 = arith.constant 0 : index
    %282 = vector.load %arg15[%c0_239, %c0_240] : memref<64x2xbf16, #tpu.memory_space<vmem>>, vector<64x2xbf16>
    %cst_241 = arith.constant dense<0.000000e+00> : vector<1x2xf32>
    %283 = tpu.matmul %281, %282, %cst_241 {dimension_numbers = #tpu.dot_dimension_numbers<[1], [0], [0], [1], [0, 0, 1, 1], [], []>} : vector<1x64xbf16>, vector<64x2xbf16>, vector<1x2xf32> -> vector<1x2xf32>
    %c0_242 = arith.constant 0 : index
    %c0_243 = arith.constant 0 : index
    %284 = vector.load %arg16[%c0_242, %c0_243] : memref<1x2xf32, #tpu.memory_space<vmem>>, vector<1x2xf32>
    %285 = arith.addf %283, %284 : vector<1x2xf32>
    %c0_244 = arith.constant 0 : index
    %c0_245 = arith.constant 0 : index
    %c0_246 = arith.constant 0 : index
    %286 = vector.load %arg17[%c0_244, %c0_245, %c0_246] : memref<1x1x2xf32, #tpu.memory_space<vmem>>, vector<1x1x2xf32>
    %287 = vector.shape_cast %286 : vector<1x1x2xf32> to vector<1x2xf32>
    %288 = vector.shape_cast %285 : vector<1x2xf32> to vector<1x1x2xf32>
    tpu.vector_store %arg17[%c0_244, %c0_245, %c0_246], %288 {strides = array<i32>} : memref<1x1x2xf32, #tpu.memory_space<vmem>>, vector<1x1x2xf32>,
    return
  }
  func.func @transform_0(%arg0: i32) -> (i32, i32, i32) {
    %c0_i32 = arith.constant 0 : i32
    %c0_i32_0 = arith.constant 0 : i32
    %c0_i32_1 = arith.constant 0 : i32
    return %arg0, %c0_i32, %c0_i32_0 : i32, i32, i32
  }
  func.func @transform_1(%arg0: i32) -> (i32, i32) {
    %c0_i32 = arith.constant 0 : i32
    %c0_i32_0 = arith.constant 0 : i32
    %c0_i32_1 = arith.constant 0 : i32
    return %c0_i32, %c0_i32_0 : i32, i32
  }
  func.func @transform_2(%arg0: i32) -> (i32, i32) {
    %c0_i32 = arith.constant 0 : i32
    %c0_i32_0 = arith.constant 0 : i32
    %c0_i32_1 = arith.constant 0 : i32
    return %c0_i32, %c0_i32_0 : i32, i32
  }
  func.func @transform_3(%arg0: i32) -> (i32, i32) {
    %c0_i32 = arith.constant 0 : i32
    %c0_i32_0 = arith.constant 0 : i32
    %c0_i32_1 = arith.constant 0 : i32
    return %c0_i32, %c0_i32_0 : i32, i32
  }
  func.func @transform_4(%arg0: i32) -> (i32, i32) {
    %c0_i32 = arith.constant 0 : i32
    %c0_i32_0 = arith.constant 0 : i32
    %c0_i32_1 = arith.constant 0 : i32
    return %c0_i32, %c0_i32_0 : i32, i32
  }
  func.func @transform_5(%arg0: i32) -> (i32, i32) {
    %c0_i32 = arith.constant 0 : i32
    %c0_i32_0 = arith.constant 0 : i32
    %c0_i32_1 = arith.constant 0 : i32
    return %c0_i32, %c0_i32_0 : i32, i32
  }
  func.func @transform_6(%arg0: i32) -> (i32, i32) {
    %c0_i32 = arith.constant 0 : i32
    %c0_i32_0 = arith.constant 0 : i32
    %c0_i32_1 = arith.constant 0 : i32
    return %c0_i32, %c0_i32_0 : i32, i32
  }
  func.func @transform_7(%arg0: i32) -> (i32, i32) {
    %c0_i32 = arith.constant 0 : i32
    %c0_i32_0 = arith.constant 0 : i32
    %c0_i32_1 = arith.constant 0 : i32
    return %c0_i32, %c0_i32_0 : i32, i32
  }
  func.func @transform_8(%arg0: i32) -> (i32, i32) {
    %c0_i32 = arith.constant 0 : i32
    %c0_i32_0 = arith.constant 0 : i32
    %c0_i32_1 = arith.constant 0 : i32
    return %c0_i32, %c0_i32_0 : i32, i32
  }
  func.func @transform_9(%arg0: i32) -> (i32, i32) {
    %c0_i32 = arith.constant 0 : i32
    %c0_i32_0 = arith.constant 0 : i32
    %c0_i32_1 = arith.constant 0 : i32
    return %c0_i32, %c0_i32_0 : i32, i32
  }
  func.func @transform_10(%arg0: i32) -> (i32, i32) {
    %c0_i32 = arith.constant 0 : i32
    %c0_i32_0 = arith.constant 0 : i32
    %c0_i32_1 = arith.constant 0 : i32
    return %c0_i32, %c0_i32_0 : i32, i32
  }
  func.func @transform_11(%arg0: i32) -> (i32, i32) {
    %c0_i32 = arith.constant 0 : i32
    %c0_i32_0 = arith.constant 0 : i32
    %c0_i32_1 = arith.constant 0 : i32
    return %c0_i32, %c0_i32_0 : i32, i32
  }
  func.func @transform_12(%arg0: i32) -> (i32, i32) {
    %c0_i32 = arith.constant 0 : i32
    %c0_i32_0 = arith.constant 0 : i32
    %c0_i32_1 = arith.constant 0 : i32
    return %c0_i32, %c0_i32_0 : i32, i32
  }
  func.func @transform_13(%arg0: i32) -> (i32, i32) {
    %c0_i32 = arith.constant 0 : i32
    %c0_i32_0 = arith.constant 0 : i32
    %c0_i32_1 = arith.constant 0 : i32
    return %c0_i32, %c0_i32_0 : i32, i32
  }
  func.func @transform_14(%arg0: i32) -> (i32, i32) {
    %c0_i32 = arith.constant 0 : i32
    %c0_i32_0 = arith.constant 0 : i32
    %c0_i32_1 = arith.constant 0 : i32
    return %c0_i32, %c0_i32_0 : i32, i32
  }
  func.func @transform_15(%arg0: i32) -> (i32, i32) {
    %c0_i32 = arith.constant 0 : i32
    %c0_i32_0 = arith.constant 0 : i32
    %c0_i32_1 = arith.constant 0 : i32
    return %c0_i32, %c0_i32_0 : i32, i32
  }
  func.func @transform_16(%arg0: i32) -> (i32, i32, i32) {
    %c0_i32 = arith.constant 0 : i32
    %c0_i32_0 = arith.constant 0 : i32
    %c0_i32_1 = arith.constant 0 : i32
    return %arg0, %c0_i32, %c0_i32_0 : i32, i32, i32
  }
}

</mosaic_0001>

<bundles_post_ra>
// kernel: stock_price_cnn_forward.1
= control target key start
LH: loop header
LB: loop body
LE: loop exit
PB: predicated region body
PF: predicated region fallthrough
CT: control target
= control target key end

     0   :  { %s11388_s0 = inlined_call_operand.vmem [shape: f32[2,252,5], index: 0, kind: input, shape index: {}]   ;;  %s11389_s1 = inlined_call_operand.vmem [shape: bf16[35,32], index: 1, kind: input, shape index: {}]   ;;  %s11390_s2 = inlined_call_operand.vmem [shape: f32[1,32], index: 2, kind: input, shape index: {}]   ;;  %s11391_s3 = inlined_call_operand.vmem [shape: f32[1,32], index: 3, kind: input, shape index: {}]   ;;  %s11392_s4 = inlined_call_operand.vmem [shape: bf16[160,64], index: 4, kind: input, shape index: {}]   ;;  %s11393_s5 = inlined_call_operand.vmem [shape: f32[1,64], index: 5, kind: input, shape index: {}]   ;;  %s11394_s6 = inlined_call_operand.vmem [shape: f32[1,64], index: 6, kind: input, shape index: {}]   ;;  %s11395_s7 = inlined_call_operand.vmem [shape: bf16[192,128], index: 7, kind: input, shape index: {}]   ;;  %s11396_s8 = inlined_call_operand.vmem [shape: f32[1,128], index: 8, kind: input, shape index: {}]   ;;  %s11397_s9 = inlined_call_operand.vmem [shape: f32[1,128], index: 9, kind: input, shape index: {}]   ;;  %s11398_s10 = inlined_call_operand.hbm [shape: bf16[3968,128], index: 10, kind: input, shape index: {}]   ;;  %s11399_s11 = inlined_call_operand.vmem [shape: f32[1,128], index: 11, kind: input, shape index: {}]   ;;  %s11400_s12 = inlined_call_operand.vmem [shape: bf16[128,64], index: 12, kind: input, shape index: {}]   ;;  %s11401_s13 = inlined_call_operand.vmem [shape: f32[1,64], index: 13, kind: input, shape index: {}]   ;;  %s11402_s14 = inlined_call_operand.vmem [shape: bf16[64,2], index: 14, kind: input, shape index: {}]   ;;  %s11403_s15 = inlined_call_operand.vmem [shape: f32[1,2], index: 15, kind: input, shape index: {}]   ;;  %s11404_s16 = inlined_call_operand.hbm [shape: f32[2,1,2], index: 16, kind: output, shape index: {}]  }
   0x1   :  { %11413 = sst [smem:[#allocation21_spill]] %s11388_s0 }
   0x2   :  { %21 = vsyncpa [#allocation11], 0 }
   0x3   :  { %22 = vsyncpa [#allocation12], 0 }
   0x4   :  { %24 = vsyncpa [#allocation12 + $0x1], 0  ;;  %s10088_s21 = smov 0   ;;  %s10090_s22 = smov 0  }
   0x5   :  { %s10092_s23 = smov 0   ;;  %s10094_s24 = smov 0  }
   0x6 LB: > { %11414 = sst [smem:[#allocation16_spill]] %s9971_s21  ;;  %s10109_s25 = sadd.s32 4294967295, %s9983_s24   ;;  %s9983_s24 = sphi %s10094_s24, %s11435_s24   ;;  %s9979_s23 = sphi %s10092_s23, %s11437_s23   ;;  %s9975_s22 = sphi %s10090_s22, %s11439_s22   ;;  %s9971_s21 = sphi %s10088_s21, %s11438_s21  }
   0x7   : > { %11415 = sst [smem:[#allocation17_spill]] %s9979_s23  ;;  %s7991_s26 = sadd.s32 4294967294, %s9983_s24  }
   0x8   : > { %s10113_s27 = sadd.s32 1, %s9983_s24   ;;  %s378_s28 = sadd.s32 1, %s9979_s23 }
   0x9   : > { %11416 = sst [smem:[#allocation18_spill]] %s10113_s27  ;;  %s375_s29 = ssub.s32 %s9983_s24, %s10113_s27 }
   0xa   : > { %p388_p0 = scmp.ne.s32.totalorder %s9979_s23, %s9975_s22  ;;  %p376_p1 = scmp.eq.s32.totalorder %s375_s29, 0 }
   0xb   : > { %p389_p2 = scmp.eq.s32.totalorder %s10109_s25, 1  ;;  %p394_p3 = scmp.ne.s32.totalorder %s9975_s22, %s9971_s21 }
   0xc   : > { %p395_p4 = scmp.eq.s32.totalorder %s7991_s26, 1  ;;  %p7992_p7 = scmp.ge.s32.totalorder %s9983_s24, 1 }
   0xd   : > { %s10124_s30 = scalar_select %p376_p1, %s9979_s23, %s378_s28  }
   0xe   : > { %p10126_p5 = por %p389_p2, %p388_p0  ;;  %p10130_p6 = por %p395_p4, %p394_p3 }
   0xf   : > { %11417 = sst [smem:[#allocation19_spill]] %s10124_s30  ;;  %p402_p8 = scmp.lt.s32.totalorder %s9983_s24, 3 }
  0x10   : > { %s11418_s0 = scalar_select %p10126_p5, 1, 0 }
  0x11   : > { %s11419_s17 = scalar_select %p10130_p6, 1, 0 }
  0x12   : > { %p11410_p9 = scmp.eq.s32.totalorder %s10109_s25, 0  ;;  %p10137_p10 = pnand %p7992_p7, %p402_p8 }
  0x13   : > { %11420 = sst [smem:[#allocation20_spill]] %s11419_s17  ;;  %s9985_s19 = smov [#allocation10]  }
  0x14   : > { %s11421_s18 = scalar_select %p10137_p10, 1, 0 }
  0x15   : > { %s441_s20 = sshll.u32 %s9985_s19, 4  ;;  %p9487_p11 = pneg %p10137_p10  ;;  %s442_s20 = int_to_ptr.vmem [resolvable:$true] %s441_s20 }
  0x16   : > { %s9889_s30 = scalar_lea.hbm %s11398_s10, 31744 }
  0x17   : > { %p10145_p12 = pnand %p11410_p9, %p9487_p11  ;;  %p9890_p13 = scmp.ne.s32.totalorder %s11398_s10, %s9889_s30 }
  0x18   : > { %p9896_p3 = scmp.lt.u32.totalorder %s9889_s30, %s11398_s10 }
  0x19   : > { %p9891_p0 = pneg %p10145_p12 }
  0x1b   : > { %p9892_p1 = pnand %p9891_p0, %p9890_p13 }
  0x1d   : > { %p9893_p2 = pneg %p9892_p1 }
  0x1f   : > { %p9898_p4 = pnand %p9896_p3, %p9893_p2 }
  0x21   : > { %9901 = shalt.err (!%p9898_p4)
}
  0x22   : > { %s9902_s21 = scalar_lea.vmem %s442_s20, 31744  ;;  %p9910_p9 = scmp.lt.s32.totalorder %s442_s20, %s442_s20 }
  0x23   : > { %p9903_p7 = scmp.ne.s32.totalorder %s442_s20, %s9902_s21  ;;  %p9911_p6 = scmp.lt.s32.totalorder %s9902_s21, %s9902_s21 }
  0x25   : > { %p9905_p8 = pnand %p9903_p7, %p9891_p0  ;;  %p9912_p5 = por %p9911_p6, %p9910_p9 }
  0x27   : > { %p9906_p11 = pneg %p9905_p8 }
  0x29   : > { %p9913_p10 = pnand %p9912_p5, %p9906_p11 }
  0x2b   : > { %9916 = shalt.err (!%p9913_p10)
}
  0x2c   : > { %s9986_s23 = smov 64   ;;  %s9987_s27 = smov 4  }
  0x2d   : > { %9490 = dma.hbm_to_vmem [thread:$0]  (!%p10145_p12), %s11398_s10, 31744, %s442_s20, [#allocation11], %s9986_s23, %s9986_s23, %s9987_s27  }
  0x2e   : > { %p11423_p13 = scmp.ne.s32.totalorder %s11421_s18, 0 }
  0x2f   : > { %p11424_p1 = scmp.eq.s32.totalorder (!%p11423_p13), %s10109_s25, 0 }
  0x30   : > { %480 = sbr.rel (%p11423_p13) target bundleno = 2257 (0x8d1), region = 84 }
  0x37   : > { %9962 = dma.done.wait (%p11424_p1), [#allocation11], 31744   ;;  %p11425_p0 = pmov %p11424_p1 }
  0x38   : > { %p529_p5 = scmp.lt.s32.totalorder %s10109_s25, 1  ;;  %vm535_vm0 = vcmask 34816   ;;  %v9988_v0 = vmov 0.0   ;;  %s11426_s20 = sld [smem:[#allocation21_spill]]  ;;  %vm570_vm1 = vcmask 39936   ;;  %vm602_vm2 = vcmask 35840  }
  0x39   : > { %9964 = vsyncadd (%p11425_p0), [#allocation11], 4294935552  ;;  %536 = vst.msk [vmem:[#allocation2] sm:$0x7] %vm535_vm0, %v9988_v0  ;;  %s9989_s19 = smov 5   ;;  %s9990_s23 = smov 10  }
  0x3a   : > { %s530_s21 = scalar_select %p529_p5, %s10109_s25, 1  ;;  %537 = vst.msk [vmem:[#allocation2 + $0xff] sm:$0x7] %vm535_vm0, %v9988_v0  ;;  %v9547_v59 = vld [vmem:[%s11389_s1] sm:$0xff]   ;;  %vm2526_vm3 = vcmask 1040384   ;;  %vm2527_vm4 = vcmask 1041408  }
  0x3b   : > { %s9991_s27 = smov 15   ;;  %s9992_s28 = smov 20   ;;  %9391 = vmatprep.subr.bf16.mxu0 %v9547_v59  ;;  %vm1021_vm5 = vcmask 76840   ;;  %vm1279_vm6 = vcmask 117840   ;;  %vm1537_vm7 = vcmask 158840   ;;  %vm1795_vm8 = vcmask 199840  }
  0x3c   : > { %s8690_s30 = sshll.u32 %s530_s21, 8  ;;  %9392 = vmatpush3.bf16.msra.mxu0 %v9547_v59  ;;  %s9995_s21 = smov 30   ;;  %vm2053_vm9 = vcmask 240840   ;;  %vm2311_vm10 = vcmask 281840   ;;  %vm2477_vm11 = vcmask 285696   ;;  %vm2804_vm12 = vcmask 257024  }
  0x3d   : > { %2805 = vst.msk [vmem:[#allocation4] sm:$0xf] %vm2804_vm12, %v9988_v0  ;;  %2806 = vst.msk [vmem:[#allocation4 + $0x100] sm:$0xf] %vm2804_vm12, %v9988_v0  ;;  %vm795_vm13 = vcmask 33792   ;;  %vm2807_vm14 = vcmask 261120  }
  0x3e   : > { %s10178_s26 = scalar_lea.vmem %s11426_s20, %s8690_s30  ;;  %s9993_s30 = smov 25   ;;  %vm1053_vm15 = vcmask 74792   ;;  %vm1311_vm0 = vcmask 115792  }
  0x3f   : > { %v539_v1 = vld [vmem:[%s10178_s26 + $0x8] sm:$0xff]  ;;  %v540_v2 = vld [vmem:[%s10178_s26 + $0x10] sm:$0xff]  ;;  %v538_v3 = vld [vmem:[%s10178_s26] sm:$0xff]  ;;  %s9999_s20 = smov 96   ;;  %s8687_s18 = sshll.u32 %s10109_s25, 4 }
  0x40   : > { %572 = vst.msk [vmem:[#allocation2 + $0xb] sm:$0xff] %vm570_vm1, %v539_v1  ;;  %573 = vst.msk [vmem:[#allocation2 + $0x13] sm:$0xff] %vm570_vm1, %v540_v2  ;;  %v541_v4 = vld [vmem:[%s10178_s26 + $0x18] sm:$0xff]  ;;  %v542_v5 = vld [vmem:[%s10178_s26 + $0x20] sm:$0xff]  ;;  %p11431_p9 = scmp.ne.s32.totalorder %s11418_s0, 0 }
  0x41   : > { %571 = vst.msk [vmem:[#allocation2 + $0x3] sm:$0xff] %vm570_vm1, %v538_v3  ;;  %v543_v6 = vld [vmem:[%s10178_s26 + $0x28] sm:$0xff]  ;;  %574 = vst.msk [vmem:[#allocation2 + $0x1b] sm:$0xff] %vm570_vm1, %v541_v4  ;;  %v544_v7 = vld [vmem:[%s10178_s26 + $0x30] sm:$0xff] }
  0x42   : > { %575 = vst.msk [vmem:[#allocation2 + $0x23] sm:$0xff] %vm570_vm1, %v542_v5  ;;  %576 = vst.msk [vmem:[#allocation2 + $0x2b] sm:$0xff] %vm570_vm1, %v543_v6  ;;  %v545_v8 = vld [vmem:[%s10178_s26 + $0x38] sm:$0xff]  ;;  %v546_v9 = vld [vmem:[%s10178_s26 + $0x40] sm:$0xff] }
  0x43   : > { %577 = vst.msk [vmem:[#allocation2 + $0x33] sm:$0xff] %vm570_vm1, %v544_v7  ;;  %578 = vst.msk [vmem:[#allocation2 + $0x3b] sm:$0xff] %vm570_vm1, %v545_v8  ;;  %v547_v10 = vld [vmem:[%s10178_s26 + $0x48] sm:$0xff]  ;;  %v548_v11 = vld [vmem:[%s10178_s26 + $0x50] sm:$0xff] }
  0x44   : > { %579 = vst.msk [vmem:[#allocation2 + $0x43] sm:$0xff] %vm570_vm1, %v546_v9  ;;  %v549_v12 = vld [vmem:[%s10178_s26 + $0x58] sm:$0xff]  ;;  %580 = vst.msk [vmem:[#allocation2 + $0x4b] sm:$0xff] %vm570_vm1, %v547_v10  ;;  %v550_v13 = vld [vmem:[%s10178_s26 + $0x60] sm:$0xff] }
  0x45   : > { %581 = vst.msk [vmem:[#allocation2 + $0x53] sm:$0xff] %vm570_vm1, %v548_v11  ;;  %582 = vst.msk [vmem:[#allocation2 + $0x5b] sm:$0xff] %vm570_vm1, %v549_v12  ;;  %v551_v52 = vld [vmem:[%s10178_s26 + $0x68] sm:$0xff]  ;;  %v552_v54 = vld [vmem:[%s10178_s26 + $0x70] sm:$0xff]  ;;  %v9994_v11 = vmov 65535  }
  0x46   : > { %583 = vst.msk [vmem:[#allocation2 + $0x63] sm:$0xff] %vm570_vm1, %v550_v13  ;;  %584 = vst.msk [vmem:[#allocation2 + $0x6b] sm:$0xff] %vm570_vm1, %v551_v52  ;;  %v553_v55 = vld [vmem:[%s10178_s26 + $0x78] sm:$0xff]  ;;  %v9548_v3 = vld [vmem:[%s11389_s1 + $0x8] sm:$0xff]   ;;  %v2528_v12 = vsel %vm2526_vm3, 4294967295, %v9994_v11 }
  0x47   : > { %v799_v14 = vld [vmem:[#allocation2 + $0x11] sm:$0xff]  ;;  %585 = vst.msk [vmem:[#allocation2 + $0x73] sm:$0xff] %vm570_vm1, %v552_v54  ;;  %586 = vst.msk [vmem:[#allocation2 + $0x7b] sm:$0xff] %vm570_vm1, %v553_v55  ;;  %9393 = vmatprep.subr.bf16.mxu0 %v9548_v3  ;;  %v9549_v10 = vld [vmem:[%s11389_s1 + $0x10] ss:$0 sps:$4 sm:$0x33]  }
  0x48   : > { %v797_v15 = vld [vmem:[#allocation2 + $0x1] sm:$0xff]  ;;  %v798_v16 = vld [vmem:[#allocation2 + $0x9] sm:$0xff]  ;;  %v8725_v17 = vpack.c.bf16 %v799_v14, %v799_v14  ;;  %v800_v19 = vld [vmem:[#allocation2 + $0x19] sm:$0xff]  ;;  %9394 = vmatpush3.bf16.msra.mxu0 %v9548_v3 }
  0x49   : > { %v8723_v18 = vpack.c.bf16 %v797_v15, %v797_v15  ;;  %v8726_v20 = vpack.c.bf16 %v800_v19, %v800_v19  ;;  %v8724_v21 = vpack.c.bf16 %v798_v16, %v798_v16  ;;  %v1056_v22 = vld [vmem:[#allocation2 + $0xa] sm:$0xff]  ;;  %v1055_v23 = vld [vmem:[#allocation2 + $0x2] sm:$0xff]  ;;  %v1058_v26 = vld [vmem:[#allocation2 + $0x1a] sm:$0xff]  ;;  %v2529_v15 = vsel %vm2527_vm4, %v2528_v12, 0 }
  0x4a   : > { %929 = vrot.lane.b32.xlu1 %v8725_v17, %s9989_s19  ;;  %v8756_v24 = vpack.c.bf16 %v1056_v22, %v1056_v22  ;;  %v8755_v25 = vpack.c.bf16 %v1055_v23, %v1055_v23  ;;  %v1057_v27 = vld [vmem:[#allocation2 + $0x12] sm:$0xff]  ;;  %v8758_v28 = vpack.c.bf16 %v1058_v26, %v1058_v26  ;;  %v1313_v31 = vld [vmem:[#allocation2 + $0x3] sm:$0xff]  ;;  %v1316_v34 = vld [vmem:[#allocation2 + $0x1b] sm:$0xff]  ;;  %vm2085_vm4 = vcmask 238792  }
  0x4b   : > { %925 = vrot.lane.b32.xlu0 %v8723_v18, %s9989_s19  ;;  %v8757_v29 = vpack.c.bf16 %v1057_v27, %v1057_v27  ;;  %v1314_v30 = vld [vmem:[#allocation2 + $0xb] sm:$0xff]  ;;  %v8787_v33 = vpack.c.bf16 %v1313_v31, %v1313_v31  ;;  %v1315_v35 = vld [vmem:[#allocation2 + $0x13] sm:$0xff]  ;;  %v8790_v36 = vpack.c.bf16 %v1316_v34, %v1316_v34  ;;  %v604_v39 = vld [vmem:[#allocation2] sm:$0xff]  ;;  %v2531_v18 = vand.u32 %v9549_v10, %v2529_v15 }
  0x4c   : > { %v8788_v32 = vpack.c.bf16 %v1314_v30, %v1314_v30  ;;  %v8789_v37 = vpack.c.bf16 %v1315_v35, %v1315_v35  ;;  %v606_v38 = vld [vmem:[#allocation2 + $0x10] sm:$0xff]  ;;  %v1571_v41 = vld [vmem:[#allocation2 + $0x4] sm:$0xff]  ;;  %v8691_v43 = vpack.c.bf16 %v604_v39, %v604_v39  ;;  %v607_v44 = vld [vmem:[#allocation2 + $0x18] sm:$0xff] }
  0x4d   : > { %v1572_v40 = vld [vmem:[#allocation2 + $0xc] sm:$0xff]  ;;  %v8693_v42 = vpack.c.bf16 %v606_v38, %v606_v38  ;;  %v8694_v45 = vpack.c.bf16 %v607_v44, %v607_v44  ;;  %v8819_v49 = vpack.c.bf16 %v1571_v41, %v1571_v41  ;;  %v1574_v50 = vld [vmem:[#allocation2 + $0x1c] sm:$0xff]  ;;  %v1573_v51 = vld [vmem:[#allocation2 + $0x14] sm:$0xff]  ;;  %9395 = vmatprep.subr.bf16.mxu0 %v2531_v18 }
  0x4e   : > { %931 = vrot.lane.b32.xlu1 %v8726_v20, %s9989_s19  ;;  %v605_v46 = vld [vmem:[#allocation2 + $0x8] sm:$0xff]  ;;  %764 = vst.msk [vmem:[#allocation3] sm:$0xf] %vm602_vm2, %v8691_v43  ;;  %v8820_v48 = vpack.c.bf16 %v1572_v40, %v1572_v40  ;;  %v8822_v56 = vpack.c.bf16 %v1574_v50, %v1574_v50  ;;  %v8821_v57 = vpack.c.bf16 %v1573_v51, %v1573_v51  ;;  %v1832_v60 = vld [vmem:[#allocation2 + $0x1d] sm:$0xff]  ;;  %v1831_v63 = vld [vmem:[#allocation2 + $0x15] sm:$0xff] }
  0x4f   : > { %927 = vrot.lane.b32.xlu0 %v8724_v21, %s9989_s19  ;;  %766 = vst.msk [vmem:[#allocation3 + $0x8] sm:$0xf] %vm602_vm2, %v8693_v42  ;;  %v8692_v47 = vpack.c.bf16 %v605_v46, %v605_v46  ;;  %767 = vst.msk [vmem:[#allocation3 + $0xc] sm:$0xf] %vm602_vm2, %v8694_v45  ;;  %v1830_v53 = vld [vmem:[#allocation2 + $0xd] sm:$0xff]  ;;  %v1829_v58 = vld [vmem:[#allocation2 + $0x5] sm:$0xff]  ;;  %v8854_v1 = vpack.c.bf16 %v1832_v60, %v1832_v60  ;;  %v8853_v2 = vpack.c.bf16 %v1831_v63, %v1831_v63 }
  0x50   : > { %v8852_v61 = vpack.c.bf16 %v1830_v53, %v1830_v53  ;;  %v8851_v62 = vpack.c.bf16 %v1829_v58, %v1829_v58  ;;  %v609_v4 = vld [vmem:[#allocation2 + $0x28] sm:$0xff]  ;;  %v608_v8 = vld [vmem:[#allocation2 + $0x20] sm:$0xff]  ;;  %v611_v19 = vld [vmem:[#allocation2 + $0x38] sm:$0xff]  ;;  %9396 = vmatpush3.bf16.msra.mxu0 %v2531_v18 }
  0x51   : > { %765 = vst.msk [vmem:[#allocation3 + $0x4] sm:$0xf] %vm602_vm2, %v8692_v47  ;;  %v2088_v5 = vld [vmem:[#allocation2 + $0xe] sm:$0xff]  ;;  %v2087_v6 = vld [vmem:[#allocation2 + $0x6] sm:$0xff]  ;;  %v8696_v7 = vpack.c.bf16 %v609_v4, %v609_v4  ;;  %v8695_v9 = vpack.c.bf16 %v608_v8, %v608_v8  ;;  %v2090_v14 = vld [vmem:[#allocation2 + $0x1e] sm:$0xff]  ;;  %v8698_v22 = vpack.c.bf16 %v611_v19, %v611_v19 }
  0x52   : > { %1185 = vrot.lane.b32.xlu1 %v8756_v24, %s9990_s23  ;;  %v554_v13 = vld [vmem:[%s10178_s26 + $0x80] sm:$0xff]  ;;  %v8884_v16 = vpack.c.bf16 %v2088_v5, %v2088_v5  ;;  %v8883_v17 = vpack.c.bf16 %v2087_v6, %v2087_v6  ;;  %v610_v20 = vld [vmem:[#allocation2 + $0x30] sm:$0xff]  ;;  %v8886_v26 = vpack.c.bf16 %v2090_v14, %v2090_v14  ;;  %v555_v40 = vld [vmem:[%s10178_s26 + $0x88] sm:$0xff] }
  0x53   : > { %1183 = vrot.lane.b32.xlu0 %v8755_v25, %s9990_s23  ;;  %769 = vst.msk [vmem:[#allocation3 + $0x14] sm:$0xf] %vm602_vm2, %v8696_v7  ;;  %768 = vst.msk [vmem:[#allocation3 + $0x10] sm:$0xf] %vm602_vm2, %v8695_v9  ;;  %v2089_v21 = vld [vmem:[#allocation2 + $0x16] sm:$0xff]  ;;  %v8697_v23 = vpack.c.bf16 %v610_v20, %v610_v20  ;;  %v802_v24 = vld [vmem:[#allocation2 + $0x29] sm:$0xff] }
  0x54   : > { %587 = vst.msk [vmem:[#allocation2 + $0x83] sm:$0xff] %vm570_vm1, %v554_v13  ;;  %v801_v25 = vld [vmem:[#allocation2 + $0x21] sm:$0xff]  ;;  %v8885_v27 = vpack.c.bf16 %v2089_v21, %v2089_v21  ;;  %v8728_v30 = vpack.c.bf16 %v802_v24, %v802_v24  ;;  %v1318_v41 = vld [vmem:[#allocation2 + $0x2b] sm:$0xff]  ;;  %588 = vst.msk [vmem:[#allocation2 + $0x8b] sm:$0xff] %vm570_vm1, %v555_v40 }
  0x55   : > { %771 = vst.msk [vmem:[#allocation3 + $0x1c] sm:$0xf] %vm602_vm2, %v8698_v22  ;;  %770 = vst.msk [vmem:[#allocation3 + $0x18] sm:$0xf] %vm602_vm2, %v8697_v23  ;;  %v8727_v31 = vpack.c.bf16 %v801_v25, %v801_v25  ;;  %v1317_v42 = vld [vmem:[#allocation2 + $0x23] sm:$0xff]  ;;  %v556_v45 = vld [vmem:[%s10178_s26 + $0x90] sm:$0xff] }
  0x56   : > { %1189 = vrot.lane.b32.xlu1 %v8758_v28, %s9990_s23  ;;  %v804_v28 = vld [vmem:[#allocation2 + $0x39] sm:$0xff]  ;;  %589 = vst.msk [vmem:[#allocation2 + $0x93] sm:$0xff] %vm570_vm1, %v556_v45  ;;  %v8791_v50 = vpack.c.bf16 %v1317_v42, %v1317_v42  ;;  %v1576_v51 = vld [vmem:[#allocation2 + $0x2c] sm:$0xff]  ;;  %v1575_v52 = vld [vmem:[#allocation2 + $0x24] sm:$0xff] }
  0x57   : > { %1187 = vrot.lane.b32.xlu0 %v8757_v29, %s9990_s23  ;;  %v803_v29 = vld [vmem:[#allocation2 + $0x31] sm:$0xff]  ;;  %v8730_v34 = vpack.c.bf16 %v804_v28, %v804_v28  ;;  %v1320_v46 = vld [vmem:[#allocation2 + $0x3b] sm:$0xff]  ;;  %v8823_v58 = vpack.c.bf16 %v1575_v52, %v1575_v52  ;;  %v1833_v60 = vld [vmem:[#allocation2 + $0x25] sm:$0xff] }
  0x58   : > { %v8729_v35 = vpack.c.bf16 %v803_v29, %v803_v29  ;;  %v1319_v47 = vld [vmem:[#allocation2 + $0x33] sm:$0xff]  ;;  %v8794_v53 = vpack.c.bf16 %v1320_v46, %v1320_v46  ;;  %v1578_v55 = vld [vmem:[#allocation2 + $0x3c] sm:$0xff]  ;;  %v8855_v3 = vpack.c.bf16 %v1833_v60, %v1833_v60  ;;  %v2091_v5 = vld [vmem:[#allocation2 + $0x26] sm:$0xff] }
  0x59   : > { %v8793_v54 = vpack.c.bf16 %v1319_v47, %v1319_v47  ;;  %v1834_v59 = vld [vmem:[#allocation2 + $0x2d] sm:$0xff]  ;;  %v1836_v63 = vld [vmem:[#allocation2 + $0x3d] sm:$0xff] }
  0x5a   : > { %1443 = vrot.lane.b32.xlu1 %v8788_v32, %s9991_s27  ;;  %v1060_v32 = vld [vmem:[#allocation2 + $0x2a] sm:$0xff]  ;;  %v8858_v6 = vpack.c.bf16 %v1836_v63, %v1836_v63  ;;  %v612_v9 = vld [vmem:[#allocation2 + $0x40] sm:$0xff]  ;;  %v2093_v14 = vld [vmem:[#allocation2 + $0x36] sm:$0xff] }
  0x5b   : > { %1441 = vrot.lane.b32.xlu0 %v8787_v33, %s9991_s27  ;;  %v1059_v33 = vld [vmem:[#allocation2 + $0x22] sm:$0xff]  ;;  %v8760_v38 = vpack.c.bf16 %v1060_v32, %v1060_v32  ;;  %v2092_v4 = vld [vmem:[#allocation2 + $0x2e] sm:$0xff]  ;;  %v8699_v11 = vpack.c.bf16 %v612_v9, %v612_v9  ;;  %v8889_v24 = vpack.c.bf16 %v2093_v14, %v2093_v14  ;;  %v808_v25 = vld [vmem:[#allocation2 + $0x59] sm:$0xff] }
  0x5c   : > { %v8759_v39 = vpack.c.bf16 %v1059_v33, %v1059_v33  ;;  %v613_v8 = vld [vmem:[#allocation2 + $0x48] sm:$0xff]  ;;  %v558_v12 = vld [vmem:[%s10178_s26 + $0xa0] sm:$0xff]  ;;  %v8888_v15 = vpack.c.bf16 %v2092_v4, %v2092_v4  ;;  %v614_v18 = vld [vmem:[#allocation2 + $0x50] sm:$0xff] }
  0x5d   : > { %v8700_v10 = vpack.c.bf16 %v613_v8, %v613_v8  ;;  %v2094_v13 = vld [vmem:[#allocation2 + $0x3e] sm:$0xff]  ;;  %772 = vst.msk [vmem:[#allocation3 + $0x20] sm:$0xf] %vm602_vm2, %v8699_v11  ;;  %v8701_v20 = vpack.c.bf16 %v614_v18, %v614_v18  ;;  %v806_v21 = vld [vmem:[#allocation2 + $0x49] sm:$0xff]  ;;  %v1839_v4 = vld [vmem:[#allocation2 + $0x55] sm:$0xff] }
  0x5e   : > { %1447 = vrot.lane.b32.xlu1 %v8790_v36, %s9991_s27  ;;  %v1062_v36 = vld [vmem:[#allocation2 + $0x3a] sm:$0xff]  ;;  %591 = vst.msk [vmem:[#allocation2 + $0xa3] sm:$0xff] %vm570_vm1, %v558_v12  ;;  %v8890_v23 = vpack.c.bf16 %v2094_v13, %v2094_v13  ;;  %v1064_v29 = vld [vmem:[#allocation2 + $0x4a] sm:$0xff]  ;;  %v8861_v12 = vpack.c.bf16 %v1839_v4, %v1839_v4 }
  0x5f   : > { %1445 = vrot.lane.b32.xlu0 %v8789_v37, %s9991_s27  ;;  %v1061_v37 = vld [vmem:[#allocation2 + $0x32] sm:$0xff]  ;;  %v8762_v43 = vpack.c.bf16 %v1062_v36, %v1062_v36  ;;  %773 = vst.msk [vmem:[#allocation3 + $0x24] sm:$0xf] %vm602_vm2, %v8700_v10  ;;  %v805_v22 = vld [vmem:[#allocation2 + $0x41] sm:$0xff]  ;;  %774 = vst.msk [vmem:[#allocation3 + $0x28] sm:$0xf] %vm602_vm2, %v8701_v20 }
  0x60   : > { %v8761_v44 = vpack.c.bf16 %v1061_v37, %v1061_v37  ;;  %v8731_v28 = vpack.c.bf16 %v805_v22, %v805_v22  ;;  %v1066_v33 = vld [vmem:[#allocation2 + $0x5a] sm:$0xff]  ;;  %v559_v37 = vld [vmem:[%s10178_s26 + $0xa8] sm:$0xff]  ;;  %v560_v42 = vld [vmem:[%s10178_s26 + $0xb0] sm:$0xff] }
  0x61   : > { %592 = vst.msk [vmem:[#allocation2 + $0xab] sm:$0xff] %vm570_vm1, %v559_v37  ;;  %v8766_v40 = vpack.c.bf16 %v1066_v33, %v1066_v33  ;;  %v561_v45 = vld [vmem:[%s10178_s26 + $0xb8] sm:$0xff]  ;;  %593 = vst.msk [vmem:[#allocation2 + $0xb3] sm:$0xff] %vm570_vm1, %v560_v42  ;;  %v1838_v60 = vld [vmem:[#allocation2 + $0x4d] sm:$0xff] }
  0x62   : > { %1701 = vrot.lane.b32.xlu1 %v8820_v48, %s9992_s28  ;;  %v557_v48 = vld [vmem:[%s10178_s26 + $0x98] sm:$0xff]  ;;  %594 = vst.msk [vmem:[#allocation2 + $0xbb] sm:$0xff] %vm570_vm1, %v561_v45  ;;  %v2096_v9 = vld [vmem:[#allocation2 + $0x4e] sm:$0xff]  ;;  %v2095_v10 = vld [vmem:[#allocation2 + $0x46] sm:$0xff] }
  0x63   : > { %1699 = vrot.lane.b32.xlu0 %v8819_v49, %s9992_s28  ;;  %v8792_v49 = vpack.c.bf16 %v1318_v41, %v1318_v41  ;;  %590 = vst.msk [vmem:[#allocation2 + $0x9b] sm:$0xff] %vm570_vm1, %v557_v48  ;;  %v1580_v48 = vld [vmem:[#allocation2 + $0x4c] sm:$0xff]  ;;  %v616_v14 = vld [vmem:[#allocation2 + $0x60] sm:$0xff]  ;;  %v8892_v22 = vpack.c.bf16 %v2096_v9, %v2096_v9 }
  0x64   : > { %v617_v13 = vld [vmem:[#allocation2 + $0x68] sm:$0xff]  ;;  %v2098_v20 = vld [vmem:[#allocation2 + $0x5e] sm:$0xff]  ;;  %v811_v37 = vld [vmem:[#allocation2 + $0x71] sm:$0xff] }
  0x65   : > { %v1068_v42 = vld [vmem:[#allocation2 + $0x6a] sm:$0xff]  ;;  %v8737_v45 = vpack.c.bf16 %v811_v37, %v811_v37  ;;  %v620_v37 = vld [vmem:[#allocation2 + $0x80] sm:$0xff] }
  0x66   : > { %1705 = vrot.lane.b32.xlu1 %v8822_v56, %s9992_s28  ;;  %v1577_v56 = vld [vmem:[#allocation2 + $0x34] sm:$0xff] }
  0x67   : > { %1703 = vrot.lane.b32.xlu0 %v8821_v57, %s9992_s28  ;;  %v8824_v57 = vpack.c.bf16 %v1576_v51, %v1576_v51 }
  0x6a   : > { %1959 = vrot.lane.b32.xlu1 %v8852_v61, %s9993_s30  ;;  %v8826_v61 = vpack.c.bf16 %v1578_v55, %v1578_v55  ;;  %v1581_v55 = vld [vmem:[#allocation2 + $0x54] sm:$0xff] }
  0x6b   : > { %1957 = vrot.lane.b32.xlu0 %v8851_v62, %s9993_s30  ;;  %v8825_v62 = vpack.c.bf16 %v1577_v56, %v1577_v56  ;;  %v8828_v56 = vpack.c.bf16 %v1580_v48, %v1580_v48  ;;  %v8829_v63 = vpack.c.bf16 %v1581_v55, %v1581_v55  ;;  %v1070_v48 = vld [vmem:[#allocation2 + $0x7a] sm:$0xff]  ;;  %v1326_v55 = vld [vmem:[#allocation2 + $0x6b] sm:$0xff] }
  0x6e   : > { %1963 = vrot.lane.b32.xlu1 %v8854_v1, %s9993_s30  ;;  %v1835_v1 = vld [vmem:[#allocation2 + $0x35] sm:$0xff] }
  0x6f   : > { %1961 = vrot.lane.b32.xlu0 %v8853_v2, %s9993_s30  ;;  %v8856_v2 = vpack.c.bf16 %v1834_v59, %v1834_v59  ;;  %v8857_v7 = vpack.c.bf16 %v1835_v1, %v1835_v1 }
  0x72   : > { %2217 = vrot.lane.b32.xlu1 %v8884_v16, %s9995_s21  ;;  %v8887_v16 = vpack.c.bf16 %v2091_v5, %v2091_v5  ;;  %v8860_v5 = vpack.c.bf16 %v1838_v60, %v1838_v60 }
  0x73   : > { %2215 = vrot.lane.b32.xlu0 %v8883_v17, %s9995_s21  ;;  %v615_v17 = vld [vmem:[#allocation2 + $0x58] sm:$0xff] }
  0x74   : > { %v8702_v19 = vpack.c.bf16 %v615_v17, %v615_v17 }
  0x76   : > { %2221 = vrot.lane.b32.xlu1 %v8886_v26, %s9995_s21  ;;  %775 = vst.msk [vmem:[#allocation3 + $0x2c] sm:$0xf] %vm602_vm2, %v8702_v19  ;;  %v807_v26 = vld [vmem:[#allocation2 + $0x51] sm:$0xff]  ;;  %v562_v19 = vld [vmem:[%s10178_s26 + $0xc0] sm:$0xff] }
  0x77   : > { %2219 = vrot.lane.b32.xlu0 %v8885_v27, %s9995_s21  ;;  %v8732_v27 = vpack.c.bf16 %v806_v21, %v806_v21  ;;  %v8733_v32 = vpack.c.bf16 %v807_v26, %v807_v26  ;;  %v2097_v21 = vld [vmem:[#allocation2 + $0x56] sm:$0xff]  ;;  %595 = vst.msk [vmem:[#allocation2 + $0xc3] sm:$0xff] %vm570_vm1, %v562_v19 }
  0x78   : > { %v8893_v33 = vpack.c.bf16 %v2097_v21, %v2097_v21  ;;  %v1841_v21 = vld [vmem:[#allocation2 + $0x65] sm:$0xff] }
  0x7a   : > { %935 = vrot.lane.b32.xlu1 %v8728_v30, %s9989_s19  ;;  %v1063_v30 = vld [vmem:[#allocation2 + $0x42] sm:$0xff] }
  0x7b   : > { %933 = vrot.lane.b32.xlu0 %v8727_v31, %s9989_s19  ;;  %v8734_v31 = vpack.c.bf16 %v808_v25, %v808_v25  ;;  %v8763_v36 = vpack.c.bf16 %v1063_v30, %v1063_v30  ;;  %v618_v25 = vld [vmem:[#allocation2 + $0x70] sm:$0xff] }
  0x7c   : > { %v810_v30 = vld [vmem:[#allocation2 + $0x69] sm:$0xff] }
  0x7e   : > { %939 = vrot.lane.b32.xlu1 %v8730_v34, %s9989_s19  ;;  %v1065_v34 = vld [vmem:[#allocation2 + $0x52] sm:$0xff] }
  0x7f   : > { %937 = vrot.lane.b32.xlu0 %v8729_v35, %s9989_s19  ;;  %v8764_v35 = vpack.c.bf16 %v1064_v29, %v1064_v29  ;;  %v8765_v41 = vpack.c.bf16 %v1065_v34, %v1065_v34 }
  0x82   : > { %1193 = vrot.lane.b32.xlu1 %v8760_v38, %s9990_s23  ;;  %v1322_v38 = vld [vmem:[#allocation2 + $0x4b] sm:$0xff] }
  0x83   : > { %1191 = vrot.lane.b32.xlu0 %v8759_v39, %s9990_s23  ;;  %v1321_v39 = vld [vmem:[#allocation2 + $0x43] sm:$0xff]  ;;  %v8796_v46 = vpack.c.bf16 %v1322_v38, %v1322_v38  ;;  %v8736_v38 = vpack.c.bf16 %v810_v30, %v810_v30 }
  0x84   : > { %v8795_v47 = vpack.c.bf16 %v1321_v39, %v1321_v39 }
  0x86   : > { %1197 = vrot.lane.b32.xlu1 %v8762_v43, %s9990_s23  ;;  %v1324_v43 = vld [vmem:[#allocation2 + $0x5b] sm:$0xff] }
  0x87   : > { %1195 = vrot.lane.b32.xlu0 %v8761_v44, %s9990_s23  ;;  %v1323_v44 = vld [vmem:[#allocation2 + $0x53] sm:$0xff] }
  0x88   : > { %v8797_v51 = vpack.c.bf16 %v1323_v44, %v1323_v44 }
  0x8a   : > { %1451 = vrot.lane.b32.xlu1 %v8792_v49, %s9991_s27  ;;  %v1579_v49 = vld [vmem:[#allocation2 + $0x44] sm:$0xff] }
  0x8b   : > { %1449 = vrot.lane.b32.xlu0 %v8791_v50, %s9991_s27  ;;  %v8798_v50 = vpack.c.bf16 %v1324_v43, %v1324_v43  ;;  %v1067_v43 = vld [vmem:[#allocation2 + $0x62] sm:$0xff] }
  0x8e   : > { %1455 = vrot.lane.b32.xlu1 %v8794_v53, %s9991_s27 }
  0x8f   : > { %1453 = vrot.lane.b32.xlu0 %v8793_v54, %s9991_s27  ;;  %v1582_v54 = vld [vmem:[#allocation2 + $0x5c] sm:$0xff] }
  0x92   : > { %1709 = vrot.lane.b32.xlu1 %v8824_v57, %s9992_s28  ;;  %v8827_v57 = vpack.c.bf16 %v1579_v49, %v1579_v49  ;;  %v1069_v49 = vld [vmem:[#allocation2 + $0x72] sm:$0xff] }
  0x93   : > { %1707 = vrot.lane.b32.xlu0 %v8823_v58, %s9992_s28 }
  0x96   : > { %1713 = vrot.lane.b32.xlu1 %v8826_v61, %s9992_s28  ;;  %v1837_v61 = vld [vmem:[#allocation2 + $0x45] sm:$0xff] }
  0x97   : > { %1711 = vrot.lane.b32.xlu0 %v8825_v62, %s9992_s28  ;;  %v8830_v62 = vpack.c.bf16 %v1582_v54, %v1582_v54  ;;  %v563_v54 = vld [vmem:[%s10178_s26 + $0xc8] sm:$0xff] }
  0x98   : > { %596 = vst.msk [vmem:[#allocation2 + $0xcb] sm:$0xff] %vm570_vm1, %v563_v54  ;;  %v813_v54 = vld [vmem:[#allocation2 + $0x81] sm:$0xff] }
  0x9a   : > { %1967 = vrot.lane.b32.xlu1 %v8856_v2, %s9993_s30 }
  0x9b   : > { %1965 = vrot.lane.b32.xlu0 %v8855_v3, %s9993_s30  ;;  %v1840_v3 = vld [vmem:[#allocation2 + $0x5d] sm:$0xff] }
  0x9c   : > { %v8862_v11 = vpack.c.bf16 %v1840_v3, %v1840_v3 }
  0x9e   : > { %1971 = vrot.lane.b32.xlu1 %v8858_v6, %s9993_s30  ;;  %v8859_v6 = vpack.c.bf16 %v1837_v61, %v1837_v61  ;;  %v564_v61 = vld [vmem:[%s10178_s26 + $0xd0] sm:$0xff] }
  0x9f   : > { %1969 = vrot.lane.b32.xlu0 %v8857_v7, %s9993_s30  ;;  %597 = vst.msk [vmem:[#allocation2 + $0xd3] sm:$0xff] %vm570_vm1, %v564_v61 }
  0xa2   : > { %2225 = vrot.lane.b32.xlu1 %v8888_v15, %s9995_s21  ;;  %v8704_v15 = vpack.c.bf16 %v617_v13, %v617_v13  ;;  %v1586_v13 = vld [vmem:[#allocation2 + $0x7c] sm:$0xff] }
  0xa3   : > { %2223 = vrot.lane.b32.xlu0 %v8887_v16, %s9995_s21  ;;  %v8703_v16 = vpack.c.bf16 %v616_v14, %v616_v14  ;;  %v1585_v14 = vld [vmem:[#allocation2 + $0x74] sm:$0xff] }
  0xa4   : > { %777 = vst.msk [vmem:[#allocation3 + $0x34] sm:$0xf] %vm602_vm2, %v8704_v15 }
  0xa5   : > { %776 = vst.msk [vmem:[#allocation3 + $0x30] sm:$0xf] %vm602_vm2, %v8703_v16 }
  0xa6   : > { %2229 = vrot.lane.b32.xlu1 %v8890_v23, %s9995_s21  ;;  %v8891_v23 = vpack.c.bf16 %v2095_v10, %v2095_v10 }
  0xa7   : > { %2227 = vrot.lane.b32.xlu0 %v8889_v24, %s9995_s21  ;;  %v619_v24 = vld [vmem:[#allocation2 + $0x78] sm:$0xff] }
  0xa8   : > { %v8706_v26 = vpack.c.bf16 %v619_v24, %v619_v24 }
  0xaa   : > { %943 = vrot.lane.b32.xlu1 %v8732_v27, %s9989_s19  ;;  %v8705_v27 = vpack.c.bf16 %v618_v25, %v618_v25  ;;  %779 = vst.msk [vmem:[#allocation3 + $0x3c] sm:$0xf] %vm602_vm2, %v8706_v26  ;;  %v1844_v26 = vld [vmem:[#allocation2 + $0x7d] sm:$0xff] }
  0xab   : > { %941 = vrot.lane.b32.xlu0 %v8731_v28, %s9989_s19 }
  0xac   : > { %778 = vst.msk [vmem:[#allocation3 + $0x38] sm:$0xf] %vm602_vm2, %v8705_v27  ;;  %v1843_v27 = vld [vmem:[#allocation2 + $0x75] sm:$0xff] }
  0xae   : > { %947 = vrot.lane.b32.xlu1 %v8734_v31, %s9989_s19  ;;  %v809_v31 = vld [vmem:[#allocation2 + $0x61] sm:$0xff] }
  0xaf   : > { %945 = vrot.lane.b32.xlu0 %v8733_v32, %s9989_s19  ;;  %v8894_v32 = vpack.c.bf16 %v2098_v20, %v2098_v20  ;;  %v8735_v39 = vpack.c.bf16 %v809_v31, %v809_v31  ;;  %v1842_v20 = vld [vmem:[#allocation2 + $0x6d] sm:$0xff] }
  0xb2   : > { %1201 = vrot.lane.b32.xlu1 %v8764_v35, %s9990_s23 }
  0xb3   : > { %1199 = vrot.lane.b32.xlu0 %v8763_v36, %s9990_s23  ;;  %v812_v36 = vld [vmem:[#allocation2 + $0x79] sm:$0xff] }
  0xb4   : > { %v8738_v44 = vpack.c.bf16 %v812_v36, %v812_v36  ;;  %v621_v36 = vld [vmem:[#allocation2 + $0x88] sm:$0xff] }
  0xb6   : > { %1205 = vrot.lane.b32.xlu1 %v8766_v40, %s9990_s23 }
  0xb7   : > { %1203 = vrot.lane.b32.xlu0 %v8765_v41, %s9990_s23 }
  0xba   : > { %1459 = vrot.lane.b32.xlu1 %v8796_v46, %s9991_s27 }
  0xbb   : > { %1457 = vrot.lane.b32.xlu0 %v8795_v47, %s9991_s27 }
  0xbc   : > { %v930_v52 = vpop.permute.xlu1 %929 }
  0xbd   : > { %v926_v53 = vpop.permute.xlu0 %925  ;;  %1024 = vst.msk [vmem:[#allocation3 + $0x8] sm:$0xf] %vm1021_vm5, %v930_v52 }
  0xbe   : > { %1022 = vst.msk [vmem:[#allocation3] sm:$0xf] %vm1021_vm5, %v926_v53  ;;  %1463 = vrot.lane.b32.xlu1 %v8798_v50, %s9991_s27  ;;  %v8768_v50 = vpack.c.bf16 %v1068_v42, %v1068_v42  ;;  %v566_v42 = vld [vmem:[%s10178_s26 + $0xe0] sm:$0xff] }
  0xbf   : > { %1461 = vrot.lane.b32.xlu0 %v8797_v51, %s9991_s27  ;;  %v8767_v51 = vpack.c.bf16 %v1067_v43, %v1067_v43  ;;  %v2102_v43 = vld [vmem:[#allocation2 + $0x7e] sm:$0xff]  ;;  %599 = vst.msk [vmem:[#allocation2 + $0xe3] sm:$0xff] %vm570_vm1, %v566_v42 }
  0xc0   : > { %v932_v58 = vpop.permute.xlu1 %931 }
  0xc1   : > { %v928_v59 = vpop.permute.xlu0 %927  ;;  %1025 = vst.msk [vmem:[#allocation3 + $0xc] sm:$0xf] %vm1021_vm5, %v932_v58  ;;  %v8769_v58 = vpack.c.bf16 %v1069_v49, %v1069_v49 }
  0xc2   : > { %1023 = vst.msk [vmem:[#allocation3 + $0x4] sm:$0xf] %vm1021_vm5, %v928_v59  ;;  %1717 = vrot.lane.b32.xlu1 %v8828_v56, %s9992_s28  ;;  %v1325_v56 = vld [vmem:[#allocation2 + $0x63] sm:$0xff] }
  0xc3   : > { %1715 = vrot.lane.b32.xlu0 %v8827_v57, %s9992_s28  ;;  %v8770_v57 = vpack.c.bf16 %v1070_v48, %v1070_v48  ;;  %v8799_v3 = vpack.c.bf16 %v1325_v56, %v1325_v56  ;;  %v622_v48 = vld [vmem:[#allocation2 + $0x90] sm:$0xff] }
  0xc4   : > { %v1186_v1 = vpop.permute.xlu1 %1185 }
  0xc5   : > { %v1184_v2 = vpop.permute.xlu0 %1183  ;;  %1281 = vst.msk [vmem:[#allocation3 + $0x4] sm:$0xf] %vm1279_vm6, %v1186_v1  ;;  %v565_v1 = vld [vmem:[%s10178_s26 + $0xd8] sm:$0xff] }
  0xc6   : > { %1280 = vst.msk [vmem:[#allocation3] sm:$0xf] %vm1279_vm6, %v1184_v2  ;;  %1721 = vrot.lane.b32.xlu1 %v8830_v62, %s9992_s28  ;;  %v1328_v62 = vld [vmem:[#allocation2 + $0x7b] sm:$0xff]  ;;  %v8800_v2 = vpack.c.bf16 %v1326_v55, %v1326_v55  ;;  %v8898_v55 = vpack.c.bf16 %v2102_v43, %v2102_v43  ;;  %v1846_v43 = vld [vmem:[#allocation2 + $0x8d] sm:$0xff] }
  0xc7   : > { %1719 = vrot.lane.b32.xlu0 %v8829_v63, %s9992_s28  ;;  %v1327_v63 = vld [vmem:[#allocation2 + $0x73] sm:$0xff]  ;;  %598 = vst.msk [vmem:[#allocation2 + $0xdb] sm:$0xff] %vm570_vm1, %v565_v1 }
  0xc8   : > { %v1190_v7 = vpop.permute.xlu1 %1189  ;;  %v8801_v9 = vpack.c.bf16 %v1327_v63, %v1327_v63 }
  0xc9   : > { %v1188_v8 = vpop.permute.xlu0 %1187  ;;  %1283 = vst.msk [vmem:[#allocation3 + $0xc] sm:$0xf] %vm1279_vm6, %v1190_v7  ;;  %v1583_v7 = vld [vmem:[#allocation2 + $0x64] sm:$0xff] }
  0xca   : > { %1282 = vst.msk [vmem:[#allocation3 + $0x8] sm:$0xf] %vm1279_vm6, %v1188_v8  ;;  %1975 = vrot.lane.b32.xlu1 %v8860_v5, %s9993_s30  ;;  %v8802_v8 = vpack.c.bf16 %v1328_v62, %v1328_v62  ;;  %v8831_v16 = vpack.c.bf16 %v1583_v7, %v1583_v7  ;;  %v8739_v62 = vpack.c.bf16 %v813_v54, %v813_v54 }
  0xcb   : > { %1973 = vrot.lane.b32.xlu0 %v8859_v6, %s9993_s30  ;;  %v1584_v6 = vld [vmem:[#allocation2 + $0x6c] sm:$0xff] }
  0xcc   : > { %v1444_v17 = vpop.permute.xlu1 %1443  ;;  %v8832_v15 = vpack.c.bf16 %v1584_v6, %v1584_v6 }
  0xcd   : > { %v1442_v18 = vpop.permute.xlu0 %1441  ;;  %1539 = vst.msk [vmem:[#allocation3 + $0x4] sm:$0xf] %vm1537_vm7, %v1444_v17 }
  0xce   : > { %1538 = vst.msk [vmem:[#allocation3] sm:$0xf] %vm1537_vm7, %v1442_v18  ;;  %1979 = vrot.lane.b32.xlu1 %v8862_v11, %s9993_s30 }
  0xcf   : > { %1977 = vrot.lane.b32.xlu0 %v8861_v12, %s9993_s30 }
  0xd0   : > { %v1448_v28 = vpop.permute.xlu1 %1447 }
  0xd1   : > { %v1446_v29 = vpop.permute.xlu0 %1445  ;;  %1541 = vst.msk [vmem:[#allocation3 + $0xc] sm:$0xf] %vm1537_vm7, %v1448_v28  ;;  %v8864_v28 = vpack.c.bf16 %v1842_v20, %v1842_v20 }
  0xd2   : > { %1540 = vst.msk [vmem:[#allocation3 + $0x8] sm:$0xf] %vm1537_vm7, %v1446_v29  ;;  %2233 = vrot.lane.b32.xlu1 %v8892_v22, %s9995_s21  ;;  %v8834_v22 = vpack.c.bf16 %v1586_v13, %v1586_v13  ;;  %v8863_v29 = vpack.c.bf16 %v1841_v21, %v1841_v21  ;;  %v568_v21 = vld [vmem:[%s10178_s26 + $0xf0] sm:$0xff] }
  0xd3   : > { %2231 = vrot.lane.b32.xlu0 %v8891_v23, %s9995_s21  ;;  %v8833_v23 = vpack.c.bf16 %v1585_v14, %v1585_v14  ;;  %v567_v14 = vld [vmem:[%s10178_s26 + $0xe8] sm:$0xff]  ;;  %601 = vst.msk [vmem:[#allocation2 + $0xf3] sm:$0xff] %vm570_vm1, %v568_v21 }
  0xd4   : > { %v1702_v34 = vpop.permute.xlu1 %1701  ;;  %600 = vst.msk [vmem:[#allocation2 + $0xeb] sm:$0xff] %vm570_vm1, %v567_v14  ;;  %vm1569_vm1 = vcmask 156792  }
  0xd5   : > { %v1700_v35 = vpop.permute.xlu0 %1699  ;;  %1797 = vst.msk [vmem:[#allocation3 + $0x4] sm:$0xf] %vm1795_vm8, %v1702_v34  ;;  %v8866_v34 = vpack.c.bf16 %v1844_v26, %v1844_v26 }
  0xd6   : > { %1796 = vst.msk [vmem:[#allocation3] sm:$0xf] %vm1795_vm8, %v1700_v35  ;;  %2237 = vrot.lane.b32.xlu1 %v8894_v32, %s9995_s21  ;;  %v2100_v32 = vld [vmem:[#allocation2 + $0x6e] sm:$0xff]  ;;  %v8865_v35 = vpack.c.bf16 %v1843_v27, %v1843_v27 }
  0xd7   : > { %2235 = vrot.lane.b32.xlu0 %v8893_v33, %s9995_s21  ;;  %v2099_v33 = vld [vmem:[#allocation2 + $0x66] sm:$0xff] }
  0xd8   : > { %v1706_v40 = vpop.permute.xlu1 %1705 }
  0xd9   : > { %v1704_v41 = vpop.permute.xlu0 %1703  ;;  %1799 = vst.msk [vmem:[#allocation3 + $0xc] sm:$0xf] %vm1795_vm8, %v1706_v40 }
  0xda   : > { %1798 = vst.msk [vmem:[#allocation3 + $0x8] sm:$0xf] %vm1795_vm8, %v1704_v41  ;;  %951 = vrot.lane.b32.xlu1 %v8736_v38, %s9989_s19  ;;  %v8708_v38 = vpack.c.bf16 %v621_v36, %v621_v36  ;;  %v1590_v36 = vld [vmem:[#allocation2 + $0x9c] sm:$0xff] }
  0xdb   : > { %949 = vrot.lane.b32.xlu0 %v8735_v39, %s9989_s19  ;;  %v8707_v39 = vpack.c.bf16 %v620_v37, %v620_v37  ;;  %v1589_v37 = vld [vmem:[#allocation2 + $0x94] sm:$0xff] }
  0xdc   : > { %v1960_v46 = vpop.permute.xlu1 %1959  ;;  %781 = vst.msk [vmem:[#allocation3 + $0x44] sm:$0xf] %vm602_vm2, %v8708_v38 }
  0xdd   : > { %v1958_v47 = vpop.permute.xlu0 %1957  ;;  %2055 = vst.msk [vmem:[#allocation3 + $0x4] sm:$0xf] %vm2053_vm9, %v1960_v46  ;;  %v8895_v46 = vpack.c.bf16 %v2099_v33, %v2099_v33 }
  0xde   : > { %2054 = vst.msk [vmem:[#allocation3] sm:$0xf] %vm2053_vm9, %v1958_v47  ;;  %955 = vrot.lane.b32.xlu1 %v8738_v44, %s9989_s19  ;;  %v2101_v44 = vld [vmem:[#allocation2 + $0x76] sm:$0xff] }
  0xdf   : > { %953 = vrot.lane.b32.xlu0 %v8737_v45, %s9989_s19  ;;  %780 = vst.msk [vmem:[#allocation3 + $0x40] sm:$0xf] %vm602_vm2, %v8707_v39  ;;  %v8896_v45 = vpack.c.bf16 %v2100_v32, %v2100_v32  ;;  %v623_v47 = vld [vmem:[#allocation2 + $0x98] sm:$0xff]  ;;  %v8897_v56 = vpack.c.bf16 %v2101_v44, %v2101_v44  ;;  %v1845_v44 = vld [vmem:[#allocation2 + $0x85] sm:$0xff] }
  0xe0   : > { %v1964_v52 = vpop.permute.xlu1 %1963  ;;  %v8710_v49 = vpack.c.bf16 %v623_v47, %v623_v47 }
  0xe1   : > { %v1962_v53 = vpop.permute.xlu0 %1961  ;;  %2057 = vst.msk [vmem:[#allocation3 + $0xc] sm:$0xf] %vm2053_vm9, %v1964_v52 }
  0xe2   : > { %2056 = vst.msk [vmem:[#allocation3 + $0x8] sm:$0xf] %vm2053_vm9, %v1962_v53  ;;  %1209 = vrot.lane.b32.xlu1 %v8768_v50, %s9990_s23  ;;  %v8709_v50 = vpack.c.bf16 %v622_v48, %v622_v48  ;;  %v814_v53 = vld [vmem:[#allocation2 + $0x89] sm:$0xff] }
  0xe3   : > { %1207 = vrot.lane.b32.xlu0 %v8767_v51, %s9990_s23  ;;  %783 = vst.msk [vmem:[#allocation3 + $0x4c] sm:$0xf] %vm602_vm2, %v8710_v49  ;;  %v8740_v61 = vpack.c.bf16 %v814_v53, %v814_v53  ;;  %v1848_v49 = vld [vmem:[#allocation2 + $0x9d] sm:$0xff] }
  0xe4   : > { %v2218_v59 = vpop.permute.xlu1 %2217  ;;  %782 = vst.msk [vmem:[#allocation3 + $0x48] sm:$0xf] %vm602_vm2, %v8709_v50  ;;  %v1847_v50 = vld [vmem:[#allocation2 + $0x95] sm:$0xff] }
  0xe5   : > { %v2216_v60 = vpop.permute.xlu0 %2215  ;;  %2313 = vst.msk [vmem:[#allocation3 + $0x4] sm:$0xf] %vm2311_vm10, %v2218_v59  ;;  %v816_v59 = vld [vmem:[#allocation2 + $0x99] sm:$0xff] }
  0xe6   : > { %2312 = vst.msk [vmem:[#allocation3] sm:$0xf] %vm2311_vm10, %v2216_v60  ;;  %1213 = vrot.lane.b32.xlu1 %v8770_v57, %s9990_s23  ;;  %v815_v60 = vld [vmem:[#allocation2 + $0x91] sm:$0xff] }
  0xe7   : > { %1211 = vrot.lane.b32.xlu0 %v8769_v58, %s9990_s23 }
  0xe8   : > { %v2222_v4 = vpop.permute.xlu1 %2221 }
  0xe9   : > { %v2220_v5 = vpop.permute.xlu0 %2219  ;;  %2315 = vst.msk [vmem:[#allocation3 + $0xc] sm:$0xf] %vm2311_vm10, %v2222_v4  ;;  %v8742_v4 = vpack.c.bf16 %v816_v59, %v816_v59  ;;  %v625_v59 = vld [vmem:[#allocation2 + $0xa8] sm:$0xff] }
  0xea   : > { %2314 = vst.msk [vmem:[#allocation3 + $0x8] sm:$0xf] %vm2311_vm10, %v2220_v5  ;;  %1467 = vrot.lane.b32.xlu1 %v8800_v2, %s9991_s27  ;;  %v1072_v2 = vld [vmem:[#allocation2 + $0x8a] sm:$0xff]  ;;  %v8741_v5 = vpack.c.bf16 %v815_v60, %v815_v60  ;;  %v624_v60 = vld [vmem:[#allocation2 + $0xa0] sm:$0xff] }
  0xeb   : > { %1465 = vrot.lane.b32.xlu0 %v8799_v3, %s9991_s27  ;;  %v1071_v3 = vld [vmem:[#allocation2 + $0x82] sm:$0xff] }
  0xec   : > { %v936_v10 = vpop.permute.xlu1 %935 }
  0xed   : > { %v934_v11 = vpop.permute.xlu0 %933  ;;  %v9550_v12 = vld [vmem:[#allocation3] sm:$0xff]   ;;  %1027 = vst.msk [vmem:[#allocation3 + $0x14] sm:$0xf] %vm1021_vm5, %v936_v10  ;;  %v8772_v10 = vpack.c.bf16 %v1072_v2, %v1072_v2  ;;  %v2106_v2 = vld [vmem:[#allocation2 + $0x9e] sm:$0xff] }
  0xee   : > { %1026 = vst.msk [vmem:[#allocation3 + $0x10] sm:$0xf] %vm1021_vm5, %v934_v11  ;;  %1471 = vrot.lane.b32.xlu1 %v8802_v8, %s9991_s27  ;;  %9397 = vmatprep.mubr.msk.bf16.mxu0 %vm2477_vm11, %v9550_v12  ;;  %v1074_v8 = vld [vmem:[#allocation2 + $0x9a] sm:$0xff]  ;;  %v8771_v11 = vpack.c.bf16 %v1071_v3, %v1071_v3  ;;  %v8902_v14 = vpack.c.bf16 %v2106_v2, %v2106_v2  ;;  %v1849_v2 = vld [vmem:[#allocation2 + $0xa5] sm:$0xff] }
  0xef   : > { %1469 = vrot.lane.b32.xlu0 %v8801_v9, %s9991_s27  ;;  %v1073_v9 = vld [vmem:[#allocation2 + $0x92] sm:$0xff] }
  0xf0   : > { %v940_v17 = vpop.permute.xlu1 %939  ;;  %v2105_v3 = vld [vmem:[#allocation2 + $0x96] sm:$0xff] }
  0xf1   : > { %v938_v18 = vpop.permute.xlu0 %937  ;;  %v9551_v19 = vld [vmem:[#allocation3 + $0x8] sm:$0xff]   ;;  %1029 = vst.msk [vmem:[#allocation3 + $0x1c] sm:$0xf] %vm1021_vm5, %v940_v17  ;;  %v8774_v17 = vpack.c.bf16 %v1074_v8, %v1074_v8 }
  0xf2   : > { %1028 = vst.msk [vmem:[#allocation3 + $0x18] sm:$0xf] %vm1021_vm5, %v938_v18  ;;  %1725 = vrot.lane.b32.xlu1 %v8832_v15, %s9992_s28  ;;  %9398 = vmatmul.mubr.msk.bf16.vlgmr.msra.gmra.mrb[0].mxu0 %vm2477_vm11, %v9551_v19  ;;  %v1330_v15 = vld [vmem:[#allocation2 + $0x8b] sm:$0xff]  ;;  %v8773_v18 = vpack.c.bf16 %v1073_v9, %v1073_v9 }
  0xf3   : > { %1723 = vrot.lane.b32.xlu0 %v8831_v16, %s9992_s28  ;;  %v1329_v16 = vld [vmem:[#allocation2 + $0x83] sm:$0xff] }
  0xf4   : > { %v1194_v24 = vpop.permute.xlu1 %1193  ;;  %v8803_v26 = vpack.c.bf16 %v1329_v16, %v1329_v16 }
  0xf5   : > { %v1192_v25 = vpop.permute.xlu0 %1191  ;;  %1285 = vst.msk [vmem:[#allocation3 + $0x14] sm:$0xf] %vm1279_vm6, %v1194_v24  ;;  %v569_v24 = vld [vmem:[%s10178_s26 + $0xf8] sm:$0xf] }
  0xf6   : > { %1284 = vst.msk [vmem:[#allocation3 + $0x10] sm:$0xf] %vm1279_vm6, %v1192_v25  ;;  %1729 = vrot.lane.b32.xlu1 %v8834_v22, %s9992_s28  ;;  %v1332_v22 = vld [vmem:[#allocation2 + $0x9b] sm:$0xff]  ;;  %v8804_v25 = vpack.c.bf16 %v1330_v15, %v1330_v15  ;;  %v8901_v15 = vpack.c.bf16 %v2105_v3, %v2105_v3 }
  0xf7   : > { %1727 = vrot.lane.b32.xlu0 %v8833_v23, %s9992_s28  ;;  %v1331_v23 = vld [vmem:[#allocation2 + $0x93] sm:$0xff]  ;;  %603 = vst.msk [vmem:[#allocation2 + $0xfb] sm:$0xf] %vm602_vm2, %v569_v24  ;;  %v1076_v24 = vld [vmem:[#allocation2 + $0xaa] sm:$0xff] }
  0xf8   : > { %v1198_v30 = vpop.permute.xlu1 %1197  ;;  %v8805_v32 = vpack.c.bf16 %v1331_v23, %v1331_v23 }
  0xf9   : > { %v1196_v31 = vpop.permute.xlu0 %1195  ;;  %1287 = vst.msk [vmem:[#allocation3 + $0x1c] sm:$0xf] %vm1279_vm6, %v1198_v30  ;;  %v1587_v30 = vld [vmem:[#allocation2 + $0x84] sm:$0xff] }
  0xfa   : > { %1286 = vst.msk [vmem:[#allocation3 + $0x18] sm:$0xf] %vm1279_vm6, %v1196_v31  ;;  %1983 = vrot.lane.b32.xlu1 %v8864_v28, %s9993_s30  ;;  %v8806_v31 = vpack.c.bf16 %v1332_v22, %v1332_v22  ;;  %v8835_v39 = vpack.c.bf16 %v1587_v30, %v1587_v30  ;;  %v1078_v30 = vld [vmem:[#allocation2 + $0xba] sm:$0xff] }
  0xfb   : > { %1981 = vrot.lane.b32.xlu0 %v8863_v29, %s9993_s30  ;;  %v1588_v29 = vld [vmem:[#allocation2 + $0x8c] sm:$0xff] }
  0xfc   : > { %v1452_v40 = vpop.permute.xlu1 %1451  ;;  %v8836_v38 = vpack.c.bf16 %v1588_v29, %v1588_v29 }
  0xfd   : > { %v1450_v41 = vpop.permute.xlu0 %1449  ;;  %1543 = vst.msk [vmem:[#allocation3 + $0x14] sm:$0xf] %vm1537_vm7, %v1452_v40 }
  0xfe   : > { %1542 = vst.msk [vmem:[#allocation3 + $0x10] sm:$0xf] %vm1537_vm7, %v1450_v41  ;;  %1987 = vrot.lane.b32.xlu1 %v8866_v34, %s9993_s30 }
  0xff   : > { %1985 = vrot.lane.b32.xlu0 %v8865_v35, %s9993_s30 }
 0x100   : > { %v1456_v51 = vpop.permute.xlu1 %1455 }
 0x101   : > { %v1454_v52 = vpop.permute.xlu0 %1453  ;;  %1545 = vst.msk [vmem:[#allocation3 + $0x1c] sm:$0xf] %vm1537_vm7, %v1456_v51  ;;  %v8868_v51 = vpack.c.bf16 %v1846_v43, %v1846_v43 }
 0x102   : > { %1544 = vst.msk [vmem:[#allocation3 + $0x18] sm:$0xf] %vm1537_vm7, %v1454_v52  ;;  %2241 = vrot.lane.b32.xlu1 %v8896_v45, %s9995_s21  ;;  %v8838_v45 = vpack.c.bf16 %v1590_v36, %v1590_v36  ;;  %v8867_v52 = vpack.c.bf16 %v1845_v44, %v1845_v44  ;;  %v1334_v36 = vld [vmem:[#allocation2 + $0xab] sm:$0xff]  ;;  %v1336_v44 = vld [vmem:[#allocation2 + $0xbb] sm:$0xff] }
 0x103   : > { %2239 = vrot.lane.b32.xlu0 %v8895_v46, %s9995_s21  ;;  %v8837_v46 = vpack.c.bf16 %v1589_v37, %v1589_v37  ;;  %v1333_v37 = vld [vmem:[#allocation2 + $0xa3] sm:$0xff] }
 0x104   : > { %v1710_v57 = vpop.permute.xlu1 %1709  ;;  %v8807_v43 = vpack.c.bf16 %v1333_v37, %v1333_v37 }
 0x105   : > { %v1708_v58 = vpop.permute.xlu0 %1707  ;;  %1801 = vst.msk [vmem:[#allocation3 + $0x14] sm:$0xf] %vm1795_vm8, %v1710_v57  ;;  %v8870_v57 = vpack.c.bf16 %v1848_v49, %v1848_v49  ;;  %v8810_v49 = vpack.c.bf16 %v1336_v44, %v1336_v44 }
 0x106   : > { %1800 = vst.msk [vmem:[#allocation3 + $0x10] sm:$0xf] %vm1795_vm8, %v1708_v58  ;;  %2245 = vrot.lane.b32.xlu1 %v8898_v55, %s9995_s21  ;;  %v2104_v55 = vld [vmem:[#allocation2 + $0x8e] sm:$0xff]  ;;  %v8869_v58 = vpack.c.bf16 %v1847_v50, %v1847_v50 }
 0x107   : > { %2243 = vrot.lane.b32.xlu0 %v8897_v56, %s9995_s21  ;;  %v2103_v56 = vld [vmem:[#allocation2 + $0x86] sm:$0xff] }
 0x108   : > { %v1714_v63 = vpop.permute.xlu1 %1713 }
 0x109   : > { %v1712_v1 = vpop.permute.xlu0 %1711  ;;  %1803 = vst.msk [vmem:[#allocation3 + $0x1c] sm:$0xf] %vm1795_vm8, %v1714_v63 }
 0x10a   : > { %1802 = vst.msk [vmem:[#allocation3 + $0x18] sm:$0xf] %vm1795_vm8, %v1712_v1  ;;  %959 = vrot.lane.b32.xlu1 %v8740_v61, %s9989_s19  ;;  %v8712_v61 = vpack.c.bf16 %v625_v59, %v625_v59 }
 0x10b   : > { %957 = vrot.lane.b32.xlu0 %v8739_v62, %s9989_s19  ;;  %v8711_v62 = vpack.c.bf16 %v624_v60, %v624_v60 }
 0x10c   : > { %v1968_v6 = vpop.permute.xlu1 %1967  ;;  %785 = vst.msk [vmem:[#allocation3 + $0x54] sm:$0xf] %vm602_vm2, %v8712_v61 }
 0x10d   : > { %v1966_v7 = vpop.permute.xlu0 %1965  ;;  %2059 = vst.msk [vmem:[#allocation3 + $0x14] sm:$0xf] %vm2053_vm9, %v1968_v6  ;;  %v627_v6 = vld [vmem:[#allocation2 + $0xb8] sm:$0xff] }
 0x10e   : > { %2058 = vst.msk [vmem:[#allocation3 + $0x10] sm:$0xf] %vm2053_vm9, %v1966_v7  ;;  %963 = vrot.lane.b32.xlu1 %v8742_v4, %s9989_s19  ;;  %v8900_v4 = vpack.c.bf16 %v2104_v55, %v2104_v55  ;;  %v626_v7 = vld [vmem:[#allocation2 + $0xb0] sm:$0xff]  ;;  %v8714_v8 = vpack.c.bf16 %v627_v6, %v627_v6  ;;  %v1594_v55 = vld [vmem:[#allocation2 + $0xbc] sm:$0xff] }
 0x10f   : > { %961 = vrot.lane.b32.xlu0 %v8741_v5, %s9989_s19  ;;  %784 = vst.msk [vmem:[#allocation3 + $0x50] sm:$0xf] %vm602_vm2, %v8711_v62  ;;  %v8899_v5 = vpack.c.bf16 %v2103_v56, %v2103_v56  ;;  %v8713_v9 = vpack.c.bf16 %v626_v7, %v626_v7  ;;  %v1593_v56 = vld [vmem:[#allocation2 + $0xb4] sm:$0xff]  ;;  %v8871_v7 = vpack.c.bf16 %v1849_v2, %v1849_v2 }
 0x110   : > { %v1972_v12 = vpop.permute.xlu1 %1971  ;;  %787 = vst.msk [vmem:[#allocation3 + $0x5c] sm:$0xf] %vm602_vm2, %v8714_v8  ;;  %v1850_v62 = vld [vmem:[#allocation2 + $0xad] sm:$0xff]  ;;  %v1851_v8 = vld [vmem:[#allocation2 + $0xb5] sm:$0xff] }
 0x111   : > { %v1970_v13 = vpop.permute.xlu0 %1969  ;;  %2061 = vst.msk [vmem:[#allocation3 + $0x1c] sm:$0xf] %vm2053_vm9, %v1972_v12  ;;  %v818_v12 = vld [vmem:[#allocation2 + $0xa9] sm:$0xff]  ;;  %v8872_v6 = vpack.c.bf16 %v1850_v62, %v1850_v62 }
 0x112   : > { %2060 = vst.msk [vmem:[#allocation3 + $0x18] sm:$0xf] %vm2053_vm9, %v1970_v13  ;;  %1217 = vrot.lane.b32.xlu1 %v8772_v10, %s9990_s23  ;;  %v817_v13 = vld [vmem:[#allocation2 + $0xa1] sm:$0xff] }
 0x113   : > { %1215 = vrot.lane.b32.xlu0 %v8771_v11, %s9990_s23  ;;  %786 = vst.msk [vmem:[#allocation3 + $0x58] sm:$0xf] %vm602_vm2, %v8713_v9  ;;  %v8743_v21 = vpack.c.bf16 %v817_v13, %v817_v13  ;;  %v8873_v13 = vpack.c.bf16 %v1851_v8, %v1851_v8 }
 0x114   : > { %v2226_v19 = vpop.permute.xlu1 %2225 }
 0x115   : > { %v2224_v20 = vpop.permute.xlu0 %2223  ;;  %2317 = vst.msk [vmem:[#allocation3 + $0x14] sm:$0xf] %vm2311_vm10, %v2226_v19  ;;  %v819_v19 = vld [vmem:[#allocation2 + $0xb1] sm:$0xff] }
 0x116   : > { %2316 = vst.msk [vmem:[#allocation3 + $0x10] sm:$0xf] %vm2311_vm10, %v2224_v20  ;;  %1221 = vrot.lane.b32.xlu1 %v8774_v17, %s9990_s23  ;;  %v8744_v20 = vpack.c.bf16 %v818_v12, %v818_v12 }
 0x117   : > { %1219 = vrot.lane.b32.xlu0 %v8773_v18, %s9990_s23  ;;  %v820_v18 = vld [vmem:[#allocation2 + $0xb9] sm:$0xff] }
 0x118   : > { %v2230_v27 = vpop.permute.xlu1 %2229 }
 0x119   : > { %v2228_v28 = vpop.permute.xlu0 %2227  ;;  %2319 = vst.msk [vmem:[#allocation3 + $0x1c] sm:$0xf] %vm2311_vm10, %v2230_v27  ;;  %v8745_v27 = vpack.c.bf16 %v819_v19, %v819_v19 }
 0x11a   : > { %2318 = vst.msk [vmem:[#allocation3 + $0x18] sm:$0xf] %vm2311_vm10, %v2228_v28  ;;  %1475 = vrot.lane.b32.xlu1 %v8804_v25, %s9991_s27  ;;  %v1075_v25 = vld [vmem:[#allocation2 + $0xa2] sm:$0xff] }
 0x11b   : > { %1473 = vrot.lane.b32.xlu0 %v8803_v26, %s9991_s27  ;;  %v8746_v26 = vpack.c.bf16 %v820_v18, %v820_v18 }
 0x11c   : > { %v944_v33 = vpop.permute.xlu1 %943 }
 0x11d   : > { %v942_v34 = vpop.permute.xlu0 %941  ;;  %v9552_v35 = vld [vmem:[#allocation3 + $0x10] sm:$0xff]   ;;  %1031 = vst.msk [vmem:[#allocation3 + $0x24] sm:$0xf] %vm1021_vm5, %v944_v33  ;;  %v8775_v33 = vpack.c.bf16 %v1075_v25, %v1075_v25 }
 0x11e   : > { %1030 = vst.msk [vmem:[#allocation3 + $0x20] sm:$0xf] %vm1021_vm5, %v942_v34  ;;  %1479 = vrot.lane.b32.xlu1 %v8806_v31, %s9991_s27  ;;  %9401 = vmatprep.mubr.msk.bf16.mxu0 %vm2477_vm11, %v9552_v35  ;;  %v1077_v31 = vld [vmem:[#allocation2 + $0xb2] sm:$0xff] }
 0x11f   : > { %1477 = vrot.lane.b32.xlu0 %v8805_v32, %s9991_s27  ;;  %v8776_v32 = vpack.c.bf16 %v1076_v24, %v1076_v24  ;;  %v2109_v24 = vld [vmem:[#allocation2 + $0xb6] sm:$0xff] }
 0x120   : > { %v948_v40 = vpop.permute.xlu1 %947  ;;  %v631_v25 = vld [vmem:[#allocation2 + $0xd8] sm:$0xff] }
 0x121   : > { %v946_v41 = vpop.permute.xlu0 %945  ;;  %v9553_v42 = vld [vmem:[#allocation3 + $0x18] sm:$0xff]   ;;  %1033 = vst.msk [vmem:[#allocation3 + $0x2c] sm:$0xf] %vm1021_vm5, %v948_v40 }
 0x122   : > { %1032 = vst.msk [vmem:[#allocation3 + $0x28] sm:$0xf] %vm1021_vm5, %v946_v41  ;;  %1733 = vrot.lane.b32.xlu1 %v8836_v38, %s9992_s28  ;;  %9402 = vmatmul.mubr.msk.bf16.gmra.mrb[4].mxu0 %vm2477_vm11, %v9553_v42  ;;  %v8778_v38 = vpack.c.bf16 %v1078_v30, %v1078_v30  ;;  %v8808_v42 = vpack.c.bf16 %v1334_v36, %v1334_v36 }
 0x123   : > { %1731 = vrot.lane.b32.xlu0 %v8835_v39, %s9992_s28  ;;  %v8777_v39 = vpack.c.bf16 %v1077_v31, %v1077_v31 }
 0x124   : > { %v1202_v47 = vpop.permute.xlu1 %1201 }
 0x125   : > { %v1200_v48 = vpop.permute.xlu0 %1199  ;;  %1289 = vst.msk [vmem:[#allocation3 + $0x24] sm:$0xf] %vm1279_vm6, %v1202_v47 }
 0x126   : > { %1288 = vst.msk [vmem:[#allocation3 + $0x20] sm:$0xf] %vm1279_vm6, %v1200_v48  ;;  %1737 = vrot.lane.b32.xlu1 %v8838_v45, %s9992_s28  ;;  %v1335_v45 = vld [vmem:[#allocation2 + $0xb3] sm:$0xff] }
 0x127   : > { %1735 = vrot.lane.b32.xlu0 %v8837_v46, %s9992_s28  ;;  %v1592_v48 = vld [vmem:[#allocation2 + $0xac] sm:$0xff]  ;;  %v8809_v50 = vpack.c.bf16 %v1335_v45, %v1335_v45 }
 0x128   : > { %v1206_v53 = vpop.permute.xlu1 %1205  ;;  %v1080_v45 = vld [vmem:[#allocation2 + $0xca] sm:$0xff] }
 0x129   : > { %v1204_v54 = vpop.permute.xlu0 %1203  ;;  %1291 = vst.msk [vmem:[#allocation3 + $0x2c] sm:$0xf] %vm1279_vm6, %v1206_v53 }
 0x12a   : > { %1290 = vst.msk [vmem:[#allocation3 + $0x28] sm:$0xf] %vm1279_vm6, %v1204_v54  ;;  %1991 = vrot.lane.b32.xlu1 %v8868_v51, %s9993_s30  ;;  %v1591_v51 = vld [vmem:[#allocation2 + $0xa4] sm:$0xff] }
 0x12b   : > { %1989 = vrot.lane.b32.xlu0 %v8867_v52, %s9993_s30 }
 0x12c   : > { %v1460_v63 = vpop.permute.xlu1 %1459 }
 0x12d   : > { %v1458_v1 = vpop.permute.xlu0 %1457  ;;  %1547 = vst.msk [vmem:[#allocation3 + $0x24] sm:$0xf] %vm1537_vm7, %v1460_v63  ;;  %v8842_v63 = vpack.c.bf16 %v1594_v55, %v1594_v55 }
 0x12e   : > { %1546 = vst.msk [vmem:[#allocation3 + $0x20] sm:$0xf] %vm1537_vm7, %v1458_v1  ;;  %1995 = vrot.lane.b32.xlu1 %v8870_v57, %s9993_s30  ;;  %v8840_v57 = vpack.c.bf16 %v1592_v48, %v1592_v48  ;;  %v8841_v1 = vpack.c.bf16 %v1593_v56, %v1593_v56 }
 0x12f   : > { %1993 = vrot.lane.b32.xlu0 %v8869_v58, %s9993_s30  ;;  %v8839_v58 = vpack.c.bf16 %v1591_v51, %v1591_v51  ;;  %v1082_v51 = vld [vmem:[#allocation2 + $0xda] sm:$0xff] }
 0x130   : > { %v1464_v10 = vpop.permute.xlu1 %1463  ;;  %v8782_v55 = vpack.c.bf16 %v1082_v51, %v1082_v51 }
 0x131   : > { %v1462_v11 = vpop.permute.xlu0 %1461  ;;  %1549 = vst.msk [vmem:[#allocation3 + $0x2c] sm:$0xf] %vm1537_vm7, %v1464_v10 }
 0x132   : > { %1548 = vst.msk [vmem:[#allocation3 + $0x28] sm:$0xf] %vm1537_vm7, %v1462_v11  ;;  %2249 = vrot.lane.b32.xlu1 %v8900_v4, %s9995_s21  ;;  %v629_v11 = vld [vmem:[#allocation2 + $0xc8] sm:$0xff] }
 0x133   : > { %2247 = vrot.lane.b32.xlu0 %v8899_v5, %s9995_s21  ;;  %v1852_v5 = vld [vmem:[#allocation2 + $0xbd] sm:$0xff] }
 0x134   : > { %v1718_v16 = vpop.permute.xlu1 %1717  ;;  %v8874_v12 = vpack.c.bf16 %v1852_v5, %v1852_v5 }
 0x135   : > { %v1716_v17 = vpop.permute.xlu0 %1715  ;;  %1805 = vst.msk [vmem:[#allocation3 + $0x24] sm:$0xf] %vm1795_vm8, %v1718_v16  ;;  %v2107_v16 = vld [vmem:[#allocation2 + $0xa6] sm:$0xff] }
 0x136   : > { %1804 = vst.msk [vmem:[#allocation3 + $0x20] sm:$0xf] %vm1795_vm8, %v1716_v17  ;;  %2253 = vrot.lane.b32.xlu1 %v8902_v14, %s9995_s21  ;;  %v8716_v14 = vpack.c.bf16 %v629_v11, %v629_v11  ;;  %v628_v17 = vld [vmem:[#allocation2 + $0xc0] sm:$0xff] }
 0x137   : > { %2251 = vrot.lane.b32.xlu0 %v8901_v15, %s9995_s21  ;;  %v2108_v15 = vld [vmem:[#allocation2 + $0xae] sm:$0xff] }
 0x138   : > { %v1722_v22 = vpop.permute.xlu1 %1721  ;;  %789 = vst.msk [vmem:[#allocation3 + $0x64] sm:$0xf] %vm602_vm2, %v8716_v14  ;;  %v1597_v14 = vld [vmem:[#allocation2 + $0xd4] sm:$0xff] }
 0x139   : > { %v1720_v23 = vpop.permute.xlu0 %1719  ;;  %1807 = vst.msk [vmem:[#allocation3 + $0x2c] sm:$0xf] %vm1795_vm8, %v1722_v22  ;;  %v8903_v22 = vpack.c.bf16 %v2107_v16, %v2107_v16 }
 0x13a   : > { %1806 = vst.msk [vmem:[#allocation3 + $0x28] sm:$0xf] %vm1795_vm8, %v1720_v23  ;;  %967 = vrot.lane.b32.xlu1 %v8744_v20, %s9989_s19  ;;  %v8715_v20 = vpack.c.bf16 %v628_v17, %v628_v17  ;;  %v2110_v23 = vld [vmem:[#allocation2 + $0xbe] sm:$0xff] }
 0x13b   : > { %965 = vrot.lane.b32.xlu0 %v8743_v21, %s9989_s19  ;;  %v8904_v21 = vpack.c.bf16 %v2108_v15, %v2108_v15  ;;  %v8906_v31 = vpack.c.bf16 %v2110_v23, %v2110_v23 }
 0x13c   : > { %v1976_v28 = vpop.permute.xlu1 %1975  ;;  %788 = vst.msk [vmem:[#allocation3 + $0x60] sm:$0xf] %vm602_vm2, %v8715_v20  ;;  %v1854_v20 = vld [vmem:[#allocation2 + $0xcd] sm:$0xff] }
 0x13d   : > { %v1974_v29 = vpop.permute.xlu0 %1973  ;;  %2063 = vst.msk [vmem:[#allocation3 + $0x24] sm:$0xf] %vm2053_vm9, %v1976_v28  ;;  %v8718_v28 = vpack.c.bf16 %v631_v25, %v631_v25 }
 0x13e   : > { %2062 = vst.msk [vmem:[#allocation3 + $0x20] sm:$0xf] %vm2053_vm9, %v1974_v29  ;;  %971 = vrot.lane.b32.xlu1 %v8746_v26, %s9989_s19  ;;  %v630_v29 = vld [vmem:[#allocation2 + $0xd0] sm:$0xff] }
 0x13f   : > { %969 = vrot.lane.b32.xlu0 %v8745_v27, %s9989_s19  ;;  %v8717_v30 = vpack.c.bf16 %v630_v29, %v630_v29  ;;  %791 = vst.msk [vmem:[#allocation3 + $0x6c] sm:$0xf] %vm602_vm2, %v8718_v28 }
 0x140   : > { %v1980_v34 = vpop.permute.xlu1 %1979 }
 0x141   : > { %v1978_v35 = vpop.permute.xlu0 %1977  ;;  %2065 = vst.msk [vmem:[#allocation3 + $0x2c] sm:$0xf] %vm2053_vm9, %v1980_v34  ;;  %v821_v34 = vld [vmem:[#allocation2 + $0xc1] sm:$0xff] }
 0x142   : > { %2064 = vst.msk [vmem:[#allocation3 + $0x28] sm:$0xf] %vm2053_vm9, %v1978_v35  ;;  %1225 = vrot.lane.b32.xlu1 %v8776_v32, %s9990_s23  ;;  %v8905_v32 = vpack.c.bf16 %v2109_v24, %v2109_v24  ;;  %v8876_v24 = vpack.c.bf16 %v1854_v20, %v1854_v20  ;;  %v1343_v20 = vld [vmem:[#allocation2 + $0xf3] sm:$0xff] }
 0x143   : > { %1223 = vrot.lane.b32.xlu0 %v8775_v33, %s9990_s23  ;;  %v822_v33 = vld [vmem:[#allocation2 + $0xc9] sm:$0xff]  ;;  %790 = vst.msk [vmem:[#allocation3 + $0x68] sm:$0xf] %vm602_vm2, %v8717_v30 }
 0x144   : > { %v2234_v40 = vpop.permute.xlu1 %2233  ;;  %v8748_v37 = vpack.c.bf16 %v822_v33, %v822_v33  ;;  %v2111_v33 = vld [vmem:[#allocation2 + $0xc6] sm:$0xff] }
 0x145   : > { %v2232_v41 = vpop.permute.xlu0 %2231  ;;  %2321 = vst.msk [vmem:[#allocation3 + $0x24] sm:$0xf] %vm2311_vm10, %v2234_v40  ;;  %v823_v40 = vld [vmem:[#allocation2 + $0xd1] sm:$0xff] }
 0x146   : > { %2320 = vst.msk [vmem:[#allocation3 + $0x20] sm:$0xf] %vm2311_vm10, %v2232_v41  ;;  %1229 = vrot.lane.b32.xlu1 %v8778_v38, %s9990_s23  ;;  %v8747_v38 = vpack.c.bf16 %v821_v34, %v821_v34  ;;  %v8749_v44 = vpack.c.bf16 %v823_v40, %v823_v40 }
 0x147   : > { %1227 = vrot.lane.b32.xlu0 %v8777_v39, %s9990_s23  ;;  %v824_v39 = vld [vmem:[#allocation2 + $0xd9] sm:$0xff] }
 0x148   : > { %v2238_v46 = vpop.permute.xlu1 %2237 }
 0x149   : > { %v2236_v47 = vpop.permute.xlu0 %2235  ;;  %2323 = vst.msk [vmem:[#allocation3 + $0x2c] sm:$0xf] %vm2311_vm10, %v2238_v46  ;;  %v1079_v46 = vld [vmem:[#allocation2 + $0xc2] sm:$0xff] }
 0x14a   : > { %2322 = vst.msk [vmem:[#allocation3 + $0x28] sm:$0xf] %vm2311_vm10, %v2236_v47  ;;  %1483 = vrot.lane.b32.xlu1 %v8808_v42, %s9991_s27 }
 0x14b   : > { %1481 = vrot.lane.b32.xlu0 %v8807_v43, %s9991_s27  ;;  %v8750_v43 = vpack.c.bf16 %v824_v39, %v824_v39  ;;  %v8907_v39 = vpack.c.bf16 %v2111_v33, %v2111_v33  ;;  %v1601_v33 = vld [vmem:[#allocation2 + $0xf4] sm:$0xff] }
 0x14c   : > { %v952_v52 = vpop.permute.xlu1 %951 }
 0x14d   : > { %v950_v53 = vpop.permute.xlu0 %949  ;;  %v9554_v54 = vld [vmem:[#allocation3 + $0x20] sm:$0xff]   ;;  %1035 = vst.msk [vmem:[#allocation3 + $0x34] sm:$0xf] %vm1021_vm5, %v952_v52  ;;  %v1081_v52 = vld [vmem:[#allocation2 + $0xd2] sm:$0xff] }
 0x14e   : > { %1034 = vst.msk [vmem:[#allocation3 + $0x30] sm:$0xf] %vm1021_vm5, %v950_v53  ;;  %1487 = vrot.lane.b32.xlu1 %v8810_v49, %s9991_s27  ;;  %9405 = vmatprep.mubr.msk.bf16.mxu0 %vm2477_vm11, %v9554_v54  ;;  %v8780_v49 = vpack.c.bf16 %v1080_v45, %v1080_v45  ;;  %v8781_v56 = vpack.c.bf16 %v1081_v52, %v1081_v52  ;;  %v826_v52 = vld [vmem:[#allocation2 + $0xe9] sm:$0xff] }
 0x14f   : > { %1485 = vrot.lane.b32.xlu0 %v8809_v50, %s9991_s27  ;;  %v8779_v50 = vpack.c.bf16 %v1079_v46, %v1079_v46 }
 0x150   : > { %v956_v59 = vpop.permute.xlu1 %955 }
 0x151   : > { %v954_v60 = vpop.permute.xlu0 %953  ;;  %v9555_v61 = vld [vmem:[#allocation3 + $0x28] sm:$0xff]   ;;  %1037 = vst.msk [vmem:[#allocation3 + $0x3c] sm:$0xf] %vm1021_vm5, %v956_v59 }
 0x152   : > { %1036 = vst.msk [vmem:[#allocation3 + $0x38] sm:$0xf] %vm1021_vm5, %v954_v60  ;;  %1741 = vrot.lane.b32.xlu1 %v8840_v57, %s9992_s28  ;;  %9406 = vmatmul.mubr.msk.bf16.gmra.mrb[8].mxu0 %vm2477_vm11, %v9555_v61  ;;  %v1338_v57 = vld [vmem:[#allocation2 + $0xcb] sm:$0xff] }
 0x153   : > { %1739 = vrot.lane.b32.xlu0 %v8839_v58, %s9992_s28  ;;  %v1337_v58 = vld [vmem:[#allocation2 + $0xc3] sm:$0xff]  ;;  %v8812_v61 = vpack.c.bf16 %v1338_v57, %v1338_v57 }
 0x154   : > { %v1210_v3 = vpop.permute.xlu1 %1209  ;;  %v8811_v62 = vpack.c.bf16 %v1337_v58, %v1337_v58  ;;  %v828_v58 = vld [vmem:[#allocation2 + $0xf9] sm:$0xf] }
 0x155   : > { %v1208_v4 = vpop.permute.xlu0 %1207  ;;  %1293 = vst.msk [vmem:[#allocation3 + $0x34] sm:$0xf] %vm1279_vm6, %v1210_v3 }
 0x156   : > { %1292 = vst.msk [vmem:[#allocation3 + $0x30] sm:$0xf] %vm1279_vm6, %v1208_v4  ;;  %1745 = vrot.lane.b32.xlu1 %v8842_v63, %s9992_s28  ;;  %v1340_v63 = vld [vmem:[#allocation2 + $0xdb] sm:$0xff] }
 0x157   : > { %1743 = vrot.lane.b32.xlu0 %v8841_v1, %s9992_s28  ;;  %v1339_v1 = vld [vmem:[#allocation2 + $0xd3] sm:$0xff]  ;;  %v8814_v4 = vpack.c.bf16 %v1340_v63, %v1340_v63 }
 0x158   : > { %v1214_v9 = vpop.permute.xlu1 %1213  ;;  %v8813_v5 = vpack.c.bf16 %v1339_v1, %v1339_v1  ;;  %v1084_v1 = vld [vmem:[#allocation2 + $0xea] sm:$0xff] }
 0x159   : > { %v1212_v10 = vpop.permute.xlu0 %1211  ;;  %1295 = vst.msk [vmem:[#allocation3 + $0x3c] sm:$0xf] %vm1279_vm6, %v1214_v9 }
 0x15a   : > { %1294 = vst.msk [vmem:[#allocation3 + $0x38] sm:$0xf] %vm1279_vm6, %v1212_v10  ;;  %1999 = vrot.lane.b32.xlu1 %v8872_v6, %s9993_s30  ;;  %v1596_v6 = vld [vmem:[#allocation2 + $0xcc] sm:$0xff] }
 0x15b   : > { %1997 = vrot.lane.b32.xlu0 %v8871_v7, %s9993_s30  ;;  %v1595_v7 = vld [vmem:[#allocation2 + $0xc4] sm:$0xff]  ;;  %v8844_v11 = vpack.c.bf16 %v1596_v6, %v1596_v6 }
 0x15c   : > { %v1468_v18 = vpop.permute.xlu1 %1467 }
 0x15d   : > { %v1466_v19 = vpop.permute.xlu0 %1465  ;;  %1551 = vst.msk [vmem:[#allocation3 + $0x34] sm:$0xf] %vm1537_vm7, %v1468_v18 }
 0x15e   : > { %1550 = vst.msk [vmem:[#allocation3 + $0x30] sm:$0xf] %vm1537_vm7, %v1466_v19  ;;  %2003 = vrot.lane.b32.xlu1 %v8874_v12, %s9993_s30  ;;  %v8843_v12 = vpack.c.bf16 %v1595_v7, %v1595_v7  ;;  %v8845_v19 = vpack.c.bf16 %v1597_v14, %v1597_v14  ;;  %v1086_v7 = vld [vmem:[#allocation2 + $0xfa] sm:$0xf]  ;;  %v1341_v14 = vld [vmem:[#allocation2 + $0xe3] sm:$0xff] }
 0x15f   : > { %2001 = vrot.lane.b32.xlu0 %v8873_v13, %s9993_s30  ;;  %v1598_v13 = vld [vmem:[#allocation2 + $0xdc] sm:$0xff] }
 0x160   : > { %v1472_v26 = vpop.permute.xlu1 %1471  ;;  %v8846_v18 = vpack.c.bf16 %v1598_v13, %v1598_v13  ;;  %v1342_v13 = vld [vmem:[#allocation2 + $0xeb] sm:$0xff] }
 0x161   : > { %v1470_v27 = vpop.permute.xlu0 %1469  ;;  %1553 = vst.msk [vmem:[#allocation3 + $0x3c] sm:$0xf] %vm1537_vm7, %v1472_v26  ;;  %v1856_v26 = vld [vmem:[#allocation2 + $0xdd] sm:$0xff] }
 0x162   : > { %1552 = vst.msk [vmem:[#allocation3 + $0x38] sm:$0xf] %vm1537_vm7, %v1470_v27  ;;  %2257 = vrot.lane.b32.xlu1 %v8904_v21, %s9995_s21  ;;  %v1853_v21 = vld [vmem:[#allocation2 + $0xc5] sm:$0xff]  ;;  %v1855_v27 = vld [vmem:[#allocation2 + $0xd5] sm:$0xff]  ;;  %v8878_v30 = vpack.c.bf16 %v1856_v26, %v1856_v26 }
 0x163   : > { %2255 = vrot.lane.b32.xlu0 %v8903_v22, %s9995_s21  ;;  %v8875_v25 = vpack.c.bf16 %v1853_v21, %v1853_v21  ;;  %v1599_v26 = vld [vmem:[#allocation2 + $0xe4] sm:$0xff] }
 0x164   : > { %v1726_v35 = vpop.permute.xlu1 %1725 }
 0x165   : > { %v1724_v36 = vpop.permute.xlu0 %1723  ;;  %1809 = vst.msk [vmem:[#allocation3 + $0x34] sm:$0xf] %vm1795_vm8, %v1726_v35 }
 0x166   : > { %1808 = vst.msk [vmem:[#allocation3 + $0x30] sm:$0xf] %vm1795_vm8, %v1724_v36  ;;  %2261 = vrot.lane.b32.xlu1 %v8906_v31, %s9995_s21  ;;  %v8877_v31 = vpack.c.bf16 %v1855_v27, %v1855_v27 }
 0x167   : > { %2259 = vrot.lane.b32.xlu0 %v8905_v32, %s9995_s21  ;;  %v2112_v32 = vld [vmem:[#allocation2 + $0xce] sm:$0xff] }
 0x168   : > { %v1730_v41 = vpop.permute.xlu1 %1729  ;;  %v8908_v36 = vpack.c.bf16 %v2112_v32, %v2112_v32  ;;  %v1602_v32 = vld [vmem:[#allocation2 + $0xfc] sm:$0xf] }
 0x169   : > { %v1728_v42 = vpop.permute.xlu0 %1727  ;;  %1811 = vst.msk [vmem:[#allocation3 + $0x3c] sm:$0xf] %vm1795_vm8, %v1730_v41 }
 0x16a   : > { %1810 = vst.msk [vmem:[#allocation3 + $0x38] sm:$0xf] %vm1795_vm8, %v1728_v42  ;;  %975 = vrot.lane.b32.xlu1 %v8748_v37, %s9989_s19  ;;  %v633_v37 = vld [vmem:[#allocation2 + $0xe8] sm:$0xff]  ;;  %v2114_v42 = vld [vmem:[#allocation2 + $0xde] sm:$0xff] }
 0x16b   : > { %973 = vrot.lane.b32.xlu0 %v8747_v38, %s9989_s19  ;;  %v632_v38 = vld [vmem:[#allocation2 + $0xe0] sm:$0xff]  ;;  %v8720_v40 = vpack.c.bf16 %v633_v37, %v633_v37  ;;  %v8850_v37 = vpack.c.bf16 %v1602_v32, %v1602_v32 }
 0x16c   : > { %v1984_v47 = vpop.permute.xlu1 %1983  ;;  %v8719_v41 = vpack.c.bf16 %v632_v38, %v632_v38  ;;  %v8849_v38 = vpack.c.bf16 %v1601_v33, %v1601_v33 }
 0x16d   : > { %v1982_v48 = vpop.permute.xlu0 %1981  ;;  %2067 = vst.msk [vmem:[#allocation3 + $0x34] sm:$0xf] %vm2053_vm9, %v1984_v47 }
 0x16e   : > { %2066 = vst.msk [vmem:[#allocation3 + $0x30] sm:$0xf] %vm2053_vm9, %v1982_v48  ;;  %979 = vrot.lane.b32.xlu1 %v8750_v43, %s9989_s19  ;;  %v2113_v43 = vld [vmem:[#allocation2 + $0xd6] sm:$0xff] }
 0x16f   : > { %977 = vrot.lane.b32.xlu0 %v8749_v44, %s9989_s19  ;;  %v635_v44 = vld [vmem:[#allocation2 + $0xf8] sm:$0xf]  ;;  %793 = vst.msk [vmem:[#allocation3 + $0x74] sm:$0xf] %vm602_vm2, %v8720_v40  ;;  %792 = vst.msk [vmem:[#allocation3 + $0x70] sm:$0xf] %vm602_vm2, %v8719_v41 }
 0x170   : > { %v1988_v53 = vpop.permute.xlu1 %1987  ;;  %v8722_v47 = vpack.c.bf16 %v635_v44, %v635_v44  ;;  %v634_v48 = vld [vmem:[#allocation2 + $0xf0] sm:$0xff]  ;;  %v1857_v40 = vld [vmem:[#allocation2 + $0xe5] sm:$0xff] }
 0x171   : > { %v1986_v54 = vpop.permute.xlu0 %1985  ;;  %2069 = vst.msk [vmem:[#allocation3 + $0x3c] sm:$0xf] %vm2053_vm9, %v1988_v53  ;;  %v8721_v51 = vpack.c.bf16 %v634_v48, %v634_v48  ;;  %v825_v53 = vld [vmem:[#allocation2 + $0xe1] sm:$0xff]  ;;  %v8879_v44 = vpack.c.bf16 %v1857_v40, %v1857_v40 }
 0x172   : > { %2068 = vst.msk [vmem:[#allocation3 + $0x38] sm:$0xf] %vm2053_vm9, %v1986_v54  ;;  %1233 = vrot.lane.b32.xlu1 %v8780_v49, %s9990_s23  ;;  %v8910_v49 = vpack.c.bf16 %v2114_v42, %v2114_v42  ;;  %v8751_v57 = vpack.c.bf16 %v825_v53, %v825_v53 }
 0x173   : > { %1231 = vrot.lane.b32.xlu0 %v8779_v50, %s9990_s23  ;;  %v8909_v50 = vpack.c.bf16 %v2113_v43, %v2113_v43  ;;  %796 = vst.msk [vmem:[#allocation3 + $0x7c] sm:$0x3] %vm795_vm13, %v8722_v47  ;;  %vm3192_vm13 = vcmask 518400  }
 0x174   : > { %v2242_v59 = vpop.permute.xlu1 %2241  ;;  %794 = vst.msk [vmem:[#allocation3 + $0x78] sm:$0xf] %vm602_vm2, %v8721_v51  ;;  %v2116_v51 = vld [vmem:[#allocation2 + $0xee] sm:$0xff]  ;;  %vm1827_vm2 = vcmask 197792  }
 0x175   : > { %v2240_v60 = vpop.permute.xlu0 %2239  ;;  %2325 = vst.msk [vmem:[#allocation3 + $0x34] sm:$0xf] %vm2311_vm10, %v2242_v59  ;;  %v827_v59 = vld [vmem:[#allocation2 + $0xf1] sm:$0xff] }
 0x176   : > { %2324 = vst.msk [vmem:[#allocation3 + $0x30] sm:$0xf] %vm2311_vm10, %v2240_v60  ;;  %1237 = vrot.lane.b32.xlu1 %v8782_v55, %s9990_s23  ;;  %v8753_v63 = vpack.c.bf16 %v827_v59, %v827_v59 }
 0x177   : > { %1235 = vrot.lane.b32.xlu0 %v8781_v56, %s9990_s23  ;;  %v8752_v56 = vpack.c.bf16 %v826_v52, %v826_v52  ;;  %v2115_v52 = vld [vmem:[#allocation2 + $0xe6] sm:$0xff] }
 0x178   : > { %v2246_v2 = vpop.permute.xlu1 %2245 }
 0x179   : > { %v2244_v3 = vpop.permute.xlu0 %2243  ;;  %2327 = vst.msk [vmem:[#allocation3 + $0x3c] sm:$0xf] %vm2311_vm10, %v2246_v2  ;;  %v1083_v2 = vld [vmem:[#allocation2 + $0xe2] sm:$0xff] }
 0x17a   : > { %2326 = vst.msk [vmem:[#allocation3 + $0x38] sm:$0xf] %vm2311_vm10, %v2244_v3  ;;  %1491 = vrot.lane.b32.xlu1 %v8812_v61, %s9991_s27  ;;  %v8783_v6 = vpack.c.bf16 %v1083_v2, %v1083_v2  ;;  %v10624_v2 = vld [vmem:[%s11390_s2] ss:$0 sm:$0xff] }
 0x17b   : > { %1489 = vrot.lane.b32.xlu0 %v8811_v62, %s9991_s27  ;;  %v8754_v62 = vpack.c.bf16 %v828_v58, %v828_v58  ;;  %v2117_v58 = vld [vmem:[#allocation2 + $0xf6] sm:$0xff] }
 0x17c   : > { %v960_v8 = vpop.permute.xlu1 %959 }
 0x17d   : > { %v958_v9 = vpop.permute.xlu0 %957  ;;  %v9556_v10 = vld [vmem:[#allocation3 + $0x30] sm:$0xff]   ;;  %1039 = vst.msk [vmem:[#allocation3 + $0x44] sm:$0xf] %vm1021_vm5, %v960_v8 }
 0x17e   : > { %1038 = vst.msk [vmem:[#allocation3 + $0x40] sm:$0xf] %vm1021_vm5, %v958_v9  ;;  %1495 = vrot.lane.b32.xlu1 %v8814_v4, %s9991_s27  ;;  %9409 = vmatprep.mubr.msk.bf16.mxu0 %vm2477_vm11, %v9556_v10  ;;  %v1085_v8 = vld [vmem:[#allocation2 + $0xf2] sm:$0xff] }
 0x17f   : > { %1493 = vrot.lane.b32.xlu0 %v8813_v5, %s9991_s27  ;;  %v8784_v5 = vpack.c.bf16 %v1084_v1, %v1084_v1 }
 0x180   : > { %v964_v15 = vpop.permute.xlu1 %963 }
 0x181   : > { %v962_v16 = vpop.permute.xlu0 %961  ;;  %v9557_v17 = vld [vmem:[#allocation3 + $0x38] sm:$0xff]   ;;  %1041 = vst.msk [vmem:[#allocation3 + $0x4c] sm:$0xf] %vm1021_vm5, %v964_v15 }
 0x182   : > { %1040 = vst.msk [vmem:[#allocation3 + $0x48] sm:$0xf] %vm1021_vm5, %v962_v16  ;;  %1749 = vrot.lane.b32.xlu1 %v8844_v11, %s9992_s28  ;;  %9410 = vmatmul.mubr.msk.bf16.gmra.mrb[12].mxu0 %vm2477_vm11, %v9557_v17  ;;  %v8786_v11 = vpack.c.bf16 %v1086_v7, %v1086_v7  ;;  %v8816_v17 = vpack.c.bf16 %v1342_v13, %v1342_v13 }
 0x183   : > { %1747 = vrot.lane.b32.xlu0 %v8843_v12, %s9992_s28  ;;  %v8785_v12 = vpack.c.bf16 %v1085_v8, %v1085_v8 }
 0x184   : > { %v1218_v22 = vpop.permute.xlu1 %1217 }
 0x185   : > { %v1216_v23 = vpop.permute.xlu0 %1215  ;;  %1297 = vst.msk [vmem:[#allocation3 + $0x44] sm:$0xf] %vm1279_vm6, %v1218_v22 }
 0x186   : > { %1296 = vst.msk [vmem:[#allocation3 + $0x40] sm:$0xf] %vm1279_vm6, %v1216_v23  ;;  %1753 = vrot.lane.b32.xlu1 %v8846_v18, %s9992_s28  ;;  %v8815_v18 = vpack.c.bf16 %v1341_v14, %v1341_v14 }
 0x187   : > { %1751 = vrot.lane.b32.xlu0 %v8845_v19, %s9992_s28  ;;  %v1344_v19 = vld [vmem:[#allocation2 + $0xfb] sm:$0xf] }
 0x188   : > { %v1222_v28 = vpop.permute.xlu1 %1221  ;;  %v8818_v23 = vpack.c.bf16 %v1344_v19, %v1344_v19 }
 0x189   : > { %v1220_v29 = vpop.permute.xlu0 %1219  ;;  %1299 = vst.msk [vmem:[#allocation3 + $0x4c] sm:$0xf] %vm1279_vm6, %v1222_v28 }
 0x18a   : > { %1298 = vst.msk [vmem:[#allocation3 + $0x48] sm:$0xf] %vm1279_vm6, %v1220_v29  ;;  %2007 = vrot.lane.b32.xlu1 %v8876_v24, %s9993_s30  ;;  %v8817_v24 = vpack.c.bf16 %v1343_v20, %v1343_v20 }
 0x18b   : > { %2005 = vrot.lane.b32.xlu0 %v8875_v25, %s9993_s30  ;;  %v1600_v25 = vld [vmem:[#allocation2 + $0xec] sm:$0xff] }
 0x18c   : > { %v1476_v34 = vpop.permute.xlu1 %1475 }
 0x18d   : > { %v1474_v35 = vpop.permute.xlu0 %1473  ;;  %1555 = vst.msk [vmem:[#allocation3 + $0x44] sm:$0xf] %vm1537_vm7, %v1476_v34 }
 0x18e   : > { %1554 = vst.msk [vmem:[#allocation3 + $0x40] sm:$0xf] %vm1537_vm7, %v1474_v35  ;;  %2011 = vrot.lane.b32.xlu1 %v8878_v30, %s9993_s30  ;;  %v8848_v30 = vpack.c.bf16 %v1600_v25, %v1600_v25 }
 0x18f   : > { %2009 = vrot.lane.b32.xlu0 %v8877_v31, %s9993_s30  ;;  %v8847_v31 = vpack.c.bf16 %v1599_v26, %v1599_v26 }
 0x190   : > { %v1480_v45 = vpop.permute.xlu1 %1479 }
 0x191   : > { %v1478_v46 = vpop.permute.xlu0 %1477  ;;  %1557 = vst.msk [vmem:[#allocation3 + $0x4c] sm:$0xf] %vm1537_vm7, %v1480_v45  ;;  %v1860_v45 = vld [vmem:[#allocation2 + $0xfd] sm:$0xf] }
 0x192   : > { %1556 = vst.msk [vmem:[#allocation3 + $0x48] sm:$0xf] %vm1537_vm7, %v1478_v46  ;;  %2265 = vrot.lane.b32.xlu1 %v8908_v36, %s9995_s21  ;;  %v1859_v46 = vld [vmem:[#allocation2 + $0xf5] sm:$0xff] }
 0x193   : > { %2263 = vrot.lane.b32.xlu0 %v8907_v39, %s9995_s21  ;;  %v1858_v39 = vld [vmem:[#allocation2 + $0xed] sm:$0xff] }
 0x194   : > { %v1734_v54 = vpop.permute.xlu1 %1733  ;;  %v8880_v43 = vpack.c.bf16 %v1858_v39, %v1858_v39 }
 0x195   : > { %v1732_v55 = vpop.permute.xlu0 %1731  ;;  %1813 = vst.msk [vmem:[#allocation3 + $0x44] sm:$0xf] %vm1795_vm8, %v1734_v54 }
 0x196   : > { %1812 = vst.msk [vmem:[#allocation3 + $0x40] sm:$0xf] %vm1795_vm8, %v1732_v55  ;;  %2269 = vrot.lane.b32.xlu1 %v8910_v49, %s9995_s21  ;;  %v8882_v49 = vpack.c.bf16 %v1860_v45, %v1860_v45  ;;  %v8912_v55 = vpack.c.bf16 %v2116_v51, %v2116_v51 }
 0x197   : > { %2267 = vrot.lane.b32.xlu0 %v8909_v50, %s9995_s21  ;;  %v8881_v50 = vpack.c.bf16 %v1859_v46, %v1859_v46 }
 0x198   : > { %v1738_v60 = vpop.permute.xlu1 %1737 }
 0x199   : > { %v1736_v61 = vpop.permute.xlu0 %1735  ;;  %1815 = vst.msk [vmem:[#allocation3 + $0x4c] sm:$0xf] %vm1795_vm8, %v1738_v60 }
 0x19a   : > { %1814 = vst.msk [vmem:[#allocation3 + $0x48] sm:$0xf] %vm1795_vm8, %v1736_v61  ;;  %983 = vrot.lane.b32.xlu1 %v8752_v56, %s9989_s19  ;;  %v8911_v56 = vpack.c.bf16 %v2115_v52, %v2115_v52 }
 0x19b   : > { %981 = vrot.lane.b32.xlu0 %v8751_v57, %s9989_s19  ;;  %v2118_v57 = vld [vmem:[#allocation2 + $0xfe] sm:$0xf] }
 0x19c   : > { %v1992_v3 = vpop.permute.xlu1 %1991  ;;  %v8914_v61 = vpack.c.bf16 %v2118_v57, %v2118_v57 }
 0x19d   : > { %v1990_v4 = vpop.permute.xlu0 %1989  ;;  %2071 = vst.msk [vmem:[#allocation3 + $0x44] sm:$0xf] %vm2053_vm9, %v1992_v3 }
 0x19e   : > { %2070 = vst.msk [vmem:[#allocation3 + $0x40] sm:$0xf] %vm2053_vm9, %v1990_v4  ;;  %987 = vrot.lane.b32.xlu1 %v8754_v62, %s9989_s19  ;;  %v8913_v62 = vpack.c.bf16 %v2117_v58, %v2117_v58  ;;  %v10633_v4 = vld [vmem:[%s11391_s3] ss:$0 sm:$0xff] }
 0x19f   : > { %985 = vrot.lane.b32.xlu0 %v8753_v63, %s9989_s19 }
 0x1a0   : > { %v1996_v9 = vpop.permute.xlu1 %1995 }
 0x1a1   : > { %v1994_v10 = vpop.permute.xlu0 %1993  ;;  %2073 = vst.msk [vmem:[#allocation3 + $0x4c] sm:$0xf] %vm2053_vm9, %v1996_v9 }
 0x1a2   : > { %2072 = vst.msk [vmem:[#allocation3 + $0x48] sm:$0xf] %vm2053_vm9, %v1994_v10  ;;  %1241 = vrot.lane.b32.xlu1 %v8784_v5, %s9990_s23 }
 0x1a3   : > { %1239 = vrot.lane.b32.xlu0 %v8783_v6, %s9990_s23 }
 0x1a4   : > { %v2250_v15 = vpop.permute.xlu1 %2249 }
 0x1a5   : > { %v2248_v16 = vpop.permute.xlu0 %2247  ;;  %2329 = vst.msk [vmem:[#allocation3 + $0x44] sm:$0xf] %vm2311_vm10, %v2250_v15 }
 0x1a6   : > { %2328 = vst.msk [vmem:[#allocation3 + $0x40] sm:$0xf] %vm2311_vm10, %v2248_v16  ;;  %1245 = vrot.lane.b32.xlu1 %v8786_v11, %s9990_s23 }
 0x1a7   : > { %1243 = vrot.lane.b32.xlu0 %v8785_v12, %s9990_s23 }
 0x1a8   : > { %v2254_v21 = vpop.permute.xlu1 %2253 }
 0x1a9   : > { %v2252_v22 = vpop.permute.xlu0 %2251  ;;  %2331 = vst.msk [vmem:[#allocation3 + $0x4c] sm:$0xf] %vm2311_vm10, %v2254_v21 }
 0x1aa   : > { %2330 = vst.msk [vmem:[#allocation3 + $0x48] sm:$0xf] %vm2311_vm10, %v2252_v22  ;;  %1499 = vrot.lane.b32.xlu1 %v8816_v17, %s9991_s27 }
 0x1ab   : > { %1497 = vrot.lane.b32.xlu0 %v8815_v18, %s9991_s27 }
 0x1ac   : > { %v968_v27 = vpop.permute.xlu1 %967 }
 0x1ad   : > { %v966_v28 = vpop.permute.xlu0 %965  ;;  %v9558_v29 = vld [vmem:[#allocation3 + $0x40] sm:$0xff]   ;;  %1043 = vst.msk [vmem:[#allocation3 + $0x54] sm:$0xf] %vm1021_vm5, %v968_v27 }
 0x1ae   : > { %1042 = vst.msk [vmem:[#allocation3 + $0x50] sm:$0xf] %vm1021_vm5, %v966_v28  ;;  %1503 = vrot.lane.b32.xlu1 %v8818_v23, %s9991_s27  ;;  %9413 = vmatprep.mubr.msk.bf16.mxu0 %vm2477_vm11, %v9558_v29 }
 0x1af   : > { %1501 = vrot.lane.b32.xlu0 %v8817_v24, %s9991_s27  ;;  %s10002_s27 = smov [#allocation13]  }
 0x1b0   : > { %v972_v34 = vpop.permute.xlu1 %971 }
 0x1b1   : > { %v970_v35 = vpop.permute.xlu0 %969  ;;  %v9559_v36 = vld [vmem:[#allocation3 + $0x48] sm:$0xff]   ;;  %1045 = vst.msk [vmem:[#allocation3 + $0x5c] sm:$0xf] %vm1021_vm5, %v972_v34 }
 0x1b2   : > { %1044 = vst.msk [vmem:[#allocation3 + $0x58] sm:$0xf] %vm1021_vm5, %v970_v35  ;;  %1757 = vrot.lane.b32.xlu1 %v8848_v30, %s9992_s28  ;;  %9414 = vmatmul.mubr.msk.bf16.gmra.mrb[16].mxu0 %vm2477_vm11, %v9559_v36 }
 0x1b3   : > { %1755 = vrot.lane.b32.xlu0 %v8847_v31, %s9992_s28 }
 0x1b4   : > { %v1226_v41 = vpop.permute.xlu1 %1225 }
 0x1b5   : > { %v1224_v42 = vpop.permute.xlu0 %1223  ;;  %1301 = vst.msk [vmem:[#allocation3 + $0x54] sm:$0xf] %vm1279_vm6, %v1226_v41 }
 0x1b6   : > { %1300 = vst.msk [vmem:[#allocation3 + $0x50] sm:$0xf] %vm1279_vm6, %v1224_v42  ;;  %1761 = vrot.lane.b32.xlu1 %v8850_v37, %s9992_s28 }
 0x1b7   : > { %1759 = vrot.lane.b32.xlu0 %v8849_v38, %s9992_s28  ;;  %s9996_s28 = smov 32  }
 0x1b8   : > { %v1230_v47 = vpop.permute.xlu1 %1229 }
 0x1b9   : > { %v1228_v48 = vpop.permute.xlu0 %1227  ;;  %1303 = vst.msk [vmem:[#allocation3 + $0x5c] sm:$0xf] %vm1279_vm6, %v1230_v47 }
 0x1ba   : > { %1302 = vst.msk [vmem:[#allocation3 + $0x58] sm:$0xf] %vm1279_vm6, %v1228_v48  ;;  %2015 = vrot.lane.b32.xlu1 %v8880_v43, %s9993_s30 }
 0x1bb   : > { %2013 = vrot.lane.b32.xlu0 %v8879_v44, %s9993_s30 }
 0x1bc   : > { %v1484_v53 = vpop.permute.xlu1 %1483 }
 0x1bd   : > { %v1482_v54 = vpop.permute.xlu0 %1481  ;;  %1559 = vst.msk [vmem:[#allocation3 + $0x54] sm:$0xf] %vm1537_vm7, %v1484_v53 }
 0x1be   : > { %1558 = vst.msk [vmem:[#allocation3 + $0x50] sm:$0xf] %vm1537_vm7, %v1482_v54  ;;  %2019 = vrot.lane.b32.xlu1 %v8882_v49, %s9993_s30 }
 0x1bf   : > { %2017 = vrot.lane.b32.xlu0 %v8881_v50, %s9993_s30  ;;  %s9997_s30 = smov 64  }
 0x1c0   : > { %v1488_v59 = vpop.permute.xlu1 %1487 }
 0x1c1   : > { %v1486_v60 = vpop.permute.xlu0 %1485  ;;  %1561 = vst.msk [vmem:[#allocation3 + $0x5c] sm:$0xf] %vm1537_vm7, %v1488_v59 }
 0x1c2   : > { %1560 = vst.msk [vmem:[#allocation3 + $0x58] sm:$0xf] %vm1537_vm7, %v1486_v60  ;;  %2273 = vrot.lane.b32.xlu1 %v8912_v55, %s9995_s21 }
 0x1c3   : > { %2271 = vrot.lane.b32.xlu0 %v8911_v56, %s9995_s21 }
 0x1c4   : > { %v1742_v63 = vpop.permute.xlu1 %1741 }
 0x1c5   : > { %v1740_v1 = vpop.permute.xlu0 %1739  ;;  %1817 = vst.msk [vmem:[#allocation3 + $0x54] sm:$0xf] %vm1795_vm8, %v1742_v63  ;;  %v9399_v3 = vpop.f32.mrb[0].mxu0 }
 0x1c6   : > { %1816 = vst.msk [vmem:[#allocation3 + $0x50] sm:$0xf] %vm1795_vm8, %v1740_v1  ;;  %2277 = vrot.lane.b32.xlu1 %v8914_v61, %s9995_s21  ;;  %v2703_v5 = vmul.f32 %v9399_v3, %v10624_v2  ;;  %v2567_v6 = vpop.f32.mrb[1].mxu0 }
 0x1c7   : > { %2275 = vrot.lane.b32.xlu0 %v8913_v62, %s9995_s21  ;;  %v2701_v7 = vmul.f32 %v10624_v2, %v2567_v6  ;;  %v9400_v11 = vpop.f32.mrb[2].mxu0 }
 0x1c8   : > { %v1746_v8 = vpop.permute.xlu1 %1745  ;;  %v2742_v10 = vadd.f32 %v10633_v4, %v2703_v5  ;;  %v2704_v13 = vmul.f32 %v9400_v11, %v10624_v2  ;;  %v2570_v14 = vpop.f32.mrb[3].mxu0 }
 0x1c9   : > { %v1744_v9 = vpop.permute.xlu0 %1743  ;;  %1819 = vst.msk [vmem:[#allocation3 + $0x5c] sm:$0xf] %vm1795_vm8, %v1746_v8  ;;  %v2740_v12 = vadd.f32 %v10633_v4, %v2701_v7  ;;  %v2702_v16 = vmul.f32 %v10624_v2, %v2570_v14 }
 0x1ca   : > { %1818 = vst.msk [vmem:[#allocation3 + $0x58] sm:$0xf] %vm1795_vm8, %v1744_v9  ;;  %v2774_v15 = vmax.f32 %v2742_v10, 0.0  ;;  %v2743_v18 = vadd.f32 %v10633_v4, %v2704_v13  ;;  %v9566_v9 = vld [vmem:[%s11392_s4] sm:$0xff]   ;;  %v9998_v10 = vmov 0   ;;  %v9567_v13 = vld [vmem:[%s11392_s4 + $0x8] sm:$0xff]  }
 0x1cb   : > { %v2772_v17 = vmax.f32 %v2740_v12, 0.0  ;;  %v2741_v21 = vadd.f32 %v10633_v4, %v2702_v16  ;;  %3934 = vmatprep.subr.bf16.mxu1 %v9998_v10  ;;  %4534 = vmatprep.subr.bf16.mxu0 %v9998_v10  ;;  %v9568_v16 = vld [vmem:[%s11392_s4 + $0x10] sm:$0xff]  }
 0x1cc   : > { %v2000_v19 = vpop.permute.xlu1 %1999  ;;  %2810 = vst.msk [vmem:[#allocation4 + $0x14] sm:$0xff] %vm2807_vm14, %v2774_v15  ;;  %v2775_v22 = vmax.f32 %v2743_v18, 0.0  ;;  %3935 = vmatpush1.bf16.msra.mxu1 %v9566_v9 }
 0x1cd   : > { %v1998_v20 = vpop.permute.xlu0 %1997  ;;  %2075 = vst.msk [vmem:[#allocation3 + $0x54] sm:$0xf] %vm2053_vm9, %v2000_v19  ;;  %v2773_v23 = vmax.f32 %v2741_v21, 0.0  ;;  %3936 = vmatprep.subr.bf16.mxu1 %v9998_v10 }
 0x1ce   : > { %2074 = vst.msk [vmem:[#allocation3 + $0x50] sm:$0xf] %vm2053_vm9, %v1998_v20  ;;  %v9570_v20 = vld [vmem:[%s11392_s4 + $0x20] sm:$0xff]  }
 0x1cf   : > { %2808 = vst.msk [vmem:[#allocation4 + $0x4] sm:$0xff] %vm2807_vm14, %v2772_v17  ;;  %2811 = vst.msk [vmem:[#allocation4 + $0x1c] sm:$0xff] %vm2807_vm14, %v2775_v22  ;;  %v9569_v17 = vld [vmem:[%s11392_s4 + $0x18] sm:$0xff]  }
 0x1d0   : > { %v2004_v24 = vpop.permute.xlu1 %2003  ;;  %2809 = vst.msk [vmem:[#allocation4 + $0xc] sm:$0xff] %vm2807_vm14, %v2773_v23  ;;  %3937 = vmatpush1.bf16.msra.mxu1 %v9567_v13 }
 0x1d1   : > { %v2002_v25 = vpop.permute.xlu0 %2001  ;;  %2077 = vst.msk [vmem:[#allocation3 + $0x5c] sm:$0xf] %vm2053_vm9, %v2004_v24  ;;  %3938 = vmatprep.subr.bf16.mxu1 %v9998_v10  ;;  %v9571_v24 = vld [vmem:[%s11392_s4 + $0x28] sm:$0xff]  }
 0x1d2   : > { %2076 = vst.msk [vmem:[#allocation3 + $0x58] sm:$0xf] %vm2053_vm9, %v2002_v25 }
 0x1d4   : > { %v2258_v26 = vpop.permute.xlu1 %2257  ;;  %3939 = vmatpush1.bf16.msra.mxu1 %v9568_v16 }
 0x1d5   : > { %v2256_v27 = vpop.permute.xlu0 %2255  ;;  %2333 = vst.msk [vmem:[#allocation3 + $0x54] sm:$0xf] %vm2311_vm10, %v2258_v26  ;;  %3940 = vmatprep.subr.bf16.mxu1 %v9998_v10 }
 0x1d6   : > { %2332 = vst.msk [vmem:[#allocation3 + $0x50] sm:$0xf] %vm2311_vm10, %v2256_v27  ;;  %v3197_v28 = vld [vmem:[#allocation4 + $0x14] ss:$2 sm:$0xff]  ;;  %v3229_v29 = vld [vmem:[#allocation4 + $0x15] ss:$2 sm:$0xff] }
 0x1d7   : > { %v3583_v30 = vld [vmem:[#allocation4 + $0x8] ss:$2 sm:$0xff]  ;;  %v3615_v31 = vld [vmem:[#allocation4 + $0x9] ss:$2 sm:$0xff]  ;;  %v3259_v43 = vmax.f32 %v3197_v28, %v3229_v29 }
 0x1d8   : > { %v2262_v32 = vpop.permute.xlu1 %2261  ;;  %v3003_v34 = vld [vmem:[#allocation4 + $0x12] ss:$2 sm:$0xff]  ;;  %v3035_v35 = vld [vmem:[#allocation4 + $0x13] ss:$2 sm:$0xff]  ;;  %v3001_v36 = vld [vmem:[#allocation4 + $0x2] ss:$2 sm:$0xff]  ;;  %v3646_v38 = vmax.f32 %v3583_v30, %v3615_v31  ;;  %3941 = vmatpush1.bf16.msra.mxu1 %v9569_v17 }
 0x1d9   : > { %v2260_v33 = vpop.permute.xlu0 %2259  ;;  %2335 = vst.msk [vmem:[#allocation3 + $0x5c] sm:$0xf] %vm2311_vm10, %v2262_v32  ;;  %v3033_v37 = vld [vmem:[#allocation4 + $0x3] ss:$2 sm:$0xff]  ;;  %v3065_v39 = vmax.f32 %v3003_v34, %v3035_v35  ;;  %v3195_v41 = vld [vmem:[#allocation4 + $0x4] ss:$2 sm:$0xff]  ;;  %v8948_v62 = vpack.c.bf16 %v3259_v43, %v3259_v43  ;;  %3942 = vmatprep.subr.bf16.mxu1 %v9998_v10 }
 0x1da   : > { %2334 = vst.msk [vmem:[#allocation3 + $0x58] sm:$0xf] %vm2311_vm10, %v2260_v33  ;;  %v3064_v40 = vmax.f32 %v3001_v36, %v3033_v37  ;;  %v3227_v42 = vld [vmem:[#allocation4 + $0x5] ss:$2 sm:$0xff]  ;;  %v3389_v44 = vld [vmem:[#allocation4 + $0x6] ss:$2 sm:$0xff]  ;;  %v8979_v47 = vpack.c.bf16 %v3646_v38, %v3646_v38 }
 0x1db   : > { %v2842_v45 = vld [vmem:[#allocation4 + $0x10] ss:$2 sm:$0xff]  ;;  %v2874_v46 = vld [vmem:[#allocation4 + $0x11] ss:$2 sm:$0xff]  ;;  %v8932_v50 = vpack.c.bf16 %v3065_v39, %v3065_v39  ;;  %v3258_v53 = vmax.f32 %v3195_v41, %v3227_v42  ;;  %v2840_v56 = vld [vmem:[#allocation4] ss:$2 sm:$0xff] }
 0x1dc   : > { %v976_v48 = vpop.permute.xlu1 %975  ;;  %v8931_v51 = vpack.c.bf16 %v3064_v40, %v3064_v40  ;;  %v2904_v54 = vmax.f32 %v2842_v45, %v2874_v46  ;;  %v3421_v55 = vld [vmem:[#allocation4 + $0x7] ss:$2 sm:$0xff]  ;;  %3726 = vst.msk [vmem:[#allocation5 + $0x4] sm:$0xf] %vm2804_vm12, %v8979_v47  ;;  %3943 = vmatpush1.bf16.msra.mxu1 %v9570_v20 }
 0x1dd   : > { %v974_v49 = vpop.permute.xlu0 %973  ;;  %v9560_v52 = vld [vmem:[#allocation3 + $0x50] sm:$0xff]   ;;  %1047 = vst.msk [vmem:[#allocation3 + $0x64] sm:$0xf] %vm1021_vm5, %v976_v48  ;;  %v2872_v57 = vld [vmem:[#allocation4 + $0x1] ss:$2 sm:$0xff]  ;;  %3130 = vrot.lane.b32.xlu1 %v8932_v50, %s9996_s28  ;;  %v8947_v63 = vpack.c.bf16 %v3258_v53, %v3258_v53  ;;  %v3452_v3 = vmax.f32 %v3389_v44, %v3421_v55  ;;  %3944 = vmatprep.subr.bf16.mxu1 %v9998_v10  ;;  %v9574_v48 = vld [vmem:[%s11392_s4 + $0x40] sm:$0xff]  }
 0x1de   : > { %1046 = vst.msk [vmem:[#allocation3 + $0x60] sm:$0xf] %vm1021_vm5, %v974_v49  ;;  %3128 = vrot.lane.b32.xlu0 %v8931_v51, %s9996_s28  ;;  %v8916_v58 = vpack.c.bf16 %v2904_v54, %v2904_v54  ;;  %v2903_v59 = vmax.f32 %v2840_v56, %v2872_v57  ;;  %9417 = vmatprep.mubr.msk.bf16.mxu0 %vm2477_vm11, %v9560_v52  ;;  %v9572_v35 = vld [vmem:[%s11392_s4 + $0x30] sm:$0xff]   ;;  %v9573_v44 = vld [vmem:[%s11392_s4 + $0x38] sm:$0xff]   ;;  %v9575_v55 = vld [vmem:[%s11392_s4 + $0x48] sm:$0xff]  }
 0x1df   : > { %v8963_v8 = vpack.c.bf16 %v3452_v3, %v3452_v3 }
 0x1e0   : > { %v980_v60 = vpop.permute.xlu1 %979  ;;  %2984 = vst.msk [vmem:[#allocation5 + $0x8] sm:$0xf] %vm2804_vm12, %v8916_v58  ;;  %v8915_v5 = vpack.c.bf16 %v2903_v59, %v2903_v59  ;;  %3945 = vmatpush1.bf16.msra.mxu1 %v9571_v24 }
 0x1e1   : > { %v978_v61 = vpop.permute.xlu0 %977  ;;  %v9561_v1 = vld [vmem:[#allocation3 + $0x58] sm:$0xff]   ;;  %1049 = vst.msk [vmem:[#allocation3 + $0x6c] sm:$0xf] %vm1021_vm5, %v980_v60  ;;  %3324 = vrot.lane.b32.xlu1 %v8948_v62, %s9997_s30  ;;  %3946 = vmatprep.subr.bf16.mxu1 %v9998_v10 }
 0x1e2   : > { %1048 = vst.msk [vmem:[#allocation3 + $0x68] sm:$0xf] %vm1021_vm5, %v978_v61  ;;  %3322 = vrot.lane.b32.xlu0 %v8947_v63, %s9997_s30  ;;  %9418 = vmatmul.mubr.msk.bf16.gmra.mrb[20].mxu0 %vm2477_vm11, %v9561_v1 }
 0x1e3   : > { %2983 = vst.msk [vmem:[#allocation5] sm:$0xf] %vm2804_vm12, %v8915_v5 }
 0x1e4   : > { %v1234_v6 = vpop.permute.xlu1 %1233  ;;  %3947 = vmatpush1.bf16.msra.mxu1 %v9572_v35 }
 0x1e5   : > { %v1232_v7 = vpop.permute.xlu0 %1231  ;;  %1305 = vst.msk [vmem:[#allocation3 + $0x64] sm:$0xf] %vm1279_vm6, %v1234_v6  ;;  %3948 = vmatprep.subr.bf16.mxu1 %v9998_v10 }
 0x1e6   : > { %1304 = vst.msk [vmem:[#allocation3 + $0x60] sm:$0xf] %vm1279_vm6, %v1232_v7  ;;  %3516 = vrot.lane.b32.xlu0 %v8963_v8, %s9999_s20 }
 0x1e8   : > { %v1238_v11 = vpop.permute.xlu1 %1237  ;;  %3949 = vmatpush1.bf16.msra.mxu1 %v9573_v44 }
 0x1e9   : > { %v1236_v12 = vpop.permute.xlu0 %1235  ;;  %1307 = vst.msk [vmem:[#allocation3 + $0x6c] sm:$0xf] %vm1279_vm6, %v1238_v11  ;;  %3950 = vmatprep.subr.bf16.mxu1 %v9998_v10 }
 0x1ea   : > { %1306 = vst.msk [vmem:[#allocation3 + $0x68] sm:$0xf] %vm1279_vm6, %v1236_v12 }
 0x1ec   : > { %v1492_v14 = vpop.permute.xlu1 %1491  ;;  %3951 = vmatpush1.bf16.msra.mxu1 %v9574_v48 }
 0x1ed   : > { %v1490_v15 = vpop.permute.xlu0 %1489  ;;  %1563 = vst.msk [vmem:[#allocation3 + $0x64] sm:$0xf] %vm1537_vm7, %v1492_v14  ;;  %3952 = vmatprep.subr.bf16.mxu1 %v9998_v10 }
 0x1ee   : > { %1562 = vst.msk [vmem:[#allocation3 + $0x60] sm:$0xf] %vm1537_vm7, %v1490_v15 }
 0x1f0   : > { %v1496_v18 = vpop.permute.xlu1 %1495  ;;  %3953 = vmatpush1.bf16.msra.mxu1 %v9575_v55 }
 0x1f1   : > { %v1494_v19 = vpop.permute.xlu0 %1493  ;;  %1565 = vst.msk [vmem:[#allocation3 + $0x6c] sm:$0xf] %vm1537_vm7, %v1496_v18 }
 0x1f2   : > { %1564 = vst.msk [vmem:[#allocation3 + $0x68] sm:$0xf] %vm1537_vm7, %v1494_v19 }
 0x1f4   : > { %v1750_v21 = vpop.permute.xlu1 %1749 }
 0x1f5   : > { %v1748_v22 = vpop.permute.xlu0 %1747  ;;  %1821 = vst.msk [vmem:[#allocation3 + $0x64] sm:$0xf] %vm1795_vm8, %v1750_v21  ;;  %v9403_v23 = vpop.f32.mrb[4].mxu0 }
 0x1f6   : > { %1820 = vst.msk [vmem:[#allocation3 + $0x60] sm:$0xf] %vm1795_vm8, %v1748_v22  ;;  %v2707_v25 = vmul.f32 %v9403_v23, %v10624_v2  ;;  %v2583_v26 = vpop.f32.mrb[5].mxu0 }
 0x1f7   : > { %v2705_v27 = vmul.f32 %v10624_v2, %v2583_v26  ;;  %v9404_v31 = vpop.f32.mrb[6].mxu0 }
 0x1f8   : > { %v1754_v28 = vpop.permute.xlu1 %1753  ;;  %v2746_v30 = vadd.f32 %v10633_v4, %v2707_v25  ;;  %v2708_v33 = vmul.f32 %v9404_v31, %v10624_v2  ;;  %v2586_v34 = vpop.f32.mrb[7].mxu0 }
 0x1f9   : > { %v1752_v29 = vpop.permute.xlu0 %1751  ;;  %1823 = vst.msk [vmem:[#allocation3 + $0x6c] sm:$0xf] %vm1795_vm8, %v1754_v28  ;;  %v2744_v32 = vadd.f32 %v10633_v4, %v2705_v27  ;;  %v2706_v37 = vmul.f32 %v10624_v2, %v2586_v34 }
 0x1fa   : > { %1822 = vst.msk [vmem:[#allocation3 + $0x68] sm:$0xf] %vm1795_vm8, %v1752_v29  ;;  %v2778_v36 = vmax.f32 %v2746_v30, 0.0  ;;  %v2747_v39 = vadd.f32 %v10633_v4, %v2708_v33 }
 0x1fb   : > { %v2776_v38 = vmax.f32 %v2744_v32, 0.0  ;;  %v2745_v42 = vadd.f32 %v10633_v4, %v2706_v37 }
 0x1fc   : > { %v2008_v40 = vpop.permute.xlu1 %2007  ;;  %2814 = vst.msk [vmem:[#allocation4 + $0x34] sm:$0xff] %vm2807_vm14, %v2778_v36  ;;  %v2779_v43 = vmax.f32 %v2747_v39, 0.0 }
 0x1fd   : > { %v2006_v41 = vpop.permute.xlu0 %2005  ;;  %2079 = vst.msk [vmem:[#allocation3 + $0x64] sm:$0xf] %vm2053_vm9, %v2008_v40  ;;  %v2777_v45 = vmax.f32 %v2745_v42, 0.0 }
 0x1fe   : > { %2078 = vst.msk [vmem:[#allocation3 + $0x60] sm:$0xf] %vm2053_vm9, %v2006_v41 }
 0x1ff   : > { %2812 = vst.msk [vmem:[#allocation4 + $0x24] sm:$0xff] %vm2807_vm14, %v2776_v38  ;;  %2815 = vst.msk [vmem:[#allocation4 + $0x3c] sm:$0xff] %vm2807_vm14, %v2779_v43 }
 0x200   : > { %v2012_v46 = vpop.permute.xlu1 %2011  ;;  %2813 = vst.msk [vmem:[#allocation4 + $0x2c] sm:$0xff] %vm2807_vm14, %v2777_v45 }
 0x201   : > { %v2010_v47 = vpop.permute.xlu0 %2009  ;;  %2081 = vst.msk [vmem:[#allocation3 + $0x6c] sm:$0xf] %vm2053_vm9, %v2012_v46 }
 0x202   : > { %2080 = vst.msk [vmem:[#allocation3 + $0x68] sm:$0xf] %vm2053_vm9, %v2010_v47 }
 0x204   : > { %v2266_v49 = vpop.permute.xlu1 %2265 }
 0x205   : > { %v2264_v50 = vpop.permute.xlu0 %2263  ;;  %2337 = vst.msk [vmem:[#allocation3 + $0x64] sm:$0xf] %vm2311_vm10, %v2266_v49 }
 0x206   : > { %v3585_v51 = vld [vmem:[#allocation4 + $0x18] ss:$2 sm:$0xff]  ;;  %v3617_v52 = vld [vmem:[#allocation4 + $0x19] ss:$2 sm:$0xff]  ;;  %2336 = vst.msk [vmem:[#allocation3 + $0x60] sm:$0xf] %vm2311_vm10, %v2264_v50 }
 0x207   : > { %v3391_v53 = vld [vmem:[#allocation4 + $0x16] ss:$2 sm:$0xff]  ;;  %v3423_v54 = vld [vmem:[#allocation4 + $0x17] ss:$2 sm:$0xff]  ;;  %v3647_v56 = vmax.f32 %v3585_v51, %v3617_v52  ;;  %v3393_v16 = vld [vmem:[#allocation4 + $0x26] ss:$2 sm:$0xff] }
 0x208   : > { %v3453_v57 = vmax.f32 %v3391_v53, %v3423_v54  ;;  %v3587_v58 = vld [vmem:[#allocation4 + $0x28] ss:$2 sm:$0xff]  ;;  %v3619_v59 = vld [vmem:[#allocation4 + $0x29] ss:$2 sm:$0xff]  ;;  %v2270_v60 = vpop.permute.xlu1 %2269 }
 0x209   : > { %v2268_v61 = vpop.permute.xlu0 %2267  ;;  %v3005_v62 = vld [vmem:[#allocation4 + $0x22] ss:$2 sm:$0xff]  ;;  %v8980_v1 = vpack.c.bf16 %v3647_v56, %v3647_v56  ;;  %v3648_v3 = vmax.f32 %v3587_v58, %v3619_v59  ;;  %2339 = vst.msk [vmem:[#allocation3 + $0x6c] sm:$0xf] %vm2311_vm10, %v2270_v60  ;;  %v3037_v6 = vld [vmem:[#allocation4 + $0x23] ss:$2 sm:$0xff] }
 0x20a   : > { %v3201_v63 = vld [vmem:[#allocation4 + $0x34] ss:$2 sm:$0xff]  ;;  %2338 = vst.msk [vmem:[#allocation3 + $0x68] sm:$0xf] %vm2311_vm10, %v2268_v61  ;;  %v8964_v5 = vpack.c.bf16 %v3453_v57, %v3453_v57  ;;  %v3039_v8 = vld [vmem:[#allocation4 + $0x33] ss:$2 sm:$0xff]  ;;  %v3066_v9 = vmax.f32 %v3005_v62, %v3037_v6 }
 0x20b   : > { %v3007_v7 = vld [vmem:[#allocation4 + $0x32] ss:$2 sm:$0xff]  ;;  %v3231_v13 = vld [vmem:[#allocation4 + $0x25] ss:$2 sm:$0xff]  ;;  %v3233_v14 = vld [vmem:[#allocation4 + $0x35] ss:$2 sm:$0xff]  ;;  %v8981_v15 = vpack.c.bf16 %v3648_v3, %v3648_v3 }
 0x20c   : > { %v3067_v11 = vmax.f32 %v3007_v7, %v3039_v8  ;;  %v3199_v12 = vld [vmem:[#allocation4 + $0x24] ss:$2 sm:$0xff]  ;;  %3727 = vst.msk [vmem:[#allocation5 + $0xc] sm:$0xf] %vm2804_vm12, %v8980_v1  ;;  %3518 = vrot.lane.b32.xlu1 %v8964_v5, %s9999_s20  ;;  %v2876_v18 = vld [vmem:[#allocation4 + $0x21] ss:$2 sm:$0xff]  ;;  %v984_v19 = vpop.permute.xlu1 %983  ;;  %v8933_v21 = vpack.c.bf16 %v3066_v9, %v3066_v9  ;;  %v3261_v26 = vmax.f32 %v3201_v63, %v3233_v14 }
 0x20d   : > { %v2844_v17 = vld [vmem:[#allocation4 + $0x20] ss:$2 sm:$0xff]  ;;  %v982_v20 = vpop.permute.xlu0 %981  ;;  %v3260_v23 = vmax.f32 %v3199_v12, %v3231_v13  ;;  %3728 = vst.msk [vmem:[#allocation5 + $0x14] sm:$0xf] %vm2804_vm12, %v8981_v15  ;;  %v3425_v27 = vld [vmem:[#allocation4 + $0x27] ss:$2 sm:$0xff] }
 0x20e   : > { %v9562_v22 = vld [vmem:[#allocation3 + $0x60] sm:$0xff]   ;;  %v2905_v24 = vmax.f32 %v2844_v17, %v2876_v18  ;;  %1051 = vst.msk [vmem:[#allocation3 + $0x74] sm:$0xf] %vm1021_vm5, %v984_v19  ;;  %1050 = vst.msk [vmem:[#allocation3 + $0x70] sm:$0xf] %vm1021_vm5, %v982_v20  ;;  %v8934_v25 = vpack.c.bf16 %v3067_v11, %v3067_v11  ;;  %3132 = vrot.lane.b32.xlu0 %v8933_v21, %s9996_s28  ;;  %v3454_v36 = vmax.f32 %v3393_v16, %v3425_v27 }
 0x20f   : > { %v2846_v28 = vld [vmem:[#allocation4 + $0x30] ss:$2 sm:$0xff]  ;;  %v2878_v29 = vld [vmem:[#allocation4 + $0x31] ss:$2 sm:$0xff]  ;;  %9421 = vmatprep.mubr.msk.bf16.mxu0 %vm2477_vm11, %v9562_v22  ;;  %v8949_v34 = vpack.c.bf16 %v3260_v23, %v3260_v23  ;;  %v8950_v38 = vpack.c.bf16 %v3261_v26, %v3261_v26 }
 0x210   : > { %v8917_v30 = vpack.c.bf16 %v2905_v24, %v2905_v24  ;;  %v2906_v31 = vmax.f32 %v2846_v28, %v2878_v29  ;;  %3134 = vrot.lane.b32.xlu1 %v8934_v25, %s9996_s28  ;;  %v988_v32 = vpop.permute.xlu1 %987  ;;  %v8965_v41 = vpack.c.bf16 %v3454_v36, %v3454_v36 }
 0x211   : > { %v986_v33 = vpop.permute.xlu0 %985  ;;  %v9563_v35 = vld [vmem:[#allocation3 + $0x68] sm:$0xff]   ;;  %1054 = vst.msk [vmem:[#allocation3 + $0x7c] sm:$0x3] %vm1053_vm15, %v988_v32  ;;  %vm3386_vm15 = vcmask 780800  }
 0x212   : > { %2985 = vst.msk [vmem:[#allocation5 + $0x10] sm:$0xf] %vm2804_vm12, %v8917_v30  ;;  %v8918_v37 = vpack.c.bf16 %v2906_v31, %v2906_v31  ;;  %3326 = vrot.lane.b32.xlu0 %v8949_v34, %s9997_s30  ;;  %9422 = vmatmul.mubr.msk.bf16.gmra.mrb[24].mxu0 %vm2477_vm11, %v9563_v35 }
 0x213   : > { %1052 = vst.msk [vmem:[#allocation3 + $0x78] sm:$0xf] %vm1021_vm5, %v986_v33  ;;  %vm2343_vm5 = vcmask 279792  }
 0x214   : > { %2986 = vst.msk [vmem:[#allocation5 + $0x18] sm:$0xf] %vm2804_vm12, %v8918_v37  ;;  %3328 = vrot.lane.b32.xlu1 %v8950_v38, %s9997_s30  ;;  %v1242_v39 = vpop.permute.xlu1 %1241 }
 0x215   : > { %v1240_v40 = vpop.permute.xlu0 %1239  ;;  %1309 = vst.msk [vmem:[#allocation3 + $0x74] sm:$0xf] %vm1279_vm6, %v1242_v39 }
 0x216   : > { %1308 = vst.msk [vmem:[#allocation3 + $0x70] sm:$0xf] %vm1279_vm6, %v1240_v40  ;;  %3520 = vrot.lane.b32.xlu0 %v8965_v41, %s9999_s20 }
 0x218   : > { %v1246_v42 = vpop.permute.xlu1 %1245 }
 0x219   : > { %v1244_v43 = vpop.permute.xlu0 %1243  ;;  %1312 = vst.msk [vmem:[#allocation3 + $0x7c] sm:$0x3] %vm1311_vm0, %v1246_v42  ;;  %vm3580_vm0 = vcmask 1043200  }
 0x21a   : > { %1310 = vst.msk [vmem:[#allocation3 + $0x78] sm:$0xf] %vm1279_vm6, %v1244_v43  ;;  %vm3176_vm6 = vcmask 519424  }
 0x21c   : > { %v1500_v44 = vpop.permute.xlu1 %1499 }
 0x21d   : > { %v1498_v45 = vpop.permute.xlu0 %1497  ;;  %1567 = vst.msk [vmem:[#allocation3 + $0x74] sm:$0xf] %vm1537_vm7, %v1500_v44 }
 0x21e   : > { %1566 = vst.msk [vmem:[#allocation3 + $0x70] sm:$0xf] %vm1537_vm7, %v1498_v45 }
 0x220   : > { %v1504_v46 = vpop.permute.xlu1 %1503 }
 0x221   : > { %v1502_v47 = vpop.permute.xlu0 %1501  ;;  %1570 = vst.msk [vmem:[#allocation3 + $0x7c] sm:$0x3] %vm1569_vm1, %v1504_v46  ;;  %vm4112_vm1 = vcmask 521216  }
 0x222   : > { %1568 = vst.msk [vmem:[#allocation3 + $0x78] sm:$0xf] %vm1537_vm7, %v1502_v47  ;;  %vm3370_vm7 = vcmask 781824  }
 0x224   : > { %v1758_v48 = vpop.permute.xlu1 %1757 }
 0x225   : > { %v1756_v49 = vpop.permute.xlu0 %1755  ;;  %1825 = vst.msk [vmem:[#allocation3 + $0x74] sm:$0xf] %vm1795_vm8, %v1758_v48  ;;  %v9407_v50 = vpop.f32.mrb[8].mxu0 }
 0x226   : > { %1824 = vst.msk [vmem:[#allocation3 + $0x70] sm:$0xf] %vm1795_vm8, %v1756_v49  ;;  %v2711_v51 = vmul.f32 %v9407_v50, %v10624_v2  ;;  %v2599_v52 = vpop.f32.mrb[9].mxu0 }
 0x227   : > { %v2709_v53 = vmul.f32 %v10624_v2, %v2599_v52  ;;  %v9408_v57 = vpop.f32.mrb[10].mxu0 }
 0x228   : > { %v1762_v54 = vpop.permute.xlu1 %1761  ;;  %v2750_v56 = vadd.f32 %v10633_v4, %v2711_v51  ;;  %v2712_v59 = vmul.f32 %v9408_v57, %v10624_v2  ;;  %v2602_v60 = vpop.f32.mrb[11].mxu0 }
 0x229   : > { %v1760_v55 = vpop.permute.xlu0 %1759  ;;  %1828 = vst.msk [vmem:[#allocation3 + $0x7c] sm:$0x3] %vm1827_vm2, %v1762_v54  ;;  %v2748_v58 = vadd.f32 %v10633_v4, %v2709_v53  ;;  %v2710_v62 = vmul.f32 %v10624_v2, %v2602_v60  ;;  %vm4194_vm2 = vsmask.f32 3328 }
 0x22a   : > { %1826 = vst.msk [vmem:[#allocation3 + $0x78] sm:$0xf] %vm1795_vm8, %v1760_v55  ;;  %v2782_v61 = vmax.f32 %v2750_v56, 0.0  ;;  %v2751_v1 = vadd.f32 %v10633_v4, %v2712_v59  ;;  %vm3564_vm8 = vcmask 1044224  }
 0x22b   : > { %v2780_v63 = vmax.f32 %v2748_v58, 0.0  ;;  %v2749_v6 = vadd.f32 %v10633_v4, %v2710_v62 }
 0x22c   : > { %v2016_v3 = vpop.permute.xlu1 %2015  ;;  %2818 = vst.msk [vmem:[#allocation4 + $0x54] sm:$0xff] %vm2807_vm14, %v2782_v61  ;;  %v2783_v7 = vmax.f32 %v2751_v1, 0.0 }
 0x22d   : > { %v2014_v5 = vpop.permute.xlu0 %2013  ;;  %2083 = vst.msk [vmem:[#allocation3 + $0x74] sm:$0xf] %vm2053_vm9, %v2016_v3  ;;  %v2781_v8 = vmax.f32 %v2749_v6, 0.0 }
 0x22e   : > { %2082 = vst.msk [vmem:[#allocation3 + $0x70] sm:$0xf] %vm2053_vm9, %v2014_v5 }
 0x22f   : > { %2816 = vst.msk [vmem:[#allocation4 + $0x44] sm:$0xff] %vm2807_vm14, %v2780_v63  ;;  %2819 = vst.msk [vmem:[#allocation4 + $0x5c] sm:$0xff] %vm2807_vm14, %v2783_v7 }
 0x230   : > { %v2020_v9 = vpop.permute.xlu1 %2019  ;;  %2817 = vst.msk [vmem:[#allocation4 + $0x4c] sm:$0xff] %vm2807_vm14, %v2781_v8 }
 0x231   : > { %v2018_v11 = vpop.permute.xlu0 %2017  ;;  %2086 = vst.msk [vmem:[#allocation3 + $0x7c] sm:$0x3] %vm2085_vm4, %v2020_v9 }
 0x232   : > { %2084 = vst.msk [vmem:[#allocation3 + $0x78] sm:$0xf] %vm2053_vm9, %v2018_v11  ;;  %vm4093_vm9 = vcmask 517120  }
 0x233   : > { %4094 = vst.msk [vmem:[#allocation6] sm:$0x3] %vm4093_vm9, %v9988_v0  ;;  %4095 = vst.msk [vmem:[#allocation6 + $0x80] sm:$0x3] %vm4093_vm9, %v9988_v0 }
 0x234   : > { %v2274_v12 = vpop.permute.xlu1 %2273 }
 0x235   : > { %v2272_v13 = vpop.permute.xlu0 %2271  ;;  %2341 = vst.msk [vmem:[#allocation3 + $0x74] sm:$0xf] %vm2311_vm10, %v2274_v12 }
 0x236   : > { %v3589_v14 = vld [vmem:[#allocation4 + $0x38] ss:$2 sm:$0xff]  ;;  %v3621_v15 = vld [vmem:[#allocation4 + $0x39] ss:$2 sm:$0xff]  ;;  %2340 = vst.msk [vmem:[#allocation3 + $0x70] sm:$0xf] %vm2311_vm10, %v2272_v13 }
 0x237   : > { %v3395_v16 = vld [vmem:[#allocation4 + $0x36] ss:$2 sm:$0xff]  ;;  %v3649_v17 = vmax.f32 %v3589_v14, %v3621_v15  ;;  %v3427_v18 = vld [vmem:[#allocation4 + $0x37] ss:$2 sm:$0xff]  ;;  %v3397_v38 = vld [vmem:[#allocation4 + $0x46] ss:$2 sm:$0xff] }
 0x238   : > { %v3455_v19 = vmax.f32 %v3395_v16, %v3427_v18  ;;  %v3591_v21 = vld [vmem:[#allocation4 + $0x48] ss:$2 sm:$0xff]  ;;  %v3623_v22 = vld [vmem:[#allocation4 + $0x49] ss:$2 sm:$0xff]  ;;  %v2278_v23 = vpop.permute.xlu1 %2277 }
 0x239   : > { %v8982_v20 = vpack.c.bf16 %v3649_v17, %v3649_v17  ;;  %v2276_v24 = vpop.permute.xlu0 %2275  ;;  %v3009_v25 = vld [vmem:[#allocation4 + $0x42] ss:$2 sm:$0xff]  ;;  %v3650_v27 = vmax.f32 %v3591_v21, %v3623_v22  ;;  %2344 = vst.msk [vmem:[#allocation3 + $0x7c] sm:$0x3] %vm2343_vm5, %v2278_v23  ;;  %v3041_v29 = vld [vmem:[#allocation4 + $0x43] ss:$2 sm:$0xff] }
 0x23a   : > { %v3205_v26 = vld [vmem:[#allocation4 + $0x54] ss:$2 sm:$0xff]  ;;  %2342 = vst.msk [vmem:[#allocation3 + $0x78] sm:$0xf] %vm2311_vm10, %v2276_v24  ;;  %v8966_v28 = vpack.c.bf16 %v3455_v19, %v3455_v19  ;;  %v3043_v31 = vld [vmem:[#allocation4 + $0x53] ss:$2 sm:$0xff]  ;;  %v3068_v32 = vmax.f32 %v3009_v25, %v3041_v29 }
 0x23b   : > { %v3011_v30 = vld [vmem:[#allocation4 + $0x52] ss:$2 sm:$0xff]  ;;  %3729 = vst.msk [vmem:[#allocation5 + $0x1c] sm:$0xf] %vm2804_vm12, %v8982_v20  ;;  %v3235_v35 = vld [vmem:[#allocation4 + $0x45] ss:$2 sm:$0xff]  ;;  %v8983_v37 = vpack.c.bf16 %v3650_v27, %v3650_v27 }
 0x23c   : > { %v3069_v33 = vmax.f32 %v3011_v30, %v3043_v31  ;;  %v3203_v34 = vld [vmem:[#allocation4 + $0x44] ss:$2 sm:$0xff]  ;;  %v3237_v36 = vld [vmem:[#allocation4 + $0x55] ss:$2 sm:$0xff]  ;;  %3522 = vrot.lane.b32.xlu1 %v8966_v28, %s9999_s20  ;;  %v8935_v41 = vpack.c.bf16 %v3068_v32, %v3068_v32  ;;  %vm2998_vm10 = vcmask 256000  }
 0x23d   : > { %v2848_v39 = vld [vmem:[#allocation4 + $0x40] ss:$2 sm:$0xff]  ;;  %v2880_v40 = vld [vmem:[#allocation4 + $0x41] ss:$2 sm:$0xff]  ;;  %v3262_v42 = vmax.f32 %v3203_v34, %v3235_v35  ;;  %v9564_v43 = vld [vmem:[#allocation3 + $0x70] sm:$0xff]   ;;  %v3263_v46 = vmax.f32 %v3205_v26, %v3237_v36 }
 0x23e   : > { %v2907_v44 = vmax.f32 %v2848_v39, %v2880_v40  ;;  %3730 = vst.msk [vmem:[#allocation5 + $0x24] sm:$0xf] %vm2804_vm12, %v8983_v37  ;;  %v8936_v45 = vpack.c.bf16 %v3069_v33, %v3069_v33  ;;  %v3429_v47 = vld [vmem:[#allocation4 + $0x47] ss:$2 sm:$0xff]  ;;  %v2850_v48 = vld [vmem:[#allocation4 + $0x50] ss:$2 sm:$0xff]  ;;  %3136 = vrot.lane.b32.xlu0 %v8935_v41, %s9996_s28  ;;  %9425 = vmatprep.mubr.msk.bf16.mxu0 %vm2477_vm11, %v9564_v43 }
 0x23f   : > { %v2882_v49 = vld [vmem:[#allocation4 + $0x51] ss:$2 sm:$0xff]  ;;  %v8951_v52 = vpack.c.bf16 %v3262_v42, %v3262_v42  ;;  %v3456_v54 = vmax.f32 %v3397_v38, %v3429_v47  ;;  %v8952_v56 = vpack.c.bf16 %v3263_v46, %v3263_v46  ;;  %vm4650_vm5 = vsmask.f32 256 }
 0x240   : > { %v8919_v50 = vpack.c.bf16 %v2907_v44, %v2907_v44  ;;  %v2908_v51 = vmax.f32 %v2850_v48, %v2882_v49  ;;  %3138 = vrot.lane.b32.xlu1 %v8936_v45, %s9996_s28 }
 0x241   : > { %v9565_v53 = vld [vmem:[#allocation3 + $0x78] sm:$0x3f]   ;;  %v8967_v57 = vpack.c.bf16 %v3456_v54, %v3456_v54 }
 0x242   : > { %2987 = vst.msk [vmem:[#allocation5 + $0x20] sm:$0xf] %vm2804_vm12, %v8919_v50  ;;  %v8920_v55 = vpack.c.bf16 %v2908_v51, %v2908_v51  ;;  %3330 = vrot.lane.b32.xlu0 %v8951_v52, %s9997_s30  ;;  %9426 = vmatmul.mubr.msk.bf16.gmra.mrb[28].mxu0 %vm2477_vm11, %v9565_v53  ;;  %vm4096_vm11 = vcmask 523264  }
 0x244   : > { %2988 = vst.msk [vmem:[#allocation5 + $0x28] sm:$0xf] %vm2804_vm12, %v8920_v55  ;;  %3332 = vrot.lane.b32.xlu1 %v8952_v56, %s9997_s30 }
 0x246   : > { %3524 = vrot.lane.b32.xlu0 %v8967_v57, %s9999_s20 }
 0x24f   : > { %v3131_v58 = vpop.permute.xlu1 %3130 }
 0x250   : > { %v3129_v59 = vpop.permute.xlu0 %3128  ;;  %3178 = vst.msk [vmem:[#allocation5 + $0x8] sm:$0xf] %vm3176_vm6, %v3131_v58 }
 0x251   : > { %3177 = vst.msk [vmem:[#allocation5] sm:$0xf] %vm3176_vm6, %v3129_v59 }
 0x253   : > { %v3325_v60 = vpop.permute.xlu1 %3324 }
 0x254   : > { %v3323_v61 = vpop.permute.xlu0 %3322  ;;  %3372 = vst.msk [vmem:[#allocation5 + $0x8] sm:$0xf] %vm3370_vm7, %v3325_v60 }
 0x255   : > { %3371 = vst.msk [vmem:[#allocation5] sm:$0xf] %vm3370_vm7, %v3323_v61  ;;  %v9411_v62 = vpop.f32.mrb[12].mxu0 }
 0x256   : > { %v2715_v63 = vmul.f32 %v9411_v62, %v10624_v2  ;;  %v2615_v1 = vpop.f32.mrb[13].mxu0 }
 0x257   : > { %v2713_v5 = vmul.f32 %v10624_v2, %v2615_v1  ;;  %v9412_v6 = vpop.f32.mrb[14].mxu0 }
 0x258   : > { %v3517_v3 = vpop.permute.xlu0 %3516  ;;  %v2754_v7 = vadd.f32 %v10633_v4, %v2715_v63  ;;  %v2716_v8 = vmul.f32 %v9412_v6, %v10624_v2  ;;  %v2618_v9 = vpop.f32.mrb[15].mxu0 }
 0x259   : > { %3565 = vst.msk [vmem:[#allocation5] sm:$0xf] %vm3564_vm8, %v3517_v3  ;;  %v2752_v11 = vadd.f32 %v10633_v4, %v2713_v5  ;;  %v2714_v12 = vmul.f32 %v10624_v2, %v2618_v9  ;;  %v9578_v3 = vld [vmem:[#allocation5 + $0x4] ss:$8 sps:$4 sm:$0xff]  }
 0x25a   : > { %v2786_v13 = vmax.f32 %v2754_v7, 0.0  ;;  %v2755_v14 = vadd.f32 %v10633_v4, %v2716_v8  ;;  %8366 = vmatprep.mubr.msk.bf16.mxu1 %vm2807_vm14, %v9578_v3 }
 0x25b   : > { %v2784_v15 = vmax.f32 %v2752_v11, 0.0  ;;  %v2753_v16 = vadd.f32 %v10633_v4, %v2714_v12 }
 0x25c   : > { %2822 = vst.msk [vmem:[#allocation4 + $0x74] sm:$0xff] %vm2807_vm14, %v2786_v13  ;;  %v2787_v17 = vmax.f32 %v2755_v14, 0.0 }
 0x25d   : > { %2820 = vst.msk [vmem:[#allocation4 + $0x64] sm:$0xff] %vm2807_vm14, %v2784_v15  ;;  %v2785_v18 = vmax.f32 %v2753_v16, 0.0 }
 0x25e   : > { %2823 = vst.msk [vmem:[#allocation4 + $0x7c] sm:$0xff] %vm2807_vm14, %v2787_v17 }
 0x25f   : > { %2821 = vst.msk [vmem:[#allocation4 + $0x6c] sm:$0xff] %vm2807_vm14, %v2785_v18 }
 0x264   : > { %v3593_v19 = vld [vmem:[#allocation4 + $0x58] ss:$2 sm:$0xff]  ;;  %v3625_v20 = vld [vmem:[#allocation4 + $0x59] ss:$2 sm:$0xff] }
 0x265   : > { %v3399_v21 = vld [vmem:[#allocation4 + $0x56] ss:$2 sm:$0xff]  ;;  %v3651_v22 = vmax.f32 %v3593_v19, %v3625_v20  ;;  %v3431_v23 = vld [vmem:[#allocation4 + $0x57] ss:$2 sm:$0xff] }
 0x266   : > { %v3595_v24 = vld [vmem:[#allocation4 + $0x68] ss:$2 sm:$0xff]  ;;  %v3627_v25 = vld [vmem:[#allocation4 + $0x69] ss:$2 sm:$0xff]  ;;  %v3457_v26 = vmax.f32 %v3399_v21, %v3431_v23 }
 0x267   : > { %v3013_v27 = vld [vmem:[#allocation4 + $0x62] ss:$2 sm:$0xff]  ;;  %v8984_v28 = vpack.c.bf16 %v3651_v22, %v3651_v22  ;;  %v3652_v29 = vmax.f32 %v3595_v24, %v3627_v25  ;;  %v3045_v30 = vld [vmem:[#allocation4 + $0x63] ss:$2 sm:$0xff]  ;;  %v3015_v31 = vld [vmem:[#allocation4 + $0x72] ss:$2 sm:$0xff] }
 0x268   : > { %v3047_v32 = vld [vmem:[#allocation4 + $0x73] ss:$2 sm:$0xff]  ;;  %v8968_v33 = vpack.c.bf16 %v3457_v26, %v3457_v26  ;;  %v3070_v34 = vmax.f32 %v3013_v27, %v3045_v30  ;;  %v3207_v36 = vld [vmem:[#allocation4 + $0x64] ss:$2 sm:$0xff]  ;;  %v3209_v38 = vld [vmem:[#allocation4 + $0x74] ss:$2 sm:$0xff] }
 0x269   : > { %v3071_v35 = vmax.f32 %v3015_v31, %v3047_v32  ;;  %v3239_v37 = vld [vmem:[#allocation4 + $0x65] ss:$2 sm:$0xff]  ;;  %3731 = vst.msk [vmem:[#allocation5 + $0x2c] sm:$0xf] %vm2804_vm12, %v8984_v28  ;;  %v8985_v39 = vpack.c.bf16 %v3652_v29, %v3652_v29  ;;  %v3241_v40 = vld [vmem:[#allocation4 + $0x75] ss:$2 sm:$0xff] }
 0x26a   : > { %v2852_v41 = vld [vmem:[#allocation4 + $0x60] ss:$2 sm:$0xff]  ;;  %v2884_v42 = vld [vmem:[#allocation4 + $0x61] ss:$2 sm:$0xff]  ;;  %3526 = vrot.lane.b32.xlu1 %v8968_v33, %s9999_s20  ;;  %v8937_v43 = vpack.c.bf16 %v3070_v34, %v3070_v34  ;;  %v3264_v44 = vmax.f32 %v3207_v36, %v3239_v37  ;;  %v2854_v46 = vld [vmem:[#allocation4 + $0x70] ss:$2 sm:$0xff]  ;;  %v3265_v52 = vmax.f32 %v3209_v38, %v3241_v40 }
 0x26b   : > { %v2909_v45 = vmax.f32 %v2852_v41, %v2884_v42  ;;  %v2886_v47 = vld [vmem:[#allocation4 + $0x71] ss:$2 sm:$0xff]  ;;  %3732 = vst.msk [vmem:[#allocation5 + $0x34] sm:$0xf] %vm2804_vm12, %v8985_v39  ;;  %v3401_v48 = vld [vmem:[#allocation4 + $0x66] ss:$2 sm:$0xff]  ;;  %v8938_v51 = vpack.c.bf16 %v3071_v35, %v3071_v35 }
 0x26c   : > { %v3433_v49 = vld [vmem:[#allocation4 + $0x67] ss:$2 sm:$0xff]  ;;  %v2910_v50 = vmax.f32 %v2854_v46, %v2886_v47  ;;  %3140 = vrot.lane.b32.xlu0 %v8937_v43, %s9996_s28  ;;  %v8953_v55 = vpack.c.bf16 %v3264_v44, %v3264_v44  ;;  %v8954_v57 = vpack.c.bf16 %v3265_v52, %v3265_v52 }
 0x26d   : > { %v8921_v53 = vpack.c.bf16 %v2909_v45, %v2909_v45  ;;  %v3458_v56 = vmax.f32 %v3401_v48, %v3433_v49 }
 0x26e   : > { %v8922_v54 = vpack.c.bf16 %v2910_v50, %v2910_v50  ;;  %3142 = vrot.lane.b32.xlu1 %v8938_v51, %s9996_s28 }
 0x26f   : > { %2989 = vst.msk [vmem:[#allocation5 + $0x30] sm:$0xf] %vm2804_vm12, %v8921_v53  ;;  %v8969_v58 = vpack.c.bf16 %v3458_v56, %v3458_v56 }
 0x270   : > { %2990 = vst.msk [vmem:[#allocation5 + $0x38] sm:$0xf] %vm2804_vm12, %v8922_v54  ;;  %3334 = vrot.lane.b32.xlu0 %v8953_v55, %s9997_s30 }
 0x272   : > { %3336 = vrot.lane.b32.xlu1 %v8954_v57, %s9997_s30 }
 0x274   : > { %3528 = vrot.lane.b32.xlu0 %v8969_v58, %s9999_s20 }
 0x27e   : > { %v3519_v59 = vpop.permute.xlu1 %3518 }
 0x27f   : > { %3566 = vst.msk [vmem:[#allocation5 + $0x8] sm:$0xf] %vm3564_vm8, %v3519_v59 }
 0x280   : > { %v3133_v60 = vpop.permute.xlu0 %3132 }
 0x281   : > { %3179 = vst.msk [vmem:[#allocation5 + $0x10] sm:$0xf] %vm3176_vm6, %v3133_v60 }
 0x282   : > { %v3135_v61 = vpop.permute.xlu1 %3134 }
 0x283   : > { %3180 = vst.msk [vmem:[#allocation5 + $0x18] sm:$0xf] %vm3176_vm6, %v3135_v61 }
 0x284   : > { %v3327_v62 = vpop.permute.xlu0 %3326 }
 0x285   : > { %3373 = vst.msk [vmem:[#allocation5 + $0x10] sm:$0xf] %vm3370_vm7, %v3327_v62  ;;  %v9415_v5 = vpop.f32.mrb[16].mxu0 }
 0x286   : > { %v3329_v63 = vpop.permute.xlu1 %3328  ;;  %v9576_v1 = vld [vmem:[#allocation5] ss:$8 sps:$4 sm:$0xff]   ;;  %v2719_v6 = vmul.f32 %v9415_v5, %v10624_v2  ;;  %v2631_v7 = vpop.f32.mrb[17].mxu0 }
 0x287   : > { %3374 = vst.msk [vmem:[#allocation5 + $0x18] sm:$0xf] %vm3370_vm7, %v3329_v63  ;;  %v2717_v9 = vmul.f32 %v10624_v2, %v2631_v7  ;;  %v9416_v11 = vpop.f32.mrb[18].mxu0  ;;  %3967 = vmatmul.mubr.bf16.vlgmr.msra.gmra.mrb[0].mxu1 %v9576_v1  ;;  %v9579_v7 = vld [vmem:[#allocation5 + $0x14] ss:$8 sps:$4 sm:$0xff]  }
 0x288   : > { %v3521_v8 = vpop.permute.xlu0 %3520  ;;  %v2758_v12 = vadd.f32 %v10633_v4, %v2719_v6  ;;  %v2720_v13 = vmul.f32 %v9416_v11, %v10624_v2  ;;  %v2634_v14 = vpop.f32.mrb[19].mxu0  ;;  %v10862_v11 = vld [vmem:[%s11390_s2] ss:$0 sm:$0xff]  ;;  %8367 = vmatprep.mubr.msk.bf16.mxu1 %vm2807_vm14, %v9579_v7 }
 0x289   : > { %3567 = vst.msk [vmem:[#allocation5 + $0x10] sm:$0xf] %vm3564_vm8, %v3521_v8  ;;  %v2756_v15 = vadd.f32 %v10633_v4, %v2717_v9  ;;  %v2718_v16 = vmul.f32 %v10624_v2, %v2634_v14 }
 0x28a   : > { %v2790_v17 = vmax.f32 %v2758_v12, 0.0  ;;  %v2759_v18 = vadd.f32 %v10633_v4, %v2720_v13 }
 0x28b   : > { %v2788_v19 = vmax.f32 %v2756_v15, 0.0  ;;  %v2757_v20 = vadd.f32 %v10633_v4, %v2718_v16 }
 0x28c   : > { %2826 = vst.msk [vmem:[#allocation4 + $0x94] sm:$0xff] %vm2807_vm14, %v2790_v17  ;;  %v2791_v21 = vmax.f32 %v2759_v18, 0.0  ;;  %v10871_v17 = vld [vmem:[%s11391_s3] ss:$0 sm:$0xff] }
 0x28d   : > { %2824 = vst.msk [vmem:[#allocation4 + $0x84] sm:$0xff] %vm2807_vm14, %v2788_v19  ;;  %v2789_v22 = vmax.f32 %v2757_v20, 0.0 }
 0x28e   : > { %2827 = vst.msk [vmem:[#allocation4 + $0x9c] sm:$0xff] %vm2807_vm14, %v2791_v21 }
 0x28f   : > { %2825 = vst.msk [vmem:[#allocation4 + $0x8c] sm:$0xff] %vm2807_vm14, %v2789_v22 }
 0x290   : > { %v3744_v5 = vld [vmem:[#allocation5 + $0x10] sm:$0xff] }
 0x294   : > { %v3597_v23 = vld [vmem:[#allocation4 + $0x78] ss:$2 sm:$0xff]  ;;  %v3629_v24 = vld [vmem:[#allocation4 + $0x79] ss:$2 sm:$0xff] }
 0x295   : > { %v3403_v25 = vld [vmem:[#allocation4 + $0x76] ss:$2 sm:$0xff]  ;;  %v3653_v2 = vmax.f32 %v3597_v23, %v3629_v24  ;;  %v3435_v26 = vld [vmem:[#allocation4 + $0x77] ss:$2 sm:$0xff] }
 0x296   : > { %v3599_v27 = vld [vmem:[#allocation4 + $0x88] ss:$2 sm:$0xff]  ;;  %v3631_v28 = vld [vmem:[#allocation4 + $0x89] ss:$2 sm:$0xff]  ;;  %v3459_v29 = vmax.f32 %v3403_v25, %v3435_v26 }
 0x297   : > { %v3017_v30 = vld [vmem:[#allocation4 + $0x82] ss:$2 sm:$0xff]  ;;  %v8986_v4 = vpack.c.bf16 %v3653_v2, %v3653_v2  ;;  %v3654_v31 = vmax.f32 %v3599_v27, %v3631_v28  ;;  %v3049_v32 = vld [vmem:[#allocation4 + $0x83] ss:$2 sm:$0xff]  ;;  %v3019_v33 = vld [vmem:[#allocation4 + $0x92] ss:$2 sm:$0xff] }
 0x298   : > { %v3051_v34 = vld [vmem:[#allocation4 + $0x93] ss:$2 sm:$0xff]  ;;  %v8970_v35 = vpack.c.bf16 %v3459_v29, %v3459_v29  ;;  %v3072_v36 = vmax.f32 %v3017_v30, %v3049_v32  ;;  %v3211_v38 = vld [vmem:[#allocation4 + $0x84] ss:$2 sm:$0xff]  ;;  %v3213_v40 = vld [vmem:[#allocation4 + $0x94] ss:$2 sm:$0xff] }
 0x299   : > { %v3073_v37 = vmax.f32 %v3019_v33, %v3051_v34  ;;  %v3243_v39 = vld [vmem:[#allocation4 + $0x85] ss:$2 sm:$0xff]  ;;  %3733 = vst.msk [vmem:[#allocation5 + $0x3c] sm:$0xf] %vm2804_vm12, %v8986_v4  ;;  %v8987_v41 = vpack.c.bf16 %v3654_v31, %v3654_v31  ;;  %v3245_v42 = vld [vmem:[#allocation4 + $0x95] ss:$2 sm:$0xff] }
 0x29a   : > { %v2856_v43 = vld [vmem:[#allocation4 + $0x80] ss:$2 sm:$0xff]  ;;  %v2888_v44 = vld [vmem:[#allocation4 + $0x81] ss:$2 sm:$0xff]  ;;  %3530 = vrot.lane.b32.xlu1 %v8970_v35, %s9999_s20  ;;  %v8939_v45 = vpack.c.bf16 %v3072_v36, %v3072_v36  ;;  %v3266_v46 = vmax.f32 %v3211_v38, %v3243_v39  ;;  %v2858_v48 = vld [vmem:[#allocation4 + $0x90] ss:$2 sm:$0xff]  ;;  %v3267_v54 = vmax.f32 %v3213_v40, %v3245_v42 }
 0x29b   : > { %v2911_v47 = vmax.f32 %v2856_v43, %v2888_v44  ;;  %v2890_v49 = vld [vmem:[#allocation4 + $0x91] ss:$2 sm:$0xff]  ;;  %3734 = vst.msk [vmem:[#allocation5 + $0x44] sm:$0xf] %vm2804_vm12, %v8987_v41  ;;  %v3405_v50 = vld [vmem:[#allocation4 + $0x86] ss:$2 sm:$0xff]  ;;  %v8940_v53 = vpack.c.bf16 %v3073_v37, %v3073_v37 }
 0x29c   : > { %v3437_v51 = vld [vmem:[#allocation4 + $0x87] ss:$2 sm:$0xff]  ;;  %v2912_v52 = vmax.f32 %v2858_v48, %v2890_v49  ;;  %3144 = vrot.lane.b32.xlu0 %v8939_v45, %s9996_s28  ;;  %v8955_v57 = vpack.c.bf16 %v3266_v46, %v3266_v46  ;;  %v8956_v59 = vpack.c.bf16 %v3267_v54, %v3267_v54 }
 0x29d   : > { %v8923_v55 = vpack.c.bf16 %v2911_v47, %v2911_v47  ;;  %v3460_v58 = vmax.f32 %v3405_v50, %v3437_v51 }
 0x29e   : > { %v8924_v56 = vpack.c.bf16 %v2912_v52, %v2912_v52  ;;  %3146 = vrot.lane.b32.xlu1 %v8940_v53, %s9996_s28 }
 0x29f   : > { %2991 = vst.msk [vmem:[#allocation5 + $0x40] sm:$0xf] %vm2804_vm12, %v8923_v55  ;;  %v8971_v60 = vpack.c.bf16 %v3460_v58, %v3460_v58 }
 0x2a0   : > { %2992 = vst.msk [vmem:[#allocation5 + $0x48] sm:$0xf] %vm2804_vm12, %v8924_v56  ;;  %3338 = vrot.lane.b32.xlu0 %v8955_v57, %s9997_s30 }
 0x2a2   : > { %3340 = vrot.lane.b32.xlu1 %v8956_v59, %s9997_s30 }
 0x2a4   : > { %3532 = vrot.lane.b32.xlu0 %v8971_v60, %s9999_s20 }
 0x2ae   : > { %v3523_v61 = vpop.permute.xlu1 %3522 }
 0x2af   : > { %3568 = vst.msk [vmem:[#allocation5 + $0x18] sm:$0xf] %vm3564_vm8, %v3523_v61 }
 0x2b0   : > { %v3137_v62 = vpop.permute.xlu0 %3136 }
 0x2b1   : > { %3181 = vst.msk [vmem:[#allocation5 + $0x20] sm:$0xf] %vm3176_vm6, %v3137_v62 }
 0x2b2   : > { %v3139_v63 = vpop.permute.xlu1 %3138 }
 0x2b3   : > { %3182 = vst.msk [vmem:[#allocation5 + $0x28] sm:$0xf] %vm3176_vm6, %v3139_v63 }
 0x2b4   : > { %v3331_v1 = vpop.permute.xlu0 %3330 }
 0x2b5   : > { %3375 = vst.msk [vmem:[#allocation5 + $0x20] sm:$0xf] %vm3370_vm7, %v3331_v1  ;;  %v9419_v8 = vpop.f32.mrb[20].mxu0 }
 0x2b6   : > { %v3333_v3 = vpop.permute.xlu1 %3332  ;;  %v3745_v6 = vld [vmem:[#allocation5 + $0x18] sm:$0xff]  ;;  %v2723_v12 = vmul.f32 %v10862_v11, %v9419_v8  ;;  %v2647_v13 = vpop.f32.mrb[21].mxu0 }
 0x2b7   : > { %3376 = vst.msk [vmem:[#allocation5 + $0x28] sm:$0xf] %vm3370_vm7, %v3333_v3  ;;  %v8342_v9 = vcombine.low %v3744_v5, %v3745_v6  ;;  %v2721_v15 = vmul.f32 %v10862_v11, %v2647_v13  ;;  %v9420_v16 = vpop.f32.mrb[22].mxu0 }
 0x2b8   : > { %v3525_v14 = vpop.permute.xlu0 %3524  ;;  %v2762_v18 = vadd.f32 %v10871_v17, %v2723_v12  ;;  %v2724_v19 = vmul.f32 %v10862_v11, %v9420_v16  ;;  %v2650_v20 = vpop.f32.mrb[23].mxu0  ;;  %v9581_v16 = vld [vmem:[#allocation5 + $0x24] ss:$8 sps:$4 sm:$0xff]  }
 0x2b9   : > { %3975 = vmatmul.mubr.bf16.gmra.mrb[4].mxu1 %v8342_v9  ;;  %3569 = vst.msk [vmem:[#allocation5 + $0x20] sm:$0xf] %vm3564_vm8, %v3525_v14  ;;  %v2760_v21 = vadd.f32 %v10871_v17, %v2721_v15  ;;  %v2722_v22 = vmul.f32 %v10862_v11, %v2650_v20 }
 0x2ba   : > { %v2794_v23 = vmax.f32 %v2762_v18, 0.0  ;;  %v2763_v24 = vadd.f32 %v10871_v17, %v2724_v19  ;;  %8368 = vmatprep.mubr.msk.bf16.mxu1 %vm2807_vm14, %v9581_v16 }
 0x2bb   : > { %v2792_v25 = vmax.f32 %v2760_v21, 0.0  ;;  %v2761_v2 = vadd.f32 %v10871_v17, %v2722_v22 }
 0x2bc   : > { %2830 = vst.msk [vmem:[#allocation4 + $0xb4] sm:$0xff] %vm2807_vm14, %v2794_v23  ;;  %v2795_v26 = vmax.f32 %v2763_v24, 0.0 }
 0x2bd   : > { %2828 = vst.msk [vmem:[#allocation4 + $0xa4] sm:$0xff] %vm2807_vm14, %v2792_v25  ;;  %v2793_v27 = vmax.f32 %v2761_v2, 0.0 }
 0x2be   : > { %2831 = vst.msk [vmem:[#allocation4 + $0xbc] sm:$0xff] %vm2807_vm14, %v2795_v26 }
 0x2bf   : > { %2829 = vst.msk [vmem:[#allocation4 + $0xac] sm:$0xff] %vm2807_vm14, %v2793_v27 }
 0x2c0   : > { %v3746_v14 = vld [vmem:[#allocation5 + $0x20] sm:$0xff] }
 0x2c4   : > { %v3601_v28 = vld [vmem:[#allocation4 + $0x98] ss:$2 sm:$0xff]  ;;  %v3633_v29 = vld [vmem:[#allocation4 + $0x99] ss:$2 sm:$0xff] }
 0x2c5   : > { %v3407_v30 = vld [vmem:[#allocation4 + $0x96] ss:$2 sm:$0xff]  ;;  %v3655_v4 = vmax.f32 %v3601_v28, %v3633_v29  ;;  %v3439_v31 = vld [vmem:[#allocation4 + $0x97] ss:$2 sm:$0xff] }
 0x2c6   : > { %v3603_v32 = vld [vmem:[#allocation4 + $0xa8] ss:$2 sm:$0xff]  ;;  %v3635_v33 = vld [vmem:[#allocation4 + $0xa9] ss:$2 sm:$0xff]  ;;  %v3461_v34 = vmax.f32 %v3407_v30, %v3439_v31 }
 0x2c7   : > { %v3021_v35 = vld [vmem:[#allocation4 + $0xa2] ss:$2 sm:$0xff]  ;;  %v8988_v36 = vpack.c.bf16 %v3655_v4, %v3655_v4  ;;  %v3656_v37 = vmax.f32 %v3603_v32, %v3635_v33  ;;  %v3053_v38 = vld [vmem:[#allocation4 + $0xa3] ss:$2 sm:$0xff]  ;;  %v3023_v39 = vld [vmem:[#allocation4 + $0xb2] ss:$2 sm:$0xff] }
 0x2c8   : > { %v3055_v40 = vld [vmem:[#allocation4 + $0xb3] ss:$2 sm:$0xff]  ;;  %v8972_v41 = vpack.c.bf16 %v3461_v34, %v3461_v34  ;;  %v3074_v42 = vmax.f32 %v3021_v35, %v3053_v38  ;;  %v3215_v44 = vld [vmem:[#allocation4 + $0xa4] ss:$2 sm:$0xff]  ;;  %v3217_v46 = vld [vmem:[#allocation4 + $0xb4] ss:$2 sm:$0xff] }
 0x2c9   : > { %v3075_v43 = vmax.f32 %v3023_v39, %v3055_v40  ;;  %v3247_v45 = vld [vmem:[#allocation4 + $0xa5] ss:$2 sm:$0xff]  ;;  %3735 = vst.msk [vmem:[#allocation5 + $0x4c] sm:$0xf] %vm2804_vm12, %v8988_v36  ;;  %v8989_v47 = vpack.c.bf16 %v3656_v37, %v3656_v37  ;;  %v3249_v48 = vld [vmem:[#allocation4 + $0xb5] ss:$2 sm:$0xff] }
 0x2ca   : > { %v2860_v49 = vld [vmem:[#allocation4 + $0xa0] ss:$2 sm:$0xff]  ;;  %v2892_v50 = vld [vmem:[#allocation4 + $0xa1] ss:$2 sm:$0xff]  ;;  %3534 = vrot.lane.b32.xlu1 %v8972_v41, %s9999_s20  ;;  %v8941_v51 = vpack.c.bf16 %v3074_v42, %v3074_v42  ;;  %v3268_v52 = vmax.f32 %v3215_v44, %v3247_v45  ;;  %v2862_v54 = vld [vmem:[#allocation4 + $0xb0] ss:$2 sm:$0xff]  ;;  %v3269_v60 = vmax.f32 %v3217_v46, %v3249_v48 }
 0x2cb   : > { %v2913_v53 = vmax.f32 %v2860_v49, %v2892_v50  ;;  %v2894_v55 = vld [vmem:[#allocation4 + $0xb1] ss:$2 sm:$0xff]  ;;  %3736 = vst.msk [vmem:[#allocation5 + $0x54] sm:$0xf] %vm2804_vm12, %v8989_v47  ;;  %v3409_v56 = vld [vmem:[#allocation4 + $0xa6] ss:$2 sm:$0xff]  ;;  %v8942_v59 = vpack.c.bf16 %v3075_v43, %v3075_v43 }
 0x2cc   : > { %v3441_v57 = vld [vmem:[#allocation4 + $0xa7] ss:$2 sm:$0xff]  ;;  %v2914_v58 = vmax.f32 %v2862_v54, %v2894_v55  ;;  %3148 = vrot.lane.b32.xlu0 %v8941_v51, %s9996_s28  ;;  %v8957_v63 = vpack.c.bf16 %v3268_v52, %v3268_v52  ;;  %v8958_v3 = vpack.c.bf16 %v3269_v60, %v3269_v60 }
 0x2cd   : > { %v8925_v61 = vpack.c.bf16 %v2913_v53, %v2913_v53  ;;  %v3462_v1 = vmax.f32 %v3409_v56, %v3441_v57 }
 0x2ce   : > { %v8926_v62 = vpack.c.bf16 %v2914_v58, %v2914_v58  ;;  %3150 = vrot.lane.b32.xlu1 %v8942_v59, %s9996_s28 }
 0x2cf   : > { %2993 = vst.msk [vmem:[#allocation5 + $0x50] sm:$0xf] %vm2804_vm12, %v8925_v61  ;;  %v8973_v5 = vpack.c.bf16 %v3462_v1, %v3462_v1 }
 0x2d0   : > { %2994 = vst.msk [vmem:[#allocation5 + $0x58] sm:$0xf] %vm2804_vm12, %v8926_v62  ;;  %3342 = vrot.lane.b32.xlu0 %v8957_v63, %s9997_s30 }
 0x2d2   : > { %3344 = vrot.lane.b32.xlu1 %v8958_v3, %s9997_s30 }
 0x2d4   : > { %3536 = vrot.lane.b32.xlu0 %v8973_v5, %s9999_s20 }
 0x2dc   : > { %v3527_v6 = vpop.permute.xlu1 %3526 }
 0x2dd   : > { %3570 = vst.msk [vmem:[#allocation5 + $0x28] sm:$0xf] %vm3564_vm8, %v3527_v6 }
 0x2de   : > { %v3141_v7 = vpop.permute.xlu0 %3140 }
 0x2df   : > { %3183 = vst.msk [vmem:[#allocation5 + $0x30] sm:$0xf] %vm3176_vm6, %v3141_v7 }
 0x2e0   : > { %v3143_v8 = vpop.permute.xlu1 %3142 }
 0x2e1   : > { %3184 = vst.msk [vmem:[#allocation5 + $0x38] sm:$0xf] %vm3176_vm6, %v3143_v8 }
 0x2e2   : > { %v3335_v9 = vpop.permute.xlu0 %3334 }
 0x2e3   : > { %3377 = vst.msk [vmem:[#allocation5 + $0x30] sm:$0xf] %vm3370_vm7, %v3335_v9 }
 0x2e4   : > { %v3337_v12 = vpop.permute.xlu1 %3336  ;;  %v3747_v15 = vld [vmem:[#allocation5 + $0x28] sm:$0xff] }
 0x2e5   : > { %v9423_v13 = vpop.f32.mrb[24].mxu0  ;;  %3378 = vst.msk [vmem:[#allocation5 + $0x38] sm:$0xf] %vm3370_vm7, %v3337_v12  ;;  %v8344_v20 = vcombine.low %v3746_v14, %v3747_v15 }
 0x2e6   : > { %v2727_v18 = vmul.f32 %v10862_v11, %v9423_v13  ;;  %v2663_v19 = vpop.f32.mrb[25].mxu0  ;;  %v3529_v21 = vpop.permute.xlu0 %3528 }
 0x2e7   : > { %v2725_v22 = vmul.f32 %v10862_v11, %v2663_v19  ;;  %v9424_v23 = vpop.f32.mrb[26].mxu0  ;;  %3571 = vst.msk [vmem:[#allocation5 + $0x30] sm:$0xf] %vm3564_vm8, %v3529_v21  ;;  %3983 = vmatmul.mubr.bf16.gmra.mrb[8].mxu1 %v8344_v20 }
 0x2e8   : > { %v2766_v24 = vadd.f32 %v10871_v17, %v2727_v18  ;;  %v2728_v25 = vmul.f32 %v10862_v11, %v9424_v23  ;;  %v2666_v2 = vpop.f32.mrb[27].mxu0  ;;  %v9583_v23 = vld [vmem:[#allocation5 + $0x34] ss:$8 sps:$4 sm:$0xff]  }
 0x2e9   : > { %v2764_v26 = vadd.f32 %v10871_v17, %v2725_v22  ;;  %v2726_v27 = vmul.f32 %v10862_v11, %v2666_v2  ;;  %8369 = vmatprep.mubr.msk.bf16.mxu1 %vm2807_vm14, %v9583_v23 }
 0x2ea   : > { %v2798_v28 = vmax.f32 %v2766_v24, 0.0  ;;  %v2767_v29 = vadd.f32 %v10871_v17, %v2728_v25 }
 0x2eb   : > { %v2796_v30 = vmax.f32 %v2764_v26, 0.0  ;;  %v2765_v4 = vadd.f32 %v10871_v17, %v2726_v27 }
 0x2ec   : > { %2834 = vst.msk [vmem:[#allocation4 + $0xd4] sm:$0xff] %vm2807_vm14, %v2798_v28  ;;  %v2799_v31 = vmax.f32 %v2767_v29, 0.0 }
 0x2ed   : > { %2832 = vst.msk [vmem:[#allocation4 + $0xc4] sm:$0xff] %vm2807_vm14, %v2796_v30  ;;  %v2797_v32 = vmax.f32 %v2765_v4, 0.0 }
 0x2ee   : > { %2835 = vst.msk [vmem:[#allocation4 + $0xdc] sm:$0xff] %vm2807_vm14, %v2799_v31  ;;  %v3748_v21 = vld [vmem:[#allocation5 + $0x30] sm:$0xff] }
 0x2ef   : > { %2833 = vst.msk [vmem:[#allocation4 + $0xcc] sm:$0xff] %vm2807_vm14, %v2797_v32 }
 0x2f4   : > { %v3605_v33 = vld [vmem:[#allocation4 + $0xb8] ss:$2 sm:$0xff]  ;;  %v3637_v34 = vld [vmem:[#allocation4 + $0xb9] ss:$2 sm:$0xff] }
 0x2f5   : > { %v3411_v35 = vld [vmem:[#allocation4 + $0xb6] ss:$2 sm:$0xff]  ;;  %v3657_v36 = vmax.f32 %v3605_v33, %v3637_v34  ;;  %v3443_v37 = vld [vmem:[#allocation4 + $0xb7] ss:$2 sm:$0xff] }
 0x2f6   : > { %v3607_v38 = vld [vmem:[#allocation4 + $0xc8] ss:$2 sm:$0xff]  ;;  %v3639_v39 = vld [vmem:[#allocation4 + $0xc9] ss:$2 sm:$0xff]  ;;  %v3463_v40 = vmax.f32 %v3411_v35, %v3443_v37 }
 0x2f7   : > { %v3025_v41 = vld [vmem:[#allocation4 + $0xc2] ss:$2 sm:$0xff]  ;;  %v8990_v42 = vpack.c.bf16 %v3657_v36, %v3657_v36  ;;  %v3658_v43 = vmax.f32 %v3607_v38, %v3639_v39  ;;  %v3057_v44 = vld [vmem:[#allocation4 + $0xc3] ss:$2 sm:$0xff]  ;;  %v3027_v45 = vld [vmem:[#allocation4 + $0xd2] ss:$2 sm:$0xff] }
 0x2f8   : > { %v3059_v46 = vld [vmem:[#allocation4 + $0xd3] ss:$2 sm:$0xff]  ;;  %v8974_v47 = vpack.c.bf16 %v3463_v40, %v3463_v40  ;;  %v3076_v48 = vmax.f32 %v3025_v41, %v3057_v44  ;;  %v3219_v50 = vld [vmem:[#allocation4 + $0xc4] ss:$2 sm:$0xff]  ;;  %v3221_v52 = vld [vmem:[#allocation4 + $0xd4] ss:$2 sm:$0xff] }
 0x2f9   : > { %v3077_v49 = vmax.f32 %v3027_v45, %v3059_v46  ;;  %v3251_v51 = vld [vmem:[#allocation4 + $0xc5] ss:$2 sm:$0xff]  ;;  %3737 = vst.msk [vmem:[#allocation5 + $0x5c] sm:$0xf] %vm2804_vm12, %v8990_v42  ;;  %v8991_v53 = vpack.c.bf16 %v3658_v43, %v3658_v43  ;;  %v3253_v54 = vld [vmem:[#allocation4 + $0xd5] ss:$2 sm:$0xff] }
 0x2fa   : > { %v2864_v55 = vld [vmem:[#allocation4 + $0xc0] ss:$2 sm:$0xff]  ;;  %v2896_v56 = vld [vmem:[#allocation4 + $0xc1] ss:$2 sm:$0xff]  ;;  %3538 = vrot.lane.b32.xlu1 %v8974_v47, %s9999_s20  ;;  %v8943_v57 = vpack.c.bf16 %v3076_v48, %v3076_v48  ;;  %v3270_v58 = vmax.f32 %v3219_v50, %v3251_v51  ;;  %v2866_v60 = vld [vmem:[#allocation4 + $0xd0] ss:$2 sm:$0xff]  ;;  %v3271_v5 = vmax.f32 %v3221_v52, %v3253_v54 }
 0x2fb   : > { %v2915_v59 = vmax.f32 %v2864_v55, %v2896_v56  ;;  %v2898_v61 = vld [vmem:[#allocation4 + $0xd1] ss:$2 sm:$0xff]  ;;  %3738 = vst.msk [vmem:[#allocation5 + $0x64] sm:$0xf] %vm2804_vm12, %v8991_v53  ;;  %v3413_v62 = vld [vmem:[#allocation4 + $0xc6] ss:$2 sm:$0xff]  ;;  %v8944_v3 = vpack.c.bf16 %v3077_v49, %v3077_v49 }
 0x2fc   : > { %v3445_v63 = vld [vmem:[#allocation4 + $0xc7] ss:$2 sm:$0xff]  ;;  %v2916_v1 = vmax.f32 %v2866_v60, %v2898_v61  ;;  %3152 = vrot.lane.b32.xlu0 %v8943_v57, %s9996_s28  ;;  %v8959_v8 = vpack.c.bf16 %v3270_v58, %v3270_v58  ;;  %v8960_v12 = vpack.c.bf16 %v3271_v5, %v3271_v5 }
 0x2fd   : > { %v8927_v6 = vpack.c.bf16 %v2915_v59, %v2915_v59  ;;  %v3464_v9 = vmax.f32 %v3413_v62, %v3445_v63 }
 0x2fe   : > { %v8928_v7 = vpack.c.bf16 %v2916_v1, %v2916_v1  ;;  %3154 = vrot.lane.b32.xlu1 %v8944_v3, %s9996_s28 }
 0x2ff   : > { %2995 = vst.msk [vmem:[#allocation5 + $0x60] sm:$0xf] %vm2804_vm12, %v8927_v6  ;;  %v8975_v13 = vpack.c.bf16 %v3464_v9, %v3464_v9 }
 0x300   : > { %2996 = vst.msk [vmem:[#allocation5 + $0x68] sm:$0xf] %vm2804_vm12, %v8928_v7  ;;  %3346 = vrot.lane.b32.xlu0 %v8959_v8, %s9997_s30 }
 0x302   : > { %3348 = vrot.lane.b32.xlu1 %v8960_v12, %s9997_s30 }
 0x304   : > { %3540 = vrot.lane.b32.xlu0 %v8975_v13, %s9999_s20 }
 0x30c   : > { %v3531_v14 = vpop.permute.xlu1 %3530 }
 0x30d   : > { %3572 = vst.msk [vmem:[#allocation5 + $0x38] sm:$0xf] %vm3564_vm8, %v3531_v14 }
 0x30e   : > { %v3145_v15 = vpop.permute.xlu0 %3144 }
 0x30f   : > { %3185 = vst.msk [vmem:[#allocation5 + $0x40] sm:$0xf] %vm3176_vm6, %v3145_v15 }
 0x310   : > { %v3147_v16 = vpop.permute.xlu1 %3146 }
 0x311   : > { %3186 = vst.msk [vmem:[#allocation5 + $0x48] sm:$0xf] %vm3176_vm6, %v3147_v16 }
 0x312   : > { %v3339_v18 = vpop.permute.xlu0 %3338 }
 0x313   : > { %3379 = vst.msk [vmem:[#allocation5 + $0x40] sm:$0xf] %vm3370_vm7, %v3339_v18 }
 0x314   : > { %v3341_v19 = vpop.permute.xlu1 %3340  ;;  %v3749_v22 = vld [vmem:[#allocation5 + $0x38] sm:$0xff] }
 0x315   : > { %v9427_v20 = vpop.f32.mrb[28].mxu0  ;;  %3380 = vst.msk [vmem:[#allocation5 + $0x48] sm:$0xf] %vm3370_vm7, %v3341_v19  ;;  %v8346_v2 = vcombine.low %v3748_v21, %v3749_v22 }
 0x316   : > { %v2731_v24 = vmul.f32 %v10862_v11, %v9427_v20  ;;  %v2679_v25 = vpop.f32.mrb[29].mxu0  ;;  %v3533_v26 = vpop.permute.xlu0 %3532 }
 0x317   : > { %v2729_v27 = vmul.f32 %v10862_v11, %v2679_v25  ;;  %v9428_v28 = vpop.f32.mrb[30].mxu0  ;;  %3573 = vst.msk [vmem:[#allocation5 + $0x40] sm:$0xf] %vm3564_vm8, %v3533_v26  ;;  %3991 = vmatmul.mubr.bf16.gmra.mrb[12].mxu1 %v8346_v2 }
 0x318   : > { %v2770_v29 = vadd.f32 %v10871_v17, %v2731_v24  ;;  %v2732_v30 = vmul.f32 %v10862_v11, %v9428_v28  ;;  %v2682_v4 = vpop.f32.mrb[31].mxu0 }
 0x319   : > { %v2768_v31 = vadd.f32 %v10871_v17, %v2729_v27  ;;  %v2730_v32 = vmul.f32 %v10862_v11, %v2682_v4  ;;  %v9585_v4 = vld [vmem:[#allocation5 + $0x44] ss:$8 sps:$4 sm:$0xff]  }
 0x31a   : > { %v2802_v33 = vmax.f32 %v2770_v29, 0.0  ;;  %v2771_v34 = vadd.f32 %v10871_v17, %v2732_v30  ;;  %8370 = vmatprep.mubr.msk.bf16.mxu1 %vm2807_vm14, %v9585_v4 }
 0x31b   : > { %v2800_v35 = vmax.f32 %v2768_v31, 0.0  ;;  %v2769_v36 = vadd.f32 %v10871_v17, %v2730_v32 }
 0x31c   : > { %2838 = vst.msk [vmem:[#allocation4 + $0xf4] sm:$0xff] %vm2807_vm14, %v2802_v33  ;;  %v2803_v37 = vmax.f32 %v2771_v34, 0.0  ;;  %v10963_v33 = vld [vmem:[%s11393_s5] ss:$0 sm:$0xff] }
 0x31d   : > { %2836 = vst.msk [vmem:[#allocation4 + $0xe4] sm:$0xff] %vm2807_vm14, %v2800_v35  ;;  %v2801_v38 = vmax.f32 %v2769_v36, 0.0  ;;  %v10968_v35 = vld [vmem:[%s11394_s6] ss:$0 sm:$0xff] }
 0x31e   : > { %2839 = vst.msk [vmem:[#allocation4 + $0xfc] sm:$0xf] %vm2804_vm12, %v2803_v37 }
 0x31f   : > { %2837 = vst.msk [vmem:[#allocation4 + $0xec] sm:$0xff] %vm2807_vm14, %v2801_v38 }
 0x324   : > { %v3609_v39 = vld [vmem:[#allocation4 + $0xd8] ss:$2 sm:$0xff]  ;;  %v3641_v40 = vld [vmem:[#allocation4 + $0xd9] ss:$2 sm:$0xff] }
 0x325   : > { %v3415_v41 = vld [vmem:[#allocation4 + $0xd6] ss:$2 sm:$0xff]  ;;  %v3659_v11 = vmax.f32 %v3609_v39, %v3641_v40  ;;  %v3447_v42 = vld [vmem:[#allocation4 + $0xd7] ss:$2 sm:$0xff] }
 0x326   : > { %v3611_v43 = vld [vmem:[#allocation4 + $0xe8] ss:$2 sm:$0xff]  ;;  %v3643_v44 = vld [vmem:[#allocation4 + $0xe9] ss:$2 sm:$0xff]  ;;  %v3465_v45 = vmax.f32 %v3415_v41, %v3447_v42 }
 0x327   : > { %v3029_v46 = vld [vmem:[#allocation4 + $0xe2] ss:$2 sm:$0xff]  ;;  %v8992_v17 = vpack.c.bf16 %v3659_v11, %v3659_v11  ;;  %v3660_v47 = vmax.f32 %v3611_v43, %v3643_v44  ;;  %v3061_v48 = vld [vmem:[#allocation4 + $0xe3] ss:$2 sm:$0xff] }
 0x328   : > { %v3031_v49 = vld [vmem:[#allocation4 + $0xf2] ss:$2 sm:$0x3f]  ;;  %v8976_v51 = vpack.c.bf16 %v3465_v45, %v3465_v45  ;;  %v3078_v52 = vmax.f32 %v3029_v46, %v3061_v48  ;;  %v3063_v53 = vld [vmem:[#allocation4 + $0xf3] ss:$2 sm:$0x3f] }
 0x329   : > { %v3225_v50 = vld [vmem:[#allocation4 + $0xf4] ss:$2 sm:$0x3f]  ;;  %v3223_v54 = vld [vmem:[#allocation4 + $0xe4] ss:$2 sm:$0xff]  ;;  %v8993_v55 = vpack.c.bf16 %v3660_v47, %v3660_v47  ;;  %v3079_v56 = vmax.f32 %v3031_v49, %v3063_v53 }
 0x32a   : > { %3739 = vst.msk [vmem:[#allocation5 + $0x6c] sm:$0xf] %vm2804_vm12, %v8992_v17  ;;  %v3255_v57 = vld [vmem:[#allocation4 + $0xe5] ss:$2 sm:$0xff]  ;;  %3542 = vrot.lane.b32.xlu1 %v8976_v51, %s9999_s20  ;;  %v8945_v59 = vpack.c.bf16 %v3078_v52, %v3078_v52  ;;  %v3417_v61 = vld [vmem:[#allocation4 + $0xe6] ss:$2 sm:$0xff] }
 0x32b   : > { %v3257_v58 = vld [vmem:[#allocation4 + $0xf5] ss:$2 sm:$0x3f]  ;;  %v3272_v60 = vmax.f32 %v3223_v54, %v3255_v57  ;;  %v2868_v63 = vld [vmem:[#allocation4 + $0xe0] ss:$2 sm:$0xff]  ;;  %v8946_v5 = vpack.c.bf16 %v3079_v56, %v3079_v56 }
 0x32c   : > { %v3449_v62 = vld [vmem:[#allocation4 + $0xe7] ss:$2 sm:$0xff]  ;;  %3740 = vst.msk [vmem:[#allocation5 + $0x74] sm:$0xf] %vm2804_vm12, %v8993_v55  ;;  %3156 = vrot.lane.b32.xlu0 %v8945_v59, %s9996_s28  ;;  %v3273_v6 = vmax.f32 %v3225_v50, %v3257_v58  ;;  %v9597_v55 = vld [vmem:[%s11395_s7] sm:$0xff]  }
 0x32d   : > { %v3419_v1 = vld [vmem:[#allocation4 + $0xf6] ss:$2 sm:$0x3f]  ;;  %v3451_v3 = vld [vmem:[#allocation4 + $0xf7] ss:$2 sm:$0x3f]  ;;  %v8961_v14 = vpack.c.bf16 %v3272_v60, %v3272_v60  ;;  %v3466_v15 = vmax.f32 %v3417_v61, %v3449_v62  ;;  %4535 = vmatpush1.bf16.msra.mxu0 %v9597_v55 }
 0x32e   : > { %v2900_v7 = vld [vmem:[#allocation4 + $0xe1] ss:$2 sm:$0xff]  ;;  %v3613_v8 = vld [vmem:[#allocation4 + $0xf8] ss:$2 sm:$0x3f]  ;;  %3158 = vrot.lane.b32.xlu1 %v8946_v5, %s9996_s28  ;;  %v8962_v21 = vpack.c.bf16 %v3273_v6, %v3273_v6  ;;  %v3467_v22 = vmax.f32 %v3419_v1, %v3451_v3  ;;  %4536 = vmatprep.subr.bf16.mxu0 %v9998_v10  ;;  %v9600_v62 = vld [vmem:[%s11395_s7 + $0x18] sm:$0xff]  }
 0x32f   : > { %v2917_v9 = vmax.f32 %v2868_v63, %v2900_v7  ;;  %v3645_v12 = vld [vmem:[#allocation4 + $0xf9] ss:$2 sm:$0x3f]  ;;  %v2870_v13 = vld [vmem:[#allocation4 + $0xf0] ss:$2 sm:$0x3f]  ;;  %v8977_v25 = vpack.c.bf16 %v3466_v15, %v3466_v15 }
 0x330   : > { %v3661_v16 = vmax.f32 %v3613_v8, %v3645_v12  ;;  %v2902_v18 = vld [vmem:[#allocation4 + $0xf1] ss:$2 sm:$0x3f]  ;;  %3350 = vrot.lane.b32.xlu0 %v8961_v14, %s9997_s30  ;;  %v8978_v2 = vpack.c.bf16 %v3467_v22, %v3467_v22  ;;  %v9588_v57 = vld [vmem:[#allocation5 + $0x54] ss:$8 sps:$4 sm:$0xff]   ;;  %v9599_v61 = vld [vmem:[%s11395_s7 + $0x10] sm:$0xff]  }
 0x331   : > { %v8929_v19 = vpack.c.bf16 %v2917_v9, %v2917_v9  ;;  %v2918_v20 = vmax.f32 %v2870_v13, %v2902_v18  ;;  %v9598_v60 = vld [vmem:[%s11395_s7 + $0x8] sm:$0xff]   ;;  %v9601_v63 = vld [vmem:[%s11395_s7 + $0x20] sm:$0xff]   ;;  %v9603_v3 = vld [vmem:[%s11395_s7 + $0x30] sm:$0xff]   ;;  %s527_s28 = sand.u32 1, %s9975_s22  }
 0x332   : > { %v8994_v23 = vpack.c.bf16 %v3661_v16, %v3661_v16  ;;  %3352 = vrot.lane.b32.xlu1 %v8962_v21, %s9997_s30  ;;  %4537 = vmatpush1.bf16.msra.mxu0 %v9598_v60  ;;  %v9602_v1 = vld [vmem:[%s11395_s7 + $0x28] sm:$0xff]   ;;  %v9604_v8 = vld [vmem:[%s11395_s7 + $0x38] sm:$0xff]   ;;  %v9605_v18 = vld [vmem:[%s11395_s7 + $0x40] sm:$0xff]   ;;  %s528_s29 = scalar_lea.vmem [#allocation13], %s527_s28  ;;  %s7912_s25 = scalar_lea.sflag [#allocation12], %s527_s28 }
 0x333   : > { %2997 = vst.msk [vmem:[#allocation5 + $0x70] sm:$0xf] %vm2804_vm12, %v8929_v19  ;;  %v8930_v24 = vpack.c.bf16 %v2918_v20, %v2918_v20  ;;  %vm4185_vm12 = vcmask 519168   ;;  %4538 = vmatprep.subr.bf16.mxu0 %v9998_v10  ;;  %v9606_v20 = vld [vmem:[%s11395_s7 + $0x48] sm:$0xff]   ;;  %v9607_v21 = vld [vmem:[%s11395_s7 + $0x50] sm:$0xff]   ;;  %s7924_s21 = sshll.u32 %s528_s29, 4  ;;  %s11348_s21 = int_to_ptr.vmem [resolvable:$true] %s7924_s21 }
 0x334   : > { %3741 = vst.msk [vmem:[#allocation5 + $0x7c] sm:$0x7] %vm2998_vm10, %v8994_v23  ;;  %3544 = vrot.lane.b32.xlu0 %v8977_v25, %s9999_s20  ;;  %vm11105_vm4 = vmand %vm4185_vm12, %vm4194_vm2  ;;  %s9917_s23 = scalar_lea.vmem %s11348_s21, 16 }
 0x335   : > { %2999 = vst.msk [vmem:[#allocation5 + $0x78] sm:$0x7] %vm2998_vm10, %v8930_v24  ;;  %p9918_p6 = scmp.ne.s32.totalorder %s11348_s21, %s9917_s23 }
 0x336   : > { %3546 = vrot.lane.b32.xlu1 %v8978_v2, %s9999_s20  ;;  %4539 = vmatpush1.bf16.msra.mxu0 %v9599_v61  ;;  %s9921_s20 = sshll.u32 %s10002_s27, 4  ;;  %s9922_s20 = int_to_ptr.vmem [resolvable:$false] %s9921_s20 }
 0x337   : > { %4540 = vmatprep.subr.bf16.mxu0 %v9998_v10  ;;  %p9919_p10 = pnand %p9918_p6, %p11431_p9  ;;  %s9923_s17 = scalar_lea.vmem %s9922_s20, 32 }
 0x338   : > { %p9924_p2 = scmp.lt.s32.totalorder %s11348_s21, %s9922_s20  ;;  %p9925_p3 = scmp.lt.s32.totalorder %s9923_s17, %s9917_s23 }
 0x339   : > { %p9920_p12 = pneg %p9919_p10 }
 0x33a   : > { %4541 = vmatpush1.bf16.msra.mxu0 %v9600_v62  ;;  %p9926_p4 = por %p9925_p3, %p9924_p2 }
 0x33b   : > { %4542 = vmatprep.subr.bf16.mxu0 %v9998_v10 }
 0x33c   : > { %v3535_v26 = vpop.permute.xlu1 %3534  ;;  %p9927_p7 = pnand %p9926_p4, %p9920_p12 }
 0x33d   : > { %3574 = vst.msk [vmem:[#allocation5 + $0x48] sm:$0xf] %vm3564_vm8, %v3535_v26 }
 0x33e   : > { %v3149_v27 = vpop.permute.xlu0 %3148  ;;  %4543 = vmatpush1.bf16.msra.mxu0 %v9601_v63 }
 0x33f   : > { %3187 = vst.msk [vmem:[#allocation5 + $0x50] sm:$0xf] %vm3176_vm6, %v3149_v27  ;;  %4544 = vmatprep.subr.bf16.mxu0 %v9998_v10 }
 0x340   : > { %v3151_v28 = vpop.permute.xlu1 %3150 }
 0x341   : > { %3188 = vst.msk [vmem:[#allocation5 + $0x58] sm:$0xf] %vm3176_vm6, %v3151_v28 }
 0x342   : > { %v3343_v29 = vpop.permute.xlu0 %3342  ;;  %4545 = vmatpush1.bf16.msra.mxu0 %v9602_v1 }
 0x343   : > { %3381 = vst.msk [vmem:[#allocation5 + $0x50] sm:$0xf] %vm3370_vm7, %v3343_v29  ;;  %4546 = vmatprep.subr.bf16.mxu0 %v9998_v10 }
 0x344   : > { %v3345_v30 = vpop.permute.xlu1 %3344  ;;  %v9587_v31 = vld [vmem:[#allocation5 + $0x40] ss:$8 sps:$4 sm:$0xff]  }
 0x345   : > { %3382 = vst.msk [vmem:[#allocation5 + $0x58] sm:$0xf] %vm3370_vm7, %v3345_v30  ;;  %3999 = vmatmul.mubr.bf16.gmra.mrb[16].mxu1 %v9587_v31 }
 0x346   : > { %v3537_v32 = vpop.permute.xlu0 %3536  ;;  %8371 = vmatprep.mubr.msk.bf16.mxu1 %vm2807_vm14, %v9588_v57  ;;  %4547 = vmatpush1.bf16.msra.mxu0 %v9603_v3 }
 0x347   : > { %3575 = vst.msk [vmem:[#allocation5 + $0x50] sm:$0xf] %vm3564_vm8, %v3537_v32  ;;  %4548 = vmatprep.subr.bf16.mxu0 %v9998_v10 }
 0x34a   : > { %4549 = vmatpush1.bf16.msra.mxu0 %v9604_v8 }
 0x34b   : > { %4550 = vmatprep.subr.bf16.mxu0 %v9998_v10 }
 0x34e   : > { %4551 = vmatpush1.bf16.msra.mxu0 %v9605_v18 }
 0x34f   : > { %4552 = vmatprep.subr.bf16.mxu0 %v9998_v10 }
 0x352   : > { %4553 = vmatpush1.bf16.msra.mxu0 %v9606_v20 }
 0x353   : > { %4554 = vmatprep.subr.bf16.mxu0 %v9998_v10 }
 0x356   : > { %4555 = vmatpush1.bf16.msra.mxu0 %v9607_v21 }
 0x357   : > { %4556 = vmatprep.subr.bf16.mxu0 %v9998_v10 }
 0x35a   : > { %v3968_v34 = vpop.f32.mrb[0].mxu1 }
 0x35b   : > { %v4038_v36 = vmul.f32 %v10963_v33, %v3968_v34  ;;  %v3970_v37 = vpop.f32.mrb[1].mxu1  ;;  %v9608_v34 = vld [vmem:[%s11395_s7 + $0x58] sm:$0xff]  }
 0x35c   : > { %v3971_v38 = vpop.f32.mrb[2].mxu1  ;;  %4557 = vmatpush1.bf16.msra.mxu0 %v9608_v34 }
 0x35d   : > { %v4061_v39 = vadd.f32 %v10968_v35, %v4038_v36  ;;  %v4039_v40 = vmul.f32 %v10963_v33, %v3971_v38  ;;  %v3973_v41 = vpop.f32.mrb[3].mxu1 }
 0x35f   : > { %v4077_v11 = vmax.f32 %v4061_v39, 0.0  ;;  %v4062_v42 = vadd.f32 %v10968_v35, %v4039_v40  ;;  %v9591_v39 = vld [vmem:[#allocation5 + $0x64] ss:$8 sps:$4 sm:$0xff]  }
 0x361   : > { %4097 = vst.msk [vmem:[#allocation6 + $0x2] sm:$0xff] %vm4096_vm11, %v4077_v11  ;;  %v4078_v43 = vmax.f32 %v4062_v42, 0.0  ;;  %v9594_v42 = vld [vmem:[#allocation5 + $0x74] ss:$8 sps:$4 sm:$0x7f]  }
 0x363   : > { %4098 = vst.msk [vmem:[#allocation6 + $0xa] sm:$0xff] %vm4096_vm11, %v4078_v43 }
 0x36a   : > { %v4200_v44 = vld [vmem:[#allocation6 + $0x2] ss:$2 sm:$0xff]  ;;  %v4216_v45 = vld [vmem:[#allocation6 + $0x3] ss:$2 sm:$0xff] }
 0x36b   : > { %v4114_v46 = vld [vmem:[#allocation6] ss:$2 sm:$0xff]  ;;  %v4231_v47 = vmax.f32 %v4200_v44, %v4216_v45  ;;  %v4130_v48 = vld [vmem:[#allocation6 + $0x1] ss:$2 sm:$0xff] }
 0x36c   : > { %v3539_v17 = vpop.permute.xlu1 %3538  ;;  %v4145_v49 = vmax.f32 %v4114_v46, %v4130_v48 }
 0x36d   : > { %3576 = vst.msk [vmem:[#allocation5 + $0x58] sm:$0xf] %vm3564_vm8, %v3539_v17  ;;  %v9003_v51 = vpack.c.bf16 %v4231_v47, %v4231_v47 }
 0x36e   : > { %v3153_v50 = vpop.permute.xlu0 %3152  ;;  %v8995_v52 = vpack.c.bf16 %v4145_v49, %v4145_v49 }
 0x36f   : > { %3189 = vst.msk [vmem:[#allocation5 + $0x60] sm:$0xf] %vm3176_vm6, %v3153_v50  ;;  %4263 = vrot.lane.b32.xlu0 %v9003_v51, %s9997_s30 }
 0x370   : > { %v3155_v53 = vpop.permute.xlu1 %3154  ;;  %4186 = vst.msk [vmem:[#allocation7] sm:$0xf] %vm4185_vm12, %v8995_v52 }
 0x371   : > { %3190 = vst.msk [vmem:[#allocation5 + $0x68] sm:$0xf] %vm3176_vm6, %v3155_v53 }
 0x372   : > { %v3347_v54 = vpop.permute.xlu0 %3346 }
 0x373   : > { %3383 = vst.msk [vmem:[#allocation5 + $0x60] sm:$0xf] %vm3370_vm7, %v3347_v54 }
 0x374   : > { %v3349_v56 = vpop.permute.xlu1 %3348  ;;  %v9590_v58 = vld [vmem:[#allocation5 + $0x50] ss:$8 sps:$4 sm:$0xff]  }
 0x375   : > { %3384 = vst.msk [vmem:[#allocation5 + $0x68] sm:$0xf] %vm3370_vm7, %v3349_v56  ;;  %4007 = vmatmul.mubr.bf16.gmra.mrb[20].mxu1 %v9590_v58 }
 0x376   : > { %v3541_v59 = vpop.permute.xlu0 %3540  ;;  %8372 = vmatprep.mubr.msk.bf16.mxu1 %vm2807_vm14, %v9591_v39 }
 0x377   : > { %3577 = vst.msk [vmem:[#allocation5 + $0x60] sm:$0xf] %vm3564_vm8, %v3541_v59 }
 0x38c   : > { %v3976_v5 = vpop.f32.mrb[4].mxu1 }
 0x38d   : > { %v4040_v6 = vmul.f32 %v10963_v33, %v3976_v5  ;;  %v3978_v7 = vpop.f32.mrb[5].mxu1 }
 0x38e   : > { %v3979_v9 = vpop.f32.mrb[6].mxu1 }
 0x38f   : > { %v4063_v12 = vadd.f32 %v10968_v35, %v4040_v6  ;;  %v4041_v13 = vmul.f32 %v10963_v33, %v3979_v9  ;;  %v3981_v14 = vpop.f32.mrb[7].mxu1 }
 0x391   : > { %v4079_v15 = vmax.f32 %v4063_v12, 0.0  ;;  %v4064_v16 = vadd.f32 %v10968_v35, %v4041_v13 }
 0x393   : > { %4099 = vst.msk [vmem:[#allocation6 + $0x12] sm:$0xff] %vm4096_vm11, %v4079_v15  ;;  %v4080_v19 = vmax.f32 %v4064_v16, 0.0 }
 0x395   : > { %4100 = vst.msk [vmem:[#allocation6 + $0x1a] sm:$0xff] %vm4096_vm11, %v4080_v19 }
 0x39a   : > { %v4301_v22 = vld [vmem:[#allocation6 + $0x4] ss:$2 sm:$0xff]  ;;  %v4317_v23 = vld [vmem:[#allocation6 + $0x5] ss:$2 sm:$0xff] }
 0x39b   : > { %v4332_v24 = vmax.f32 %v4301_v22, %v4317_v23 }
 0x39c   : > { %v4202_v25 = vld [vmem:[#allocation6 + $0x12] ss:$2 sm:$0xff]  ;;  %v4218_v2 = vld [vmem:[#allocation6 + $0x13] ss:$2 sm:$0xff]  ;;  %v3543_v28 = vpop.permute.xlu1 %3542 }
 0x39d   : > { %v4116_v26 = vld [vmem:[#allocation6 + $0x10] ss:$2 sm:$0xff]  ;;  %v9011_v27 = vpack.c.bf16 %v4332_v24, %v4332_v24  ;;  %v4232_v29 = vmax.f32 %v4202_v25, %v4218_v2  ;;  %v4132_v30 = vld [vmem:[#allocation6 + $0x11] ss:$2 sm:$0xff]  ;;  %3578 = vst.msk [vmem:[#allocation5 + $0x68] sm:$0xf] %vm3564_vm8, %v3543_v28 }
 0x39e   : > { %v4146_v4 = vmax.f32 %v4116_v26, %v4132_v30  ;;  %v3157_v31 = vpop.permute.xlu0 %3156 }
 0x39f   : > { %v9004_v32 = vpack.c.bf16 %v4232_v29, %v4232_v29  ;;  %4372 = vst.msk [vmem:[#allocation7 + $0x4] sm:$0xf] %vm4185_vm12, %v9011_v27 }
 0x3a0   : > { %3191 = vst.msk [vmem:[#allocation5 + $0x70] sm:$0xf] %vm3176_vm6, %v3157_v31  ;;  %v8996_v36 = vpack.c.bf16 %v4146_v4, %v4146_v4  ;;  %v3159_v37 = vpop.permute.xlu1 %3158  ;;  %vm11133_vm6 = vmand %vm2526_vm3, %vm4650_vm5 }
 0x3a1   : > { %4265 = vrot.lane.b32.xlu1 %v9004_v32, %s9997_s30  ;;  %3193 = vst.msk [vmem:[#allocation5 + $0x78] sm:$0x7] %vm3192_vm13, %v3159_v37 }
 0x3a2   : > { %4187 = vst.msk [vmem:[#allocation7 + $0x8] sm:$0xf] %vm4185_vm12, %v8996_v36  ;;  %v3351_v10 = vpop.permute.xlu0 %3350 }
 0x3a3   : > { %3385 = vst.msk [vmem:[#allocation5 + $0x70] sm:$0xf] %vm3370_vm7, %v3351_v10  ;;  %vm10001_vm7 = vmmov 0  }
 0x3a4   : > { %v3353_v38 = vpop.permute.xlu1 %3352  ;;  %v9593_v40 = vld [vmem:[#allocation5 + $0x60] ss:$8 sps:$4 sm:$0xff]  }
 0x3a5   : > { %3387 = vst.msk [vmem:[#allocation5 + $0x78] sm:$0x7] %vm3386_vm15, %v3353_v38  ;;  %4015 = vmatmul.mubr.bf16.gmra.mrb[24].mxu1 %v9593_v40 }
 0x3a6   : > { %v3545_v41 = vpop.permute.xlu0 %3544  ;;  %8373 = vmatprep.mubr.msk.bf16.mxu1 %vm2807_vm14, %v9594_v42  ;;  %vm4287_vm14 = vcmask 1043968  }
 0x3a7   : > { %3579 = vst.msk [vmem:[#allocation5 + $0x70] sm:$0xf] %vm3564_vm8, %v3545_v41  ;;  %vm4296_vm3 = vmand %vm4287_vm14, %vm4194_vm2  ;;  %vm7909_vm8 = vcmask 8192  }
 0x3a8   : > { %v3547_v11 = vpop.permute.xlu1 %3546 }
 0x3a9   : > { %3581 = vst.msk [vmem:[#allocation5 + $0x78] sm:$0x7] %vm3580_vm0, %v3547_v11 }
 0x3b0   : > { %v9596_v43 = vld [vmem:[#allocation5 + $0x70] ss:$8 sps:$4 sm:$0x7f]  }
 0x3b1   : > { %4023 = vmatmul.mubr.bf16.gmra.mrb[28].mxu1 %v9596_v43 }
 0x3ba   : > { %v3984_v44 = vpop.f32.mrb[8].mxu1 }
 0x3bb   : > { %v4042_v45 = vmul.f32 %v10963_v33, %v3984_v44  ;;  %v3986_v46 = vpop.f32.mrb[9].mxu1 }
 0x3bc   : > { %v3987_v17 = vpop.f32.mrb[10].mxu1 }
 0x3bd   : > { %v4065_v47 = vadd.f32 %v10968_v35, %v4042_v45  ;;  %v4043_v48 = vmul.f32 %v10963_v33, %v3987_v17  ;;  %v3989_v49 = vpop.f32.mrb[11].mxu1 }
 0x3bf   : > { %v4081_v50 = vmax.f32 %v4065_v47, 0.0  ;;  %v4066_v51 = vadd.f32 %v10968_v35, %v4043_v48 }
 0x3c1   : > { %4101 = vst.msk [vmem:[#allocation6 + $0x22] sm:$0xff] %vm4096_vm11, %v4081_v50  ;;  %v4082_v52 = vmax.f32 %v4066_v51, 0.0 }
 0x3c3   : > { %4102 = vst.msk [vmem:[#allocation6 + $0x2a] sm:$0xff] %vm4096_vm11, %v4082_v52 }
 0x3c8   : > { %v4303_v53 = vld [vmem:[#allocation6 + $0x14] ss:$2 sm:$0xff]  ;;  %v4319_v54 = vld [vmem:[#allocation6 + $0x15] ss:$2 sm:$0xff] }
 0x3c9   : > { %v4333_v55 = vmax.f32 %v4303_v53, %v4319_v54 }
 0x3ca   : > { %v4204_v56 = vld [vmem:[#allocation6 + $0x22] ss:$2 sm:$0xff]  ;;  %v4220_v57 = vld [vmem:[#allocation6 + $0x23] ss:$2 sm:$0xff] }
 0x3cb   : > { %v4118_v58 = vld [vmem:[#allocation6 + $0x20] ss:$2 sm:$0xff]  ;;  %v9012_v59 = vpack.c.bf16 %v4333_v55, %v4333_v55  ;;  %v4233_v60 = vmax.f32 %v4204_v56, %v4220_v57  ;;  %v4134_v61 = vld [vmem:[#allocation6 + $0x21] ss:$2 sm:$0xff] }
 0x3cc   : > { %v4147_v62 = vmax.f32 %v4118_v58, %v4134_v61 }
 0x3cd   : > { %v9005_v63 = vpack.c.bf16 %v4233_v60, %v4233_v60  ;;  %4373 = vst.msk [vmem:[#allocation7 + $0xc] sm:$0xf] %vm4185_vm12, %v9012_v59 }
 0x3ce   : > { %v8997_v1 = vpack.c.bf16 %v4147_v62, %v4147_v62 }
 0x3cf   : > { %4267 = vrot.lane.b32.xlu0 %v9005_v63, %s9997_s30 }
 0x3d0   : > { %4188 = vst.msk [vmem:[#allocation7 + $0x10] sm:$0xf] %vm4185_vm12, %v8997_v1 }
 0x3d4   : > { %v9611_v4 = vld [vmem:[#allocation7 + $0x4] ss:$8 sps:$4 sm:$0xff]  }
 0x3d5   : > { %8420 = vmatprep.mubr.msk.bf16.mxu0 %vm4096_vm11, %v9611_v4 }
 0x3e1   : > { %v4264_v3 = vpop.permute.xlu0 %4263 }
 0x3e2   : > { %4288 = vst.msk [vmem:[#allocation7] sm:$0xf] %vm4287_vm14, %v4264_v3 }
 0x3ea   : > { %v3992_v5 = vpop.f32.mrb[12].mxu1 }
 0x3eb   : > { %v4044_v6 = vmul.f32 %v10963_v33, %v3992_v5  ;;  %v3994_v7 = vpop.f32.mrb[13].mxu1 }
 0x3ec   : > { %v3995_v8 = vpop.f32.mrb[14].mxu1 }
 0x3ed   : > { %v4067_v9 = vadd.f32 %v10968_v35, %v4044_v6  ;;  %v4045_v12 = vmul.f32 %v10963_v33, %v3995_v8  ;;  %v3997_v13 = vpop.f32.mrb[15].mxu1 }
 0x3ef   : > { %v4083_v14 = vmax.f32 %v4067_v9, 0.0  ;;  %v4068_v15 = vadd.f32 %v10968_v35, %v4045_v12 }
 0x3f1   : > { %4103 = vst.msk [vmem:[#allocation6 + $0x32] sm:$0xff] %vm4096_vm11, %v4083_v14  ;;  %v4084_v16 = vmax.f32 %v4068_v15, 0.0 }
 0x3f3   : > { %4104 = vst.msk [vmem:[#allocation6 + $0x3a] sm:$0xff] %vm4096_vm11, %v4084_v16 }
 0x3f8   : > { %v4305_v18 = vld [vmem:[#allocation6 + $0x24] ss:$2 sm:$0xff]  ;;  %v4321_v19 = vld [vmem:[#allocation6 + $0x25] ss:$2 sm:$0xff] }
 0x3f9   : > { %v4334_v20 = vmax.f32 %v4305_v18, %v4321_v19  ;;  %v9618_v18 = vld [vmem:[#allocation10 + $0x40] sm:$0xff]  }
 0x3fa   : > { %v4206_v21 = vld [vmem:[#allocation6 + $0x32] ss:$2 sm:$0xff]  ;;  %v4222_v22 = vld [vmem:[#allocation6 + $0x33] ss:$2 sm:$0xff]  ;;  %v9619_v19 = vld [vmem:[#allocation10] sm:$0xff]   ;;  %9038 = vmatprep.subr.bf16.mxu1 %v9618_v18 }
 0x3fb   : > { %v4120_v23 = vld [vmem:[#allocation6 + $0x30] ss:$2 sm:$0xff]  ;;  %v9013_v24 = vpack.c.bf16 %v4334_v20, %v4334_v20  ;;  %v4234_v25 = vmax.f32 %v4206_v21, %v4222_v22  ;;  %v4136_v2 = vld [vmem:[#allocation6 + $0x31] ss:$2 sm:$0xff]  ;;  %9039 = vmatpush3.bf16.msra.mxu1 %v9619_v19 }
 0x3fc   : > { %v4148_v26 = vmax.f32 %v4120_v23, %v4136_v2  ;;  %v9620_v2 = vld [vmem:[#allocation10 + $0x48] sm:$0xff]  }
 0x3fd   : > { %4374 = vst.msk [vmem:[#allocation7 + $0x14] sm:$0xf] %vm4185_vm12, %v9013_v24  ;;  %v9006_v27 = vpack.c.bf16 %v4234_v25, %v4234_v25  ;;  %9040 = vmatprep.subr.bf16.mxu1 %v9620_v2 }
 0x3fe   : > { %v8998_v28 = vpack.c.bf16 %v4148_v26, %v4148_v26 }
 0x3ff   : > { %4269 = vrot.lane.b32.xlu1 %v9006_v27, %s9997_s30 }
 0x400   : > { %4189 = vst.msk [vmem:[#allocation7 + $0x18] sm:$0xf] %vm4185_vm12, %v8998_v28 }
 0x413   : > { %v4266_v29 = vpop.permute.xlu1 %4265 }
 0x414   : > { %4289 = vst.msk [vmem:[#allocation7 + $0x8] sm:$0xf] %vm4287_vm14, %v4266_v29  ;;  %v9621_v29 = vld [vmem:[#allocation10 + $0x8] sm:$0xff]  }
 0x415   : > { %9041 = vmatpush3.bf16.msra.mxu1 %v9621_v29 }
 0x418   : > { %v4000_v31 = vpop.f32.mrb[16].mxu1 }
 0x419   : > { %v4046_v32 = vmul.f32 %v10963_v33, %v4000_v31  ;;  %v4002_v34 = vpop.f32.mrb[17].mxu1  ;;  %v9622_v31 = vld [vmem:[#allocation10 + $0x50] sm:$0xff]  }
 0x41a   : > { %v4003_v36 = vpop.f32.mrb[18].mxu1  ;;  %v9623_v34 = vld [vmem:[#allocation10 + $0x10] sm:$0xff]   ;;  %9042 = vmatprep.subr.bf16.mxu1 %v9622_v31  ;;  %v4196_v31 = vld [vmem:[#allocation7 + $0x38] sm:$0xf] }
 0x41b   : > { %v9609_v30 = vld [vmem:[#allocation7] ss:$8 sps:$4 sm:$0xff]   ;;  %v4069_v37 = vadd.f32 %v10968_v35, %v4046_v32  ;;  %v4047_v10 = vmul.f32 %v10963_v33, %v4003_v36  ;;  %v4005_v38 = vpop.f32.mrb[19].mxu1  ;;  %9043 = vmatpush3.bf16.msra.mxu1 %v9623_v34  ;;  %v9624_v36 = vld [vmem:[#allocation10 + $0x58] sm:$0xff]  }
 0x41c   : > { %4567 = vmatmul.mubr.bf16.vlgmr.msra.gmra.mrb[32].mxu0 %v9609_v30  ;;  %9044 = vmatprep.subr.bf16.mxu1 %v9624_v36  ;;  %v9647_v34 = vld [vmem:[#allocation10 + $0xa8] sm:$0xff]  }
 0x41d   : > { %v4085_v39 = vmax.f32 %v4069_v37, 0.0  ;;  %v4070_v40 = vadd.f32 %v10968_v35, %v4047_v10  ;;  %v9625_v37 = vld [vmem:[#allocation10 + $0x18] sm:$0xff]   ;;  %v9626_v10 = vld [vmem:[#allocation10 + $0xc0] sm:$0xff]  }
 0x41e   : > { %9060 = vmatprep.subr.bf16.mxu0 %v9626_v10 }
 0x41f   : > { %4105 = vst.msk [vmem:[#allocation6 + $0x42] sm:$0xff] %vm4096_vm11, %v4085_v39  ;;  %v4086_v41 = vmax.f32 %v4070_v40, 0.0  ;;  %v9627_v39 = vld [vmem:[#allocation10 + $0x80] sm:$0xff]   ;;  %9045 = vmatpush3.bf16.msra.mxu1 %v9625_v37  ;;  %v9652_v37 = vld [vmem:[#allocation10 + $0xf0] sm:$0xff]  }
 0x420   : > { %9061 = vmatpush3.bf16.msra.mxu0 %v9627_v39  ;;  %v9655_v39 = vld [vmem:[#allocation10 + $0xb0] sm:$0xff]  }
 0x421   : > { %4106 = vst.msk [vmem:[#allocation6 + $0x4a] sm:$0xff] %vm4096_vm11, %v4086_v41 }
 0x426   : > { %v4307_v11 = vld [vmem:[#allocation6 + $0x34] ss:$2 sm:$0xff]  ;;  %v4323_v42 = vld [vmem:[#allocation6 + $0x35] ss:$2 sm:$0xff] }
 0x427   : > { %v4335_v43 = vmax.f32 %v4307_v11, %v4323_v42 }
 0x428   : > { %v4208_v44 = vld [vmem:[#allocation6 + $0x42] ss:$2 sm:$0xff]  ;;  %v4224_v45 = vld [vmem:[#allocation6 + $0x43] ss:$2 sm:$0xff] }
 0x429   : > { %v4122_v46 = vld [vmem:[#allocation6 + $0x40] ss:$2 sm:$0xff]  ;;  %v9014_v17 = vpack.c.bf16 %v4335_v43, %v4335_v43  ;;  %v4235_v47 = vmax.f32 %v4208_v44, %v4224_v45  ;;  %v4138_v48 = vld [vmem:[#allocation6 + $0x41] ss:$2 sm:$0xff] }
 0x42a   : > { %v4149_v49 = vmax.f32 %v4122_v46, %v4138_v48  ;;  %v9628_v44 = vld [vmem:[#allocation10 + $0x60] sm:$0xff]  }
 0x42b   : > { %4375 = vst.msk [vmem:[#allocation7 + $0x1c] sm:$0xf] %vm4185_vm12, %v9014_v17  ;;  %v9007_v50 = vpack.c.bf16 %v4235_v47, %v4235_v47  ;;  %v9629_v48 = vld [vmem:[#allocation10 + $0x20] sm:$0xff]   ;;  %9046 = vmatprep.subr.bf16.mxu1 %v9628_v44 }
 0x42c   : > { %v8999_v51 = vpack.c.bf16 %v4149_v49, %v4149_v49  ;;  %v9630_v49 = vld [vmem:[#allocation10 + $0xc8] sm:$0xff]   ;;  %9047 = vmatpush3.bf16.msra.mxu1 %v9629_v48 }
 0x42d   : > { %4271 = vrot.lane.b32.xlu0 %v9007_v50, %s9997_s30  ;;  %9062 = vmatprep.subr.bf16.mxu0 %v9630_v49 }
 0x42e   : > { %4190 = vst.msk [vmem:[#allocation7 + $0x20] sm:$0xf] %vm4185_vm12, %v8999_v51 }
 0x432   : > { %v9612_v21 = vld [vmem:[#allocation7 + $0x14] ss:$8 sps:$4 sm:$0xff]  }
 0x433   : > { %8421 = vmatprep.mubr.msk.bf16.mxu0 %vm4096_vm11, %v9612_v21 }
 0x441   : > { %v4268_v52 = vpop.permute.xlu0 %4267 }
 0x442   : > { %4290 = vst.msk [vmem:[#allocation7 + $0x10] sm:$0xf] %vm4287_vm14, %v4268_v52 }
 0x448   : > { %v4008_v53 = vpop.f32.mrb[20].mxu1 }
 0x449   : > { %v4048_v54 = vmul.f32 %v10963_v33, %v4008_v53  ;;  %v4010_v55 = vpop.f32.mrb[21].mxu1 }
 0x44a   : > { %v4011_v56 = vpop.f32.mrb[22].mxu1 }
 0x44b   : > { %v4071_v57 = vadd.f32 %v10968_v35, %v4048_v54  ;;  %v4049_v58 = vmul.f32 %v10963_v33, %v4011_v56  ;;  %v4013_v59 = vpop.f32.mrb[23].mxu1 }
 0x44c   : > { %v9632_v59 = vld [vmem:[#allocation10 + $0x68] sm:$0xff]  }
 0x44d   : > { %v4087_v60 = vmax.f32 %v4071_v57, 0.0  ;;  %v4072_v61 = vadd.f32 %v10968_v35, %v4049_v58  ;;  %v9631_v58 = vld [vmem:[#allocation10 + $0x88] sm:$0xff]   ;;  %9048 = vmatprep.subr.bf16.mxu1 %v9632_v59 }
 0x44e   : > { %9063 = vmatpush3.bf16.msra.mxu0 %v9631_v58 }
 0x44f   : > { %4107 = vst.msk [vmem:[#allocation6 + $0x52] sm:$0xff] %vm4096_vm11, %v4087_v60  ;;  %v4088_v62 = vmax.f32 %v4072_v61, 0.0  ;;  %v9634_v61 = vld [vmem:[#allocation10 + $0xd0] sm:$0xff]  }
 0x450   : > { %9064 = vmatprep.subr.bf16.mxu0 %v9634_v61 }
 0x451   : > { %4108 = vst.msk [vmem:[#allocation6 + $0x5a] sm:$0xff] %vm4096_vm11, %v4088_v62 }
 0x456   : > { %v4309_v63 = vld [vmem:[#allocation6 + $0x44] ss:$2 sm:$0xff]  ;;  %v4325_v1 = vld [vmem:[#allocation6 + $0x45] ss:$2 sm:$0xff] }
 0x457   : > { %v4336_v3 = vmax.f32 %v4309_v63, %v4325_v1  ;;  %v9635_v1 = vld [vmem:[#allocation10 + $0x90] sm:$0xff]  }
 0x458   : > { %v4210_v5 = vld [vmem:[#allocation6 + $0x52] ss:$2 sm:$0xff]  ;;  %v4226_v6 = vld [vmem:[#allocation6 + $0x53] ss:$2 sm:$0xff]  ;;  %9065 = vmatpush3.bf16.msra.mxu0 %v9635_v1 }
 0x459   : > { %v4124_v7 = vld [vmem:[#allocation6 + $0x50] ss:$2 sm:$0xff]  ;;  %v9015_v8 = vpack.c.bf16 %v4336_v3, %v4336_v3  ;;  %v4236_v9 = vmax.f32 %v4210_v5, %v4226_v6  ;;  %v4140_v12 = vld [vmem:[#allocation6 + $0x51] ss:$2 sm:$0xff] }
 0x45a   : > { %v4150_v13 = vmax.f32 %v4124_v7, %v4140_v12  ;;  %v9638_v5 = vld [vmem:[#allocation10 + $0xd8] sm:$0xff]   ;;  %v9637_v6 = vld [vmem:[#allocation10 + $0x30] sm:$0xff]  }
 0x45b   : > { %4376 = vst.msk [vmem:[#allocation7 + $0x24] sm:$0xf] %vm4185_vm12, %v9015_v8  ;;  %v9008_v14 = vpack.c.bf16 %v4236_v9, %v4236_v9  ;;  %v9640_v7 = vld [vmem:[#allocation10 + $0x78] sm:$0xff]   ;;  %9066 = vmatprep.subr.bf16.mxu0 %v9638_v5  ;;  %v9642_v9 = vld [vmem:[#allocation10 + $0xe0] sm:$0xff]  }
 0x45c   : > { %v9000_v15 = vpack.c.bf16 %v4150_v13, %v4150_v13  ;;  %v9639_v8 = vld [vmem:[#allocation10 + $0x98] sm:$0xff]  }
 0x45d   : > { %4273 = vrot.lane.b32.xlu1 %v9008_v14, %s9997_s30  ;;  %v9641_v12 = vld [vmem:[#allocation10 + $0x38] sm:$0xff]   ;;  %9067 = vmatpush3.bf16.msra.mxu0 %v9639_v8 }
 0x45e   : > { %4191 = vst.msk [vmem:[#allocation7 + $0x28] sm:$0xf] %vm4185_vm12, %v9000_v15  ;;  %9068 = vmatprep.subr.bf16.mxu0 %v9642_v9  ;;  %v4673_v9 = vld [vmem:[#allocation9 + $0x3] sm:$0x1] }
 0x471   : > { %v4270_v16 = vpop.permute.xlu1 %4269 }
 0x472   : > { %4291 = vst.msk [vmem:[#allocation7 + $0x18] sm:$0xf] %vm4287_vm14, %v4270_v16  ;;  %v9643_v16 = vld [vmem:[#allocation10 + $0xa0] sm:$0xff]  }
 0x473   : > { %9069 = vmatpush3.bf16.msra.mxu0 %v9643_v16  ;;  %v4680_v16 = vld [vmem:[#allocation9 + $0x4] sm:$0x1] }
 0x478   : > { %v4016_v20 = vpop.f32.mrb[24].mxu1 }
 0x479   : > { %v9614_v22 = vld [vmem:[#allocation7 + $0x10] ss:$8 sps:$4 sm:$0xff]   ;;  %v4050_v23 = vmul.f32 %v10963_v33, %v4016_v20  ;;  %v4018_v24 = vpop.f32.mrb[25].mxu1 }
 0x47a   : > { %v4019_v25 = vpop.f32.mrb[26].mxu1  ;;  %4575 = vmatmul.mubr.bf16.gmra.mrb[36].mxu0 %v9614_v22 }
 0x47b   : > { %v4073_v26 = vadd.f32 %v10968_v35, %v4050_v23  ;;  %v4051_v27 = vmul.f32 %v10963_v33, %v4019_v25  ;;  %v4021_v28 = vpop.f32.mrb[27].mxu1 }
 0x47c   : > { %v4379_v28 = vld [vmem:[#allocation7 + $0x3c] sm:$0xf] }
 0x47d   : > { %v4089_v30 = vmax.f32 %v4073_v26, 0.0  ;;  %v4074_v4 = vadd.f32 %v10968_v35, %v4051_v27 }
 0x47f   : > { %4109 = vst.msk [vmem:[#allocation6 + $0x62] sm:$0xff] %vm4096_vm11, %v4089_v30  ;;  %v4090_v32 = vmax.f32 %v4074_v4, 0.0  ;;  %v9644_v30 = vld [vmem:[#allocation10 + $0x140] sm:$0xff]   ;;  %v9645_v4 = vld [vmem:[#allocation10 + $0xe8] sm:$0xff]  }
 0x480   : > { %9070 = vmatprep.subr.bf16.mxu0 %v9645_v4 }
 0x481   : > { %4110 = vst.msk [vmem:[#allocation6 + $0x6a] sm:$0xff] %vm4096_vm11, %v4090_v32  ;;  %9071 = vmatpush3.bf16.msra.mxu0 %v9647_v34 }
 0x482   : > { %9072 = vmatprep.subr.bf16.mxu0 %v9652_v37  ;;  %v4694_v37 = vld [vmem:[#allocation9 + $0x6] sm:$0x1] }
 0x484   : > { %v4024_v38 = vpop.f32.mrb[28].mxu1 }
 0x485   : > { %v4052_v40 = vmul.f32 %v10963_v33, %v4024_v38  ;;  %v4026_v41 = vpop.f32.mrb[29].mxu1  ;;  %9073 = vmatpush3.bf16.msra.mxu0 %v9655_v39 }
 0x486   : > { %v4311_v11 = vld [vmem:[#allocation6 + $0x54] ss:$2 sm:$0xff]  ;;  %v4327_v42 = vld [vmem:[#allocation6 + $0x55] ss:$2 sm:$0xff]  ;;  %v4027_v43 = vpop.f32.mrb[30].mxu1 }
 0x487   : > { %v4337_v45 = vmax.f32 %v4311_v11, %v4327_v42  ;;  %v4075_v46 = vadd.f32 %v10968_v35, %v4052_v40  ;;  %v4053_v17 = vmul.f32 %v10963_v33, %v4027_v43  ;;  %v4029_v47 = vpop.f32.mrb[31].mxu1  ;;  %v9633_v33 = vld [vmem:[#allocation10 + $0x28] sm:$0xff]   ;;  %v9657_v40 = vld [vmem:[#allocation10 + $0xf8] sm:$0xff]   ;;  %v9662_v42 = vld [vmem:[#allocation10 + $0x1c0] sm:$0xff]  }
 0x488   : > { %v4212_v50 = vld [vmem:[#allocation6 + $0x62] ss:$2 sm:$0xff]  ;;  %v4228_v51 = vld [vmem:[#allocation6 + $0x63] ss:$2 sm:$0xff]  ;;  %9049 = vmatpush3.bf16.msra.mxu1 %v9633_v33  ;;  %9074 = vmatprep.subr.bf16.mxu0 %v9657_v40 }
 0x489   : > { %v4126_v52 = vld [vmem:[#allocation6 + $0x60] ss:$2 sm:$0xff]  ;;  %v9016_v53 = vpack.c.bf16 %v4337_v45, %v4337_v45  ;;  %v4091_v54 = vmax.f32 %v4075_v46, 0.0  ;;  %v4076_v55 = vadd.f32 %v10968_v35, %v4053_v17  ;;  %v4237_v56 = vmax.f32 %v4212_v50, %v4228_v51  ;;  %v4142_v57 = vld [vmem:[#allocation6 + $0x61] ss:$2 sm:$0xff]  ;;  %v9636_v35 = vld [vmem:[#allocation10 + $0x70] sm:$0xff]  }
 0x48a   : > { %v4151_v60 = vmax.f32 %v4126_v52, %v4142_v57  ;;  %9050 = vmatprep.subr.bf16.mxu1 %v9636_v35  ;;  %v9659_v11 = vld [vmem:[#allocation10 + $0xb8] sm:$0xff]   ;;  %v11121_v46 = vld [vmem:[%s11396_s8] ss:$0 sm:$0xff]  ;;  %v9840_v57 = vld [vmem:[#allocation10 + $0x670] sm:$0xff]  }
 0x48b   : > { %4377 = vst.msk [vmem:[#allocation7 + $0x2c] sm:$0xf] %vm4185_vm12, %v9016_v53  ;;  %v4092_v62 = vmax.f32 %v4076_v55, 0.0  ;;  %v9009_v63 = vpack.c.bf16 %v4237_v56, %v4237_v56  ;;  %9075 = vmatpush3.bf16.msra.mxu0 %v9659_v11  ;;  %v11126_v47 = vld [vmem:[%s11397_s9] ss:$0 sm:$0xff] }
 0x48c   : > { %4111 = vst.msk [vmem:[#allocation6 + $0x72] sm:$0xff] %vm4096_vm11, %v4091_v54  ;;  %v9001_v3 = vpack.c.bf16 %v4151_v60, %v4151_v60  ;;  %9051 = vmatpush3.bf16.msra.mxu1 %v9637_v6  ;;  %9104 = vmatprep.subr.bf16.mxu0 %v9662_v42  ;;  %v4652_v60 = vld [vmem:[#allocation9] sm:$0x1]  ;;  %v4701_v11 = vld [vmem:[#allocation9 + $0x7] sm:$0x1] }
 0x48d   : > { %4113 = vst.msk [vmem:[#allocation6 + $0x7a] sm:$0x3f] %vm4112_vm1, %v4092_v62  ;;  %4275 = vrot.lane.b32.xlu1 %v9009_v63, %s9997_s30  ;;  %9052 = vmatprep.subr.bf16.mxu1 %v9640_v7  ;;  %v4659_v63 = vld [vmem:[#allocation9 + $0x1] sm:$0x1]  ;;  %v10000_v42 = vmov 1966171168  }
 0x48e   : > { %4192 = vst.msk [vmem:[#allocation7 + $0x30] sm:$0xf] %vm4185_vm12, %v9001_v3  ;;  %v4666_v3 = vld [vmem:[#allocation9 + $0x2] sm:$0x1] }
 0x490   : > { %9053 = vmatpush3.bf16.msra.mxu1 %v9641_v12 }
 0x491   : > { %9082 = vmatprep.subr.bf16.mxu1 %v9644_v30 }
 0x492   : > { %v9615_v44 = vld [vmem:[#allocation7 + $0x24] ss:$8 sps:$4 sm:$0xff]  }
 0x493   : > { %v4313_v13 = vld [vmem:[#allocation6 + $0x64] ss:$2 sm:$0xff]  ;;  %v4329_v14 = vld [vmem:[#allocation6 + $0x65] ss:$2 sm:$0xff]  ;;  %8422 = vmatprep.mubr.msk.bf16.mxu0 %vm4096_vm11, %v9615_v44  ;;  %v5374_v44 = vlaneseq }
 0x494   : > { %v4338_v15 = vmax.f32 %v4313_v13, %v4329_v14  ;;  %v4214_v18 = vld [vmem:[#allocation6 + $0x72] ss:$2 sm:$0x7f]  ;;  %v4230_v19 = vld [vmem:[#allocation6 + $0x73] ss:$2 sm:$0x7f] }
 0x495   : > { %v4238_v21 = vmax.f32 %v4214_v18, %v4230_v19  ;;  %v4315_v22 = vld [vmem:[#allocation6 + $0x74] ss:$2 sm:$0x7f]  ;;  %v4331_v23 = vld [vmem:[#allocation6 + $0x75] ss:$2 sm:$0x7f] }
 0x496   : > { %v9017_v20 = vpack.c.bf16 %v4338_v15, %v4338_v15  ;;  %v4339_v25 = vmax.f32 %v4315_v22, %v4331_v23  ;;  %v4128_v2 = vld [vmem:[#allocation6 + $0x70] ss:$2 sm:$0x7f]  ;;  %v4144_v26 = vld [vmem:[#allocation6 + $0x71] ss:$2 sm:$0x7f] }
 0x497   : > { %v9010_v27 = vpack.c.bf16 %v4238_v21, %v4238_v21  ;;  %v4152_v29 = vmax.f32 %v4128_v2, %v4144_v26 }
 0x498   : > { %4378 = vst.msk [vmem:[#allocation7 + $0x34] sm:$0xf] %vm4185_vm12, %v9017_v20  ;;  %v9018_v32 = vpack.c.bf16 %v4339_v25, %v4339_v25 }
 0x499   : > { %4277 = vrot.lane.b32.xlu0 %v9010_v27, %s9997_s30  ;;  %v9002_v36 = vpack.c.bf16 %v4152_v29, %v4152_v29  ;;  %v4687_v29 = vld [vmem:[#allocation9 + $0x5] sm:$0x1]  ;;  %s11346_s30 = scalar_lea.hbm %s11404_s16, %s8687_s18 }
 0x49a   : > { %v4380_v10 = vsel %vm11105_vm4, %v9018_v32, %v4379_v28 }
 0x49b   : > { %4381 = vst [vmem:[#allocation7 + $0x3c] sm:$0xf] %v4380_v10  ;;  %v4197_v38 = vsel %vm11105_vm4, %v9002_v36, %v4196_v31 }
 0x49c   : > { %4198 = vst [vmem:[#allocation7 + $0x38] sm:$0xf] %v4197_v38 }
 0x49f   : > { %v4272_v41 = vpop.permute.xlu0 %4271 }
 0x4a0   : > { %4292 = vst.msk [vmem:[#allocation7 + $0x20] sm:$0xf] %vm4287_vm14, %v4272_v41 }
 0x4cf   : > { %v4274_v43 = vpop.permute.xlu1 %4273 }
 0x4d0   : > { %4293 = vst.msk [vmem:[#allocation7 + $0x28] sm:$0xf] %vm4287_vm14, %v4274_v43  ;;  %v5372_v43 = vunpack.c.l.s4 %v10000_v42  ;;  %v9691_v42 = vld [vmem:[#allocation10 + $0x208] sm:$0xff]  }
 0x4d7   : > { %v9617_v45 = vld [vmem:[#allocation7 + $0x20] ss:$8 sps:$4 sm:$0xff]  }
 0x4d8   : > { %4583 = vmatmul.mubr.bf16.gmra.mrb[40].mxu0 %v9617_v45 }
 0x4ef   : > { %v4568_v17 = vpop.f32.mrb[32].mxu0 }
 0x4f0   : > { %v4606_v48 = vmul.f32 %v11121_v46, %v4568_v17  ;;  %v4570_v49 = vpop.f32.mrb[33].mxu0 }
 0x4f1   : > { %v4571_v50 = vpop.f32.mrb[34].mxu0  ;;  %v5373_v49 = vunpack.c.0.s8 %v5372_v43  ;;  %v9688_v43 = vld [vmem:[#allocation10 + $0x2c0] sm:$0xff]  }
 0x4f2   : > { %v4621_v51 = vadd.f32 %v11126_v47, %v4606_v48  ;;  %v4607_v52 = vmul.f32 %v11121_v46, %v4571_v50  ;;  %v4573_v53 = vpop.f32.mrb[35].mxu0  ;;  %v5375_v50 = vshrl.u32 %v5374_v44, 7  ;;  %v9694_v44 = vld [vmem:[#allocation10 + $0x250] sm:$0xff]  }
 0x4f4   : > { %v4629_v54 = vmax.f32 %v4621_v51, 0.0  ;;  %v4622_v55 = vadd.f32 %v11126_v47, %v4607_v52  ;;  %v4297_v52 = vld [vmem:[#allocation7 + $0x38] sm:$0xf] }
 0x4f6   : > { %4637 = vst [vmem:[#allocation8] sm:$0xff] %v4629_v54  ;;  %v4630_v56 = vmax.f32 %v4622_v55, 0.0  ;;  %v11156_v54 = vsub.s32 %v5373_v49, %v5375_v50  ;;  %v9692_v49 = vld [vmem:[#allocation10 + $0x2c8] sm:$0xff]   ;;  %v9698_v50 = vld [vmem:[#allocation10 + $0x258] sm:$0xff]  }
 0x4f8   : > { %4638 = vst [vmem:[#allocation8 + $0x8] sm:$0xff] %v4630_v56 }
 0x4fd   : > { %v4645_v58 = vld [vmem:[#allocation8] sm:$0x1]  ;;  %v4646_v59 = vld [vmem:[#allocation8 + $0x1] sm:$0x1]  ;;  %v4655_v33 = vld [vmem:[#allocation8 + $0x2] sm:$0x1] }
 0x4fe   : > { %v4647_v61 = vmax.f32 %v4645_v58, %v4646_v59  ;;  %v4656_v62 = vld [vmem:[#allocation8 + $0x3] sm:$0x1]  ;;  %v4662_v1 = vld [vmem:[#allocation8 + $0x4] sm:$0x1]  ;;  %v4663_v35 = vld [vmem:[#allocation8 + $0x5] sm:$0x1] }
 0x4ff   : > { %v4657_v5 = vmax.f32 %v4655_v33, %v4656_v62  ;;  %v4664_v6 = vmax.f32 %v4662_v1, %v4663_v35  ;;  %v4669_v7 = vld [vmem:[#allocation8 + $0x6] sm:$0x1]  ;;  %v4670_v8 = vld [vmem:[#allocation8 + $0x7] sm:$0x1]  ;;  %v4676_v12 = vld [vmem:[#allocation8 + $0x8] sm:$0x1]  ;;  %v4276_v20 = vpop.permute.xlu1 %4275 }
 0x500   : > { %v4648_v13 = vpack.c.bf16 %v4647_v61, %v4647_v61  ;;  %v4671_v14 = vmax.f32 %v4669_v7, %v4670_v8  ;;  %v4677_v15 = vld [vmem:[#allocation8 + $0x9] sm:$0x1]  ;;  %v4683_v18 = vld [vmem:[#allocation8 + $0xa] sm:$0x1]  ;;  %v4684_v19 = vld [vmem:[#allocation8 + $0xb] sm:$0x1] }
 0x501   : > { %v4658_v21 = vpack.c.bf16 %v4657_v5, %v4657_v5  ;;  %v4665_v22 = vpack.c.bf16 %v4664_v6, %v4664_v6  ;;  %v4678_v23 = vmax.f32 %v4676_v12, %v4677_v15  ;;  %v4685_v24 = vmax.f32 %v4683_v18, %v4684_v19  ;;  %v4690_v25 = vld [vmem:[#allocation8 + $0xc] sm:$0x1]  ;;  %v4691_v2 = vld [vmem:[#allocation8 + $0xd] sm:$0x1]  ;;  %v4697_v26 = vld [vmem:[#allocation8 + $0xe] sm:$0x1] }
 0x502   : > { %4294 = vst.msk [vmem:[#allocation7 + $0x30] sm:$0xf] %vm4287_vm14, %v4276_v20  ;;  %v4653_v27 = vsel %vm11133_vm6, %v4648_v13, %v4652_v60  ;;  %v4672_v28 = vpack.c.bf16 %v4671_v14, %v4671_v14  ;;  %v4692_v30 = vmax.f32 %v4690_v25, %v4691_v2  ;;  %v4698_v4 = vld [vmem:[#allocation8 + $0xf] sm:$0x1]  ;;  %v9646_v33 = vld [vmem:[#allocation10 + $0x100] sm:$0xff]   ;;  %v9653_v7 = vld [vmem:[#allocation10 + $0x108] sm:$0xff]  }
 0x503   : > { %v4660_v31 = vsel %vm11133_vm6, %v4658_v21, %v4659_v63  ;;  %v4667_v32 = vsel %vm11133_vm6, %v4665_v22, %v4666_v3  ;;  %4654 = vst [vmem:[#allocation9] sm:$0x1] %v4653_v27  ;;  %v4679_v34 = vpack.c.bf16 %v4678_v23, %v4678_v23  ;;  %v4686_v36 = vpack.c.bf16 %v4685_v24, %v4685_v24  ;;  %v9650_v63 = vld [vmem:[#allocation7 + $0x34] ss:$8 sps:$4 sm:$0xff]   ;;  %v9649_v3 = vld [vmem:[#allocation10 + $0x148] sm:$0xff]  }
 0x504   : > { %v4674_v10 = vsel %vm11133_vm6, %v4672_v28, %v4673_v9  ;;  %4661 = vst [vmem:[#allocation9 + $0x1] sm:$0x1] %v4660_v31  ;;  %4668 = vst [vmem:[#allocation9 + $0x2] sm:$0x1] %v4667_v32  ;;  %v4693_v38 = vpack.c.bf16 %v4692_v30, %v4692_v30  ;;  %v4699_v39 = vmax.f32 %v4697_v26, %v4698_v4  ;;  %8423 = vmatprep.mubr.msk.bf16.mxu0 %vm4096_vm11, %v9650_v63  ;;  %v9656_v8 = vld [vmem:[#allocation10 + $0x150] sm:$0xff]   ;;  %v9663_v12 = vld [vmem:[#allocation10 + $0x180] sm:$0xff]  }
 0x505   : > { %4675 = vst [vmem:[#allocation9 + $0x3] sm:$0x1] %v4674_v10  ;;  %v4681_v40 = vsel %vm11133_vm6, %v4679_v34, %v4680_v16  ;;  %v4688_v41 = vsel %vm11133_vm6, %v4686_v36, %v4687_v29  ;;  %v9658_v9 = vld [vmem:[#allocation10 + $0x110] sm:$0xff]   ;;  %v9660_v13 = vld [vmem:[#allocation10 + $0x158] sm:$0xff]   ;;  %v9666_v15 = vld [vmem:[#allocation10 + $0x1c8] sm:$0xff]  }
 0x506   : > { %v4695_v45 = vsel %vm11133_vm6, %v4693_v38, %v4694_v37  ;;  %v4700_v17 = vpack.c.bf16 %v4699_v39, %v4699_v39  ;;  %4682 = vst [vmem:[#allocation9 + $0x4] sm:$0x1] %v4681_v40  ;;  %4689 = vst [vmem:[#allocation9 + $0x5] sm:$0x1] %v4688_v41  ;;  %v9661_v18 = vld [vmem:[#allocation10 + $0x118] sm:$0xff]   ;;  %v9667_v19 = vld [vmem:[#allocation10 + $0x188] sm:$0xff]  }
 0x507   : > { %4696 = vst [vmem:[#allocation9 + $0x6] sm:$0x1] %v4695_v45  ;;  %v9664_v20 = vld [vmem:[#allocation10 + $0x160] sm:$0xff]   ;;  %v9670_v21 = vld [vmem:[#allocation10 + $0x1d0] sm:$0xff]   ;;  %v9668_v24 = vld [vmem:[#allocation10 + $0x168] sm:$0xff]  }
 0x508   : > { %v4702_v48 = vsel %vm11133_vm6, %v4700_v17, %v4701_v11  ;;  %v9665_v22 = vld [vmem:[#allocation10 + $0x120] sm:$0xff]   ;;  %v9671_v23 = vld [vmem:[#allocation10 + $0x190] sm:$0xff]   ;;  %v9674_v25 = vld [vmem:[#allocation10 + $0x1d8] sm:$0xff]  }
 0x509   : > { %4703 = vst [vmem:[#allocation9 + $0x7] sm:$0x1] %v4702_v48  ;;  %v9669_v2 = vld [vmem:[#allocation10 + $0x128] sm:$0xff]   ;;  %v9675_v26 = vld [vmem:[#allocation10 + $0x198] sm:$0xff]   ;;  %v9672_v27 = vld [vmem:[#allocation10 + $0x170] sm:$0xff]  }
 0x50a   : > { %v9678_v28 = vld [vmem:[#allocation10 + $0x1e0] sm:$0xff]   ;;  %v9673_v29 = vld [vmem:[#allocation10 + $0x130] sm:$0xff]   ;;  %v9676_v4 = vld [vmem:[#allocation10 + $0x178] sm:$0xff]  }
 0x50b   : > { %v4278_v51 = vpop.permute.xlu0 %4277  ;;  %v9679_v30 = vld [vmem:[#allocation10 + $0x1a0] sm:$0xff]   ;;  %v9680_v31 = vld [vmem:[#allocation10 + $0x1e8] sm:$0xff]   ;;  %v9677_v32 = vld [vmem:[#allocation10 + $0x138] sm:$0xff]  }
 0x50c   : > { %v4298_v53 = vsel %vm4296_vm3, %v4278_v51, %v4297_v52  ;;  %v9681_v34 = vld [vmem:[#allocation10 + $0x1a8] sm:$0xff]   ;;  %v9682_v36 = vld [vmem:[#allocation10 + $0x1f0] sm:$0xff]   ;;  %v9686_v37 = vld [vmem:[#allocation10 + $0x240] sm:$0xff]  }
 0x50d   : > { %4299 = vst [vmem:[#allocation7 + $0x38] sm:$0xf] %v4298_v53  ;;  %v9683_v10 = vld [vmem:[#allocation10 + $0x1b0] sm:$0xff]   ;;  %v9687_v38 = vld [vmem:[#allocation10 + $0x200] sm:$0xff]   ;;  %v9684_v40 = vld [vmem:[#allocation10 + $0x1f8] sm:$0xff]  }
 0x50e   : > { %v9690_v41 = vld [vmem:[#allocation10 + $0x248] sm:$0xff]   ;;  %v9685_v11 = vld [vmem:[#allocation10 + $0x1b8] sm:$0xff]   ;;  %v9689_v45 = vld [vmem:[#allocation10 + $0x280] sm:$0xff]  }
 0x50f   : > { %v9695_v17 = vld [vmem:[#allocation10 + $0x210] sm:$0xff]   ;;  %v9693_v51 = vld [vmem:[#allocation10 + $0x288] sm:$0xff]   ;;  %v9699_v52 = vld [vmem:[#allocation10 + $0x218] sm:$0xff]  }
 0x510   : > { %v4865_v55 = vld [vmem:[#allocation9] sm:$0xff]  ;;  %v9696_v53 = vld [vmem:[#allocation10 + $0x2d0] sm:$0xff]  }
 0x511   : > { %v5377_v56 = vrot.slane %v4865_v55, %v11156_v54  ;;  %v5370_v58 = vcombine.high %v4865_v55, %v4865_v55  ;;  %v9702_v55 = vld [vmem:[#allocation10 + $0x260] sm:$0xff]   ;;  %v9710_v63 = vld [vmem:[#allocation10 + $0x270] sm:$0xff]  }
 0x513   : > { %v5385_v59 = vcombine.high %v5377_v56, %v5377_v56  ;;  %v11160_v60 = vrot.slane %v5370_v58, %v11156_v54  ;;  %v5393_v35 = vrot.slane %v5377_v56, %v11156_v54  ;;  %v9697_v56 = vld [vmem:[#allocation10 + $0x290] sm:$0xff]   ;;  %v9703_v58 = vld [vmem:[#allocation10 + $0x220] sm:$0xff]  }
 0x514   : > { %v9654_v1 = vld [vmem:[#allocation7 + $0x30] ss:$8 sps:$4 sm:$0xff]  }
 0x515   : > { %v5407_v61 = vrot.slane %v5385_v59, %v11156_v54  ;;  %v5386_v62 = vcombine.high %v11160_v60, %v11160_v60  ;;  %4591 = vmatmul.mubr.bf16.gmra.mrb[44].mxu0 %v9654_v1  ;;  %v5415_v14 = vcombine.high %v5393_v35, %v5393_v35  ;;  %v5400_v39 = vrot.slane %v11160_v60, %v11156_v54  ;;  %v9700_v59 = vld [vmem:[#allocation10 + $0x2d8] sm:$0xff]   ;;  %v9706_v60 = vld [vmem:[#allocation10 + $0x268] sm:$0xff]   ;;  %v9705_v1 = vld [vmem:[#allocation10 + $0x2a0] sm:$0xff]  }
 0x517   : > { %7116 = vmatprep.mubr.bf16.mxu1 %v5407_v61  ;;  %v5414_v5 = vrot.slane %v5386_v62, %v11156_v54  ;;  %v5417_v6 = vcombine.high %v5407_v61, %v5407_v61  ;;  %v5416_v48 = vcombine.high %v5400_v39, %v5400_v39  ;;  %v9707_v61 = vld [vmem:[#allocation10 + $0x228] sm:$0xff]   ;;  %v9704_v62 = vld [vmem:[#allocation10 + $0x2e0] sm:$0xff]  }
 0x518   : > { %7117 = vmatmul.mubr.bf16.vlgmr.msra.gmra.mrb[32].mxu1 %v5393_v35  ;;  %v9711_v35 = vld [vmem:[#allocation10 + $0x230] sm:$0xff]  }
 0x519   : > { %9083 = vmatpush3.bf16.msra.mxu1 %v9646_v33  ;;  %7196 = vmatprep.mubr.bf16.mxu1 %v5414_v5  ;;  %v5418_v16 = vcombine.high %v5414_v5, %v5414_v5  ;;  %v9701_v33 = vld [vmem:[#allocation10 + $0x298] sm:$0xff]  }
 0x51a   : > { %9084 = vmatprep.subr.bf16.mxu1 %v9649_v3  ;;  %7156 = vmatprep.mubr.bf16.mxu0 %v5417_v6  ;;  %v9708_v3 = vld [vmem:[#allocation10 + $0x2e8] sm:$0xff]   ;;  %v9714_v5 = vld [vmem:[#allocation10 + $0x278] sm:$0xff]  }
 0x51d   : > { %9085 = vmatpush3.bf16.msra.mxu1 %v9653_v7  ;;  %7157 = vmatmul.mubr.bf16.vlgmr.msra.gmra.mrb[48].mxu0 %v5415_v14 }
 0x51e   : > { %9086 = vmatprep.subr.bf16.mxu1 %v9656_v8  ;;  %9105 = vmatpush3.bf16.msra.mxu0 %v9663_v12  ;;  %v9709_v12 = vld [vmem:[#allocation10 + $0x2a8] sm:$0xff]  }
 0x51f   : > { %7236 = vmatprep.mubr.bf16.mxu0 %v5418_v16  ;;  %9106 = vmatprep.subr.bf16.mxu0 %v9666_v15 }
 0x521   : > { %9087 = vmatpush3.bf16.msra.mxu1 %v9658_v9 }
 0x522   : > { %9088 = vmatprep.subr.bf16.mxu1 %v9660_v13  ;;  %9107 = vmatpush3.bf16.msra.mxu0 %v9667_v19  ;;  %v9715_v13 = vld [vmem:[#allocation10 + $0x238] sm:$0xff]   ;;  %v9718_v19 = vld [vmem:[#allocation10 + $0x340] sm:$0xff]  }
 0x523   : > { %9108 = vmatprep.subr.bf16.mxu0 %v9670_v21 }
 0x525   : > { %9089 = vmatpush3.bf16.msra.mxu1 %v9661_v18  ;;  %v9712_v18 = vld [vmem:[#allocation10 + $0x2f0] sm:$0xff]  }
 0x526   : > { %9090 = vmatprep.subr.bf16.mxu1 %v9664_v20  ;;  %9109 = vmatpush3.bf16.msra.mxu0 %v9671_v23 }
 0x527   : > { %9110 = vmatprep.subr.bf16.mxu0 %v9674_v25  ;;  %v9717_v25 = vld [vmem:[#allocation10 + $0x2b8] sm:$0xff]  }
 0x529   : > { %9091 = vmatpush3.bf16.msra.mxu1 %v9665_v22  ;;  %v9713_v22 = vld [vmem:[#allocation10 + $0x2b0] sm:$0xff]  }
 0x52a   : > { %9092 = vmatprep.subr.bf16.mxu1 %v9668_v24  ;;  %9111 = vmatpush3.bf16.msra.mxu0 %v9675_v26  ;;  %v9716_v24 = vld [vmem:[#allocation10 + $0x2f8] sm:$0xff]  }
 0x52b   : > { %9112 = vmatprep.subr.bf16.mxu0 %v9678_v28  ;;  %v4708_v28 = vld [vmem:[#allocation9 + $0x8] sm:$0x1] }
 0x52d   : > { %9093 = vmatpush3.bf16.msra.mxu1 %v9669_v2  ;;  %v9721_v2 = vld [vmem:[#allocation10 + $0x3c0] sm:$0xff]  }
 0x52e   : > { %9094 = vmatprep.subr.bf16.mxu1 %v9672_v27  ;;  %9113 = vmatpush3.bf16.msra.mxu0 %v9679_v30 }
 0x52f   : > { %9114 = vmatprep.subr.bf16.mxu0 %v9680_v31  ;;  %v4715_v31 = vld [vmem:[#allocation9 + $0x9] sm:$0x1] }
 0x531   : > { %9095 = vmatpush3.bf16.msra.mxu1 %v9673_v29 }
 0x532   : > { %9096 = vmatprep.subr.bf16.mxu1 %v9676_v4  ;;  %9115 = vmatpush3.bf16.msra.mxu0 %v9681_v34 }
 0x533   : > { %9116 = vmatprep.subr.bf16.mxu0 %v9682_v36  ;;  %v4722_v36 = vld [vmem:[#allocation9 + $0xa] sm:$0x1] }
 0x535   : > { %9097 = vmatpush3.bf16.msra.mxu1 %v9677_v32 }
 0x536   : > { %9126 = vmatprep.subr.bf16.mxu1 %v9686_v37  ;;  %9117 = vmatpush3.bf16.msra.mxu0 %v9683_v10 }
 0x537   : > { %9118 = vmatprep.subr.bf16.mxu0 %v9684_v40  ;;  %v4729_v40 = vld [vmem:[#allocation9 + $0xb] sm:$0x1] }
 0x538   : > { %7197 = vmatmul.mubr.bf16.vlgmr.msra.gmra.mrb[36].mxu1 %v5400_v39 }
 0x539   : > { %9127 = vmatpush3.bf16.msra.mxu1 %v9687_v38 }
 0x53a   : > { %9128 = vmatprep.subr.bf16.mxu1 %v9690_v41  ;;  %9119 = vmatpush3.bf16.msra.mxu0 %v9685_v11 }
 0x53b   : > { %9148 = vmatprep.subr.bf16.mxu0 %v9688_v43 }
 0x53d   : > { %9129 = vmatpush3.bf16.msra.mxu1 %v9691_v42  ;;  %7237 = vmatmul.mubr.bf16.vlgmr.msra.gmra.mrb[52].mxu0 %v5416_v48 }
 0x53e   : > { %9130 = vmatprep.subr.bf16.mxu1 %v9694_v44  ;;  %9149 = vmatpush3.bf16.msra.mxu0 %v9689_v45 }
 0x53f   : > { %9150 = vmatprep.subr.bf16.mxu0 %v9692_v49 }
 0x541   : > { %9131 = vmatpush3.bf16.msra.mxu1 %v9695_v17 }
 0x542   : > { %9132 = vmatprep.subr.bf16.mxu1 %v9698_v50  ;;  %9151 = vmatpush3.bf16.msra.mxu0 %v9693_v51 }
 0x543   : > { %9152 = vmatprep.subr.bf16.mxu0 %v9696_v53 }
 0x545   : > { %9133 = vmatpush3.bf16.msra.mxu1 %v9699_v52 }
 0x546   : > { %9134 = vmatprep.subr.bf16.mxu1 %v9702_v55  ;;  %9153 = vmatpush3.bf16.msra.mxu0 %v9697_v56 }
 0x547   : > { %9154 = vmatprep.subr.bf16.mxu0 %v9700_v59  ;;  %v4743_v59 = vld [vmem:[#allocation9 + $0xd] sm:$0x1] }
 0x549   : > { %9135 = vmatpush3.bf16.msra.mxu1 %v9703_v58  ;;  %v4736_v58 = vld [vmem:[#allocation9 + $0xc] sm:$0x1] }
 0x54a   : > { %9136 = vmatprep.subr.bf16.mxu1 %v9706_v60  ;;  %9155 = vmatpush3.bf16.msra.mxu0 %v9701_v33 }
 0x54b   : > { %9156 = vmatprep.subr.bf16.mxu0 %v9704_v62 }
 0x54d   : > { %9137 = vmatpush3.bf16.msra.mxu1 %v9707_v61  ;;  %v4576_v6 = vpop.f32.mrb[36].mxu0 }
 0x54e   : > { %9138 = vmatprep.subr.bf16.mxu1 %v9710_v63  ;;  %v4608_v7 = vmul.f32 %v11121_v46, %v4576_v6  ;;  %v4578_v8 = vpop.f32.mrb[37].mxu0  ;;  %9157 = vmatpush3.bf16.msra.mxu0 %v9705_v1 }
 0x54f   : > { %v4579_v9 = vpop.f32.mrb[38].mxu0  ;;  %9158 = vmatprep.subr.bf16.mxu0 %v9708_v3 }
 0x550   : > { %v4623_v14 = vadd.f32 %v11126_v47, %v4608_v7  ;;  %v4609_v15 = vmul.f32 %v11121_v46, %v4579_v9  ;;  %v4581_v16 = vpop.f32.mrb[39].mxu0  ;;  %v4757_v9 = vld [vmem:[#allocation9 + $0xf] sm:$0x1] }
 0x551   : > { %9139 = vmatpush3.bf16.msra.mxu1 %v9711_v35  ;;  %v4750_v35 = vld [vmem:[#allocation9 + $0xe] sm:$0x1] }
 0x552   : > { %9140 = vmatprep.subr.bf16.mxu1 %v9714_v5  ;;  %v4631_v20 = vmax.f32 %v4623_v14, 0.0  ;;  %v4624_v21 = vadd.f32 %v11126_v47, %v4609_v15  ;;  %9159 = vmatpush3.bf16.msra.mxu0 %v9709_v12 }
 0x553   : > { %9160 = vmatprep.subr.bf16.mxu0 %v9712_v18 }
 0x554   : > { %4639 = vst [vmem:[#allocation8 + $0x10] sm:$0xff] %v4631_v20  ;;  %v4632_v23 = vmax.f32 %v4624_v21, 0.0 }
 0x555   : > { %9141 = vmatpush3.bf16.msra.mxu1 %v9715_v13 }
 0x556   : > { %9170 = vmatprep.subr.bf16.mxu1 %v9718_v19  ;;  %4640 = vst [vmem:[#allocation8 + $0x18] sm:$0xff] %v4632_v23  ;;  %9161 = vmatpush3.bf16.msra.mxu0 %v9713_v22  ;;  %v9719_v23 = vld [vmem:[#allocation10 + $0x300] sm:$0xff]  }
 0x557   : > { %9162 = vmatprep.subr.bf16.mxu0 %v9716_v24 }
 0x55a   : > { %9163 = vmatpush3.bf16.msra.mxu0 %v9717_v25 }
 0x55b   : > { %v4704_v26 = vld [vmem:[#allocation8 + $0x10] sm:$0x1]  ;;  %v4705_v27 = vld [vmem:[#allocation8 + $0x11] sm:$0x1]  ;;  %v4711_v29 = vld [vmem:[#allocation8 + $0x12] sm:$0x1]  ;;  %9192 = vmatprep.subr.bf16.mxu0 %v9721_v2 }
 0x55c   : > { %v4706_v30 = vmax.f32 %v4704_v26, %v4705_v27  ;;  %v4712_v4 = vld [vmem:[#allocation8 + $0x13] sm:$0x1]  ;;  %v4718_v32 = vld [vmem:[#allocation8 + $0x14] sm:$0x1]  ;;  %v4719_v34 = vld [vmem:[#allocation8 + $0x15] sm:$0x1] }
 0x55d   : > { %v4713_v37 = vmax.f32 %v4711_v29, %v4712_v4  ;;  %v4720_v10 = vmax.f32 %v4718_v32, %v4719_v34  ;;  %v4725_v38 = vld [vmem:[#allocation8 + $0x16] sm:$0x1]  ;;  %v4726_v39 = vld [vmem:[#allocation8 + $0x17] sm:$0x1]  ;;  %v4732_v41 = vld [vmem:[#allocation8 + $0x18] sm:$0x1] }
 0x55e   : > { %v4707_v11 = vpack.c.bf16 %v4706_v30, %v4706_v30  ;;  %v4727_v42 = vmax.f32 %v4725_v38, %v4726_v39  ;;  %v4733_v43 = vld [vmem:[#allocation8 + $0x19] sm:$0x1]  ;;  %v4739_v44 = vld [vmem:[#allocation8 + $0x1a] sm:$0x1]  ;;  %v4740_v45 = vld [vmem:[#allocation8 + $0x1b] sm:$0x1] }
 0x55f   : > { %v4714_v17 = vpack.c.bf16 %v4713_v37, %v4713_v37  ;;  %v4721_v48 = vpack.c.bf16 %v4720_v10, %v4720_v10  ;;  %v4734_v49 = vmax.f32 %v4732_v41, %v4733_v43  ;;  %v4741_v50 = vmax.f32 %v4739_v44, %v4740_v45  ;;  %v4746_v51 = vld [vmem:[#allocation8 + $0x1c] sm:$0x1]  ;;  %v4747_v52 = vld [vmem:[#allocation8 + $0x1d] sm:$0x1]  ;;  %v4753_v53 = vld [vmem:[#allocation8 + $0x1e] sm:$0x1] }
 0x560   : > { %v4709_v55 = vsel %vm11133_vm6, %v4707_v11, %v4708_v28  ;;  %v4728_v56 = vpack.c.bf16 %v4727_v42, %v4727_v42  ;;  %v4748_v60 = vmax.f32 %v4746_v51, %v4747_v52  ;;  %v4754_v33 = vld [vmem:[#allocation8 + $0x1f] sm:$0x1]  ;;  %v9723_v27 = vld [vmem:[#allocation10 + $0x348] sm:$0xff]   ;;  %v9729_v34 = vld [vmem:[#allocation10 + $0x3d0] sm:$0xff]  }
 0x561   : > { %v4716_v61 = vsel %vm11133_vm6, %v4714_v17, %v4715_v31  ;;  %v4723_v62 = vsel %vm11133_vm6, %v4721_v48, %v4722_v36  ;;  %4710 = vst [vmem:[#allocation9 + $0x8] sm:$0x1] %v4709_v55  ;;  %v4735_v63 = vpack.c.bf16 %v4734_v49, %v4734_v49  ;;  %v4742_v1 = vpack.c.bf16 %v4741_v50, %v4741_v50  ;;  %v9722_v26 = vld [vmem:[#allocation10 + $0x380] sm:$0xff]   ;;  %v9725_v29 = vld [vmem:[#allocation10 + $0x3c8] sm:$0xff]   ;;  %v9727_v31 = vld [vmem:[#allocation10 + $0x350] sm:$0xff]  }
 0x562   : > { %v4730_v3 = vsel %vm11133_vm6, %v4728_v56, %v4729_v40  ;;  %4717 = vst [vmem:[#allocation9 + $0x9] sm:$0x1] %v4716_v61  ;;  %4724 = vst [vmem:[#allocation9 + $0xa] sm:$0x1] %v4723_v62  ;;  %v4749_v5 = vpack.c.bf16 %v4748_v60, %v4748_v60  ;;  %v4755_v6 = vmax.f32 %v4753_v53, %v4754_v33  ;;  %v9724_v4 = vld [vmem:[#allocation10 + $0x308] sm:$0xff]   ;;  %v9728_v36 = vld [vmem:[#allocation10 + $0x310] sm:$0xff]  }
 0x563   : > { %4731 = vst [vmem:[#allocation9 + $0xb] sm:$0x1] %v4730_v3  ;;  %v4737_v7 = vsel %vm11133_vm6, %v4735_v63, %v4736_v58  ;;  %v4744_v8 = vsel %vm11133_vm6, %v4742_v1, %v4743_v59  ;;  %v9726_v32 = vld [vmem:[#allocation10 + $0x388] sm:$0xff]   ;;  %v9731_v37 = vld [vmem:[#allocation10 + $0x358] sm:$0xff]   ;;  %v9730_v10 = vld [vmem:[#allocation10 + $0x390] sm:$0xff]  }
 0x564   : > { %v4751_v12 = vsel %vm11133_vm6, %v4749_v5, %v4750_v35  ;;  %v4756_v13 = vpack.c.bf16 %v4755_v6, %v4755_v6  ;;  %4738 = vst [vmem:[#allocation9 + $0xc] sm:$0x1] %v4737_v7  ;;  %4745 = vst [vmem:[#allocation9 + $0xd] sm:$0x1] %v4744_v8  ;;  %v9733_v38 = vld [vmem:[#allocation10 + $0x3d8] sm:$0xff]   ;;  %v9735_v40 = vld [vmem:[#allocation10 + $0x360] sm:$0xff]  }
 0x565   : > { %4752 = vst [vmem:[#allocation9 + $0xe] sm:$0x1] %v4751_v12  ;;  %v9732_v39 = vld [vmem:[#allocation10 + $0x318] sm:$0xff]   ;;  %v9737_v11 = vld [vmem:[#allocation10 + $0x3e0] sm:$0xff]   ;;  %v9739_v43 = vld [vmem:[#allocation10 + $0x368] sm:$0xff]  }
 0x566   : > { %v4758_v14 = vsel %vm11133_vm6, %v4756_v13, %v4757_v9  ;;  %v9734_v41 = vld [vmem:[#allocation10 + $0x398] sm:$0xff]   ;;  %v9736_v42 = vld [vmem:[#allocation10 + $0x320] sm:$0xff]   ;;  %v9741_v45 = vld [vmem:[#allocation10 + $0x3e8] sm:$0xff]  }
 0x567   : > { %4759 = vst [vmem:[#allocation9 + $0xf] sm:$0x1] %v4758_v14  ;;  %v9738_v44 = vld [vmem:[#allocation10 + $0x3a0] sm:$0xff]   ;;  %v9740_v17 = vld [vmem:[#allocation10 + $0x328] sm:$0xff]   ;;  %v9743_v48 = vld [vmem:[#allocation10 + $0x370] sm:$0xff]  }
 0x568   : > { %v9742_v49 = vld [vmem:[#allocation10 + $0x3a8] sm:$0xff]   ;;  %v9745_v50 = vld [vmem:[#allocation10 + $0x3f0] sm:$0xff]   ;;  %v9747_v52 = vld [vmem:[#allocation10 + $0x378] sm:$0xff]  }
 0x569   : > { %v9744_v51 = vld [vmem:[#allocation10 + $0x330] sm:$0xff]   ;;  %v9749_v55 = vld [vmem:[#allocation10 + $0x3f8] sm:$0xff]   ;;  %v9751_v58 = vld [vmem:[#allocation10 + $0x440] sm:$0xff]  }
 0x56a   : > { %v9746_v53 = vld [vmem:[#allocation10 + $0x3b0] sm:$0xff]   ;;  %v9748_v56 = vld [vmem:[#allocation10 + $0x338] sm:$0xff]   ;;  %v9753_v33 = vld [vmem:[#allocation10 + $0x4c0] sm:$0xff]  }
 0x56b   : > { %v9750_v59 = vld [vmem:[#allocation10 + $0x3b8] sm:$0xff]   ;;  %v9752_v61 = vld [vmem:[#allocation10 + $0x400] sm:$0xff]   ;;  %v9755_v62 = vld [vmem:[#allocation10 + $0x448] sm:$0xff]  }
 0x56c   : > { %v9754_v63 = vld [vmem:[#allocation10 + $0x480] sm:$0xff]   ;;  %v9757_v35 = vld [vmem:[#allocation10 + $0x4c8] sm:$0xff]   ;;  %v9759_v5 = vld [vmem:[#allocation10 + $0x450] sm:$0xff]  }
 0x56d   : > { %v9756_v3 = vld [vmem:[#allocation10 + $0x408] sm:$0xff]   ;;  %v9761_v7 = vld [vmem:[#allocation10 + $0x4d0] sm:$0xff]   ;;  %v9763_v9 = vld [vmem:[#allocation10 + $0x458] sm:$0xff]  }
 0x56e   : > { %v4866_v15 = vld [vmem:[#allocation9 + $0x8] sm:$0xff]  ;;  %v9765_v13 = vld [vmem:[#allocation10 + $0x4d8] sm:$0xff]  }
 0x56f   : > { %v5426_v16 = vrot.slane %v4866_v15, %v11156_v54  ;;  %v5419_v18 = vcombine.high %v4866_v15, %v4866_v15  ;;  %v9758_v6 = vld [vmem:[#allocation10 + $0x488] sm:$0xff]   ;;  %v9760_v8 = vld [vmem:[#allocation10 + $0x410] sm:$0xff]   ;;  %v9764_v14 = vld [vmem:[#allocation10 + $0x418] sm:$0xff]  }
 0x570   : > { %v9762_v12 = vld [vmem:[#allocation10 + $0x490] sm:$0xff]   ;;  %v9767_v15 = vld [vmem:[#allocation10 + $0x460] sm:$0xff]  }
 0x571   : > { %v5434_v19 = vcombine.high %v5426_v16, %v5426_v16  ;;  %v11192_v20 = vrot.slane %v5419_v18, %v11156_v54  ;;  %v5442_v21 = vrot.slane %v5426_v16, %v11156_v54  ;;  %v9766_v16 = vld [vmem:[#allocation10 + $0x498] sm:$0xff]   ;;  %v9769_v18 = vld [vmem:[#allocation10 + $0x4e0] sm:$0xff]  }
 0x573   : > { %v5456_v22 = vrot.slane %v5434_v19, %v11156_v54  ;;  %v5435_v24 = vcombine.high %v11192_v20, %v11192_v20  ;;  %v5464_v28 = vcombine.high %v5442_v21, %v5442_v21  ;;  %v5449_v60 = vrot.slane %v11192_v20, %v11156_v54  ;;  %v9768_v19 = vld [vmem:[#allocation10 + $0x420] sm:$0xff]   ;;  %v9771_v20 = vld [vmem:[#allocation10 + $0x468] sm:$0xff]  }
 0x575   : > { %7276 = vmatprep.mubr.bf16.mxu1 %v5456_v22  ;;  %v5466_v25 = vcombine.high %v5456_v22, %v5456_v22  ;;  %v5463_v2 = vrot.slane %v5435_v24, %v11156_v54  ;;  %v5465_v1 = vcombine.high %v5449_v60, %v5449_v60  ;;  %v9773_v22 = vld [vmem:[#allocation10 + $0x4e8] sm:$0xff]   ;;  %v9775_v24 = vld [vmem:[#allocation10 + $0x470] sm:$0xff]  }
 0x576   : > { %7277 = vmatmul.mubr.bf16.vlgmr.msra.gmra.mrb[40].mxu1 %v5442_v21  ;;  %v9770_v21 = vld [vmem:[#allocation10 + $0x4a0] sm:$0xff]  }
 0x577   : > { %9171 = vmatpush3.bf16.msra.mxu1 %v9719_v23  ;;  %7316 = vmatprep.mubr.bf16.mxu0 %v5466_v25  ;;  %v5467_v30 = vcombine.high %v5463_v2, %v5463_v2  ;;  %v9772_v23 = vld [vmem:[#allocation10 + $0x428] sm:$0xff]  }
 0x578   : > { %7356 = vmatprep.mubr.bf16.mxu1 %v5463_v2  ;;  %7317 = vmatmul.mubr.bf16.vlgmr.msra.gmra.mrb[56].mxu0 %v5464_v28  ;;  %v9774_v25 = vld [vmem:[#allocation10 + $0x4a8] sm:$0xff]   ;;  %v9777_v2 = vld [vmem:[#allocation10 + $0x4f0] sm:$0xff]   ;;  %v9779_v28 = vld [vmem:[#allocation10 + $0x478] sm:$0xff]  }
 0x579   : > { %9193 = vmatpush3.bf16.msra.mxu0 %v9722_v26  ;;  %9172 = vmatprep.subr.bf16.mxu1 %v9723_v27  ;;  %v9776_v26 = vld [vmem:[#allocation10 + $0x430] sm:$0xff]  }
 0x57a   : > { %7396 = vmatprep.mubr.bf16.mxu0 %v5467_v30  ;;  %9194 = vmatprep.subr.bf16.mxu0 %v9725_v29 }
 0x57b   : > { %9173 = vmatpush3.bf16.msra.mxu1 %v9724_v4  ;;  %v9778_v4 = vld [vmem:[#allocation10 + $0x4b0] sm:$0xff]  }
 0x57c   : > { %9174 = vmatprep.subr.bf16.mxu1 %v9727_v31 }
 0x57d   : > { %9195 = vmatpush3.bf16.msra.mxu0 %v9726_v32  ;;  %v9781_v32 = vld [vmem:[#allocation10 + $0x4f8] sm:$0xff]  }
 0x57e   : > { %9196 = vmatprep.subr.bf16.mxu0 %v9729_v34 }
 0x57f   : > { %9175 = vmatpush3.bf16.msra.mxu1 %v9728_v36 }
 0x580   : > { %9176 = vmatprep.subr.bf16.mxu1 %v9731_v37 }
 0x581   : > { %9197 = vmatpush3.bf16.msra.mxu0 %v9730_v10  ;;  %v9780_v10 = vld [vmem:[#allocation10 + $0x438] sm:$0xff]  }
 0x582   : > { %9198 = vmatprep.subr.bf16.mxu0 %v9733_v38  ;;  %v9783_v38 = vld [vmem:[#allocation10 + $0x540] sm:$0xff]  }
 0x583   : > { %9177 = vmatpush3.bf16.msra.mxu1 %v9732_v39 }
 0x584   : > { %9178 = vmatprep.subr.bf16.mxu1 %v9735_v40 }
 0x585   : > { %9199 = vmatpush3.bf16.msra.mxu0 %v9734_v41  ;;  %v9782_v41 = vld [vmem:[#allocation10 + $0x4b8] sm:$0xff]  }
 0x586   : > { %9200 = vmatprep.subr.bf16.mxu0 %v9737_v11  ;;  %v9786_v11 = vld [vmem:[#allocation10 + $0x5c0] sm:$0xff]  }
 0x587   : > { %9179 = vmatpush3.bf16.msra.mxu1 %v9736_v42 }
 0x588   : > { %9180 = vmatprep.subr.bf16.mxu1 %v9739_v43 }
 0x589   : > { %9201 = vmatpush3.bf16.msra.mxu0 %v9738_v44  ;;  %v4764_v44 = vld [vmem:[#allocation9 + $0x10] sm:$0x1] }
 0x58a   : > { %9202 = vmatprep.subr.bf16.mxu0 %v9741_v45 }
 0x58b   : > { %9181 = vmatpush3.bf16.msra.mxu1 %v9740_v17 }
 0x58c   : > { %9182 = vmatprep.subr.bf16.mxu1 %v9743_v48 }
 0x58d   : > { %9203 = vmatpush3.bf16.msra.mxu0 %v9742_v49  ;;  %v4771_v49 = vld [vmem:[#allocation9 + $0x11] sm:$0x1] }
 0x58e   : > { %9204 = vmatprep.subr.bf16.mxu0 %v9745_v50 }
 0x58f   : > { %9183 = vmatpush3.bf16.msra.mxu1 %v9744_v51  ;;  %v4778_v51 = vld [vmem:[#allocation9 + $0x12] sm:$0x1] }
 0x590   : > { %9184 = vmatprep.subr.bf16.mxu1 %v9747_v52 }
 0x591   : > { %9205 = vmatpush3.bf16.msra.mxu0 %v9746_v53 }
 0x592   : > { %9206 = vmatprep.subr.bf16.mxu0 %v9749_v55 }
 0x593   : > { %9185 = vmatpush3.bf16.msra.mxu1 %v9748_v56 }
 0x594   : > { %9214 = vmatprep.subr.bf16.mxu1 %v9751_v58  ;;  %v4785_v58 = vld [vmem:[#allocation9 + $0x13] sm:$0x1] }
 0x595   : > { %9207 = vmatpush3.bf16.msra.mxu0 %v9750_v59 }
 0x596   : > { %7357 = vmatmul.mubr.bf16.vlgmr.msra.gmra.mrb[44].mxu1 %v5449_v60  ;;  %9236 = vmatprep.subr.bf16.mxu0 %v9753_v33 }
 0x597   : > { %9215 = vmatpush3.bf16.msra.mxu1 %v9752_v61 }
 0x598   : > { %7397 = vmatmul.mubr.bf16.vlgmr.msra.gmra.mrb[60].mxu0 %v5465_v1  ;;  %9216 = vmatprep.subr.bf16.mxu1 %v9755_v62 }
 0x599   : > { %9237 = vmatpush3.bf16.msra.mxu0 %v9754_v63 }
 0x59a   : > { %9238 = vmatprep.subr.bf16.mxu0 %v9757_v35 }
 0x59b   : > { %9217 = vmatpush3.bf16.msra.mxu1 %v9756_v3 }
 0x59c   : > { %9218 = vmatprep.subr.bf16.mxu1 %v9759_v5 }
 0x59d   : > { %9239 = vmatpush3.bf16.msra.mxu0 %v9758_v6 }
 0x59e   : > { %9240 = vmatprep.subr.bf16.mxu0 %v9761_v7 }
 0x59f   : > { %9219 = vmatpush3.bf16.msra.mxu1 %v9760_v8 }
 0x5a0   : > { %9220 = vmatprep.subr.bf16.mxu1 %v9763_v9 }
 0x5a1   : > { %9241 = vmatpush3.bf16.msra.mxu0 %v9762_v12 }
 0x5a2   : > { %9242 = vmatprep.subr.bf16.mxu0 %v9765_v13  ;;  %v4792_v13 = vld [vmem:[#allocation9 + $0x14] sm:$0x1] }
 0x5a3   : > { %9221 = vmatpush3.bf16.msra.mxu1 %v9764_v14  ;;  %v4799_v14 = vld [vmem:[#allocation9 + $0x15] sm:$0x1] }
 0x5a4   : > { %9222 = vmatprep.subr.bf16.mxu1 %v9767_v15 }
 0x5a5   : > { %9243 = vmatpush3.bf16.msra.mxu0 %v9766_v16 }
 0x5a6   : > { %9244 = vmatprep.subr.bf16.mxu0 %v9769_v18 }
 0x5a7   : > { %9223 = vmatpush3.bf16.msra.mxu1 %v9768_v19 }
 0x5a8   : > { %9224 = vmatprep.subr.bf16.mxu1 %v9771_v20 }
 0x5a9   : > { %9245 = vmatpush3.bf16.msra.mxu0 %v9770_v21 }
 0x5aa   : > { %9246 = vmatprep.subr.bf16.mxu0 %v9773_v22  ;;  %v4806_v22 = vld [vmem:[#allocation9 + $0x16] sm:$0x1] }
 0x5ab   : > { %9225 = vmatpush3.bf16.msra.mxu1 %v9772_v23  ;;  %v4584_v27 = vpop.f32.mrb[40].mxu0 }
 0x5ac   : > { %9226 = vmatprep.subr.bf16.mxu1 %v9775_v24  ;;  %v4610_v29 = vmul.f32 %v11121_v46, %v4584_v27  ;;  %v4586_v30 = vpop.f32.mrb[41].mxu0  ;;  %v4813_v27 = vld [vmem:[#allocation9 + $0x17] sm:$0x1] }
 0x5ad   : > { %9247 = vmatpush3.bf16.msra.mxu0 %v9774_v25  ;;  %v4587_v31 = vpop.f32.mrb[42].mxu0 }
 0x5ae   : > { %9248 = vmatprep.subr.bf16.mxu0 %v9777_v2  ;;  %v4625_v34 = vadd.f32 %v11126_v47, %v4610_v29  ;;  %v4611_v36 = vmul.f32 %v11121_v46, %v4587_v31  ;;  %v4589_v37 = vpop.f32.mrb[43].mxu0 }
 0x5af   : > { %9227 = vmatpush3.bf16.msra.mxu1 %v9776_v26 }
 0x5b0   : > { %9228 = vmatprep.subr.bf16.mxu1 %v9779_v28  ;;  %v4633_v39 = vmax.f32 %v4625_v34, 0.0  ;;  %v4626_v40 = vadd.f32 %v11126_v47, %v4611_v36 }
 0x5b1   : > { %9249 = vmatpush3.bf16.msra.mxu0 %v9778_v4 }
 0x5b2   : > { %9250 = vmatprep.subr.bf16.mxu0 %v9781_v32  ;;  %4641 = vst [vmem:[#allocation8 + $0x20] sm:$0xff] %v4633_v39  ;;  %v4634_v42 = vmax.f32 %v4626_v40, 0.0 }
 0x5b3   : > { %9229 = vmatpush3.bf16.msra.mxu1 %v9780_v10 }
 0x5b4   : > { %9258 = vmatprep.subr.bf16.mxu1 %v9783_v38  ;;  %4642 = vst [vmem:[#allocation8 + $0x28] sm:$0xff] %v4634_v42  ;;  %v9784_v38 = vld [vmem:[#allocation10 + $0x500] sm:$0xff]   ;;  %v9788_v42 = vld [vmem:[#allocation10 + $0x548] sm:$0xff]  }
 0x5b5   : > { %9251 = vmatpush3.bf16.msra.mxu0 %v9782_v41 }
 0x5b6   : > { %9280 = vmatprep.subr.bf16.mxu0 %v9786_v11  ;;  %v9787_v11 = vld [vmem:[#allocation10 + $0x580] sm:$0xff]  }
 0x5b9   : > { %v4760_v46 = vld [vmem:[#allocation8 + $0x20] sm:$0x1]  ;;  %v4761_v43 = vld [vmem:[#allocation8 + $0x21] sm:$0x1]  ;;  %v4767_v45 = vld [vmem:[#allocation8 + $0x22] sm:$0x1] }
 0x5ba   : > { %v4762_v17 = vmax.f32 %v4760_v46, %v4761_v43  ;;  %v4768_v48 = vld [vmem:[#allocation8 + $0x23] sm:$0x1]  ;;  %v4774_v50 = vld [vmem:[#allocation8 + $0x24] sm:$0x1]  ;;  %v4775_v47 = vld [vmem:[#allocation8 + $0x25] sm:$0x1] }
 0x5bb   : > { %v4769_v52 = vmax.f32 %v4767_v45, %v4768_v48  ;;  %v4776_v53 = vmax.f32 %v4774_v50, %v4775_v47  ;;  %v4781_v55 = vld [vmem:[#allocation8 + $0x26] sm:$0x1]  ;;  %v4782_v56 = vld [vmem:[#allocation8 + $0x27] sm:$0x1]  ;;  %v4788_v59 = vld [vmem:[#allocation8 + $0x28] sm:$0x1] }
 0x5bc   : > { %v4763_v60 = vpack.c.bf16 %v4762_v17, %v4762_v17  ;;  %v4783_v33 = vmax.f32 %v4781_v55, %v4782_v56  ;;  %v4789_v61 = vld [vmem:[#allocation8 + $0x29] sm:$0x1]  ;;  %v4795_v62 = vld [vmem:[#allocation8 + $0x2a] sm:$0x1]  ;;  %v4796_v63 = vld [vmem:[#allocation8 + $0x2b] sm:$0x1] }
 0x5bd   : > { %v4770_v1 = vpack.c.bf16 %v4769_v52, %v4769_v52  ;;  %v4777_v35 = vpack.c.bf16 %v4776_v53, %v4776_v53  ;;  %v4790_v3 = vmax.f32 %v4788_v59, %v4789_v61  ;;  %v4797_v5 = vmax.f32 %v4795_v62, %v4796_v63  ;;  %v4802_v6 = vld [vmem:[#allocation8 + $0x2c] sm:$0x1]  ;;  %v4803_v7 = vld [vmem:[#allocation8 + $0x2d] sm:$0x1]  ;;  %v4809_v8 = vld [vmem:[#allocation8 + $0x2e] sm:$0x1] }
 0x5be   : > { %v4765_v9 = vsel %vm11133_vm6, %v4763_v60, %v4764_v44  ;;  %v4784_v12 = vpack.c.bf16 %v4783_v33, %v4783_v33  ;;  %v4804_v15 = vmax.f32 %v4802_v6, %v4803_v7  ;;  %v4810_v16 = vld [vmem:[#allocation8 + $0x2f] sm:$0x1]  ;;  %v9790_v43 = vld [vmem:[#allocation10 + $0x5c8] sm:$0xff]   ;;  %v9796_v47 = vld [vmem:[#allocation10 + $0x558] sm:$0xff]  }
 0x5bf   : > { %v4772_v18 = vsel %vm11133_vm6, %v4770_v1, %v4771_v49  ;;  %v4779_v19 = vsel %vm11133_vm6, %v4777_v35, %v4778_v51  ;;  %4766 = vst [vmem:[#allocation9 + $0x10] sm:$0x1] %v4765_v9  ;;  %v4791_v20 = vpack.c.bf16 %v4790_v3, %v4790_v3  ;;  %v4798_v21 = vpack.c.bf16 %v4797_v5, %v4797_v5  ;;  %v9789_v45 = vld [vmem:[#allocation10 + $0x508] sm:$0xff]   ;;  %v9792_v17 = vld [vmem:[#allocation10 + $0x550] sm:$0xff]   ;;  %v9798_v52 = vld [vmem:[#allocation10 + $0x5d8] sm:$0xff]  }
 0x5c0   : > { %v4786_v23 = vsel %vm11133_vm6, %v4784_v12, %v4785_v58  ;;  %4773 = vst [vmem:[#allocation9 + $0x11] sm:$0x1] %v4772_v18  ;;  %4780 = vst [vmem:[#allocation9 + $0x12] sm:$0x1] %v4779_v19  ;;  %v4805_v24 = vpack.c.bf16 %v4804_v15, %v4804_v15  ;;  %v4811_v25 = vmax.f32 %v4809_v8, %v4810_v16  ;;  %v9791_v48 = vld [vmem:[#allocation10 + $0x588] sm:$0xff]   ;;  %v9794_v49 = vld [vmem:[#allocation10 + $0x5d0] sm:$0xff]  }
 0x5c1   : > { %4787 = vst [vmem:[#allocation9 + $0x13] sm:$0x1] %v4786_v23  ;;  %v4793_v2 = vsel %vm11133_vm6, %v4791_v20, %v4792_v13  ;;  %v4800_v26 = vsel %vm11133_vm6, %v4798_v21, %v4799_v14  ;;  %v9793_v50 = vld [vmem:[#allocation10 + $0x510] sm:$0xff]   ;;  %v9797_v53 = vld [vmem:[#allocation10 + $0x518] sm:$0xff]   ;;  %v9800_v55 = vld [vmem:[#allocation10 + $0x560] sm:$0xff]  }
 0x5c2   : > { %v4807_v28 = vsel %vm11133_vm6, %v4805_v24, %v4806_v22  ;;  %v4812_v29 = vpack.c.bf16 %v4811_v25, %v4811_v25  ;;  %4794 = vst [vmem:[#allocation9 + $0x14] sm:$0x1] %v4793_v2  ;;  %4801 = vst [vmem:[#allocation9 + $0x15] sm:$0x1] %v4800_v26  ;;  %v9795_v51 = vld [vmem:[#allocation10 + $0x590] sm:$0xff]   ;;  %v9799_v56 = vld [vmem:[#allocation10 + $0x598] sm:$0xff]  }
 0x5c3   : > { %4808 = vst [vmem:[#allocation9 + $0x16] sm:$0x1] %v4807_v28  ;;  %v9802_v58 = vld [vmem:[#allocation10 + $0x5e0] sm:$0xff]   ;;  %v9804_v60 = vld [vmem:[#allocation10 + $0x568] sm:$0xff]   ;;  %v9808_v63 = vld [vmem:[#allocation10 + $0x570] sm:$0xff]  }
 0x5c4   : > { %v4814_v30 = vsel %vm11133_vm6, %v4812_v29, %v4813_v27  ;;  %v9801_v59 = vld [vmem:[#allocation10 + $0x520] sm:$0xff]   ;;  %v9806_v61 = vld [vmem:[#allocation10 + $0x5e8] sm:$0xff]   ;;  %v9810_v5 = vld [vmem:[#allocation10 + $0x5f0] sm:$0xff]  }
 0x5c5   : > { %4815 = vst [vmem:[#allocation9 + $0x17] sm:$0x1] %v4814_v30  ;;  %v9803_v33 = vld [vmem:[#allocation10 + $0x5a0] sm:$0xff]   ;;  %v9805_v62 = vld [vmem:[#allocation10 + $0x528] sm:$0xff]   ;;  %v9809_v9 = vld [vmem:[#allocation10 + $0x530] sm:$0xff]  }
 0x5c6   : > { %v9807_v1 = vld [vmem:[#allocation10 + $0x5a8] sm:$0xff]   ;;  %v9812_v16 = vld [vmem:[#allocation10 + $0x578] sm:$0xff]   ;;  %v9811_v22 = vld [vmem:[#allocation10 + $0x5b0] sm:$0xff]  }
 0x5c7   : > { %v9887_v7 = vld [vmem:[%s11396_s8] ss:$0 sm:$0xff]  ;;  %v9814_v24 = vld [vmem:[#allocation10 + $0x5f8] sm:$0xff]   ;;  %v9816_v27 = vld [vmem:[#allocation10 + $0x640] sm:$0xff]  }
 0x5c8   : > { %v9888_v19 = vld [vmem:[%s11397_s9] ss:$0 sm:$0xff]  ;;  %v9813_v26 = vld [vmem:[#allocation10 + $0x538] sm:$0xff]  }
 0x5c9   : > { %v5365_v28 = vld [vmem:[%s11399_s11] sm:$0x1]  ;;  %v9815_v30 = vld [vmem:[#allocation10 + $0x5b8] sm:$0xff]  }
 0x5cc   : > { %v4867_v4 = vld [vmem:[#allocation9 + $0x10] sm:$0xff] }
 0x5cd   : > { %v5475_v31 = vrot.slane %v4867_v4, %v11156_v54  ;;  %v5468_v32 = vcombine.high %v4867_v4, %v4867_v4 }
 0x5cf   : > { %v5483_v34 = vcombine.high %v5475_v31, %v5475_v31  ;;  %v11223_v36 = vrot.slane %v5468_v32, %v11156_v54  ;;  %v5491_v37 = vrot.slane %v5475_v31, %v11156_v54  ;;  %v9818_v32 = vld [vmem:[#allocation10 + $0x6c0] sm:$0xff]  }
 0x5d1   : > { %v5505_v10 = vrot.slane %v5483_v34, %v11156_v54  ;;  %v5484_v39 = vcombine.high %v11223_v36, %v11223_v36  ;;  %v5513_v46 = vcombine.high %v5491_v37, %v5491_v37  ;;  %v5498_v4 = vrot.slane %v11223_v36, %v11156_v54  ;;  %v9817_v34 = vld [vmem:[#allocation10 + $0x600] sm:$0xff]   ;;  %v9822_v36 = vld [vmem:[#allocation10 + $0x6c8] sm:$0xff]  }
 0x5d3   : > { %7436 = vmatprep.mubr.bf16.mxu1 %v5505_v10  ;;  %v5515_v40 = vcombine.high %v5505_v10, %v5505_v10  ;;  %v5512_v41 = vrot.slane %v5484_v39, %v11156_v54 }
 0x5d4   : > { %7437 = vmatmul.mubr.bf16.vlgmr.msra.gmra.mrb[48].mxu1 %v5491_v37 }
 0x5d5   : > { %9259 = vmatpush3.bf16.msra.mxu1 %v9784_v38  ;;  %7476 = vmatprep.mubr.bf16.mxu0 %v5515_v40  ;;  %v5516_v44 = vcombine.high %v5512_v41, %v5512_v41  ;;  %v9820_v40 = vld [vmem:[#allocation10 + $0x648] sm:$0xff]  }
 0x5d6   : > { %7516 = vmatprep.mubr.bf16.mxu1 %v5512_v41  ;;  %7477 = vmatmul.mubr.bf16.vlgmr.msra.gmra.mrb[64].mxu0 %v5513_v46  ;;  %v9819_v41 = vld [vmem:[#allocation10 + $0x680] sm:$0xff]   ;;  %v5514_v46 = vcombine.high %v5498_v4, %v5498_v4 }
 0x5d7   : > { %9281 = vmatpush3.bf16.msra.mxu0 %v9787_v11  ;;  %9260 = vmatprep.subr.bf16.mxu1 %v9788_v42 }
 0x5d8   : > { %7556 = vmatprep.mubr.bf16.mxu0 %v5516_v44  ;;  %9282 = vmatprep.subr.bf16.mxu0 %v9790_v43  ;;  %v9821_v43 = vld [vmem:[#allocation10 + $0x608] sm:$0xff]  }
 0x5d9   : > { %9261 = vmatpush3.bf16.msra.mxu1 %v9789_v45  ;;  %v9823_v44 = vld [vmem:[#allocation10 + $0x688] sm:$0xff]   ;;  %v9824_v45 = vld [vmem:[#allocation10 + $0x650] sm:$0xff]  }
 0x5da   : > { %9262 = vmatprep.subr.bf16.mxu1 %v9792_v17 }
 0x5db   : > { %9283 = vmatpush3.bf16.msra.mxu0 %v9791_v48 }
 0x5dc   : > { %9284 = vmatprep.subr.bf16.mxu0 %v9794_v49  ;;  %v4820_v49 = vld [vmem:[#allocation9 + $0x18] sm:$0x1] }
 0x5dd   : > { %9263 = vmatpush3.bf16.msra.mxu1 %v9793_v50 }
 0x5de   : > { %9264 = vmatprep.subr.bf16.mxu1 %v9796_v47  ;;  %v9826_v47 = vld [vmem:[#allocation10 + $0x6d0] sm:$0xff]  }
 0x5df   : > { %9285 = vmatpush3.bf16.msra.mxu0 %v9795_v51 }
 0x5e0   : > { %9286 = vmatprep.subr.bf16.mxu0 %v9798_v52 }
 0x5e1   : > { %9265 = vmatpush3.bf16.msra.mxu1 %v9797_v53  ;;  %v4827_v53 = vld [vmem:[#allocation9 + $0x19] sm:$0x1] }
 0x5e2   : > { %9266 = vmatprep.subr.bf16.mxu1 %v9800_v55 }
 0x5e3   : > { %9287 = vmatpush3.bf16.msra.mxu0 %v9799_v56 }
 0x5e4   : > { %9288 = vmatprep.subr.bf16.mxu0 %v9802_v58  ;;  %v4834_v58 = vld [vmem:[#allocation9 + $0x1a] sm:$0x1] }
 0x5e5   : > { %9267 = vmatpush3.bf16.msra.mxu1 %v9801_v59  ;;  %v9825_v59 = vld [vmem:[#allocation10 + $0x610] sm:$0xff]  }
 0x5e6   : > { %9268 = vmatprep.subr.bf16.mxu1 %v9804_v60 }
 0x5e7   : > { %9289 = vmatpush3.bf16.msra.mxu0 %v9803_v33 }
 0x5e8   : > { %9290 = vmatprep.subr.bf16.mxu0 %v9806_v61  ;;  %v4592_v3 = vpop.f32.mrb[44].mxu0 }
 0x5e9   : > { %9269 = vmatpush3.bf16.msra.mxu1 %v9805_v62  ;;  %v4612_v8 = vmul.f32 %v9887_v7, %v4592_v3  ;;  %v4594_v12 = vpop.f32.mrb[45].mxu0 }
 0x5ea   : > { %9270 = vmatprep.subr.bf16.mxu1 %v9808_v63  ;;  %v4595_v15 = vpop.f32.mrb[46].mxu0  ;;  %v4841_v63 = vld [vmem:[#allocation9 + $0x1b] sm:$0x1] }
 0x5eb   : > { %v9054_v35 = vpop.f32.mrb[32].mxu1  ;;  %9291 = vmatpush3.bf16.msra.mxu0 %v9807_v1  ;;  %v4627_v20 = vadd.f32 %v9888_v19, %v4612_v8  ;;  %v4613_v21 = vmul.f32 %v9887_v7, %v4595_v15  ;;  %v4597_v23 = vpop.f32.mrb[47].mxu0 }
 0x5ec   : > { %v9055_v6 = vpop.f32.mrb[33].mxu1  ;;  %9292 = vmatprep.subr.bf16.mxu0 %v9810_v5  ;;  %v9827_v23 = vld [vmem:[#allocation10 + $0x690] sm:$0xff]  }
 0x5ed   : > { %v9056_v13 = vadd.f32 %v9055_v6, %v9054_v35  ;;  %v9057_v14 = vpop.f32.mrb[34].mxu1  ;;  %v4635_v25 = vmax.f32 %v4627_v20, 0.0  ;;  %9271 = vmatpush3.bf16.msra.mxu1 %v9809_v9  ;;  %v4628_v2 = vadd.f32 %v9888_v19, %v4613_v21  ;;  %v4848_v20 = vld [vmem:[#allocation9 + $0x1c] sm:$0x1]  ;;  %v4855_v21 = vld [vmem:[#allocation9 + $0x1d] sm:$0x1] }
 0x5ee   : > { %v9058_v18 = vpop.f32.mrb[35].mxu1  ;;  %9272 = vmatprep.subr.bf16.mxu1 %v9812_v16  ;;  %v9828_v16 = vld [vmem:[#allocation10 + $0x658] sm:$0xff]  }
 0x5ef   : > { %4643 = vst [vmem:[#allocation8 + $0x30] sm:$0xff] %v4635_v25  ;;  %v4636_v29 = vmax.f32 %v4628_v2, 0.0  ;;  %9293 = vmatpush3.bf16.msra.mxu0 %v9811_v22  ;;  %v7119_v10 = vadd.f32 %v9056_v13, %v5365_v28  ;;  %v9830_v28 = vld [vmem:[#allocation10 + $0x6d8] sm:$0xff]  }
 0x5f0   : > { %9294 = vmatprep.subr.bf16.mxu0 %v9814_v24  ;;  %v9076_v31 = vpop.f32.mrb[48].mxu0 }
 0x5f1   : > { %4644 = vst [vmem:[#allocation8 + $0x38] sm:$0x7f] %v4636_v29  ;;  %9273 = vmatpush3.bf16.msra.mxu1 %v9813_v26  ;;  %v9077_v37 = vpop.f32.mrb[49].mxu0 }
 0x5f2   : > { %9302 = vmatprep.subr.bf16.mxu1 %v9816_v27  ;;  %v9078_v38 = vadd.f32 %v9077_v37, %v9076_v31  ;;  %v9079_v39 = vpop.f32.mrb[50].mxu0  ;;  %v4862_v27 = vld [vmem:[#allocation9 + $0x1e] sm:$0x1] }
 0x5f3   : > { %9295 = vmatpush3.bf16.msra.mxu0 %v9815_v30  ;;  %v9080_v11 = vpop.f32.mrb[51].mxu0  ;;  %v9833_v39 = vld [vmem:[#allocation10 + $0x620] sm:$0xff]  }
 0x5f4   : > { %7517 = vmatmul.mubr.bf16.vlgmr.msra.gmra.mrb[52].mxu1 %v5498_v4  ;;  %v11241_v42 = vadd.f32 %v9078_v38, %v7119_v10  ;;  %9324 = vmatprep.subr.bf16.mxu0 %v9818_v32  ;;  %v9829_v4 = vld [vmem:[#allocation10 + $0x618] sm:$0xff]   ;;  %v9834_v38 = vld [vmem:[#allocation10 + $0x6e0] sm:$0xff]   ;;  %v9838_v11 = vld [vmem:[#allocation10 + $0x6e8] sm:$0xff]  }
 0x5f5   : > { %9303 = vmatpush3.bf16.msra.mxu1 %v9817_v34  ;;  %v9832_v34 = vld [vmem:[#allocation10 + $0x660] sm:$0xff]   ;;  %v9831_v10 = vld [vmem:[#allocation10 + $0x698] sm:$0xff]  }
 0x5f6   : > { %v4816_v17 = vld [vmem:[#allocation8 + $0x30] sm:$0x1]  ;;  %v4817_v48 = vld [vmem:[#allocation8 + $0x31] sm:$0x1]  ;;  %v4823_v50 = vld [vmem:[#allocation8 + $0x32] sm:$0x1]  ;;  %7557 = vmatmul.mubr.bf16.vlgmr.msra.gmra.mrb[68].mxu0 %v5514_v46  ;;  %9304 = vmatprep.subr.bf16.mxu1 %v9820_v40 }
 0x5f7   : > { %v4818_v51 = vmax.f32 %v4816_v17, %v4817_v48  ;;  %v4824_v52 = vld [vmem:[#allocation8 + $0x33] sm:$0x1]  ;;  %v4830_v55 = vld [vmem:[#allocation8 + $0x34] sm:$0x1]  ;;  %v4831_v56 = vld [vmem:[#allocation8 + $0x35] sm:$0x1]  ;;  %9325 = vmatpush3.bf16.msra.mxu0 %v9819_v41 }
 0x5f8   : > { %v4825_v60 = vmax.f32 %v4823_v50, %v4824_v52  ;;  %v4832_v33 = vmax.f32 %v4830_v55, %v4831_v56  ;;  %v4837_v61 = vld [vmem:[#allocation8 + $0x36] sm:$0x1]  ;;  %v4838_v62 = vld [vmem:[#allocation8 + $0x37] sm:$0x1]  ;;  %v4844_v1 = vld [vmem:[#allocation8 + $0x38] sm:$0x1]  ;;  %9326 = vmatprep.subr.bf16.mxu0 %v9822_v36 }
 0x5f9   : > { %v4819_v35 = vpack.c.bf16 %v4818_v51, %v4818_v51  ;;  %v4839_v3 = vmax.f32 %v4837_v61, %v4838_v62  ;;  %v4845_v5 = vld [vmem:[#allocation8 + $0x39] sm:$0x1]  ;;  %v4851_v6 = vld [vmem:[#allocation8 + $0x3a] sm:$0x1]  ;;  %v4852_v7 = vld [vmem:[#allocation8 + $0x3b] sm:$0x1]  ;;  %9305 = vmatpush3.bf16.msra.mxu1 %v9821_v43 }
 0x5fa   : > { %v4826_v8 = vpack.c.bf16 %v4825_v60, %v4825_v60  ;;  %v4833_v9 = vpack.c.bf16 %v4832_v33, %v4832_v33  ;;  %v4846_v12 = vmax.f32 %v4844_v1, %v4845_v5  ;;  %v4853_v13 = vmax.f32 %v4851_v6, %v4852_v7  ;;  %v4858_v14 = vld [vmem:[#allocation8 + $0x3c] sm:$0x1]  ;;  %v4859_v15 = vld [vmem:[#allocation8 + $0x3d] sm:$0x1]  ;;  %9306 = vmatprep.subr.bf16.mxu1 %v9824_v45  ;;  %v9836_v40 = vld [vmem:[#allocation10 + $0x668] sm:$0xff]  }
 0x5fb   : > { %v4821_v18 = vsel %vm11133_vm6, %v4819_v35, %v4820_v49  ;;  %v4840_v19 = vpack.c.bf16 %v4839_v3, %v4839_v3  ;;  %v4860_v22 = vmax.f32 %v4858_v14, %v4859_v15  ;;  %9327 = vmatpush3.bf16.msra.mxu0 %v9823_v44  ;;  %v9835_v41 = vld [vmem:[#allocation10 + $0x6a0] sm:$0xff]   ;;  %v9837_v46 = vld [vmem:[#allocation10 + $0x628] sm:$0xff]   ;;  %v9842_v45 = vld [vmem:[#allocation10 + $0x6f0] sm:$0xff]  }
 0x5fc   : > { %v4828_v24 = vsel %vm11133_vm6, %v4826_v8, %v4827_v53  ;;  %v4835_v25 = vsel %vm11133_vm6, %v4833_v9, %v4834_v58  ;;  %4822 = vst [vmem:[#allocation9 + $0x18] sm:$0x1] %v4821_v18  ;;  %v4847_v2 = vpack.c.bf16 %v4846_v12, %v4846_v12  ;;  %v4854_v26 = vpack.c.bf16 %v4853_v13, %v4853_v13  ;;  %v9839_v36 = vld [vmem:[#allocation10 + $0x6a8] sm:$0xff]   ;;  %v9841_v50 = vld [vmem:[#allocation10 + $0x630] sm:$0xff]   ;;  %v9844_v52 = vld [vmem:[#allocation10 + $0x678] sm:$0xff]  }
 0x5fd   : > { %9328 = vmatprep.subr.bf16.mxu0 %v9826_v47  ;;  %v4842_v29 = vsel %vm11133_vm6, %v4840_v19, %v4841_v63  ;;  %4829 = vst [vmem:[#allocation9 + $0x19] sm:$0x1] %v4828_v24  ;;  %4836 = vst [vmem:[#allocation9 + $0x1a] sm:$0x1] %v4835_v25  ;;  %v4861_v30 = vpack.c.bf16 %v4860_v22, %v4860_v22  ;;  %9307 = vmatpush3.bf16.msra.mxu1 %v9825_v59  ;;  %v9843_v56 = vld [vmem:[#allocation10 + $0x6b0] sm:$0xff]   ;;  %v9846_v33 = vld [vmem:[#allocation10 + $0x6f8] sm:$0xff]  }
 0x5fe   : > { %4843 = vst [vmem:[#allocation9 + $0x1b] sm:$0x1] %v4842_v29  ;;  %v4849_v31 = vsel %vm11133_vm6, %v4847_v2, %v4848_v20  ;;  %v4856_v32 = vsel %vm11133_vm6, %v4854_v26, %v4855_v21  ;;  %9308 = vmatprep.subr.bf16.mxu1 %v9828_v16  ;;  %v9845_v61 = vld [vmem:[#allocation10 + $0x638] sm:$0xff]   ;;  %v9848_v63 = vld [vmem:[#allocation10 + $0x740] sm:$0xff]   ;;  %v9852_v9 = vld [vmem:[#allocation10 + $0x748] sm:$0xff]  }
 0x5ff   : > { %v4863_v37 = vsel %vm11133_vm6, %v4861_v30, %v4862_v27  ;;  %4850 = vst [vmem:[#allocation9 + $0x1c] sm:$0x1] %v4849_v31  ;;  %4857 = vst [vmem:[#allocation9 + $0x1d] sm:$0x1] %v4856_v32  ;;  %9329 = vmatpush3.bf16.msra.mxu0 %v9827_v23  ;;  %v9847_v1 = vld [vmem:[#allocation10 + $0x6b8] sm:$0xff]   ;;  %v9849_v6 = vld [vmem:[#allocation10 + $0x700] sm:$0xff]  }
 0x600   : > { %4864 = vst [vmem:[#allocation9 + $0x1e] sm:$0x1] %v4863_v37  ;;  %9330 = vmatprep.subr.bf16.mxu0 %v9830_v28  ;;  %v9851_v14 = vld [vmem:[#allocation10 + $0x780] sm:$0xff]   ;;  %v9853_v18 = vld [vmem:[#allocation10 + $0x708] sm:$0xff]   ;;  %v9855_v19 = vld [vmem:[#allocation10 + $0x750] sm:$0xff]  }
 0x601   : > { %9309 = vmatpush3.bf16.msra.mxu1 %v9829_v4  ;;  %v9854_v20 = vld [vmem:[#allocation10 + $0x788] sm:$0xff]   ;;  %v9856_v21 = vld [vmem:[#allocation10 + $0x710] sm:$0xff]   ;;  %v9858_v22 = vld [vmem:[#allocation10 + $0x758] sm:$0xff]  }
 0x602   : > { %9310 = vmatprep.subr.bf16.mxu1 %v9832_v34  ;;  %v9857_v23 = vld [vmem:[#allocation10 + $0x790] sm:$0xff]   ;;  %v9859_v24 = vld [vmem:[#allocation10 + $0x718] sm:$0xff]   ;;  %v9861_v25 = vld [vmem:[#allocation10 + $0x760] sm:$0xff]  }
 0x603   : > { %9331 = vmatpush3.bf16.msra.mxu0 %v9831_v10  ;;  %v9860_v2 = vld [vmem:[#allocation10 + $0x798] sm:$0xff]   ;;  %v9862_v26 = vld [vmem:[#allocation10 + $0x720] sm:$0xff]   ;;  %v9864_v27 = vld [vmem:[#allocation10 + $0x768] sm:$0xff]  }
 0x604   : > { %9332 = vmatprep.subr.bf16.mxu0 %v9834_v38  ;;  %v9863_v28 = vld [vmem:[#allocation10 + $0x7a0] sm:$0xff]   ;;  %v9865_v29 = vld [vmem:[#allocation10 + $0x728] sm:$0xff]   ;;  %v9867_v30 = vld [vmem:[#allocation10 + $0x770] sm:$0xff]  }
 0x605   : > { %9311 = vmatpush3.bf16.msra.mxu1 %v9833_v39  ;;  %v9866_v4 = vld [vmem:[#allocation10 + $0x7a8] sm:$0xff]   ;;  %v9868_v31 = vld [vmem:[#allocation10 + $0x730] sm:$0xff]   ;;  %v9870_v32 = vld [vmem:[#allocation10 + $0x778] sm:$0xff]  }
 0x606   : > { %9312 = vmatprep.subr.bf16.mxu1 %v9836_v40  ;;  %v9869_v34 = vld [vmem:[#allocation10 + $0x7b0] sm:$0xff]   ;;  %v9871_v37 = vld [vmem:[#allocation10 + $0x738] sm:$0xff]  }
 0x607   : > { %9333 = vmatpush3.bf16.msra.mxu0 %v9835_v41  ;;  %v4868_v43 = vld [vmem:[#allocation9 + $0x18] sm:$0x7f] }
 0x608   : > { %9334 = vmatprep.subr.bf16.mxu0 %v9838_v11  ;;  %v5524_v17 = vrot.slane %v4868_v43, %v11156_v54  ;;  %v5517_v48 = vcombine.high %v4868_v43, %v4868_v43  ;;  %v9872_v10 = vld [vmem:[#allocation10 + $0x7b8] sm:$0xff]  }
 0x609   : > { %9313 = vmatpush3.bf16.msra.mxu1 %v9837_v46 }
 0x60a   : > { %9314 = vmatprep.subr.bf16.mxu1 %v9840_v57  ;;  %v5532_v53 = vcombine.high %v5524_v17, %v5524_v17  ;;  %v11259_v58 = vrot.slane %v5517_v48, %v11156_v54 }
 0x60b   : > { %v9098_v44 = vpop.f32.mrb[36].mxu1  ;;  %9335 = vmatpush3.bf16.msra.mxu0 %v9839_v36 }
 0x60c   : > { %v9099_v49 = vpop.f32.mrb[37].mxu1  ;;  %9336 = vmatprep.subr.bf16.mxu0 %v9842_v45  ;;  %v5554_v60 = vrot.slane %v5532_v53, %v11156_v54  ;;  %v5533_v35 = vcombine.high %v11259_v58, %v11259_v58  ;;  %v5547_v38 = vrot.slane %v11259_v58, %v11156_v54 }
 0x60d   : > { %v9100_v47 = vadd.f32 %v9099_v49, %v9098_v44  ;;  %v9101_v51 = vpop.f32.mrb[38].mxu1  ;;  %9315 = vmatpush3.bf16.msra.mxu1 %v9841_v50 }
 0x60e   : > { %v9102_v55 = vpop.f32.mrb[39].mxu1  ;;  %9316 = vmatprep.subr.bf16.mxu1 %v9844_v52  ;;  %7596 = vmatprep.mubr.bf16.mxu1 %v5554_v60  ;;  %v5564_v62 = vcombine.high %v5554_v60, %v5554_v60  ;;  %v5561_v12 = vrot.slane %v5533_v35, %v11156_v54  ;;  %v5563_v39 = vcombine.high %v5547_v38, %v5547_v38  ;;  %v9877_v35 = vld [vmem:[%s11400_s12 + $0x20] sm:$0xff]  }
 0x60f   : > { %v7199_v59 = vadd.f32 %v9100_v47, %v11241_v42  ;;  %9337 = vmatpush3.bf16.msra.mxu0 %v9843_v56  ;;  %v5540_v42 = vrot.slane %v5524_v17, %v11156_v54 }
 0x610   : > { %9338 = vmatprep.subr.bf16.mxu0 %v9846_v33  ;;  %7636 = vmatprep.mubr.bf16.mxu0 %v5564_v62  ;;  %v9120_v3 = vpop.f32.mrb[52].mxu0  ;;  %v9873_v33 = vld [vmem:[%s11400_s12] sm:$0xff]   ;;  %v9874_v62 = vld [vmem:[%s11400_s12 + $0x8] sm:$0xff]  }
 0x611   : > { %9317 = vmatpush3.bf16.msra.mxu1 %v9845_v61  ;;  %v9121_v5 = vpop.f32.mrb[53].mxu0  ;;  %v5562_v16 = vcombine.high %v5540_v42, %v5540_v42 }
 0x612   : > { %9346 = vmatprep.subr.bf16.mxu1 %v9848_v63  ;;  %v9122_v7 = vadd.f32 %v9121_v5, %v9120_v3  ;;  %v9123_v8 = vpop.f32.mrb[54].mxu0  ;;  %v9875_v63 = vld [vmem:[%s11400_s12 + $0x10] sm:$0xff]   ;;  %v9878_v3 = vld [vmem:[%s11400_s12 + $0x28] sm:$0xff]   ;;  %v9880_v5 = vld [vmem:[%s11400_s12 + $0x38] sm:$0xff]  }
 0x613   : > { %9339 = vmatpush3.bf16.msra.mxu0 %v9847_v1  ;;  %v9124_v13 = vpop.f32.mrb[55].mxu0  ;;  %v9876_v1 = vld [vmem:[%s11400_s12 + $0x18] sm:$0xff]  }
 0x614   : > { %7597 = vmatmul.mubr.bf16.vlgmr.msra.gmra.mrb[56].mxu1 %v5540_v42  ;;  %v11267_v15 = vadd.f32 %v9122_v7, %v7199_v59  ;;  %9429 = vmatprep.subr.bf16.mxu0 %v9988_v0  ;;  %v9879_v42 = vld [vmem:[%s11400_s12 + $0x30] sm:$0xff]   ;;  %v9882_v7 = vld [vmem:[%s11402_s14 + $0x8] sm:$0xff]  }
 0x615   : > { %9347 = vmatpush3.bf16.msra.mxu1 %v9849_v6  ;;  %7676 = vmatprep.mubr.bf16.mxu1 %v5561_v12  ;;  %v9881_v6 = vld [vmem:[%s11402_s14] sm:$0xff]  }
 0x616   : > { %7637 = vmatmul.mubr.bf16.vlgmr.msra.gmra.mrb[72].mxu0 %v5562_v16  ;;  %9348 = vmatprep.subr.bf16.mxu1 %v9852_v9 }
 0x617   : > { %9430 = vmatpush3.bf16.msra.mxu0 %v9851_v14  ;;  %9445 = vmatprep.mubr.msk.bf16.mxu0 %vm10001_vm7, %v9988_v0 }
 0x618   : > { %9431 = vmatprep.subr.bf16.mxu0 %v9988_v0 }
 0x619   : > { %9349 = vmatpush3.bf16.msra.mxu1 %v9853_v18 }
 0x61a   : > { %9350 = vmatprep.subr.bf16.mxu1 %v9855_v19 }
 0x61b   : > { %9432 = vmatpush3.bf16.msra.mxu0 %v9854_v20 }
 0x61c   : > { %9433 = vmatprep.subr.bf16.mxu0 %v9988_v0 }
 0x61d   : > { %9351 = vmatpush3.bf16.msra.mxu1 %v9856_v21 }
 0x61e   : > { %9352 = vmatprep.subr.bf16.mxu1 %v9858_v22 }
 0x61f   : > { %9434 = vmatpush3.bf16.msra.mxu0 %v9857_v23 }
 0x620   : > { %9435 = vmatprep.subr.bf16.mxu0 %v9988_v0 }
 0x621   : > { %9353 = vmatpush3.bf16.msra.mxu1 %v9859_v24 }
 0x622   : > { %9354 = vmatprep.subr.bf16.mxu1 %v9861_v25 }
 0x623   : > { %9436 = vmatpush3.bf16.msra.mxu0 %v9860_v2 }
 0x624   : > { %9437 = vmatprep.subr.bf16.mxu0 %v9988_v0 }
 0x625   : > { %9355 = vmatpush3.bf16.msra.mxu1 %v9862_v26 }
 0x626   : > { %9356 = vmatprep.subr.bf16.mxu1 %v9864_v27 }
 0x627   : > { %9438 = vmatpush3.bf16.msra.mxu0 %v9863_v28 }
 0x628   : > { %9439 = vmatprep.subr.bf16.mxu0 %v9988_v0 }
 0x629   : > { %9357 = vmatpush3.bf16.msra.mxu1 %v9865_v29 }
 0x62a   : > { %9358 = vmatprep.subr.bf16.mxu1 %v9867_v30 }
 0x62b   : > { %9440 = vmatpush3.bf16.msra.mxu0 %v9866_v4 }
 0x62c   : > { %9441 = vmatprep.subr.bf16.mxu0 %v9988_v0 }
 0x62d   : > { %9359 = vmatpush3.bf16.msra.mxu1 %v9868_v31 }
 0x62e   : > { %9360 = vmatprep.subr.bf16.mxu1 %v9870_v32 }
 0x62f   : > { %9442 = vmatpush3.bf16.msra.mxu0 %v9869_v34 }
 0x630   : > { %9443 = vmatprep.subr.bf16.mxu0 %v9988_v0 }
 0x631   : > { %9361 = vmatpush3.bf16.msra.mxu1 %v9871_v37 }
 0x632   : > { %9449 = vmatprep.subr.bf16.mxu1 %v9988_v0 }
 0x633   : > { %9444 = vmatpush3.bf16.msra.mxu0 %v9872_v10 }
 0x634   : > { %7677 = vmatmul.mubr.bf16.vlgmr.msra.gmra.mrb[60].mxu1 %v5547_v38  ;;  %9469 = vmatprep.subr.bf16.mxu0 %v9988_v0 }
 0x635   : > { %9465 = vmatprep.mubr.msk.bf16.mxu1 %vm10001_vm7, %v9988_v0  ;;  %9450 = vmatpush3.bf16.msra.mxu1 %v9873_v33 }
 0x636   : > { %9446 = vmatmul.mubr.bf16.vlgmr.msra.gmra.mrb[76].mxu0 %v5563_v39  ;;  %9451 = vmatprep.subr.bf16.mxu1 %v9988_v0 }
 0x637   : > { %9477 = vmatprep.mubr.msk.bf16.mxu0 %vm10001_vm7, %v9988_v0  ;;  %9470 = vmatpush3.bf16.msra.mxu0 %v9881_v6 }
 0x638   : > { %9471 = vmatprep.subr.bf16.mxu0 %v9988_v0 }
 0x639   : > { %9452 = vmatpush3.bf16.msra.mxu1 %v9874_v62 }
 0x63a   : > { %9453 = vmatprep.subr.bf16.mxu1 %v9988_v0 }
 0x63b   : > { %9472 = vmatpush3.bf16.msra.mxu0 %v9882_v7 }
 0x63c   : > { %9473 = vmatprep.subr.bf16.mxu0 %v9988_v0 }
 0x63d   : > { %9454 = vmatpush3.bf16.msra.mxu1 %v9875_v63 }
 0x63e   : > { %9455 = vmatprep.subr.bf16.mxu1 %v9988_v0 }
 0x641   : > { %9456 = vmatpush3.bf16.msra.mxu1 %v9876_v1 }
 0x642   : > { %9457 = vmatprep.subr.bf16.mxu1 %v9988_v0 }
 0x645   : > { %9458 = vmatpush3.bf16.msra.mxu1 %v9877_v35 }
 0x646   : > { %9459 = vmatprep.subr.bf16.mxu1 %v9988_v0 }
 0x649   : > { %v9142_v40 = vpop.f32.mrb[40].mxu1  ;;  %9460 = vmatpush3.bf16.msra.mxu1 %v9878_v3 }
 0x64a   : > { %v9143_v41 = vpop.f32.mrb[41].mxu1  ;;  %9461 = vmatprep.subr.bf16.mxu1 %v9988_v0 }
 0x64b   : > { %v9144_v11 = vadd.f32 %v9143_v41, %v9142_v40  ;;  %v9145_v46 = vpop.f32.mrb[42].mxu1  ;;  %v9164_v54 = vpop.f32.mrb[56].mxu0 }
 0x64c   : > { %v9146_v57 = vpop.f32.mrb[43].mxu1  ;;  %v9165_v36 = vpop.f32.mrb[57].mxu0 }
 0x64d   : > { %v7279_v43 = vadd.f32 %v9144_v11, %v11267_v15  ;;  %v9166_v44 = vadd.f32 %v9165_v36, %v9164_v54  ;;  %v9167_v45 = vpop.f32.mrb[58].mxu0  ;;  %9462 = vmatpush3.bf16.msra.mxu1 %v9879_v42 }
 0x64e   : > { %v9168_v17 = vpop.f32.mrb[59].mxu0  ;;  %9463 = vmatprep.subr.bf16.mxu1 %v9988_v0 }
 0x64f   : > { %v7319_v48 = vadd.f32 %v9166_v44, %v7279_v43 }
 0x651   : > { %9464 = vmatpush3.bf16.msra.mxu1 %v9880_v5 }
 0x669   : > { %v9186_v49 = vpop.f32.mrb[44].mxu1 }
 0x66a   : > { %v9187_v50 = vpop.f32.mrb[45].mxu1 }
 0x66b   : > { %v9188_v47 = vadd.f32 %v9187_v50, %v9186_v49  ;;  %v9189_v51 = vpop.f32.mrb[46].mxu1  ;;  %v9208_v52 = vpop.f32.mrb[60].mxu0 }
 0x66c   : > { %v9190_v53 = vpop.f32.mrb[47].mxu1  ;;  %v9209_v55 = vpop.f32.mrb[61].mxu0 }
 0x66d   : > { %v7359_v56 = vadd.f32 %v9188_v47, %v7319_v48  ;;  %v9210_v58 = vadd.f32 %v9209_v55, %v9208_v52  ;;  %v9211_v59 = vpop.f32.mrb[62].mxu0 }
 0x66e   : > { %v9212_v60 = vpop.f32.mrb[63].mxu0  ;;  %v9884_v59 = vld [vmem:[%s11402_s14 + $0x18] sm:$0xff]  }
 0x66f   : > { %v7399_v61 = vadd.f32 %v9210_v58, %v7359_v56  ;;  %v9883_v58 = vld [vmem:[%s11402_s14 + $0x10] sm:$0xff]   ;;  %v7742_v60 = vld [vmem:[%s11401_s13] sm:$0x1] }
 0x670   : > { %9474 = vmatpush3.bf16.msra.mxu0 %v9883_v58 }
 0x671   : > { %9475 = vmatprep.subr.bf16.mxu0 %v9988_v0  ;;  %v7841_v0 = vld [vmem:[%s11403_s15] sm:$0x1] }
 0x674   : > { %9476 = vmatpush3.bf16.msra.mxu0 %v9884_v59 }
 0x6a7   : > { %v9230_v8 = vpop.f32.mrb[48].mxu1 }
 0x6a8   : > { %v9231_v9 = vpop.f32.mrb[49].mxu1 }
 0x6a9   : > { %v9232_v12 = vadd.f32 %v9231_v9, %v9230_v8  ;;  %v9233_v13 = vpop.f32.mrb[50].mxu1  ;;  %v9252_v14 = vpop.f32.mrb[64].mxu0 }
 0x6aa   : > { %v9234_v15 = vpop.f32.mrb[51].mxu1  ;;  %v9253_v16 = vpop.f32.mrb[65].mxu0 }
 0x6ab   : > { %v7439_v18 = vadd.f32 %v9232_v12, %v7399_v61  ;;  %v9254_v19 = vadd.f32 %v9253_v16, %v9252_v14  ;;  %v9255_v20 = vpop.f32.mrb[66].mxu0 }
 0x6ac   : > { %v9256_v21 = vpop.f32.mrb[67].mxu0 }
 0x6ad   : > { %v7479_v22 = vadd.f32 %v9254_v19, %v7439_v18 }
 0x6c7   : > { %v9274_v23 = vpop.f32.mrb[52].mxu1 }
 0x6c8   : > { %v9275_v24 = vpop.f32.mrb[53].mxu1 }
 0x6c9   : > { %v9276_v25 = vadd.f32 %v9275_v24, %v9274_v23  ;;  %v9277_v2 = vpop.f32.mrb[54].mxu1  ;;  %v9296_v26 = vpop.f32.mrb[68].mxu0 }
 0x6ca   : > { %v9278_v27 = vpop.f32.mrb[55].mxu1  ;;  %v9297_v28 = vpop.f32.mrb[69].mxu0 }
 0x6cb   : > { %v7519_v29 = vadd.f32 %v9276_v25, %v7479_v22  ;;  %v9298_v30 = vadd.f32 %v9297_v28, %v9296_v26  ;;  %v9299_v4 = vpop.f32.mrb[70].mxu0 }
 0x6cc   : > { %v9300_v31 = vpop.f32.mrb[71].mxu0 }
 0x6cd   : > { %v7559_v32 = vadd.f32 %v9298_v30, %v7519_v29 }
 0x6e7   : > { %v9318_v34 = vpop.f32.mrb[56].mxu1 }
 0x6e8   : > { %v9319_v37 = vpop.f32.mrb[57].mxu1 }
 0x6e9   : > { %v9320_v10 = vadd.f32 %v9319_v37, %v9318_v34  ;;  %v9321_v38 = vpop.f32.mrb[58].mxu1  ;;  %v9340_v39 = vpop.f32.mrb[72].mxu0 }
 0x6ea   : > { %v9322_v40 = vpop.f32.mrb[59].mxu1  ;;  %v9341_v41 = vpop.f32.mrb[73].mxu0 }
 0x6eb   : > { %v7599_v11 = vadd.f32 %v9320_v10, %v7559_v32  ;;  %v9342_v46 = vadd.f32 %v9341_v41, %v9340_v39  ;;  %v9343_v54 = vpop.f32.mrb[74].mxu0 }
 0x6ec   : > { %v9344_v57 = vpop.f32.mrb[75].mxu0 }
 0x6ed   : > { %v7639_v36 = vadd.f32 %v9342_v46, %v7599_v11 }
 0x707   : > { %v9362_v43 = vpop.f32.mrb[60].mxu1 }
 0x708   : > { %v9363_v44 = vpop.f32.mrb[61].mxu1 }
 0x709   : > { %v9364_v45 = vadd.f32 %v9363_v44, %v9362_v43  ;;  %v9365_v17 = vpop.f32.mrb[62].mxu1  ;;  %v7718_v48 = vpop.f32.mrb[76].mxu0 }
 0x70a   : > { %v9366_v49 = vpop.f32.mrb[63].mxu1  ;;  %v9447_v50 = vpop.f32.mrb[77].mxu0 }
 0x70b   : > { %v7679_v47 = vadd.f32 %v9364_v45, %v7639_v36  ;;  %v7721_v51 = vpop.f32.mrb[78].mxu0 }
 0x70c   : > { %v9448_v52 = vpop.f32.mrb[79].mxu0 }
 0x70d   : > { %v7719_v53 = vadd.f32 %v7718_v48, %v7679_v47 }
 0x70f   : > { %v7724_v55 = vmax.f32 %v7719_v53, 0.0 }
 0x711   : > { %v7725_v56 = vpack.c.bf16 %v7724_v55, %v7724_v55 }
 0x713   : > { %9466 = vmatmul.mubr.bf16.vlgmr.msra.gmra.mrb[64].mxu1 %v7725_v56 }
 0x7e6   : > { %v7825_v33 = vpop.f32.mrb[64].mxu1 }
 0x7e7   : > { %v7826_v61 = vadd.f32 %v7825_v33, %v7742_v60  ;;  %v9467_v62 = vpop.f32.mrb[65].mxu1 }
 0x7e8   : > { %v7828_v63 = vpop.f32.mrb[66].mxu1 }
 0x7e9   : > { %v7831_v1 = vmax.f32 %v7826_v61, 0.0  ;;  %v9468_v35 = vpop.f32.mrb[67].mxu1 }
 0x7eb   : > { %v7832_v3 = vpack.c.bf16 %v7831_v1, %v7831_v1 }
 0x7ed   : > { %9478 = vmatmul.mubr.msk.bf16.vlgmr.msra.gmra.mrb[80].mxu0 %vm4096_vm11, %v7832_v3 }
 0x8c0   : > { %v7903_v42 = vpop.f32.mrb[80].mxu0 }
 0x8c1   : > { %v7904_v5 = vadd.f32 %v7903_v42, %v7841_v0  ;;  %v9479_v6 = vpop.f32.mrb[81].mxu0 }
 0x8c2   : > { %v7906_v7 = vpop.f32.mrb[82].mxu0 }
 0x8c3   : > { %v9480_v8 = vpop.f32.mrb[83].mxu0  ;;  %7910 = vst.msk [vmem:[%s528_s29] sm:$0x1] %vm7909_vm8, %v7904_v5 }
 0x8c4   : > { %9930 = shalt.err (!%p9927_p7)
}
 0x8c5   : > { %s9931_s28 = scalar_lea.hbm %s11346_s30, 16  ;;  %s9935_s26 = scalar_lea.hbm %s11404_s16, 32 }
 0x8c6   : > { %p9932_p8 = scmp.ne.s32.totalorder %s11346_s30, %s9931_s28  ;;  %p9936_p1 = scmp.lt.u32.totalorder %s11346_s30, %s11404_s16 }
 0x8c7   : > { %p9937_p0 = scmp.lt.u32.totalorder %s9935_s26, %s9931_s28  ;;  %p9939_p6 = scmp.lt.u32.totalorder %s9931_s28, %s11346_s30 }
 0x8c8   : > { %p9933_p11 = pnand %p9932_p8, %p11431_p9 }
 0x8c9   : > { %p9938_p5 = por %p9937_p0, %p9936_p1 }
 0x8ca   : > { %p9934_p13 = pneg %p9933_p11 }
 0x8cb   : > { %p9940_p10 = por %p9939_p6, %p9938_p5 }
 0x8cd   : > { %p9941_p12 = pnand %p9940_p10, %p9934_p13 }
 0x8cf   : > { %9944 = shalt.err (!%p9941_p12)
}
 0x8d0   : > { %9485 = dma.vmem_to_hbm [thread:$0]  (%p11431_p9), %s11348_s21, 16, %s11346_s30, %s7912_s25  }
 0x8d1 PF: > { %s11432_s23 = sld [smem:[#allocation16_spill]]  ;;  %s11433_s20 = sld [smem:[#allocation20_spill]] }
 0x8d2   : > { %p9497_p2 = scmp.ge.s32.totalorder %s9983_s24, 2 }
 0x8d7   : > { %s7936_s17 = sand.u32 1, %s11432_s23   ;;  %p11434_p3 = scmp.ne.s32.totalorder %s11433_s20, 0 }
 0x8d8   : > { %s7937_s18 = scalar_lea.sflag [#allocation12], %s7936_s17 }
 0x8d9   : > { %p9492_p4 = pnand %p9497_p2, %p11434_p3 }
 0x8db   : > { %9966 = dma.done.wait (!%p9492_p4), %s7937_s18, 16  }
 0x8dc   : > { %9968 = vsyncadd (!%p9492_p4), %s7937_s18, 4294967280  ;;  %s11435_s24 = sld [smem:[#allocation18_spill]]  ;;  %s11436_s28 = sld [smem:[#allocation17_spill]] }
 0x8dd   : > { %s11437_s23 = sld [smem:[#allocation19_spill]]  ;;  %s11438_s21 = smov %s9975_s22 }
 0x8e2   : > { %p27_p7 = scmp.ge.s32.totalorder %s11435_s24, 4   ;;  %s11439_s22 = smov %s11436_s28 }
 0x8e4   :  { %29 = sbr.rel (!%p27_p7) target bundleno = 6 (0x6), region = 330 }
 0x8eb   :  { %7941 = vsyncpa [#allocation11], 1 }
 0x8ec   :  { %7943 = vsyncpa [#allocation11 + $0x1], 1 }
 0x8ed   :  { %7944 = vsyncpa [#allocation12], 1 }
 0x8ee   :  { %7946 = vsyncpa [#allocation12 + $0x1], 1 }

</bundles_post_ra>
